<compile_context>
chip_gen: v7x
topology: tpu7x:2x2x1
jax: 0.10.0
libtpu: 0.0.40
codegen_flags: <defaults>
</compile_context>

<pallas_src>
import math
from functools import partial

import numpy as np
import jax
import jax.numpy as jnp
from jax.experimental import pallas as pl
from jax.experimental.pallas import tpu as pltpu


_VMEM_LIMIT = 48 * 1024 * 1024  # fits v7x's 64 MiB physical VMEM, > defaults


# ----------------------------------------------------------------------------
# Kernel 1: fused (optional GroupNorm-affine + SiLU) + direct 3D convolution.
#   grid = (B, T_out, kt); kt is the reduction axis (last, "arbitrary").
#   Per step: load one padded (Hp, Wp, Cin) plane, optionally normalize+SiLU,
#   accumulate kh*kw tap matmuls into an f32 VMEM scratch; write + bias on the
#   final tap.
# ----------------------------------------------------------------------------
def _conv_plane_kernel(*refs, kh, kw, ho, wo, h_off, w_off, fuse_act):
    if fuse_act:
        x_ref, w_ref, b_ref, scale_ref, shift_ref, o_ref, acc_ref = refs
    else:
        x_ref, w_ref, b_ref, o_ref, acc_ref = refs

    a = pl.program_id(2)

    @pl.when(a == 0)
    def _():
        acc_ref[...] = jnp.zeros_like(acc_ref)

    x = x_ref[0]                                       # (Hp, Wp, Cin) bf16
    if fuse_act:
        xf = x.astype(jnp.float32) * scale_ref[0, 0] + shift_ref[0, 0]
        xf = xf / (1.0 + jnp.exp(-xf))                 # SiLU(GroupNorm(x))
        x = xf.astype(jnp.bfloat16)

    acc = acc_ref[...]                                 # (Ho*Wo, Cout) f32
    for i in range(kh):
        for j in range(kw):
            patch = x[h_off + i:h_off + i + ho, w_off + j:w_off + j + wo, :]
            acc = acc + jnp.dot(patch.reshape(ho * wo, -1),
                                w_ref[0, i * kw + j],
                                preferred_element_type=jnp.float32)
    acc_ref[...] = acc

    @pl.when(a == pl.num_programs(2) - 1)
    def _():
        o_ref[0] = (acc + b_ref[...]).astype(o_ref.dtype)


def _conv_core(xp, w_taps, bias, kh, kw, out_size=None, offset=(0, 0, 0),
               scale=None, shift=None):
    """Valid correlation of padded input with per-tap weights.

    xp:     (B, Tp, Hp, Wp, Cin) bf16 (already spatially padded)
    w_taps: (kt, kh*kw, Cin, Cout) bf16
    bias:   (Cout,) f32
    out_size / offset let phase convolutions reuse the full padded input
    without slicing copies.  Returns (B, To, Ho, Wo, Cout) bf16.
    """
    B, Tp, Hp, Wp, Cin = xp.shape
    kt, khw, _, Cout = w_taps.shape
    t_off, h_off, w_off = offset
    if out_size is None:
        out_size = (Tp - t_off - kt + 1, Hp - h_off - kh + 1, Wp - w_off - kw + 1)
    To, Ho, Wo = out_size
    fuse_act = scale is not None

    x_flat = xp.reshape(B * Tp, Hp, Wp, Cin)
    bias2 = bias.reshape(1, Cout).astype(jnp.float32)

    in_specs = [
        pl.BlockSpec((1, Hp, Wp, Cin),
                     lambda b, t, a: (b * Tp + t + a + t_off, 0, 0, 0)),
        pl.BlockSpec((1, khw, Cin, Cout), lambda b, t, a: (a, 0, 0, 0)),
        pl.BlockSpec((1, Cout), lambda b, t, a: (0, 0)),
    ]
    args = [x_flat, w_taps, bias2]
    if fuse_act:
        in_specs += [
            pl.BlockSpec((1, 1, Cin), lambda b, t, a: (b, 0, 0)),
            pl.BlockSpec((1, 1, Cin), lambda b, t, a: (b, 0, 0)),
        ]
        args += [scale, shift]

    out = pl.pallas_call(
        partial(_conv_plane_kernel, kh=kh, kw=kw, ho=Ho, wo=Wo,
                h_off=h_off, w_off=w_off, fuse_act=fuse_act),
        out_shape=jax.ShapeDtypeStruct((B * To, Ho * Wo, Cout), jnp.bfloat16),
        grid_spec=pltpu.PrefetchScalarGridSpec(
            num_scalar_prefetch=0,
            grid=(B, To, kt),
            in_specs=in_specs,
            out_specs=pl.BlockSpec((1, Ho * Wo, Cout),
                                   lambda b, t, a: (b * To + t, 0, 0)),
            scratch_shapes=[pltpu.VMEM((Ho * Wo, Cout), jnp.float32)],
        ),
        compiler_params=pltpu.CompilerParams(
            dimension_semantics=("parallel", "parallel", "arbitrary"),
            vmem_limit_bytes=_VMEM_LIMIT,
        ),
    )(*args)
    return out.reshape(B, To, Ho, Wo, Cout)


# ----------------------------------------------------------------------------
# Kernel 2: GroupNorm statistics (per-channel sum / sumsq per (b, t) plane).
# Group combine / affine-coefficient math is a few-hundred-element JAX op;
# the normalization + SiLU itself is fused into the following conv kernel.
# ----------------------------------------------------------------------------
def _gn_stats_kernel(x_ref, sum_ref, sq_ref):
    xs = x_ref[0].astype(jnp.float32)                  # (H, W, C)
    r = jnp.sum(xs, axis=0)                            # (W, C)
    r2 = jnp.sum(xs * xs, axis=0)
    sum_ref[0] = jnp.sum(r, axis=0, keepdims=True)     # (1, C)
    sq_ref[0] = jnp.sum(r2, axis=0, keepdims=True)


def gn_scale_shift(x, gamma, beta, num_groups=32, eps=1e-6):
    """Returns per-(batch, channel) scale/shift so that
       GroupNorm(x) = x * scale + shift   (all stats in f32)."""
    B, T, H, W, C = x.shape
    assert C % num_groups == 0
    cg = C // num_groups
    x_flat = x.reshape(B * T, H, W, C)

    spec = pl.BlockSpec((1, 1, C), lambda i: (i, 0, 0))
    sums, sqs = pl.pallas_call(
        _gn_stats_kernel,
        out_shape=(jax.ShapeDtypeStruct((B * T, 1, C), jnp.float32),
                   jax.ShapeDtypeStruct((B * T, 1, C), jnp.float32)),
        grid_spec=pltpu.PrefetchScalarGridSpec(
            num_scalar_prefetch=0,
            grid=(B * T,),
            in_specs=[pl.BlockSpec((1, H, W, C), lambda i: (i, 0, 0, 0))],
            out_specs=(spec, spec),
        ),
        compiler_params=pltpu.CompilerParams(
            dimension_semantics=("parallel",),
            vmem_limit_bytes=_VMEM_LIMIT,
        ),
    )(x_flat)

    count = float(T * H * W * cg)
    s = sums.reshape(B, T, C).sum(axis=1).reshape(B, num_groups, cg).sum(-1)
    ss = sqs.reshape(B, T, C).sum(axis=1).reshape(B, num_groups, cg).sum(-1)
    mean = s / count
    var = jnp.maximum(ss / count - mean * mean, 0.0)   # clamp: no negative var
    inv = jax.lax.rsqrt(var + eps)
    inv_c = jnp.repeat(inv, cg, axis=1)                # (B, C)
    mean_c = jnp.repeat(mean, cg, axis=1)
    scale = inv_c * gamma[None, :].astype(jnp.float32)
    shift = beta[None, :].astype(jnp.float32) - mean_c * scale
    return scale.reshape(B, 1, C), shift.reshape(B, 1, C)


# ----------------------------------------------------------------------------
# Conv wrappers (replicate pad + weight prep in JAX; compute in Pallas)
# ----------------------------------------------------------------------------
def conv3d_same(x, w_pt, bias, scale=None, shift=None):
    """SamePadConv3d, stride 1, replicate padding; optional fused GN+SiLU on
    the input.  x: (B,T,H,W,Cin) bf16; w_pt: (Cout,Cin,kt,kh,kw) f32."""
    Cout, Cin, kt, kh, kw = w_pt.shape
    pads = []
    for k in (kt, kh, kw):
        p = k - 1
        pads.append((p // 2 + p % 2, p // 2))
    xp = jnp.pad(x, ((0, 0), pads[0], pads[1], pads[2], (0, 0)), mode="edge")
    w_taps = jnp.transpose(w_pt, (2, 3, 4, 1, 0)).reshape(
        kt, kh * kw, Cin, Cout).astype(jnp.bfloat16)
    return _conv_core(xp, w_taps, bias, kh, kw, scale=scale, shift=shift)


def conv_transpose3d_same(x, w_pt, bias, stride):
    """SamePadConvTranspose3d (ConvTranspose3d with padding=k-1) via stride-
    phase decomposition: one small conv per output phase on the un-dilated,
    replicate-padded input.  x: (B,T,H,W,Cin); w_pt: (Cin,Cout,kt,kh,kw)."""
    Cin, Cout, kt, kh, kw = w_pt.shape
    st, sh, sw = stride
    assert kt % st == 0 and kh % sh == 0 and kw % sw == 0
    pads = []
    for k, s in zip((kt, kh, kw), (st, sh, sw)):
        p = k - s
        pads.append((p // 2 + p % 2, p // 2))
    xp = jnp.pad(x, ((0, 0), pads[0], pads[1], pads[2], (0, 0)), mode="edge")
    B, Tp, Hp, Wp, _ = xp.shape
    To = (Tp - 1) * st - kt + 2
    Ho = (Hp - 1) * sh - kh + 2
    Wo = (Wp - 1) * sw - kw + 2
    kpt, kph, kpw = kt // st, kh // sh, kw // sw
    Tq, Hq, Wq = To // st, Ho // sh, Wo // sw
    # ConvTranspose3d(padding=k-1) == valid correlation of the (conceptually)
    # zero-dilated input with the spatially-flipped, Cin<->Cout kernel; the
    # phase decomposition below evaluates only the non-zero taps.
    w_eff = jnp.flip(w_pt, axis=(2, 3, 4))             # (Cin, Cout, kt, kh, kw)

    phase_outs = []
    for rt in range(st):
        ft, ot = (st - rt) % st, (0 if rt == 0 else 1)
        for rh in range(sh):
            fh, oh = (sh - rh) % sh, (0 if rh == 0 else 1)
            for rw in range(sw):
                fw, ow = (sw - rw) % sw, (0 if rw == 0 else 1)
                w_sub = w_eff[:, :, ft::st, fh::sh, fw::sw]   # (Cin,Cout,kpt,kph,kpw)
                w_taps = jnp.transpose(w_sub, (2, 3, 4, 0, 1)).reshape(
                    kpt, kph * kpw, Cin, Cout).astype(jnp.bfloat16)
                phase_outs.append(
                    _conv_core(xp, w_taps, bias, kph, kpw,
                               out_size=(Tq, Hq, Wq), offset=(ot, oh, ow)))

    # TODO(synk): phase-output interleave stays as XLA glue (one fused copy);
    # a strided out_spec scatter would need Element-offset output indexing.
    out = jnp.stack(phase_outs, axis=0)
    out = out.reshape(st, sh, sw, B, Tq, Hq, Wq, Cout)
    out = jnp.transpose(out, (3, 4, 0, 5, 1, 6, 2, 7))
    return out.reshape(B, Tq * st, Hq * sh, Wq * sw, Cout)


# ----------------------------------------------------------------------------
# Decoder = [ConvTranspose -> ResBlock -> ResBlock]* -> Conv3d
# ----------------------------------------------------------------------------
def res_block(x, p):
    sc1, sh1 = gn_scale_shift(x, p["g1"], p["be1"])
    h = conv3d_same(x, p["w1"], p["b1"], scale=sc1, shift=sh1)   # GN+SiLU fused in
    sc2, sh2 = gn_scale_shift(h, p["g2"], p["be2"])
    h = conv3d_same(h, p["w2"], p["b2"], scale=sc2, shift=sh2)
    # in_channels == out_channels in this decoder => no conv_shortcut
    return x + h


def _init_res(key, ch):
    k1, k2, k3, k4 = jax.random.split(key, 4)
    return {
        "g1": jnp.ones((ch,), jnp.float32),
        "be1": jnp.zeros((ch,), jnp.float32),
        "w1": 0.05 * jax.random.normal(k1, (ch, ch, 3, 3, 3), jnp.float32),
        "b1": 0.02 * jax.random.normal(k2, (ch,), jnp.float32),
        "g2": jnp.ones((ch,), jnp.float32),
        "be2": jnp.zeros((ch,), jnp.float32),
        "w2": 0.05 * jax.random.normal(k3, (ch, ch, 3, 3, 3), jnp.float32),
        "b2": 0.02 * jax.random.normal(k4, (ch,), jnp.float32),
    }


def init_decoder_params(key, n_hiddens, upsample, z_channels, image_channel):
    n_times_upsample = np.array([int(math.log2(d)) for d in upsample])
    max_us = int(n_times_upsample.max())
    blocks = []
    in_ch = z_channels
    out_ch = None
    for i in range(max_us):
        in_ch = in_ch if i == 0 else n_hiddens * 2 ** (max_us - i + 1)
        out_ch = n_hiddens * 2 ** (max_us - i)
        us = [2 if d > 0 else 1 for d in n_times_upsample]
        us[0] = 1
        key, k_up_w, k_up_b, k_r1, k_r2 = jax.random.split(key, 5)
        blocks.append({
            "stride": tuple(us),
            "up_w": 0.05 * jax.random.normal(k_up_w, (in_ch, out_ch, 4, 4, 4), jnp.float32),
            "up_b": 0.02 * jax.random.normal(k_up_b, (out_ch,), jnp.float32),
            "res1": _init_res(k_r1, out_ch),
            "res2": _init_res(k_r2, out_ch),
        })
        n_times_upsample = n_times_upsample - 1
    key, k_ow, k_ob = jax.random.split(key, 3)
    return {
        "blocks": blocks,
        "out_w": 0.05 * jax.random.normal(k_ow, (image_channel, out_ch, 3, 3, 3), jnp.float32),
        "out_b": 0.02 * jax.random.normal(k_ob, (image_channel,), jnp.float32),
    }


def decoder_forward(params, x_ncdhw):
    # NCDHW -> NDHWC, bf16 activations between layers (f32 accumulation inside)
    h = jnp.transpose(x_ncdhw, (0, 2, 3, 4, 1)).astype(jnp.bfloat16)
    for blk in params["blocks"]:
        h = conv_transpose3d_same(h, blk["up_w"], blk["up_b"], blk["stride"])
        h = res_block(h, blk["res1"])
        h = res_block(h, blk["res2"])
    h = conv3d_same(h, params["out_w"], params["out_b"])
    # NDHWC -> NCDHW, back to f32 (PyTorch output convention)
    return jnp.transpose(h.astype(jnp.float32), (0, 4, 1, 2, 3))


if __name__ == "__main__":
    key = jax.random.PRNGKey(0)
    kp, kx = jax.random.split(key)

    # small but GroupNorm(32)-compatible config: out_channels = 16 * 2 = 32
    n_hiddens = 16
    upsample = (1, 2, 2)
    z_channels = 8
    image_channel = 3

    params = init_decoder_params(kp, n_hiddens, upsample, z_channels, image_channel)

    # input latent: (B, z_channels, T, H, W)
    x = jax.random.normal(kx, (2, z_channels, 4, 8, 8), jnp.float32)

    fwd = jax.jit(lambda inp: decoder_forward(params, inp))
    out = jax.block_until_ready(fwd(x))

    expected = (2, image_channel, 4, 16, 16)
    assert out.shape == expected, (out.shape, expected)
    assert bool(jnp.all(jnp.isfinite(out)))
    print("KERNEL_OK")
</pallas_src>

<mosaic_0001>
module attributes {stable_mosaic.version = 11 : i64} {
  func.func @_conv_plane_kernel(%arg0: i32, %arg1: i32, %arg2: i32, %arg3: memref<1x10x10x8xbf16, #tpu.memory_space<vmem>>, %arg4: memref<1x4x8x32xbf16, #tpu.memory_space<vmem>>, %arg5: memref<1x32xf32, #tpu.memory_space<vmem>>, %arg6: memref<1x64x32xbf16, #tpu.memory_space<vmem>>, %arg7: memref<64x32xf32, #tpu.memory_space<vmem>>) attributes {dimension_semantics = [#tpu.dimension_semantics<parallel>, #tpu.dimension_semantics<parallel>, #tpu.dimension_semantics<arbitrary>], iteration_bounds = array<i64: 2, 4, 4>, scalar_prefetch = 0 : i64, scratch_operands = 1 : i64, tpu.core_type = #tpu.core_type<tc>, window_params = [{transform_indices = @transform_0, window_bounds = array<i64: 1, 10, 10, 8>}, {transform_indices = @transform_1, window_bounds = array<i64: 1, 4, 8, 32>}, {pipeline_mode = #tpu.pipeline_mode<synchronous>, transform_indices = @transform_2, window_bounds = array<i64: 1, 32>}, {transform_indices = @transform_3, window_bounds = array<i64: 1, 64, 32>}]} {
    %c0_i32 = arith.constant 0 : i32
    %0 = arith.cmpi eq, %arg2, %c0_i32 : i32
    %1 = arith.extui %0 : i1 to i32
    %c0_i32_0 = arith.constant 0 : i32
    %2 = arith.cmpi ne, %1, %c0_i32_0 : i32
    scf.if %2 {
      %cst_25 = arith.constant 0.000000e+00 : f32
      %34 = vector.broadcast %cst_25 : f32 to vector<64x32xf32>
      %c0_26 = arith.constant 0 : index
      %c0_27 = arith.constant 0 : index
      %35 = vector.load %arg7[%c0_26, %c0_27] : memref<64x32xf32, #tpu.memory_space<vmem>>, vector<64x32xf32>
      tpu.vector_store %arg7[%c0_26, %c0_27], %34 {strides = array<i32>} : memref<64x32xf32, #tpu.memory_space<vmem>>, vector<64x32xf32>,
    } else {
    }
    %c0 = arith.constant 0 : index
    %c0_1 = arith.constant 0 : index
    %c0_2 = arith.constant 0 : index
    %c0_3 = arith.constant 0 : index
    %3 = vector.load %arg3[%c0, %c0_1, %c0_2, %c0_3] : memref<1x10x10x8xbf16, #tpu.memory_space<vmem>>, vector<1x10x10x8xbf16>
    %4 = vector.shape_cast %3 : vector<1x10x10x8xbf16> to vector<10x10x8xbf16>
    %c0_4 = arith.constant 0 : index
    %c0_5 = arith.constant 0 : index
    %5 = vector.load %arg7[%c0_4, %c0_5] : memref<64x32xf32, #tpu.memory_space<vmem>>, vector<64x32xf32>
    %6 = vector.extract_strided_slice %4 {offsets = [1, 1, 0], sizes = [8, 8, 8], strides = [1, 1, 1]} : vector<10x10x8xbf16> to vector<8x8x8xbf16>
    %7 = vector.shape_cast %6 : vector<8x8x8xbf16> to vector<64x8xbf16>
    %c0_6 = arith.constant 0 : index
    %c0_7 = arith.constant 0 : index
    %c0_8 = arith.constant 0 : index
    %c0_9 = arith.constant 0 : index
    %8 = vector.load %arg4[%c0_6, %c0_7, %c0_8, %c0_9] : memref<1x4x8x32xbf16, #tpu.memory_space<vmem>>, vector<1x1x8x32xbf16>
    %9 = vector.shape_cast %8 : vector<1x1x8x32xbf16> to vector<8x32xbf16>
    %cst = arith.constant dense<0.000000e+00> : vector<64x32xf32>
    %10 = tpu.matmul %7, %9, %cst {dimension_numbers = #tpu.dot_dimension_numbers<[1], [0], [0], [1], [0, 0, 1, 1], [], []>} : vector<64x8xbf16>, vector<8x32xbf16>, vector<64x32xf32> -> vector<64x32xf32>
    %11 = arith.addf %5, %10 : vector<64x32xf32>
    %12 = vector.extract_strided_slice %4 {offsets = [1, 2, 0], sizes = [8, 8, 8], strides = [1, 1, 1]} : vector<10x10x8xbf16> to vector<8x8x8xbf16>
    %13 = vector.shape_cast %12 : vector<8x8x8xbf16> to vector<64x8xbf16>
    %c0_10 = arith.constant 0 : index
    %c1 = arith.constant 1 : index
    %c0_11 = arith.constant 0 : index
    %c0_12 = arith.constant 0 : index
    %14 = vector.load %arg4[%c0_10, %c1, %c0_11, %c0_12] : memref<1x4x8x32xbf16, #tpu.memory_space<vmem>>, vector<1x1x8x32xbf16>
    %15 = vector.shape_cast %14 : vector<1x1x8x32xbf16> to vector<8x32xbf16>
    %cst_13 = arith.constant dense<0.000000e+00> : vector<64x32xf32>
    %16 = tpu.matmul %13, %15, %cst_13 {dimension_numbers = #tpu.dot_dimension_numbers<[1], [0], [0], [1], [0, 0, 1, 1], [], []>} : vector<64x8xbf16>, vector<8x32xbf16>, vector<64x32xf32> -> vector<64x32xf32>
    %17 = arith.addf %11, %16 : vector<64x32xf32>
    %18 = vector.extract_strided_slice %4 {offsets = [2, 1, 0], sizes = [8, 8, 8], strides = [1, 1, 1]} : vector<10x10x8xbf16> to vector<8x8x8xbf16>
    %19 = vector.shape_cast %18 : vector<8x8x8xbf16> to vector<64x8xbf16>
    %c0_14 = arith.constant 0 : index
    %c2 = arith.constant 2 : index
    %c0_15 = arith.constant 0 : index
    %c0_16 = arith.constant 0 : index
    %20 = vector.load %arg4[%c0_14, %c2, %c0_15, %c0_16] : memref<1x4x8x32xbf16, #tpu.memory_space<vmem>>, vector<1x1x8x32xbf16>
    %21 = vector.shape_cast %20 : vector<1x1x8x32xbf16> to vector<8x32xbf16>
    %cst_17 = arith.constant dense<0.000000e+00> : vector<64x32xf32>
    %22 = tpu.matmul %19, %21, %cst_17 {dimension_numbers = #tpu.dot_dimension_numbers<[1], [0], [0], [1], [0, 0, 1, 1], [], []>} : vector<64x8xbf16>, vector<8x32xbf16>, vector<64x32xf32> -> vector<64x32xf32>
    %23 = arith.addf %17, %22 : vector<64x32xf32>
    %24 = vector.extract_strided_slice %4 {offsets = [2, 2, 0], sizes = [8, 8, 8], strides = [1, 1, 1]} : vector<10x10x8xbf16> to vector<8x8x8xbf16>
    %25 = vector.shape_cast %24 : vector<8x8x8xbf16> to vector<64x8xbf16>
    %c0_18 = arith.constant 0 : index
    %c3 = arith.constant 3 : index
    %c0_19 = arith.constant 0 : index
    %c0_20 = arith.constant 0 : index
    %26 = vector.load %arg4[%c0_18, %c3, %c0_19, %c0_20] : memref<1x4x8x32xbf16, #tpu.memory_space<vmem>>, vector<1x1x8x32xbf16>
    %27 = vector.shape_cast %26 : vector<1x1x8x32xbf16> to vector<8x32xbf16>
    %cst_21 = arith.constant dense<0.000000e+00> : vector<64x32xf32>
    %28 = tpu.matmul %25, %27, %cst_21 {dimension_numbers = #tpu.dot_dimension_numbers<[1], [0], [0], [1], [0, 0, 1, 1], [], []>} : vector<64x8xbf16>, vector<8x32xbf16>, vector<64x32xf32> -> vector<64x32xf32>
    %29 = arith.addf %23, %28 : vector<64x32xf32>
    %c0_22 = arith.constant 0 : index
    %c0_23 = arith.constant 0 : index
    %30 = vector.load %arg7[%c0_22, %c0_23] : memref<64x32xf32, #tpu.memory_space<vmem>>, vector<64x32xf32>
    tpu.vector_store %arg7[%c0_22, %c0_23], %29 {strides = array<i32>} : memref<64x32xf32, #tpu.memory_space<vmem>>, vector<64x32xf32>,
    %c3_i32 = arith.constant 3 : i32
    %31 = arith.cmpi eq, %arg2, %c3_i32 : i32
    %32 = arith.extui %31 : i1 to i32
    %c0_i32_24 = arith.constant 0 : i32
    %33 = arith.cmpi ne, %32, %c0_i32_24 : i32
    scf.if %33 {
      %c0_25 = arith.constant 0 : index
      %c0_26 = arith.constant 0 : index
      %34 = vector.load %arg5[%c0_25, %c0_26] : memref<1x32xf32, #tpu.memory_space<vmem>>, vector<1x32xf32>
      %35 = vector.broadcast %34 : vector<1x32xf32> to vector<64x32xf32>
      %36 = arith.addf %29, %35 : vector<64x32xf32>
      %37 = arith.truncf %36 : vector<64x32xf32> to vector<64x32xbf16>
      %c0_27 = arith.constant 0 : index
      %c0_28 = arith.constant 0 : index
      %c0_29 = arith.constant 0 : index
      %38 = vector.load %arg6[%c0_27, %c0_28, %c0_29] : memref<1x64x32xbf16, #tpu.memory_space<vmem>>, vector<1x64x32xbf16>
      %39 = vector.shape_cast %38 : vector<1x64x32xbf16> to vector<64x32xbf16>
      %40 = vector.shape_cast %37 : vector<64x32xbf16> to vector<1x64x32xbf16>
      tpu.vector_store %arg6[%c0_27, %c0_28, %c0_29], %40 {strides = array<i32>} : memref<1x64x32xbf16, #tpu.memory_space<vmem>>, vector<1x64x32xbf16>,
    } else {
    }
    return
  }
  func.func @transform_0(%arg0: i32, %arg1: i32, %arg2: i32) -> (i32, i32, i32, i32) {
    %c7_i32 = arith.constant 7 : i32
    %0 = arith.muli %arg0, %c7_i32 : i32
    %1 = arith.addi %0, %arg1 : i32
    %2 = arith.addi %1, %arg2 : i32
    %c0_i32 = arith.constant 0 : i32
    %3 = arith.addi %2, %c0_i32 : i32
    %c0_i32_0 = arith.constant 0 : i32
    %c0_i32_1 = arith.constant 0 : i32
    %c0_i32_2 = arith.constant 0 : i32
    %c0_i32_3 = arith.constant 0 : i32
    return %3, %c0_i32_0, %c0_i32_1, %c0_i32_2 : i32, i32, i32, i32
  }
  func.func @transform_1(%arg0: i32, %arg1: i32, %arg2: i32) -> (i32, i32, i32, i32) {
    %c0_i32 = arith.constant 0 : i32
    %c0_i32_0 = arith.constant 0 : i32
    %c0_i32_1 = arith.constant 0 : i32
    %c0_i32_2 = arith.constant 0 : i32
    return %arg2, %c0_i32, %c0_i32_0, %c0_i32_1 : i32, i32, i32, i32
  }
  func.func @transform_2(%arg0: i32, %arg1: i32, %arg2: i32) -> (i32, i32) {
    %c0_i32 = arith.constant 0 : i32
    %c0_i32_0 = arith.constant 0 : i32
    %c0_i32_1 = arith.constant 0 : i32
    return %c0_i32, %c0_i32_0 : i32, i32
  }
  func.func @transform_3(%arg0: i32, %arg1: i32, %arg2: i32) -> (i32, i32, i32) {
    %c4_i32 = arith.constant 4 : i32
    %0 = arith.muli %arg0, %c4_i32 : i32
    %1 = arith.addi %0, %arg1 : i32
    %c0_i32 = arith.constant 0 : i32
    %c0_i32_0 = arith.constant 0 : i32
    %c0_i32_1 = arith.constant 0 : i32
    return %1, %c0_i32, %c0_i32_0 : i32, i32, i32
  }
}

module attributes {stable_mosaic.version = 11 : i64} {
  func.func @_conv_plane_kernel(%arg0: i32, %arg1: i32, %arg2: i32, %arg3: memref<1x10x10x8xbf16, #tpu.memory_space<vmem>>, %arg4: memref<1x4x8x32xbf16, #tpu.memory_space<vmem>>, %arg5: memref<1x32xf32, #tpu.memory_space<vmem>>, %arg6: memref<1x64x32xbf16, #tpu.memory_space<vmem>>, %arg7: memref<64x32xf32, #tpu.memory_space<vmem>>) attributes {dimension_semantics = [#tpu.dimension_semantics<parallel>, #tpu.dimension_semantics<parallel>, #tpu.dimension_semantics<arbitrary>], iteration_bounds = array<i64: 2, 4, 4>, scalar_prefetch = 0 : i64, scratch_operands = 1 : i64, tpu.core_type = #tpu.core_type<tc>, window_params = [{transform_indices = @transform_0, window_bounds = array<i64: 1, 10, 10, 8>}, {transform_indices = @transform_1, window_bounds = array<i64: 1, 4, 8, 32>}, {pipeline_mode = #tpu.pipeline_mode<synchronous>, transform_indices = @transform_2, window_bounds = array<i64: 1, 32>}, {transform_indices = @transform_3, window_bounds = array<i64: 1, 64, 32>}]} {
    %c0_i32 = arith.constant 0 : i32
    %0 = arith.cmpi eq, %arg2, %c0_i32 : i32
    %1 = arith.extui %0 : i1 to i32
    %c0_i32_0 = arith.constant 0 : i32
    %2 = arith.cmpi ne, %1, %c0_i32_0 : i32
    scf.if %2 {
      %cst_25 = arith.constant 0.000000e+00 : f32
      %34 = vector.broadcast %cst_25 : f32 to vector<64x32xf32>
      %c0_26 = arith.constant 0 : index
      %c0_27 = arith.constant 0 : index
      %35 = vector.load %arg7[%c0_26, %c0_27] : memref<64x32xf32, #tpu.memory_space<vmem>>, vector<64x32xf32>
      tpu.vector_store %arg7[%c0_26, %c0_27], %34 {strides = array<i32>} : memref<64x32xf32, #tpu.memory_space<vmem>>, vector<64x32xf32>,
    } else {
    }
    %c0 = arith.constant 0 : index
    %c0_1 = arith.constant 0 : index
    %c0_2 = arith.constant 0 : index
    %c0_3 = arith.constant 0 : index
    %3 = vector.load %arg3[%c0, %c0_1, %c0_2, %c0_3] : memref<1x10x10x8xbf16, #tpu.memory_space<vmem>>, vector<1x10x10x8xbf16>
    %4 = vector.shape_cast %3 : vector<1x10x10x8xbf16> to vector<10x10x8xbf16>
    %c0_4 = arith.constant 0 : index
    %c0_5 = arith.constant 0 : index
    %5 = vector.load %arg7[%c0_4, %c0_5] : memref<64x32xf32, #tpu.memory_space<vmem>>, vector<64x32xf32>
    %6 = vector.extract_strided_slice %4 {offsets = [1, 0, 0], sizes = [8, 8, 8], strides = [1, 1, 1]} : vector<10x10x8xbf16> to vector<8x8x8xbf16>
    %7 = vector.shape_cast %6 : vector<8x8x8xbf16> to vector<64x8xbf16>
    %c0_6 = arith.constant 0 : index
    %c0_7 = arith.constant 0 : index
    %c0_8 = arith.constant 0 : index
    %c0_9 = arith.constant 0 : index
    %8 = vector.load %arg4[%c0_6, %c0_7, %c0_8, %c0_9] : memref<1x4x8x32xbf16, #tpu.memory_space<vmem>>, vector<1x1x8x32xbf16>
    %9 = vector.shape_cast %8 : vector<1x1x8x32xbf16> to vector<8x32xbf16>
    %cst = arith.constant dense<0.000000e+00> : vector<64x32xf32>
    %10 = tpu.matmul %7, %9, %cst {dimension_numbers = #tpu.dot_dimension_numbers<[1], [0], [0], [1], [0, 0, 1, 1], [], []>} : vector<64x8xbf16>, vector<8x32xbf16>, vector<64x32xf32> -> vector<64x32xf32>
    %11 = arith.addf %5, %10 : vector<64x32xf32>
    %12 = vector.extract_strided_slice %4 {offsets = [1, 1, 0], sizes = [8, 8, 8], strides = [1, 1, 1]} : vector<10x10x8xbf16> to vector<8x8x8xbf16>
    %13 = vector.shape_cast %12 : vector<8x8x8xbf16> to vector<64x8xbf16>
    %c0_10 = arith.constant 0 : index
    %c1 = arith.constant 1 : index
    %c0_11 = arith.constant 0 : index
    %c0_12 = arith.constant 0 : index
    %14 = vector.load %arg4[%c0_10, %c1, %c0_11, %c0_12] : memref<1x4x8x32xbf16, #tpu.memory_space<vmem>>, vector<1x1x8x32xbf16>
    %15 = vector.shape_cast %14 : vector<1x1x8x32xbf16> to vector<8x32xbf16>
    %cst_13 = arith.constant dense<0.000000e+00> : vector<64x32xf32>
    %16 = tpu.matmul %13, %15, %cst_13 {dimension_numbers = #tpu.dot_dimension_numbers<[1], [0], [0], [1], [0, 0, 1, 1], [], []>} : vector<64x8xbf16>, vector<8x32xbf16>, vector<64x32xf32> -> vector<64x32xf32>
    %17 = arith.addf %11, %16 : vector<64x32xf32>
    %18 = vector.extract_strided_slice %4 {offsets = [2, 0, 0], sizes = [8, 8, 8], strides = [1, 1, 1]} : vector<10x10x8xbf16> to vector<8x8x8xbf16>
    %19 = vector.shape_cast %18 : vector<8x8x8xbf16> to vector<64x8xbf16>
    %c0_14 = arith.constant 0 : index
    %c2 = arith.constant 2 : index
    %c0_15 = arith.constant 0 : index
    %c0_16 = arith.constant 0 : index
    %20 = vector.load %arg4[%c0_14, %c2, %c0_15, %c0_16] : memref<1x4x8x32xbf16, #tpu.memory_space<vmem>>, vector<1x1x8x32xbf16>
    %21 = vector.shape_cast %20 : vector<1x1x8x32xbf16> to vector<8x32xbf16>
    %cst_17 = arith.constant dense<0.000000e+00> : vector<64x32xf32>
    %22 = tpu.matmul %19, %21, %cst_17 {dimension_numbers = #tpu.dot_dimension_numbers<[1], [0], [0], [1], [0, 0, 1, 1], [], []>} : vector<64x8xbf16>, vector<8x32xbf16>, vector<64x32xf32> -> vector<64x32xf32>
    %23 = arith.addf %17, %22 : vector<64x32xf32>
    %24 = vector.extract_strided_slice %4 {offsets = [2, 1, 0], sizes = [8, 8, 8], strides = [1, 1, 1]} : vector<10x10x8xbf16> to vector<8x8x8xbf16>
    %25 = vector.shape_cast %24 : vector<8x8x8xbf16> to vector<64x8xbf16>
    %c0_18 = arith.constant 0 : index
    %c3 = arith.constant 3 : index
    %c0_19 = arith.constant 0 : index
    %c0_20 = arith.constant 0 : index
    %26 = vector.load %arg4[%c0_18, %c3, %c0_19, %c0_20] : memref<1x4x8x32xbf16, #tpu.memory_space<vmem>>, vector<1x1x8x32xbf16>
    %27 = vector.shape_cast %26 : vector<1x1x8x32xbf16> to vector<8x32xbf16>
    %cst_21 = arith.constant dense<0.000000e+00> : vector<64x32xf32>
    %28 = tpu.matmul %25, %27, %cst_21 {dimension_numbers = #tpu.dot_dimension_numbers<[1], [0], [0], [1], [0, 0, 1, 1], [], []>} : vector<64x8xbf16>, vector<8x32xbf16>, vector<64x32xf32> -> vector<64x32xf32>
    %29 = arith.addf %23, %28 : vector<64x32xf32>
    %c0_22 = arith.constant 0 : index
    %c0_23 = arith.constant 0 : index
    %30 = vector.load %arg7[%c0_22, %c0_23] : memref<64x32xf32, #tpu.memory_space<vmem>>, vector<64x32xf32>
    tpu.vector_store %arg7[%c0_22, %c0_23], %29 {strides = array<i32>} : memref<64x32xf32, #tpu.memory_space<vmem>>, vector<64x32xf32>,
    %c3_i32 = arith.constant 3 : i32
    %31 = arith.cmpi eq, %arg2, %c3_i32 : i32
    %32 = arith.extui %31 : i1 to i32
    %c0_i32_24 = arith.constant 0 : i32
    %33 = arith.cmpi ne, %32, %c0_i32_24 : i32
    scf.if %33 {
      %c0_25 = arith.constant 0 : index
      %c0_26 = arith.constant 0 : index
      %34 = vector.load %arg5[%c0_25, %c0_26] : memref<1x32xf32, #tpu.memory_space<vmem>>, vector<1x32xf32>
      %35 = vector.broadcast %34 : vector<1x32xf32> to vector<64x32xf32>
      %36 = arith.addf %29, %35 : vector<64x32xf32>
      %37 = arith.truncf %36 : vector<64x32xf32> to vector<64x32xbf16>
      %c0_27 = arith.constant 0 : index
      %c0_28 = arith.constant 0 : index
      %c0_29 = arith.constant 0 : index
      %38 = vector.load %arg6[%c0_27, %c0_28, %c0_29] : memref<1x64x32xbf16, #tpu.memory_space<vmem>>, vector<1x64x32xbf16>
      %39 = vector.shape_cast %38 : vector<1x64x32xbf16> to vector<64x32xbf16>
      %40 = vector.shape_cast %37 : vector<64x32xbf16> to vector<1x64x32xbf16>
      tpu.vector_store %arg6[%c0_27, %c0_28, %c0_29], %40 {strides = array<i32>} : memref<1x64x32xbf16, #tpu.memory_space<vmem>>, vector<1x64x32xbf16>,
    } else {
    }
    return
  }
  func.func @transform_0(%arg0: i32, %arg1: i32, %arg2: i32) -> (i32, i32, i32, i32) {
    %c7_i32 = arith.constant 7 : i32
    %0 = arith.muli %arg0, %c7_i32 : i32
    %1 = arith.addi %0, %arg1 : i32
    %2 = arith.addi %1, %arg2 : i32
    %c0_i32 = arith.constant 0 : i32
    %3 = arith.addi %2, %c0_i32 : i32
    %c0_i32_0 = arith.constant 0 : i32
    %c0_i32_1 = arith.constant 0 : i32
    %c0_i32_2 = arith.constant 0 : i32
    %c0_i32_3 = arith.constant 0 : i32
    return %3, %c0_i32_0, %c0_i32_1, %c0_i32_2 : i32, i32, i32, i32
  }
  func.func @transform_1(%arg0: i32, %arg1: i32, %arg2: i32) -> (i32, i32, i32, i32) {
    %c0_i32 = arith.constant 0 : i32
    %c0_i32_0 = arith.constant 0 : i32
    %c0_i32_1 = arith.constant 0 : i32
    %c0_i32_2 = arith.constant 0 : i32
    return %arg2, %c0_i32, %c0_i32_0, %c0_i32_1 : i32, i32, i32, i32
  }
  func.func @transform_2(%arg0: i32, %arg1: i32, %arg2: i32) -> (i32, i32) {
    %c0_i32 = arith.constant 0 : i32
    %c0_i32_0 = arith.constant 0 : i32
    %c0_i32_1 = arith.constant 0 : i32
    return %c0_i32, %c0_i32_0 : i32, i32
  }
  func.func @transform_3(%arg0: i32, %arg1: i32, %arg2: i32) -> (i32, i32, i32) {
    %c4_i32 = arith.constant 4 : i32
    %0 = arith.muli %arg0, %c4_i32 : i32
    %1 = arith.addi %0, %arg1 : i32
    %c0_i32 = arith.constant 0 : i32
    %c0_i32_0 = arith.constant 0 : i32
    %c0_i32_1 = arith.constant 0 : i32
    return %1, %c0_i32, %c0_i32_0 : i32, i32, i32
  }
}

module attributes {stable_mosaic.version = 11 : i64} {
  func.func @_conv_plane_kernel(%arg0: i32, %arg1: i32, %arg2: i32, %arg3: memref<1x10x10x8xbf16, #tpu.memory_space<vmem>>, %arg4: memref<1x4x8x32xbf16, #tpu.memory_space<vmem>>, %arg5: memref<1x32xf32, #tpu.memory_space<vmem>>, %arg6: memref<1x64x32xbf16, #tpu.memory_space<vmem>>, %arg7: memref<64x32xf32, #tpu.memory_space<vmem>>) attributes {dimension_semantics = [#tpu.dimension_semantics<parallel>, #tpu.dimension_semantics<parallel>, #tpu.dimension_semantics<arbitrary>], iteration_bounds = array<i64: 2, 4, 4>, scalar_prefetch = 0 : i64, scratch_operands = 1 : i64, tpu.core_type = #tpu.core_type<tc>, window_params = [{transform_indices = @transform_0, window_bounds = array<i64: 1, 10, 10, 8>}, {transform_indices = @transform_1, window_bounds = array<i64: 1, 4, 8, 32>}, {pipeline_mode = #tpu.pipeline_mode<synchronous>, transform_indices = @transform_2, window_bounds = array<i64: 1, 32>}, {transform_indices = @transform_3, window_bounds = array<i64: 1, 64, 32>}]} {
    %c0_i32 = arith.constant 0 : i32
    %0 = arith.cmpi eq, %arg2, %c0_i32 : i32
    %1 = arith.extui %0 : i1 to i32
    %c0_i32_0 = arith.constant 0 : i32
    %2 = arith.cmpi ne, %1, %c0_i32_0 : i32
    scf.if %2 {
      %cst_25 = arith.constant 0.000000e+00 : f32
      %34 = vector.broadcast %cst_25 : f32 to vector<64x32xf32>
      %c0_26 = arith.constant 0 : index
      %c0_27 = arith.constant 0 : index
      %35 = vector.load %arg7[%c0_26, %c0_27] : memref<64x32xf32, #tpu.memory_space<vmem>>, vector<64x32xf32>
      tpu.vector_store %arg7[%c0_26, %c0_27], %34 {strides = array<i32>} : memref<64x32xf32, #tpu.memory_space<vmem>>, vector<64x32xf32>,
    } else {
    }
    %c0 = arith.constant 0 : index
    %c0_1 = arith.constant 0 : index
    %c0_2 = arith.constant 0 : index
    %c0_3 = arith.constant 0 : index
    %3 = vector.load %arg3[%c0, %c0_1, %c0_2, %c0_3] : memref<1x10x10x8xbf16, #tpu.memory_space<vmem>>, vector<1x10x10x8xbf16>
    %4 = vector.shape_cast %3 : vector<1x10x10x8xbf16> to vector<10x10x8xbf16>
    %c0_4 = arith.constant 0 : index
    %c0_5 = arith.constant 0 : index
    %5 = vector.load %arg7[%c0_4, %c0_5] : memref<64x32xf32, #tpu.memory_space<vmem>>, vector<64x32xf32>
    %6 = vector.extract_strided_slice %4 {offsets = [0, 1, 0], sizes = [8, 8, 8], strides = [1, 1, 1]} : vector<10x10x8xbf16> to vector<8x8x8xbf16>
    %7 = vector.shape_cast %6 : vector<8x8x8xbf16> to vector<64x8xbf16>
    %c0_6 = arith.constant 0 : index
    %c0_7 = arith.constant 0 : index
    %c0_8 = arith.constant 0 : index
    %c0_9 = arith.constant 0 : index
    %8 = vector.load %arg4[%c0_6, %c0_7, %c0_8, %c0_9] : memref<1x4x8x32xbf16, #tpu.memory_space<vmem>>, vector<1x1x8x32xbf16>
    %9 = vector.shape_cast %8 : vector<1x1x8x32xbf16> to vector<8x32xbf16>
    %cst = arith.constant dense<0.000000e+00> : vector<64x32xf32>
    %10 = tpu.matmul %7, %9, %cst {dimension_numbers = #tpu.dot_dimension_numbers<[1], [0], [0], [1], [0, 0, 1, 1], [], []>} : vector<64x8xbf16>, vector<8x32xbf16>, vector<64x32xf32> -> vector<64x32xf32>
    %11 = arith.addf %5, %10 : vector<64x32xf32>
    %12 = vector.extract_strided_slice %4 {offsets = [0, 2, 0], sizes = [8, 8, 8], strides = [1, 1, 1]} : vector<10x10x8xbf16> to vector<8x8x8xbf16>
    %13 = vector.shape_cast %12 : vector<8x8x8xbf16> to vector<64x8xbf16>
    %c0_10 = arith.constant 0 : index
    %c1 = arith.constant 1 : index
    %c0_11 = arith.constant 0 : index
    %c0_12 = arith.constant 0 : index
    %14 = vector.load %arg4[%c0_10, %c1, %c0_11, %c0_12] : memref<1x4x8x32xbf16, #tpu.memory_space<vmem>>, vector<1x1x8x32xbf16>
    %15 = vector.shape_cast %14 : vector<1x1x8x32xbf16> to vector<8x32xbf16>
    %cst_13 = arith.constant dense<0.000000e+00> : vector<64x32xf32>
    %16 = tpu.matmul %13, %15, %cst_13 {dimension_numbers = #tpu.dot_dimension_numbers<[1], [0], [0], [1], [0, 0, 1, 1], [], []>} : vector<64x8xbf16>, vector<8x32xbf16>, vector<64x32xf32> -> vector<64x32xf32>
    %17 = arith.addf %11, %16 : vector<64x32xf32>
    %18 = vector.extract_strided_slice %4 {offsets = [1, 1, 0], sizes = [8, 8, 8], strides = [1, 1, 1]} : vector<10x10x8xbf16> to vector<8x8x8xbf16>
    %19 = vector.shape_cast %18 : vector<8x8x8xbf16> to vector<64x8xbf16>
    %c0_14 = arith.constant 0 : index
    %c2 = arith.constant 2 : index
    %c0_15 = arith.constant 0 : index
    %c0_16 = arith.constant 0 : index
    %20 = vector.load %arg4[%c0_14, %c2, %c0_15, %c0_16] : memref<1x4x8x32xbf16, #tpu.memory_space<vmem>>, vector<1x1x8x32xbf16>
    %21 = vector.shape_cast %20 : vector<1x1x8x32xbf16> to vector<8x32xbf16>
    %cst_17 = arith.constant dense<0.000000e+00> : vector<64x32xf32>
    %22 = tpu.matmul %19, %21, %cst_17 {dimension_numbers = #tpu.dot_dimension_numbers<[1], [0], [0], [1], [0, 0, 1, 1], [], []>} : vector<64x8xbf16>, vector<8x32xbf16>, vector<64x32xf32> -> vector<64x32xf32>
    %23 = arith.addf %17, %22 : vector<64x32xf32>
    %24 = vector.extract_strided_slice %4 {offsets = [1, 2, 0], sizes = [8, 8, 8], strides = [1, 1, 1]} : vector<10x10x8xbf16> to vector<8x8x8xbf16>
    %25 = vector.shape_cast %24 : vector<8x8x8xbf16> to vector<64x8xbf16>
    %c0_18 = arith.constant 0 : index
    %c3 = arith.constant 3 : index
    %c0_19 = arith.constant 0 : index
    %c0_20 = arith.constant 0 : index
    %26 = vector.load %arg4[%c0_18, %c3, %c0_19, %c0_20] : memref<1x4x8x32xbf16, #tpu.memory_space<vmem>>, vector<1x1x8x32xbf16>
    %27 = vector.shape_cast %26 : vector<1x1x8x32xbf16> to vector<8x32xbf16>
    %cst_21 = arith.constant dense<0.000000e+00> : vector<64x32xf32>
    %28 = tpu.matmul %25, %27, %cst_21 {dimension_numbers = #tpu.dot_dimension_numbers<[1], [0], [0], [1], [0, 0, 1, 1], [], []>} : vector<64x8xbf16>, vector<8x32xbf16>, vector<64x32xf32> -> vector<64x32xf32>
    %29 = arith.addf %23, %28 : vector<64x32xf32>
    %c0_22 = arith.constant 0 : index
    %c0_23 = arith.constant 0 : index
    %30 = vector.load %arg7[%c0_22, %c0_23] : memref<64x32xf32, #tpu.memory_space<vmem>>, vector<64x32xf32>
    tpu.vector_store %arg7[%c0_22, %c0_23], %29 {strides = array<i32>} : memref<64x32xf32, #tpu.memory_space<vmem>>, vector<64x32xf32>,
    %c3_i32 = arith.constant 3 : i32
    %31 = arith.cmpi eq, %arg2, %c3_i32 : i32
    %32 = arith.extui %31 : i1 to i32
    %c0_i32_24 = arith.constant 0 : i32
    %33 = arith.cmpi ne, %32, %c0_i32_24 : i32
    scf.if %33 {
      %c0_25 = arith.constant 0 : index
      %c0_26 = arith.constant 0 : index
      %34 = vector.load %arg5[%c0_25, %c0_26] : memref<1x32xf32, #tpu.memory_space<vmem>>, vector<1x32xf32>
      %35 = vector.broadcast %34 : vector<1x32xf32> to vector<64x32xf32>
      %36 = arith.addf %29, %35 : vector<64x32xf32>
      %37 = arith.truncf %36 : vector<64x32xf32> to vector<64x32xbf16>
      %c0_27 = arith.constant 0 : index
      %c0_28 = arith.constant 0 : index
      %c0_29 = arith.constant 0 : index
      %38 = vector.load %arg6[%c0_27, %c0_28, %c0_29] : memref<1x64x32xbf16, #tpu.memory_space<vmem>>, vector<1x64x32xbf16>
      %39 = vector.shape_cast %38 : vector<1x64x32xbf16> to vector<64x32xbf16>
      %40 = vector.shape_cast %37 : vector<64x32xbf16> to vector<1x64x32xbf16>
      tpu.vector_store %arg6[%c0_27, %c0_28, %c0_29], %40 {strides = array<i32>} : memref<1x64x32xbf16, #tpu.memory_space<vmem>>, vector<1x64x32xbf16>,
    } else {
    }
    return
  }
  func.func @transform_0(%arg0: i32, %arg1: i32, %arg2: i32) -> (i32, i32, i32, i32) {
    %c7_i32 = arith.constant 7 : i32
    %0 = arith.muli %arg0, %c7_i32 : i32
    %1 = arith.addi %0, %arg1 : i32
    %2 = arith.addi %1, %arg2 : i32
    %c0_i32 = arith.constant 0 : i32
    %3 = arith.addi %2, %c0_i32 : i32
    %c0_i32_0 = arith.constant 0 : i32
    %c0_i32_1 = arith.constant 0 : i32
    %c0_i32_2 = arith.constant 0 : i32
    %c0_i32_3 = arith.constant 0 : i32
    return %3, %c0_i32_0, %c0_i32_1, %c0_i32_2 : i32, i32, i32, i32
  }
  func.func @transform_1(%arg0: i32, %arg1: i32, %arg2: i32) -> (i32, i32, i32, i32) {
    %c0_i32 = arith.constant 0 : i32
    %c0_i32_0 = arith.constant 0 : i32
    %c0_i32_1 = arith.constant 0 : i32
    %c0_i32_2 = arith.constant 0 : i32
    return %arg2, %c0_i32, %c0_i32_0, %c0_i32_1 : i32, i32, i32, i32
  }
  func.func @transform_2(%arg0: i32, %arg1: i32, %arg2: i32) -> (i32, i32) {
    %c0_i32 = arith.constant 0 : i32
    %c0_i32_0 = arith.constant 0 : i32
    %c0_i32_1 = arith.constant 0 : i32
    return %c0_i32, %c0_i32_0 : i32, i32
  }
  func.func @transform_3(%arg0: i32, %arg1: i32, %arg2: i32) -> (i32, i32, i32) {
    %c4_i32 = arith.constant 4 : i32
    %0 = arith.muli %arg0, %c4_i32 : i32
    %1 = arith.addi %0, %arg1 : i32
    %c0_i32 = arith.constant 0 : i32
    %c0_i32_0 = arith.constant 0 : i32
    %c0_i32_1 = arith.constant 0 : i32
    return %1, %c0_i32, %c0_i32_0 : i32, i32, i32
  }
}

module attributes {stable_mosaic.version = 11 : i64} {
  func.func @_conv_plane_kernel(%arg0: i32, %arg1: i32, %arg2: i32, %arg3: memref<1x10x10x8xbf16, #tpu.memory_space<vmem>>, %arg4: memref<1x4x8x32xbf16, #tpu.memory_space<vmem>>, %arg5: memref<1x32xf32, #tpu.memory_space<vmem>>, %arg6: memref<1x64x32xbf16, #tpu.memory_space<vmem>>, %arg7: memref<64x32xf32, #tpu.memory_space<vmem>>) attributes {dimension_semantics = [#tpu.dimension_semantics<parallel>, #tpu.dimension_semantics<parallel>, #tpu.dimension_semantics<arbitrary>], iteration_bounds = array<i64: 2, 4, 4>, scalar_prefetch = 0 : i64, scratch_operands = 1 : i64, tpu.core_type = #tpu.core_type<tc>, window_params = [{transform_indices = @transform_0, window_bounds = array<i64: 1, 10, 10, 8>}, {transform_indices = @transform_1, window_bounds = array<i64: 1, 4, 8, 32>}, {pipeline_mode = #tpu.pipeline_mode<synchronous>, transform_indices = @transform_2, window_bounds = array<i64: 1, 32>}, {transform_indices = @transform_3, window_bounds = array<i64: 1, 64, 32>}]} {
    %c0_i32 = arith.constant 0 : i32
    %0 = arith.cmpi eq, %arg2, %c0_i32 : i32
    %1 = arith.extui %0 : i1 to i32
    %c0_i32_0 = arith.constant 0 : i32
    %2 = arith.cmpi ne, %1, %c0_i32_0 : i32
    scf.if %2 {
      %cst_25 = arith.constant 0.000000e+00 : f32
      %34 = vector.broadcast %cst_25 : f32 to vector<64x32xf32>
      %c0_26 = arith.constant 0 : index
      %c0_27 = arith.constant 0 : index
      %35 = vector.load %arg7[%c0_26, %c0_27] : memref<64x32xf32, #tpu.memory_space<vmem>>, vector<64x32xf32>
      tpu.vector_store %arg7[%c0_26, %c0_27], %34 {strides = array<i32>} : memref<64x32xf32, #tpu.memory_space<vmem>>, vector<64x32xf32>,
    } else {
    }
    %c0 = arith.constant 0 : index
    %c0_1 = arith.constant 0 : index
    %c0_2 = arith.constant 0 : index
    %c0_3 = arith.constant 0 : index
    %3 = vector.load %arg3[%c0, %c0_1, %c0_2, %c0_3] : memref<1x10x10x8xbf16, #tpu.memory_space<vmem>>, vector<1x10x10x8xbf16>
    %4 = vector.shape_cast %3 : vector<1x10x10x8xbf16> to vector<10x10x8xbf16>
    %c0_4 = arith.constant 0 : index
    %c0_5 = arith.constant 0 : index
    %5 = vector.load %arg7[%c0_4, %c0_5] : memref<64x32xf32, #tpu.memory_space<vmem>>, vector<64x32xf32>
    %6 = vector.extract_strided_slice %4 {offsets = [0, 0, 0], sizes = [8, 8, 8], strides = [1, 1, 1]} : vector<10x10x8xbf16> to vector<8x8x8xbf16>
    %7 = vector.shape_cast %6 : vector<8x8x8xbf16> to vector<64x8xbf16>
    %c0_6 = arith.constant 0 : index
    %c0_7 = arith.constant 0 : index
    %c0_8 = arith.constant 0 : index
    %c0_9 = arith.constant 0 : index
    %8 = vector.load %arg4[%c0_6, %c0_7, %c0_8, %c0_9] : memref<1x4x8x32xbf16, #tpu.memory_space<vmem>>, vector<1x1x8x32xbf16>
    %9 = vector.shape_cast %8 : vector<1x1x8x32xbf16> to vector<8x32xbf16>
    %cst = arith.constant dense<0.000000e+00> : vector<64x32xf32>
    %10 = tpu.matmul %7, %9, %cst {dimension_numbers = #tpu.dot_dimension_numbers<[1], [0], [0], [1], [0, 0, 1, 1], [], []>} : vector<64x8xbf16>, vector<8x32xbf16>, vector<64x32xf32> -> vector<64x32xf32>
    %11 = arith.addf %5, %10 : vector<64x32xf32>
    %12 = vector.extract_strided_slice %4 {offsets = [0, 1, 0], sizes = [8, 8, 8], strides = [1, 1, 1]} : vector<10x10x8xbf16> to vector<8x8x8xbf16>
    %13 = vector.shape_cast %12 : vector<8x8x8xbf16> to vector<64x8xbf16>
    %c0_10 = arith.constant 0 : index
    %c1 = arith.constant 1 : index
    %c0_11 = arith.constant 0 : index
    %c0_12 = arith.constant 0 : index
    %14 = vector.load %arg4[%c0_10, %c1, %c0_11, %c0_12] : memref<1x4x8x32xbf16, #tpu.memory_space<vmem>>, vector<1x1x8x32xbf16>
    %15 = vector.shape_cast %14 : vector<1x1x8x32xbf16> to vector<8x32xbf16>
    %cst_13 = arith.constant dense<0.000000e+00> : vector<64x32xf32>
    %16 = tpu.matmul %13, %15, %cst_13 {dimension_numbers = #tpu.dot_dimension_numbers<[1], [0], [0], [1], [0, 0, 1, 1], [], []>} : vector<64x8xbf16>, vector<8x32xbf16>, vector<64x32xf32> -> vector<64x32xf32>
    %17 = arith.addf %11, %16 : vector<64x32xf32>
    %18 = vector.extract_strided_slice %4 {offsets = [1, 0, 0], sizes = [8, 8, 8], strides = [1, 1, 1]} : vector<10x10x8xbf16> to vector<8x8x8xbf16>
    %19 = vector.shape_cast %18 : vector<8x8x8xbf16> to vector<64x8xbf16>
    %c0_14 = arith.constant 0 : index
    %c2 = arith.constant 2 : index
    %c0_15 = arith.constant 0 : index
    %c0_16 = arith.constant 0 : index
    %20 = vector.load %arg4[%c0_14, %c2, %c0_15, %c0_16] : memref<1x4x8x32xbf16, #tpu.memory_space<vmem>>, vector<1x1x8x32xbf16>
    %21 = vector.shape_cast %20 : vector<1x1x8x32xbf16> to vector<8x32xbf16>
    %cst_17 = arith.constant dense<0.000000e+00> : vector<64x32xf32>
    %22 = tpu.matmul %19, %21, %cst_17 {dimension_numbers = #tpu.dot_dimension_numbers<[1], [0], [0], [1], [0, 0, 1, 1], [], []>} : vector<64x8xbf16>, vector<8x32xbf16>, vector<64x32xf32> -> vector<64x32xf32>
    %23 = arith.addf %17, %22 : vector<64x32xf32>
    %24 = vector.extract_strided_slice %4 {offsets = [1, 1, 0], sizes = [8, 8, 8], strides = [1, 1, 1]} : vector<10x10x8xbf16> to vector<8x8x8xbf16>
    %25 = vector.shape_cast %24 : vector<8x8x8xbf16> to vector<64x8xbf16>
    %c0_18 = arith.constant 0 : index
    %c3 = arith.constant 3 : index
    %c0_19 = arith.constant 0 : index
    %c0_20 = arith.constant 0 : index
    %26 = vector.load %arg4[%c0_18, %c3, %c0_19, %c0_20] : memref<1x4x8x32xbf16, #tpu.memory_space<vmem>>, vector<1x1x8x32xbf16>
    %27 = vector.shape_cast %26 : vector<1x1x8x32xbf16> to vector<8x32xbf16>
    %cst_21 = arith.constant dense<0.000000e+00> : vector<64x32xf32>
    %28 = tpu.matmul %25, %27, %cst_21 {dimension_numbers = #tpu.dot_dimension_numbers<[1], [0], [0], [1], [0, 0, 1, 1], [], []>} : vector<64x8xbf16>, vector<8x32xbf16>, vector<64x32xf32> -> vector<64x32xf32>
    %29 = arith.addf %23, %28 : vector<64x32xf32>
    %c0_22 = arith.constant 0 : index
    %c0_23 = arith.constant 0 : index
    %30 = vector.load %arg7[%c0_22, %c0_23] : memref<64x32xf32, #tpu.memory_space<vmem>>, vector<64x32xf32>
    tpu.vector_store %arg7[%c0_22, %c0_23], %29 {strides = array<i32>} : memref<64x32xf32, #tpu.memory_space<vmem>>, vector<64x32xf32>,
    %c3_i32 = arith.constant 3 : i32
    %31 = arith.cmpi eq, %arg2, %c3_i32 : i32
    %32 = arith.extui %31 : i1 to i32
    %c0_i32_24 = arith.constant 0 : i32
    %33 = arith.cmpi ne, %32, %c0_i32_24 : i32
    scf.if %33 {
      %c0_25 = arith.constant 0 : index
      %c0_26 = arith.constant 0 : index
      %34 = vector.load %arg5[%c0_25, %c0_26] : memref<1x32xf32, #tpu.memory_space<vmem>>, vector<1x32xf32>
      %35 = vector.broadcast %34 : vector<1x32xf32> to vector<64x32xf32>
      %36 = arith.addf %29, %35 : vector<64x32xf32>
      %37 = arith.truncf %36 : vector<64x32xf32> to vector<64x32xbf16>
      %c0_27 = arith.constant 0 : index
      %c0_28 = arith.constant 0 : index
      %c0_29 = arith.constant 0 : index
      %38 = vector.load %arg6[%c0_27, %c0_28, %c0_29] : memref<1x64x32xbf16, #tpu.memory_space<vmem>>, vector<1x64x32xbf16>
      %39 = vector.shape_cast %38 : vector<1x64x32xbf16> to vector<64x32xbf16>
      %40 = vector.shape_cast %37 : vector<64x32xbf16> to vector<1x64x32xbf16>
      tpu.vector_store %arg6[%c0_27, %c0_28, %c0_29], %40 {strides = array<i32>} : memref<1x64x32xbf16, #tpu.memory_space<vmem>>, vector<1x64x32xbf16>,
    } else {
    }
    return
  }
  func.func @transform_0(%arg0: i32, %arg1: i32, %arg2: i32) -> (i32, i32, i32, i32) {
    %c7_i32 = arith.constant 7 : i32
    %0 = arith.muli %arg0, %c7_i32 : i32
    %1 = arith.addi %0, %arg1 : i32
    %2 = arith.addi %1, %arg2 : i32
    %c0_i32 = arith.constant 0 : i32
    %3 = arith.addi %2, %c0_i32 : i32
    %c0_i32_0 = arith.constant 0 : i32
    %c0_i32_1 = arith.constant 0 : i32
    %c0_i32_2 = arith.constant 0 : i32
    %c0_i32_3 = arith.constant 0 : i32
    return %3, %c0_i32_0, %c0_i32_1, %c0_i32_2 : i32, i32, i32, i32
  }
  func.func @transform_1(%arg0: i32, %arg1: i32, %arg2: i32) -> (i32, i32, i32, i32) {
    %c0_i32 = arith.constant 0 : i32
    %c0_i32_0 = arith.constant 0 : i32
    %c0_i32_1 = arith.constant 0 : i32
    %c0_i32_2 = arith.constant 0 : i32
    return %arg2, %c0_i32, %c0_i32_0, %c0_i32_1 : i32, i32, i32, i32
  }
  func.func @transform_2(%arg0: i32, %arg1: i32, %arg2: i32) -> (i32, i32) {
    %c0_i32 = arith.constant 0 : i32
    %c0_i32_0 = arith.constant 0 : i32
    %c0_i32_1 = arith.constant 0 : i32
    return %c0_i32, %c0_i32_0 : i32, i32
  }
  func.func @transform_3(%arg0: i32, %arg1: i32, %arg2: i32) -> (i32, i32, i32) {
    %c4_i32 = arith.constant 4 : i32
    %0 = arith.muli %arg0, %c4_i32 : i32
    %1 = arith.addi %0, %arg1 : i32
    %c0_i32 = arith.constant 0 : i32
    %c0_i32_0 = arith.constant 0 : i32
    %c0_i32_1 = arith.constant 0 : i32
    return %1, %c0_i32, %c0_i32_0 : i32, i32, i32
  }
}

module attributes {stable_mosaic.version = 11 : i64} {
  func.func @_gn_stats_kernel(%arg0: i32, %arg1: memref<1x16x16x32xbf16, #tpu.memory_space<vmem>>, %arg2: memref<1x1x32xf32, #tpu.memory_space<vmem>>, %arg3: memref<1x1x32xf32, #tpu.memory_space<vmem>>) attributes {dimension_semantics = [#tpu.dimension_semantics<parallel>], iteration_bounds = array<i64: 8>, scalar_prefetch = 0 : i64, scratch_operands = 0 : i64, tpu.core_type = #tpu.core_type<tc>, window_params = [{transform_indices = @transform_0, window_bounds = array<i64: 1, 16, 16, 32>}, {transform_indices = @transform_1, window_bounds = array<i64: 1, 1, 32>}, {transform_indices = @transform_2, window_bounds = array<i64: 1, 1, 32>}]} {
    %c0 = arith.constant 0 : index
    %c0_0 = arith.constant 0 : index
    %c0_1 = arith.constant 0 : index
    %c0_2 = arith.constant 0 : index
    %0 = vector.load %arg1[%c0, %c0_0, %c0_1, %c0_2] : memref<1x16x16x32xbf16, #tpu.memory_space<vmem>>, vector<1x16x16x32xbf16>
    %1 = vector.shape_cast %0 : vector<1x16x16x32xbf16> to vector<16x16x32xbf16>
    %2 = arith.extf %1 : vector<16x16x32xbf16> to vector<16x16x32xf32>
    %cst = arith.constant dense<0.000000e+00> : vector<16x32xf32>
    %3 = vector.multi_reduction <add>, %2, %cst [0] : vector<16x16x32xf32> to vector<16x32xf32>
    %4 = arith.mulf %2, %2 : vector<16x16x32xf32>
    %cst_3 = arith.constant dense<0.000000e+00> : vector<16x32xf32>
    %5 = vector.multi_reduction <add>, %4, %cst_3 [0] : vector<16x16x32xf32> to vector<16x32xf32>
    %cst_4 = arith.constant dense<0.000000e+00> : vector<32xf32>
    %6 = vector.multi_reduction <add>, %3, %cst_4 [0] : vector<16x32xf32> to vector<32xf32>
    %7 = vector.shape_cast %6 : vector<32xf32> to vector<1x32xf32>
    %c0_5 = arith.constant 0 : index
    %c0_6 = arith.constant 0 : index
    %c0_7 = arith.constant 0 : index
    %8 = vector.load %arg2[%c0_5, %c0_6, %c0_7] : memref<1x1x32xf32, #tpu.memory_space<vmem>>, vector<1x1x32xf32>
    %9 = vector.shape_cast %8 : vector<1x1x32xf32> to vector<1x32xf32>
    %10 = vector.shape_cast %7 : vector<1x32xf32> to vector<1x1x32xf32>
    tpu.vector_store %arg2[%c0_5, %c0_6, %c0_7], %10 {strides = array<i32>} : memref<1x1x32xf32, #tpu.memory_space<vmem>>, vector<1x1x32xf32>,
    %cst_8 = arith.constant dense<0.000000e+00> : vector<32xf32>
    %11 = vector.multi_reduction <add>, %5, %cst_8 [0] : vector<16x32xf32> to vector<32xf32>
    %12 = vector.shape_cast %11 : vector<32xf32> to vector<1x32xf32>
    %c0_9 = arith.constant 0 : index
    %c0_10 = arith.constant 0 : index
    %c0_11 = arith.constant 0 : index
    %13 = vector.load %arg3[%c0_9, %c0_10, %c0_11] : memref<1x1x32xf32, #tpu.memory_space<vmem>>, vector<1x1x32xf32>
    %14 = vector.shape_cast %13 : vector<1x1x32xf32> to vector<1x32xf32>
    %15 = vector.shape_cast %12 : vector<1x32xf32> to vector<1x1x32xf32>
    tpu.vector_store %arg3[%c0_9, %c0_10, %c0_11], %15 {strides = array<i32>} : memref<1x1x32xf32, #tpu.memory_space<vmem>>, vector<1x1x32xf32>,
    return
  }
  func.func @transform_0(%arg0: i32) -> (i32, i32, i32, i32) {
    %c0_i32 = arith.constant 0 : i32
    %c0_i32_0 = arith.constant 0 : i32
    %c0_i32_1 = arith.constant 0 : i32
    %c0_i32_2 = arith.constant 0 : i32
    return %arg0, %c0_i32, %c0_i32_0, %c0_i32_1 : i32, i32, i32, i32
  }
  func.func @transform_1(%arg0: i32) -> (i32, i32, i32) {
    %c0_i32 = arith.constant 0 : i32
    %c0_i32_0 = arith.constant 0 : i32
    %c0_i32_1 = arith.constant 0 : i32
    return %arg0, %c0_i32, %c0_i32_0 : i32, i32, i32
  }
  func.func @transform_2(%arg0: i32) -> (i32, i32, i32) {
    %c0_i32 = arith.constant 0 : i32
    %c0_i32_0 = arith.constant 0 : i32
    %c0_i32_1 = arith.constant 0 : i32
    return %arg0, %c0_i32, %c0_i32_0 : i32, i32, i32
  }
}

module attributes {stable_mosaic.version = 11 : i64} {
  func.func @_conv_plane_kernel(%arg0: i32, %arg1: i32, %arg2: i32, %arg3: memref<1x18x18x32xbf16, #tpu.memory_space<vmem>>, %arg4: memref<1x9x32x32xbf16, #tpu.memory_space<vmem>>, %arg5: memref<1x32xf32, #tpu.memory_space<vmem>>, %arg6: memref<1x1x32xf32, #tpu.memory_space<vmem>>, %arg7: memref<1x1x32xf32, #tpu.memory_space<vmem>>, %arg8: memref<1x256x32xbf16, #tpu.memory_space<vmem>>, %arg9: memref<256x32xf32, #tpu.memory_space<vmem>>) attributes {dimension_semantics = [#tpu.dimension_semantics<parallel>, #tpu.dimension_semantics<parallel>, #tpu.dimension_semantics<arbitrary>], iteration_bounds = array<i64: 2, 4, 3>, scalar_prefetch = 0 : i64, scratch_operands = 1 : i64, tpu.core_type = #tpu.core_type<tc>, window_params = [{transform_indices = @transform_0, window_bounds = array<i64: 1, 18, 18, 32>}, {transform_indices = @transform_1, window_bounds = array<i64: 1, 9, 32, 32>}, {pipeline_mode = #tpu.pipeline_mode<synchronous>, transform_indices = @transform_2, window_bounds = array<i64: 1, 32>}, {transform_indices = @transform_3, window_bounds = array<i64: 1, 1, 32>}, {transform_indices = @transform_4, window_bounds = array<i64: 1, 1, 32>}, {transform_indices = @transform_5, window_bounds = array<i64: 1, 256, 32>}]} {
    %c0_i32 = arith.constant 0 : i32
    %0 = arith.cmpi eq, %arg2, %c0_i32 : i32
    %1 = arith.extui %0 : i1 to i32
    %c0_i32_0 = arith.constant 0 : i32
    %2 = arith.cmpi ne, %1, %c0_i32_0 : i32
    scf.if %2 {
      %cst_53 = arith.constant 0.000000e+00 : f32
      %82 = vector.broadcast %cst_53 : f32 to vector<256x32xf32>
      %c0_54 = arith.constant 0 : index
      %c0_55 = arith.constant 0 : index
      %83 = vector.load %arg9[%c0_54, %c0_55] : memref<256x32xf32, #tpu.memory_space<vmem>>, vector<256x32xf32>
      tpu.vector_store %arg9[%c0_54, %c0_55], %82 {strides = array<i32>} : memref<256x32xf32, #tpu.memory_space<vmem>>, vector<256x32xf32>,
    } else {
    }
    %c0 = arith.constant 0 : index
    %c0_1 = arith.constant 0 : index
    %c0_2 = arith.constant 0 : index
    %c0_3 = arith.constant 0 : index
    %3 = vector.load %arg3[%c0, %c0_1, %c0_2, %c0_3] : memref<1x18x18x32xbf16, #tpu.memory_space<vmem>>, vector<1x18x18x32xbf16>
    %4 = vector.shape_cast %3 : vector<1x18x18x32xbf16> to vector<18x18x32xbf16>
    %5 = arith.extf %4 : vector<18x18x32xbf16> to vector<18x18x32xf32>
    %c0_4 = arith.constant 0 : index
    %c0_5 = arith.constant 0 : index
    %c0_6 = arith.constant 0 : index
    %6 = vector.load %arg6[%c0_4, %c0_5, %c0_6] : memref<1x1x32xf32, #tpu.memory_space<vmem>>, vector<1x1x32xf32>
    %7 = vector.shape_cast %6 : vector<1x1x32xf32> to vector<32xf32>
    %8 = vector.shape_cast %7 : vector<32xf32> to vector<1x1x32xf32>
    %9 = vector.broadcast %8 : vector<1x1x32xf32> to vector<18x18x32xf32>
    %10 = arith.mulf %5, %9 : vector<18x18x32xf32>
    %c0_7 = arith.constant 0 : index
    %c0_8 = arith.constant 0 : index
    %c0_9 = arith.constant 0 : index
    %11 = vector.load %arg7[%c0_7, %c0_8, %c0_9] : memref<1x1x32xf32, #tpu.memory_space<vmem>>, vector<1x1x32xf32>
    %12 = vector.shape_cast %11 : vector<1x1x32xf32> to vector<32xf32>
    %13 = vector.shape_cast %12 : vector<32xf32> to vector<1x1x32xf32>
    %14 = vector.broadcast %13 : vector<1x1x32xf32> to vector<18x18x32xf32>
    %15 = arith.addf %10, %14 : vector<18x18x32xf32>
    %cst = arith.constant 0.000000e+00 : f32
    %16 = vector.broadcast %cst : f32 to vector<18x18x32xf32>
    %17 = arith.subf %16, %15 : vector<18x18x32xf32>
    %18 = math.exp %17 : vector<18x18x32xf32>
    %cst_10 = arith.constant 1.000000e+00 : f32
    %19 = vector.broadcast %cst_10 : f32 to vector<18x18x32xf32>
    %20 = arith.addf %19, %18 : vector<18x18x32xf32>
    %21 = arith.divf %15, %20 : vector<18x18x32xf32>
    %22 = arith.truncf %21 : vector<18x18x32xf32> to vector<18x18x32xbf16>
    %c0_11 = arith.constant 0 : index
    %c0_12 = arith.constant 0 : index
    %23 = vector.load %arg9[%c0_11, %c0_12] : memref<256x32xf32, #tpu.memory_space<vmem>>, vector<256x32xf32>
    %24 = vector.extract_strided_slice %22 {offsets = [0, 0, 0], sizes = [16, 16, 32], strides = [1, 1, 1]} : vector<18x18x32xbf16> to vector<16x16x32xbf16>
    %25 = vector.shape_cast %24 : vector<16x16x32xbf16> to vector<256x32xbf16>
    %c0_13 = arith.constant 0 : index
    %c0_14 = arith.constant 0 : index
    %c0_15 = arith.constant 0 : index
    %c0_16 = arith.constant 0 : index
    %26 = vector.load %arg4[%c0_13, %c0_14, %c0_15, %c0_16] : memref<1x9x32x32xbf16, #tpu.memory_space<vmem>>, vector<1x1x32x32xbf16>
    %27 = vector.shape_cast %26 : vector<1x1x32x32xbf16> to vector<32x32xbf16>
    %cst_17 = arith.constant dense<0.000000e+00> : vector<256x32xf32>
    %28 = tpu.matmul %25, %27, %cst_17 {dimension_numbers = #tpu.dot_dimension_numbers<[1], [0], [0], [1], [0, 0, 1, 1], [], []>} : vector<256x32xbf16>, vector<32x32xbf16>, vector<256x32xf32> -> vector<256x32xf32>
    %29 = arith.addf %23, %28 : vector<256x32xf32>
    %30 = vector.extract_strided_slice %22 {offsets = [0, 1, 0], sizes = [16, 16, 32], strides = [1, 1, 1]} : vector<18x18x32xbf16> to vector<16x16x32xbf16>
    %31 = vector.shape_cast %30 : vector<16x16x32xbf16> to vector<256x32xbf16>
    %c0_18 = arith.constant 0 : index
    %c1 = arith.constant 1 : index
    %c0_19 = arith.constant 0 : index
    %c0_20 = arith.constant 0 : index
    %32 = vector.load %arg4[%c0_18, %c1, %c0_19, %c0_20] : memref<1x9x32x32xbf16, #tpu.memory_space<vmem>>, vector<1x1x32x32xbf16>
    %33 = vector.shape_cast %32 : vector<1x1x32x32xbf16> to vector<32x32xbf16>
    %cst_21 = arith.constant dense<0.000000e+00> : vector<256x32xf32>
    %34 = tpu.matmul %31, %33, %cst_21 {dimension_numbers = #tpu.dot_dimension_numbers<[1], [0], [0], [1], [0, 0, 1, 1], [], []>} : vector<256x32xbf16>, vector<32x32xbf16>, vector<256x32xf32> -> vector<256x32xf32>
    %35 = arith.addf %29, %34 : vector<256x32xf32>
    %36 = vector.extract_strided_slice %22 {offsets = [0, 2, 0], sizes = [16, 16, 32], strides = [1, 1, 1]} : vector<18x18x32xbf16> to vector<16x16x32xbf16>
    %37 = vector.shape_cast %36 : vector<16x16x32xbf16> to vector<256x32xbf16>
    %c0_22 = arith.constant 0 : index
    %c2 = arith.constant 2 : index
    %c0_23 = arith.constant 0 : index
    %c0_24 = arith.constant 0 : index
    %38 = vector.load %arg4[%c0_22, %c2, %c0_23, %c0_24] : memref<1x9x32x32xbf16, #tpu.memory_space<vmem>>, vector<1x1x32x32xbf16>
    %39 = vector.shape_cast %38 : vector<1x1x32x32xbf16> to vector<32x32xbf16>
    %cst_25 = arith.constant dense<0.000000e+00> : vector<256x32xf32>
    %40 = tpu.matmul %37, %39, %cst_25 {dimension_numbers = #tpu.dot_dimension_numbers<[1], [0], [0], [1], [0, 0, 1, 1], [], []>} : vector<256x32xbf16>, vector<32x32xbf16>, vector<256x32xf32> -> vector<256x32xf32>
    %41 = arith.addf %35, %40 : vector<256x32xf32>
    %42 = vector.extract_strided_slice %22 {offsets = [1, 0, 0], sizes = [16, 16, 32], strides = [1, 1, 1]} : vector<18x18x32xbf16> to vector<16x16x32xbf16>
    %43 = vector.shape_cast %42 : vector<16x16x32xbf16> to vector<256x32xbf16>
    %c0_26 = arith.constant 0 : index
    %c3 = arith.constant 3 : index
    %c0_27 = arith.constant 0 : index
    %c0_28 = arith.constant 0 : index
    %44 = vector.load %arg4[%c0_26, %c3, %c0_27, %c0_28] : memref<1x9x32x32xbf16, #tpu.memory_space<vmem>>, vector<1x1x32x32xbf16>
    %45 = vector.shape_cast %44 : vector<1x1x32x32xbf16> to vector<32x32xbf16>
    %cst_29 = arith.constant dense<0.000000e+00> : vector<256x32xf32>
    %46 = tpu.matmul %43, %45, %cst_29 {dimension_numbers = #tpu.dot_dimension_numbers<[1], [0], [0], [1], [0, 0, 1, 1], [], []>} : vector<256x32xbf16>, vector<32x32xbf16>, vector<256x32xf32> -> vector<256x32xf32>
    %47 = arith.addf %41, %46 : vector<256x32xf32>
    %48 = vector.extract_strided_slice %22 {offsets = [1, 1, 0], sizes = [16, 16, 32], strides = [1, 1, 1]} : vector<18x18x32xbf16> to vector<16x16x32xbf16>
    %49 = vector.shape_cast %48 : vector<16x16x32xbf16> to vector<256x32xbf16>
    %c0_30 = arith.constant 0 : index
    %c4 = arith.constant 4 : index
    %c0_31 = arith.constant 0 : index
    %c0_32 = arith.constant 0 : index
    %50 = vector.load %arg4[%c0_30, %c4, %c0_31, %c0_32] : memref<1x9x32x32xbf16, #tpu.memory_space<vmem>>, vector<1x1x32x32xbf16>
    %51 = vector.shape_cast %50 : vector<1x1x32x32xbf16> to vector<32x32xbf16>
    %cst_33 = arith.constant dense<0.000000e+00> : vector<256x32xf32>
    %52 = tpu.matmul %49, %51, %cst_33 {dimension_numbers = #tpu.dot_dimension_numbers<[1], [0], [0], [1], [0, 0, 1, 1], [], []>} : vector<256x32xbf16>, vector<32x32xbf16>, vector<256x32xf32> -> vector<256x32xf32>
    %53 = arith.addf %47, %52 : vector<256x32xf32>
    %54 = vector.extract_strided_slice %22 {offsets = [1, 2, 0], sizes = [16, 16, 32], strides = [1, 1, 1]} : vector<18x18x32xbf16> to vector<16x16x32xbf16>
    %55 = vector.shape_cast %54 : vector<16x16x32xbf16> to vector<256x32xbf16>
    %c0_34 = arith.constant 0 : index
    %c5 = arith.constant 5 : index
    %c0_35 = arith.constant 0 : index
    %c0_36 = arith.constant 0 : index
    %56 = vector.load %arg4[%c0_34, %c5, %c0_35, %c0_36] : memref<1x9x32x32xbf16, #tpu.memory_space<vmem>>, vector<1x1x32x32xbf16>
    %57 = vector.shape_cast %56 : vector<1x1x32x32xbf16> to vector<32x32xbf16>
    %cst_37 = arith.constant dense<0.000000e+00> : vector<256x32xf32>
    %58 = tpu.matmul %55, %57, %cst_37 {dimension_numbers = #tpu.dot_dimension_numbers<[1], [0], [0], [1], [0, 0, 1, 1], [], []>} : vector<256x32xbf16>, vector<32x32xbf16>, vector<256x32xf32> -> vector<256x32xf32>
    %59 = arith.addf %53, %58 : vector<256x32xf32>
    %60 = vector.extract_strided_slice %22 {offsets = [2, 0, 0], sizes = [16, 16, 32], strides = [1, 1, 1]} : vector<18x18x32xbf16> to vector<16x16x32xbf16>
    %61 = vector.shape_cast %60 : vector<16x16x32xbf16> to vector<256x32xbf16>
    %c0_38 = arith.constant 0 : index
    %c6 = arith.constant 6 : index
    %c0_39 = arith.constant 0 : index
    %c0_40 = arith.constant 0 : index
    %62 = vector.load %arg4[%c0_38, %c6, %c0_39, %c0_40] : memref<1x9x32x32xbf16, #tpu.memory_space<vmem>>, vector<1x1x32x32xbf16>
    %63 = vector.shape_cast %62 : vector<1x1x32x32xbf16> to vector<32x32xbf16>
    %cst_41 = arith.constant dense<0.000000e+00> : vector<256x32xf32>
    %64 = tpu.matmul %61, %63, %cst_41 {dimension_numbers = #tpu.dot_dimension_numbers<[1], [0], [0], [1], [0, 0, 1, 1], [], []>} : vector<256x32xbf16>, vector<32x32xbf16>, vector<256x32xf32> -> vector<256x32xf32>
    %65 = arith.addf %59, %64 : vector<256x32xf32>
    %66 = vector.extract_strided_slice %22 {offsets = [2, 1, 0], sizes = [16, 16, 32], strides = [1, 1, 1]} : vector<18x18x32xbf16> to vector<16x16x32xbf16>
    %67 = vector.shape_cast %66 : vector<16x16x32xbf16> to vector<256x32xbf16>
    %c0_42 = arith.constant 0 : index
    %c7 = arith.constant 7 : index
    %c0_43 = arith.constant 0 : index
    %c0_44 = arith.constant 0 : index
    %68 = vector.load %arg4[%c0_42, %c7, %c0_43, %c0_44] : memref<1x9x32x32xbf16, #tpu.memory_space<vmem>>, vector<1x1x32x32xbf16>
    %69 = vector.shape_cast %68 : vector<1x1x32x32xbf16> to vector<32x32xbf16>
    %cst_45 = arith.constant dense<0.000000e+00> : vector<256x32xf32>
    %70 = tpu.matmul %67, %69, %cst_45 {dimension_numbers = #tpu.dot_dimension_numbers<[1], [0], [0], [1], [0, 0, 1, 1], [], []>} : vector<256x32xbf16>, vector<32x32xbf16>, vector<256x32xf32> -> vector<256x32xf32>
    %71 = arith.addf %65, %70 : vector<256x32xf32>
    %72 = vector.extract_strided_slice %22 {offsets = [2, 2, 0], sizes = [16, 16, 32], strides = [1, 1, 1]} : vector<18x18x32xbf16> to vector<16x16x32xbf16>
    %73 = vector.shape_cast %72 : vector<16x16x32xbf16> to vector<256x32xbf16>
    %c0_46 = arith.constant 0 : index
    %c8 = arith.constant 8 : index
    %c0_47 = arith.constant 0 : index
    %c0_48 = arith.constant 0 : index
    %74 = vector.load %arg4[%c0_46, %c8, %c0_47, %c0_48] : memref<1x9x32x32xbf16, #tpu.memory_space<vmem>>, vector<1x1x32x32xbf16>
    %75 = vector.shape_cast %74 : vector<1x1x32x32xbf16> to vector<32x32xbf16>
    %cst_49 = arith.constant dense<0.000000e+00> : vector<256x32xf32>
    %76 = tpu.matmul %73, %75, %cst_49 {dimension_numbers = #tpu.dot_dimension_numbers<[1], [0], [0], [1], [0, 0, 1, 1], [], []>} : vector<256x32xbf16>, vector<32x32xbf16>, vector<256x32xf32> -> vector<256x32xf32>
    %77 = arith.addf %71, %76 : vector<256x32xf32>
    %c0_50 = arith.constant 0 : index
    %c0_51 = arith.constant 0 : index
    %78 = vector.load %arg9[%c0_50, %c0_51] : memref<256x32xf32, #tpu.memory_space<vmem>>, vector<256x32xf32>
    tpu.vector_store %arg9[%c0_50, %c0_51], %77 {strides = array<i32>} : memref<256x32xf32, #tpu.memory_space<vmem>>, vector<256x32xf32>,
    %c2_i32 = arith.constant 2 : i32
    %79 = arith.cmpi eq, %arg2, %c2_i32 : i32
    %80 = arith.extui %79 : i1 to i32
    %c0_i32_52 = arith.constant 0 : i32
    %81 = arith.cmpi ne, %80, %c0_i32_52 : i32
    scf.if %81 {
      %c0_53 = arith.constant 0 : index
      %c0_54 = arith.constant 0 : index
      %82 = vector.load %arg5[%c0_53, %c0_54] : memref<1x32xf32, #tpu.memory_space<vmem>>, vector<1x32xf32>
      %83 = vector.broadcast %82 : vector<1x32xf32> to vector<256x32xf32>
      %84 = arith.addf %77, %83 : vector<256x32xf32>
      %85 = arith.truncf %84 : vector<256x32xf32> to vector<256x32xbf16>
      %c0_55 = arith.constant 0 : index
      %c0_56 = arith.constant 0 : index
      %c0_57 = arith.constant 0 : index
      %86 = vector.load %arg8[%c0_55, %c0_56, %c0_57] : memref<1x256x32xbf16, #tpu.memory_space<vmem>>, vector<1x256x32xbf16>
      %87 = vector.shape_cast %86 : vector<1x256x32xbf16> to vector<256x32xbf16>
      %88 = vector.shape_cast %85 : vector<256x32xbf16> to vector<1x256x32xbf16>
      tpu.vector_store %arg8[%c0_55, %c0_56, %c0_57], %88 {strides = array<i32>} : memref<1x256x32xbf16, #tpu.memory_space<vmem>>, vector<1x256x32xbf16>,
    } else {
    }
    return
  }
  func.func @transform_0(%arg0: i32, %arg1: i32, %arg2: i32) -> (i32, i32, i32, i32) {
    %c6_i32 = arith.constant 6 : i32
    %0 = arith.muli %arg0, %c6_i32 : i32
    %1 = arith.addi %0, %arg1 : i32
    %2 = arith.addi %1, %arg2 : i32
    %c0_i32 = arith.constant 0 : i32
    %3 = arith.addi %2, %c0_i32 : i32
    %c0_i32_0 = arith.constant 0 : i32
    %c0_i32_1 = arith.constant 0 : i32
    %c0_i32_2 = arith.constant 0 : i32
    %c0_i32_3 = arith.constant 0 : i32
    return %3, %c0_i32_0, %c0_i32_1, %c0_i32_2 : i32, i32, i32, i32
  }
  func.func @transform_1(%arg0: i32, %arg1: i32, %arg2: i32) -> (i32, i32, i32, i32) {
    %c0_i32 = arith.constant 0 : i32
    %c0_i32_0 = arith.constant 0 : i32
    %c0_i32_1 = arith.constant 0 : i32
    %c0_i32_2 = arith.constant 0 : i32
    return %arg2, %c0_i32, %c0_i32_0, %c0_i32_1 : i32, i32, i32, i32
  }
  func.func @transform_2(%arg0: i32, %arg1: i32, %arg2: i32) -> (i32, i32) {
    %c0_i32 = arith.constant 0 : i32
    %c0_i32_0 = arith.constant 0 : i32
    %c0_i32_1 = arith.constant 0 : i32
    return %c0_i32, %c0_i32_0 : i32, i32
  }
  func.func @transform_3(%arg0: i32, %arg1: i32, %arg2: i32) -> (i32, i32, i32) {
    %c0_i32 = arith.constant 0 : i32
    %c0_i32_0 = arith.constant 0 : i32
    %c0_i32_1 = arith.constant 0 : i32
    return %arg0, %c0_i32, %c0_i32_0 : i32, i32, i32
  }
  func.func @transform_4(%arg0: i32, %arg1: i32, %arg2: i32) -> (i32, i32, i32) {
    %c0_i32 = arith.constant 0 : i32
    %c0_i32_0 = arith.constant 0 : i32
    %c0_i32_1 = arith.constant 0 : i32
    return %arg0, %c0_i32, %c0_i32_0 : i32, i32, i32
  }
  func.func @transform_5(%arg0: i32, %arg1: i32, %arg2: i32) -> (i32, i32, i32) {
    %c4_i32 = arith.constant 4 : i32
    %0 = arith.muli %arg0, %c4_i32 : i32
    %1 = arith.addi %0, %arg1 : i32
    %c0_i32 = arith.constant 0 : i32
    %c0_i32_0 = arith.constant 0 : i32
    %c0_i32_1 = arith.constant 0 : i32
    return %1, %c0_i32, %c0_i32_0 : i32, i32, i32
  }
}

module attributes {stable_mosaic.version = 11 : i64} {
  func.func @_conv_plane_kernel(%arg0: i32, %arg1: i32, %arg2: i32, %arg3: memref<1x18x18x32xbf16, #tpu.memory_space<vmem>>, %arg4: memref<1x9x32x3xbf16, #tpu.memory_space<vmem>>, %arg5: memref<1x3xf32, #tpu.memory_space<vmem>>, %arg6: memref<1x256x3xbf16, #tpu.memory_space<vmem>>, %arg7: memref<256x3xf32, #tpu.memory_space<vmem>>) attributes {dimension_semantics = [#tpu.dimension_semantics<parallel>, #tpu.dimension_semantics<parallel>, #tpu.dimension_semantics<arbitrary>], iteration_bounds = array<i64: 2, 4, 3>, scalar_prefetch = 0 : i64, scratch_operands = 1 : i64, tpu.core_type = #tpu.core_type<tc>, window_params = [{transform_indices = @transform_0, window_bounds = array<i64: 1, 18, 18, 32>}, {transform_indices = @transform_1, window_bounds = array<i64: 1, 9, 32, 3>}, {pipeline_mode = #tpu.pipeline_mode<synchronous>, transform_indices = @transform_2, window_bounds = array<i64: 1, 3>}, {transform_indices = @transform_3, window_bounds = array<i64: 1, 256, 3>}]} {
    %c0_i32 = arith.constant 0 : i32
    %0 = arith.cmpi eq, %arg2, %c0_i32 : i32
    %1 = arith.extui %0 : i1 to i32
    %c0_i32_0 = arith.constant 0 : i32
    %2 = arith.cmpi ne, %1, %c0_i32_0 : i32
    scf.if %2 {
      %cst_45 = arith.constant 0.000000e+00 : f32
      %64 = vector.broadcast %cst_45 : f32 to vector<256x3xf32>
      %c0_46 = arith.constant 0 : index
      %c0_47 = arith.constant 0 : index
      %65 = vector.load %arg7[%c0_46, %c0_47] : memref<256x3xf32, #tpu.memory_space<vmem>>, vector<256x3xf32>
      tpu.vector_store %arg7[%c0_46, %c0_47], %64 {strides = array<i32>} : memref<256x3xf32, #tpu.memory_space<vmem>>, vector<256x3xf32>,
    } else {
    }
    %c0 = arith.constant 0 : index
    %c0_1 = arith.constant 0 : index
    %c0_2 = arith.constant 0 : index
    %c0_3 = arith.constant 0 : index
    %3 = vector.load %arg3[%c0, %c0_1, %c0_2, %c0_3] : memref<1x18x18x32xbf16, #tpu.memory_space<vmem>>, vector<1x18x18x32xbf16>
    %4 = vector.shape_cast %3 : vector<1x18x18x32xbf16> to vector<18x18x32xbf16>
    %c0_4 = arith.constant 0 : index
    %c0_5 = arith.constant 0 : index
    %5 = vector.load %arg7[%c0_4, %c0_5] : memref<256x3xf32, #tpu.memory_space<vmem>>, vector<256x3xf32>
    %6 = vector.extract_strided_slice %4 {offsets = [0, 0, 0], sizes = [16, 16, 32], strides = [1, 1, 1]} : vector<18x18x32xbf16> to vector<16x16x32xbf16>
    %7 = vector.shape_cast %6 : vector<16x16x32xbf16> to vector<256x32xbf16>
    %c0_6 = arith.constant 0 : index
    %c0_7 = arith.constant 0 : index
    %c0_8 = arith.constant 0 : index
    %c0_9 = arith.constant 0 : index
    %8 = vector.load %arg4[%c0_6, %c0_7, %c0_8, %c0_9] : memref<1x9x32x3xbf16, #tpu.memory_space<vmem>>, vector<1x1x32x3xbf16>
    %9 = vector.shape_cast %8 : vector<1x1x32x3xbf16> to vector<32x3xbf16>
    %cst = arith.constant dense<0.000000e+00> : vector<256x3xf32>
    %10 = tpu.matmul %7, %9, %cst {dimension_numbers = #tpu.dot_dimension_numbers<[1], [0], [0], [1], [0, 0, 1, 1], [], []>} : vector<256x32xbf16>, vector<32x3xbf16>, vector<256x3xf32> -> vector<256x3xf32>
    %11 = arith.addf %5, %10 : vector<256x3xf32>
    %12 = vector.extract_strided_slice %4 {offsets = [0, 1, 0], sizes = [16, 16, 32], strides = [1, 1, 1]} : vector<18x18x32xbf16> to vector<16x16x32xbf16>
    %13 = vector.shape_cast %12 : vector<16x16x32xbf16> to vector<256x32xbf16>
    %c0_10 = arith.constant 0 : index
    %c1 = arith.constant 1 : index
    %c0_11 = arith.constant 0 : index
    %c0_12 = arith.constant 0 : index
    %14 = vector.load %arg4[%c0_10, %c1, %c0_11, %c0_12] : memref<1x9x32x3xbf16, #tpu.memory_space<vmem>>, vector<1x1x32x3xbf16>
    %15 = vector.shape_cast %14 : vector<1x1x32x3xbf16> to vector<32x3xbf16>
    %cst_13 = arith.constant dense<0.000000e+00> : vector<256x3xf32>
    %16 = tpu.matmul %13, %15, %cst_13 {dimension_numbers = #tpu.dot_dimension_numbers<[1], [0], [0], [1], [0, 0, 1, 1], [], []>} : vector<256x32xbf16>, vector<32x3xbf16>, vector<256x3xf32> -> vector<256x3xf32>
    %17 = arith.addf %11, %16 : vector<256x3xf32>
    %18 = vector.extract_strided_slice %4 {offsets = [0, 2, 0], sizes = [16, 16, 32], strides = [1, 1, 1]} : vector<18x18x32xbf16> to vector<16x16x32xbf16>
    %19 = vector.shape_cast %18 : vector<16x16x32xbf16> to vector<256x32xbf16>
    %c0_14 = arith.constant 0 : index
    %c2 = arith.constant 2 : index
    %c0_15 = arith.constant 0 : index
    %c0_16 = arith.constant 0 : index
    %20 = vector.load %arg4[%c0_14, %c2, %c0_15, %c0_16] : memref<1x9x32x3xbf16, #tpu.memory_space<vmem>>, vector<1x1x32x3xbf16>
    %21 = vector.shape_cast %20 : vector<1x1x32x3xbf16> to vector<32x3xbf16>
    %cst_17 = arith.constant dense<0.000000e+00> : vector<256x3xf32>
    %22 = tpu.matmul %19, %21, %cst_17 {dimension_numbers = #tpu.dot_dimension_numbers<[1], [0], [0], [1], [0, 0, 1, 1], [], []>} : vector<256x32xbf16>, vector<32x3xbf16>, vector<256x3xf32> -> vector<256x3xf32>
    %23 = arith.addf %17, %22 : vector<256x3xf32>
    %24 = vector.extract_strided_slice %4 {offsets = [1, 0, 0], sizes = [16, 16, 32], strides = [1, 1, 1]} : vector<18x18x32xbf16> to vector<16x16x32xbf16>
    %25 = vector.shape_cast %24 : vector<16x16x32xbf16> to vector<256x32xbf16>
    %c0_18 = arith.constant 0 : index
    %c3 = arith.constant 3 : index
    %c0_19 = arith.constant 0 : index
    %c0_20 = arith.constant 0 : index
    %26 = vector.load %arg4[%c0_18, %c3, %c0_19, %c0_20] : memref<1x9x32x3xbf16, #tpu.memory_space<vmem>>, vector<1x1x32x3xbf16>
    %27 = vector.shape_cast %26 : vector<1x1x32x3xbf16> to vector<32x3xbf16>
    %cst_21 = arith.constant dense<0.000000e+00> : vector<256x3xf32>
    %28 = tpu.matmul %25, %27, %cst_21 {dimension_numbers = #tpu.dot_dimension_numbers<[1], [0], [0], [1], [0, 0, 1, 1], [], []>} : vector<256x32xbf16>, vector<32x3xbf16>, vector<256x3xf32> -> vector<256x3xf32>
    %29 = arith.addf %23, %28 : vector<256x3xf32>
    %30 = vector.extract_strided_slice %4 {offsets = [1, 1, 0], sizes = [16, 16, 32], strides = [1, 1, 1]} : vector<18x18x32xbf16> to vector<16x16x32xbf16>
    %31 = vector.shape_cast %30 : vector<16x16x32xbf16> to vector<256x32xbf16>
    %c0_22 = arith.constant 0 : index
    %c4 = arith.constant 4 : index
    %c0_23 = arith.constant 0 : index
    %c0_24 = arith.constant 0 : index
    %32 = vector.load %arg4[%c0_22, %c4, %c0_23, %c0_24] : memref<1x9x32x3xbf16, #tpu.memory_space<vmem>>, vector<1x1x32x3xbf16>
    %33 = vector.shape_cast %32 : vector<1x1x32x3xbf16> to vector<32x3xbf16>
    %cst_25 = arith.constant dense<0.000000e+00> : vector<256x3xf32>
    %34 = tpu.matmul %31, %33, %cst_25 {dimension_numbers = #tpu.dot_dimension_numbers<[1], [0], [0], [1], [0, 0, 1, 1], [], []>} : vector<256x32xbf16>, vector<32x3xbf16>, vector<256x3xf32> -> vector<256x3xf32>
    %35 = arith.addf %29, %34 : vector<256x3xf32>
    %36 = vector.extract_strided_slice %4 {offsets = [1, 2, 0], sizes = [16, 16, 32], strides = [1, 1, 1]} : vector<18x18x32xbf16> to vector<16x16x32xbf16>
    %37 = vector.shape_cast %36 : vector<16x16x32xbf16> to vector<256x32xbf16>
    %c0_26 = arith.constant 0 : index
    %c5 = arith.constant 5 : index
    %c0_27 = arith.constant 0 : index
    %c0_28 = arith.constant 0 : index
    %38 = vector.load %arg4[%c0_26, %c5, %c0_27, %c0_28] : memref<1x9x32x3xbf16, #tpu.memory_space<vmem>>, vector<1x1x32x3xbf16>
    %39 = vector.shape_cast %38 : vector<1x1x32x3xbf16> to vector<32x3xbf16>
    %cst_29 = arith.constant dense<0.000000e+00> : vector<256x3xf32>
    %40 = tpu.matmul %37, %39, %cst_29 {dimension_numbers = #tpu.dot_dimension_numbers<[1], [0], [0], [1], [0, 0, 1, 1], [], []>} : vector<256x32xbf16>, vector<32x3xbf16>, vector<256x3xf32> -> vector<256x3xf32>
    %41 = arith.addf %35, %40 : vector<256x3xf32>
    %42 = vector.extract_strided_slice %4 {offsets = [2, 0, 0], sizes = [16, 16, 32], strides = [1, 1, 1]} : vector<18x18x32xbf16> to vector<16x16x32xbf16>
    %43 = vector.shape_cast %42 : vector<16x16x32xbf16> to vector<256x32xbf16>
    %c0_30 = arith.constant 0 : index
    %c6 = arith.constant 6 : index
    %c0_31 = arith.constant 0 : index
    %c0_32 = arith.constant 0 : index
    %44 = vector.load %arg4[%c0_30, %c6, %c0_31, %c0_32] : memref<1x9x32x3xbf16, #tpu.memory_space<vmem>>, vector<1x1x32x3xbf16>
    %45 = vector.shape_cast %44 : vector<1x1x32x3xbf16> to vector<32x3xbf16>
    %cst_33 = arith.constant dense<0.000000e+00> : vector<256x3xf32>
    %46 = tpu.matmul %43, %45, %cst_33 {dimension_numbers = #tpu.dot_dimension_numbers<[1], [0], [0], [1], [0, 0, 1, 1], [], []>} : vector<256x32xbf16>, vector<32x3xbf16>, vector<256x3xf32> -> vector<256x3xf32>
    %47 = arith.addf %41, %46 : vector<256x3xf32>
    %48 = vector.extract_strided_slice %4 {offsets = [2, 1, 0], sizes = [16, 16, 32], strides = [1, 1, 1]} : vector<18x18x32xbf16> to vector<16x16x32xbf16>
    %49 = vector.shape_cast %48 : vector<16x16x32xbf16> to vector<256x32xbf16>
    %c0_34 = arith.constant 0 : index
    %c7 = arith.constant 7 : index
    %c0_35 = arith.constant 0 : index
    %c0_36 = arith.constant 0 : index
    %50 = vector.load %arg4[%c0_34, %c7, %c0_35, %c0_36] : memref<1x9x32x3xbf16, #tpu.memory_space<vmem>>, vector<1x1x32x3xbf16>
    %51 = vector.shape_cast %50 : vector<1x1x32x3xbf16> to vector<32x3xbf16>
    %cst_37 = arith.constant dense<0.000000e+00> : vector<256x3xf32>
    %52 = tpu.matmul %49, %51, %cst_37 {dimension_numbers = #tpu.dot_dimension_numbers<[1], [0], [0], [1], [0, 0, 1, 1], [], []>} : vector<256x32xbf16>, vector<32x3xbf16>, vector<256x3xf32> -> vector<256x3xf32>
    %53 = arith.addf %47, %52 : vector<256x3xf32>
    %54 = vector.extract_strided_slice %4 {offsets = [2, 2, 0], sizes = [16, 16, 32], strides = [1, 1, 1]} : vector<18x18x32xbf16> to vector<16x16x32xbf16>
    %55 = vector.shape_cast %54 : vector<16x16x32xbf16> to vector<256x32xbf16>
    %c0_38 = arith.constant 0 : index
    %c8 = arith.constant 8 : index
    %c0_39 = arith.constant 0 : index
    %c0_40 = arith.constant 0 : index
    %56 = vector.load %arg4[%c0_38, %c8, %c0_39, %c0_40] : memref<1x9x32x3xbf16, #tpu.memory_space<vmem>>, vector<1x1x32x3xbf16>
    %57 = vector.shape_cast %56 : vector<1x1x32x3xbf16> to vector<32x3xbf16>
    %cst_41 = arith.constant dense<0.000000e+00> : vector<256x3xf32>
    %58 = tpu.matmul %55, %57, %cst_41 {dimension_numbers = #tpu.dot_dimension_numbers<[1], [0], [0], [1], [0, 0, 1, 1], [], []>} : vector<256x32xbf16>, vector<32x3xbf16>, vector<256x3xf32> -> vector<256x3xf32>
    %59 = arith.addf %53, %58 : vector<256x3xf32>
    %c0_42 = arith.constant 0 : index
    %c0_43 = arith.constant 0 : index
    %60 = vector.load %arg7[%c0_42, %c0_43] : memref<256x3xf32, #tpu.memory_space<vmem>>, vector<256x3xf32>
    tpu.vector_store %arg7[%c0_42, %c0_43], %59 {strides = array<i32>} : memref<256x3xf32, #tpu.memory_space<vmem>>, vector<256x3xf32>,
    %c2_i32 = arith.constant 2 : i32
    %61 = arith.cmpi eq, %arg2, %c2_i32 : i32
    %62 = arith.extui %61 : i1 to i32
    %c0_i32_44 = arith.constant 0 : i32
    %63 = arith.cmpi ne, %62, %c0_i32_44 : i32
    scf.if %63 {
      %c0_45 = arith.constant 0 : index
      %c0_46 = arith.constant 0 : index
      %64 = vector.load %arg5[%c0_45, %c0_46] : memref<1x3xf32, #tpu.memory_space<vmem>>, vector<1x3xf32>
      %65 = vector.broadcast %64 : vector<1x3xf32> to vector<256x3xf32>
      %66 = arith.addf %59, %65 : vector<256x3xf32>
      %67 = arith.truncf %66 : vector<256x3xf32> to vector<256x3xbf16>
      %c0_47 = arith.constant 0 : index
      %c0_48 = arith.constant 0 : index
      %c0_49 = arith.constant 0 : index
      %68 = vector.load %arg6[%c0_47, %c0_48, %c0_49] : memref<1x256x3xbf16, #tpu.memory_space<vmem>>, vector<1x256x3xbf16>
      %69 = vector.shape_cast %68 : vector<1x256x3xbf16> to vector<256x3xbf16>
      %70 = vector.shape_cast %67 : vector<256x3xbf16> to vector<1x256x3xbf16>
      tpu.vector_store %arg6[%c0_47, %c0_48, %c0_49], %70 {strides = array<i32>} : memref<1x256x3xbf16, #tpu.memory_space<vmem>>, vector<1x256x3xbf16>,
    } else {
    }
    return
  }
  func.func @transform_0(%arg0: i32, %arg1: i32, %arg2: i32) -> (i32, i32, i32, i32) {
    %c6_i32 = arith.constant 6 : i32
    %0 = arith.muli %arg0, %c6_i32 : i32
    %1 = arith.addi %0, %arg1 : i32
    %2 = arith.addi %1, %arg2 : i32
    %c0_i32 = arith.constant 0 : i32
    %3 = arith.addi %2, %c0_i32 : i32
    %c0_i32_0 = arith.constant 0 : i32
    %c0_i32_1 = arith.constant 0 : i32
    %c0_i32_2 = arith.constant 0 : i32
    %c0_i32_3 = arith.constant 0 : i32
    return %3, %c0_i32_0, %c0_i32_1, %c0_i32_2 : i32, i32, i32, i32
  }
  func.func @transform_1(%arg0: i32, %arg1: i32, %arg2: i32) -> (i32, i32, i32, i32) {
    %c0_i32 = arith.constant 0 : i32
    %c0_i32_0 = arith.constant 0 : i32
    %c0_i32_1 = arith.constant 0 : i32
    %c0_i32_2 = arith.constant 0 : i32
    return %arg2, %c0_i32, %c0_i32_0, %c0_i32_1 : i32, i32, i32, i32
  }
  func.func @transform_2(%arg0: i32, %arg1: i32, %arg2: i32) -> (i32, i32) {
    %c0_i32 = arith.constant 0 : i32
    %c0_i32_0 = arith.constant 0 : i32
    %c0_i32_1 = arith.constant 0 : i32
    return %c0_i32, %c0_i32_0 : i32, i32
  }
  func.func @transform_3(%arg0: i32, %arg1: i32, %arg2: i32) -> (i32, i32, i32) {
    %c4_i32 = arith.constant 4 : i32
    %0 = arith.muli %arg0, %c4_i32 : i32
    %1 = arith.addi %0, %arg1 : i32
    %c0_i32 = arith.constant 0 : i32
    %c0_i32_0 = arith.constant 0 : i32
    %c0_i32_1 = arith.constant 0 : i32
    return %1, %c0_i32, %c0_i32_0 : i32, i32, i32
  }
}

</mosaic_0001>

<bundles_post_ra>
// kernel: _lambda_.16
= control target key start
LH: loop header
LB: loop body
LE: loop exit
PB: predicated region body
PF: predicated region fallthrough
CT: control target
= control target key end

     0   :  { %s1333_s12 = smov 0   ;;  %s1335_s13 = smov 0   ;;  %s1626_s0 = inlined_call_operand.vmem [shape: bf16[14,10,10,8], index: 0, kind: input, shape index: {}]   ;;  %s1627_s1 = inlined_call_operand.vmem [shape: bf16[4,4,8,32], index: 1, kind: input, shape index: {}]   ;;  %s1628_s2 = inlined_call_operand.vmem [shape: f32[1,32], index: 2, kind: input, shape index: {}]   ;;  %s1629_s3 = inlined_call_operand.vmem [shape: bf16[8,64,32], index: 3, kind: output, shape index: {}]  }
   0x1   :  { %s1337_s14 = smov 0   ;;  %s1339_s15 = smov 0  }
   0x2   :  { %s1341_s16 = smov 0   ;;  %s1343_s17 = smov 0  }
   0x3   :  { %s1345_s18 = smov 0  }
   0x4 LB: > { %s25_s19 = sadd.s32 1, %s1298_s15  ;;  %s28_s20 = sadd.s32 1, %s1302_s16  ;;  %s1310_s18 = sphi %s1345_s18, %s13_s18   ;;  %s1306_s17 = sphi %s1343_s17, %s1639_s17   ;;  %s1302_s16 = sphi %s1341_s16, %s1638_s16   ;;  %s1298_s15 = sphi %s1339_s15, %s1637_s15   ;;  %s1294_s14 = sphi %s1337_s14, %s1636_s14   ;;  %s1290_s13 = sphi %s1335_s13, %s1635_s13   ;;  %s1286_s12 = sphi %s1333_s12, %s1634_s12  }
   0x5   : > { %p26_p0 = scmp.ge.s32.totalorder %s25_s19, 4  ;;  %p1028_p1 = scmp.ge.s32.totalorder %s1310_s18, 1 }
   0x6   : > { %p182_p2 = scmp.lt.s32.totalorder %s1310_s18, 33  ;;  %s32_s21 = sadd.s32 1, %s1306_s17 }
   0x7   : > { %s1641_s19 = smov (%p26_p0, %s25_s19), 0  ;;  %s1643_s20 = smov (!%p26_p0, %s28_s20), %s1302_s16 }
   0x8   : > { %p183_p3 = pnand %p1028_p1, %p182_p2  ;;  %p30_p4 = scmp.ge.s32.totalorder %s1643_s20, 4 }
   0x9   : > { %s216_s22 = smul.u32 (!%p183_p3), 7, %s1294_s14  ;;  %p227_p6 = scmp.lt.s32.totalorder (!%p183_p3), %s1286_s12, 3 }
   0xa   : > { %s1645_s20 = smov (%p30_p4, %s1643_s20), 0  ;;  %s1647_s21 = smov (!%p30_p4, %s32_s21), %s1306_s17 }
   0xb   : > { %p34_p5 = scmp.ge.s32.totalorder %s1647_s21, 2  ;;  %186 = sbr.rel (%p183_p3) target bundleno = 302 (0x12e), region = 32 }
   0xc   : > { %s1032_s23 = sshll.u32 (!%p183_p3), %s1294_s14, 2  ;;  %s217_s24 = sadd.s32 (!%p183_p3), %s1290_s13, %s216_s22 }
   0xd   : > { %s1649_s21 = smov (%p34_p5, %s1647_s21), 0  ;;  %s233_s25 = sadd.s32 (!%p183_p3), %s1290_s13, %s1032_s23 }
   0xe   : > { %s218_s26 = sadd.s32 (!%p183_p3), %s1286_s12, %s217_s24  ;;  %p234_p8 = scmp.lt.s32.totalorder (!%p183_p3), %s233_s25, 7 }
   0xf   : > { %p219_p7 = scmp.lt.s32.totalorder (!%p183_p3), %s218_s26, 13  ;;  %p1035_p9 = scmp.ne.s32.totalorder (!%p183_p3), %s1286_s12, 0 }
  0x12   : > { %s228_s27 = scalar_select %p227_p6, %s1286_s12, 3 }
  0x13   : > { %s1651_s26 = smov (!%p219_p7, %s218_s26), 13  ;;  %s1653_s25 = smov (!%p234_p8, %s233_s25), 7 }
  0x14   : > { %s1092_s28 = sshll.u32 %s228_s27, 4  ;;  %s1198_s29 = smul.u32 80, %s1651_s26  ;;  %vm246_vm0 = vcmask (!%p1035_p9), 261120   ;;  %v1312_v0 = vmov (!%p1035_p9), 0.0  }
  0x15   : > { %s1383_s5 = scalar_lea.vmem %s1627_s1, %s1092_s28  ;;  %s1093_s9 = sshll.u32 %s1653_s25, 5  ;;  %247 = vst.msk [vmem:[#allocation2] sm:$0xff] (!%p1035_p9), %vm246_vm0, %v1312_v0  ;;  %248 = vst.msk [vmem:[#allocation2 + $0x8] sm:$0xff] (!%p1035_p9), %vm246_vm0, %v1312_v0 }
  0x16   : > { %s1388_s8 = scalar_lea.vmem %s1626_s0, %s1198_s29  ;;  %s1393_s13 = scalar_lea.vmem %s1629_s3, %s1093_s9  ;;  %249 = vst.msk [vmem:[#allocation2 + $0x10] sm:$0xff] (!%p1035_p9), %vm246_vm0, %v1312_v0  ;;  %250 = vst.msk [vmem:[#allocation2 + $0x18] sm:$0xff] (!%p1035_p9), %vm246_vm0, %v1312_v0 }
  0x17   : > { %245 = sbr.rel (%p1035_p9) target bundleno = 30 (0x1e), region = 36  ;;  %251 = vst.msk [vmem:[#allocation2 + $0x20] sm:$0xff] (!%p1035_p9), %vm246_vm0, %v1312_v0  ;;  %252 = vst.msk [vmem:[#allocation2 + $0x28] sm:$0xff] (!%p1035_p9), %vm246_vm0, %v1312_v0 }
  0x18   : > { %253 = vst.msk [vmem:[#allocation2 + $0x30] sm:$0xff] (!%p1035_p9), %vm246_vm0, %v1312_v0  ;;  %254 = vst.msk [vmem:[#allocation2 + $0x38] sm:$0xff] (!%p1035_p9), %vm246_vm0, %v1312_v0 }
  0x1e PF: > { %v396_v1 = vld [vmem:[%s1383_s5] sm:$0xf]  ;;  %vm422_vm1 = vcmask 1043456   ;;  %v1061_v2 = vld [vmem:[%s1383_s5 + $0x8] sm:$0xf]  ;;  %vm409_vm4 = vcmask 64512  }
  0x1f   : > { %1194 = vmatprep.subr.msk.bf16.mxu1 %vm422_vm1, %v396_v1  ;;  %v424_v3 = vsel %vm422_vm1, %v396_v1, 0  ;;  %1196 = vmatprep.subr.msk.bf16.mxu0 %vm422_vm1, %v1061_v2  ;;  %v686_v4 = vsel %vm422_vm1, %v1061_v2, 0  ;;  %v1403_v5 = vld [vmem:[%s1388_s8 + $0x8] sm:$0xf]  ;;  %v1406_v6 = vld [vmem:[%s1388_s8 + $0xc] sm:$0x1] }
  0x20   : > { %1123 = vmatpush3.bf16.msra.mxu1 %v424_v3  ;;  %1143 = vmatpush3.bf16.msra.mxu0 %v686_v4  ;;  %v1409_v7 = vld [vmem:[%s1388_s8 + $0x10] sm:$0xf]  ;;  %v1412_v8 = vld [vmem:[%s1388_s8 + $0x14] sm:$0x1]  ;;  %vm281_vm2 = vsmask.f32 3328 }
  0x21   : > { %vm282_vm3 = vsmask.f32 7440  ;;  %v285_v9 = vshrl.u32 %v1403_v5, 16  ;;  %v288_v10 = vshll.u32 %v1403_v5, 16  ;;  %v294_v11 = vshll.u32 %v1406_v6, 16  ;;  %p1080_p10 = scmp.ne.s32.totalorder %s1286_s12, 3 }
  0x22   : > { %v299_v12 = vshrl.u32 %v1409_v7, 16  ;;  %v302_v13 = vshll.u32 %v1409_v7, 16  ;;  %v308_v14 = vshll.u32 %v1412_v8, 16  ;;  %v1052_v15 = vld [vmem:[%s1383_s5 + $0x4] sm:$0xf]  ;;  %v520_v19 = vrot.slane %v1406_v6, 5  ;;  %vm1441_vm5 = vmor %vm281_vm2, %vm282_vm3 }
  0x23   : > { %v287_v16 = vrot.slane %v285_v9, 4  ;;  %v290_v17 = vrot.slane %v288_v10, 5  ;;  %v296_v18 = vrot.slane %v294_v11, 5  ;;  %1195 = vmatprep.subr.msk.bf16.mxu1 %vm422_vm1, %v1052_v15  ;;  %v1424_v20 = vld [vmem:[%s1388_s8 + $0x18] sm:$0xf]  ;;  %v524_v41 = vrot.slane %v1412_v8, 5 }
  0x24   : > { %v301_v21 = vrot.slane %v299_v12, 4  ;;  %v304_v22 = vrot.slane %v302_v13, 5  ;;  %v310_v23 = vrot.slane %v308_v14, 5  ;;  %v1427_v24 = vld [vmem:[%s1388_s8 + $0x1c] sm:$0x1]  ;;  %v313_v25 = vshrl.u32 %v1424_v20, 16 }
  0x25   : > { %v291_v26 = vor.u32 %v290_v17, %v287_v16  ;;  %v1431_v27 = vld [vmem:[%s1388_s8 + $0x20] sm:$0xf]  ;;  %v1434_v28 = vld [vmem:[%s1388_s8 + $0x24] sm:$0x1]  ;;  %v1437_v29 = vld [vmem:[%s1388_s8 + $0x28] sm:$0xf] }
  0x26   : > { %v305_v31 = vor.u32 %v304_v22, %v301_v21  ;;  %v315_v32 = vrot.slane %v313_v25, 4  ;;  %v316_v33 = vshll.u32 %v1424_v20, 16  ;;  %v322_v34 = vshll.u32 %v1427_v24, 16  ;;  %v1071_v39 = vld [vmem:[%s1383_s5 + $0xc] sm:$0xf] }
  0x27   : > { %v292_v35 = vrot.slane %v291_v26, 4  ;;  %v327_v36 = vshrl.u32 %v1431_v27, 16  ;;  %v330_v37 = vshll.u32 %v1431_v27, 16  ;;  %v336_v38 = vshll.u32 %v1434_v28, 16  ;;  %v1453_v42 = vld [vmem:[%s1388_s8 + $0x2c] sm:$0x1]  ;;  %1197 = vmatprep.subr.msk.bf16.mxu0 %vm422_vm1, %v1071_v39 }
  0x28   : > { %v306_v40 = vrot.slane %v305_v31, 4  ;;  %v318_v43 = vrot.slane %v316_v33, 5  ;;  %v341_v44 = vshrl.u32 %v1437_v29, 16  ;;  %v324_v46 = vrot.slane %v322_v34, 5  ;;  %v1464_v57 = vld [vmem:[%s1388_s8 + $0x30] sm:$0xf] }
  0x29   : > { %v297_v45 = vsel %vm1441_vm5, %v292_v35, %v296_v18  ;;  %v329_v47 = vrot.slane %v327_v36, 4  ;;  %v332_v48 = vrot.slane %v330_v37, 5  ;;  %v344_v52 = vshll.u32 %v1437_v29, 16  ;;  %v1467_v58 = vld [vmem:[%s1388_s8 + $0x34] sm:$0x1] }
  0x2a   : > { %v311_v49 = vsel %vm1441_vm5, %v306_v40, %v310_v23  ;;  %v319_v50 = vor.u32 %v318_v43, %v315_v32  ;;  %v343_v51 = vrot.slane %v341_v44, 4  ;;  %v338_v55 = vrot.slane %v336_v38, 5  ;;  %v1472_v63 = vld [vmem:[%s1388_s8 + $0x38] sm:$0xf]  ;;  %v1482_v12 = vld [vmem:[%s1388_s8 + $0x3c] sm:$0x1] }
  0x2b   : > { %v1036_v53 = vcombine.low %v297_v45, %v311_v49  ;;  %v333_v54 = vor.u32 %v332_v48, %v329_v47  ;;  %v350_v56 = vshll.u32 %v1453_v42, 16  ;;  %v346_v60 = vrot.slane %v344_v52, 5  ;;  %v1489_v17 = vld [vmem:[%s1388_s8 + $0x40] sm:$0xf]  ;;  %v1492_v25 = vld [vmem:[%s1388_s8 + $0x44] sm:$0x1] }
  0x2c   : > { %v320_v59 = vrot.slane %v319_v50, 4  ;;  %v528_v61 = vrot.slane %v1427_v24, 5  ;;  %v532_v62 = vrot.slane %v1434_v28, 5  ;;  %v577_v2 = vsel %vm422_vm1, %v1052_v15, 0  ;;  %v1498_v34 = vld [vmem:[%s1388_s8 + $0x48] sm:$0xf] }
  0x2d   : > { %1124 = vmatprep.mubr.msk.bf16.mxu1 %vm409_vm4, %v1036_v53  ;;  %v334_v0 = vrot.slane %v333_v54, 4  ;;  %v352_v1 = vrot.slane %v350_v56, 5  ;;  %v787_v3 = vsel %vm422_vm1, %v1071_v39, 0  ;;  %v347_v9 = vor.u32 %v346_v60, %v343_v51  ;;  %v1506_v39 = vld [vmem:[%s1388_s8 + $0x4c] sm:$0x1] }
  0x2e   : > { %v325_v4 = vsel %vm1441_vm5, %v320_v59, %v324_v46  ;;  %v355_v10 = vshrl.u32 %v1464_v57, 16  ;;  %v358_v11 = vshll.u32 %v1464_v57, 16  ;;  %v364_v15 = vshll.u32 %v1467_v58, 16 }
  0x2f   : > { %v339_v13 = vsel %vm1441_vm5, %v334_v0, %v338_v55  ;;  %v1062_v14 = vcombine.low %v311_v49, %v325_v4  ;;  %v369_v16 = vshrl.u32 %v1472_v63, 16  ;;  %v348_v18 = vrot.slane %v347_v9, 4 }
  0x30   : > { %v1037_v21 = vcombine.low %v325_v4, %v339_v13  ;;  %v357_v22 = vrot.slane %v355_v10, 4  ;;  %v360_v23 = vrot.slane %v358_v11, 5  ;;  %v366_v26 = vrot.slane %v364_v15, 5 }
  0x31   : > { %1144 = vmatprep.mubr.msk.bf16.mxu0 %vm409_vm4, %v1062_v14  ;;  %v371_v31 = vrot.slane %v369_v16, 4  ;;  %v372_v32 = vshll.u32 %v1472_v63, 16  ;;  %v378_v33 = vshll.u32 %v1482_v12, 16  ;;  %v353_v35 = vsel %vm1441_vm5, %v348_v18, %v352_v1 }
  0x32   : > { %1125 = vmatmul.mubr.msk.bf16.vlgmr.msra.gmra.mrb[0].mxu1 %vm409_vm4, %v1037_v21  ;;  %v361_v36 = vor.u32 %v360_v23, %v357_v22  ;;  %v383_v37 = vshrl.u32 %v1489_v17, 16  ;;  %v386_v38 = vshll.u32 %v1489_v17, 16  ;;  %v1063_v40 = vcombine.low %v339_v13, %v353_v35 }
  0x33   : > { %1133 = vmatpush3.bf16.msra.mxu1 %v577_v2  ;;  %v374_v43 = vrot.slane %v372_v32, 5  ;;  %v380_v44 = vrot.slane %v378_v33, 5  ;;  %v392_v45 = vshll.u32 %v1492_v25, 16  ;;  %v653_v49 = vshrl.u32 %v1498_v34, 16 }
  0x34   : > { %v362_v46 = vrot.slane %v361_v36, 4  ;;  %v385_v47 = vrot.slane %v383_v37, 4  ;;  %v388_v48 = vrot.slane %v386_v38, 5  ;;  %1145 = vmatmul.mubr.msk.bf16.vlgmr.msra.gmra.mrb[0].mxu0 %vm409_vm4, %v1063_v40  ;;  %v656_v52 = vshll.u32 %v1498_v34, 16  ;;  %v273_v37 = vld [vmem:[#allocation2] sm:$0xff] }
  0x35   : > { %v375_v50 = vor.u32 %v374_v43, %v371_v31  ;;  %v394_v51 = vrot.slane %v392_v45, 5  ;;  %v662_v53 = vshll.u32 %v1506_v39, 16  ;;  %1153 = vmatpush3.bf16.msra.mxu0 %v787_v3  ;;  %v655_v56 = vrot.slane %v653_v49, 4 }
  0x36   : > { %v367_v54 = vsel %vm1441_vm5, %v362_v46, %v366_v26  ;;  %v389_v55 = vor.u32 %v388_v48, %v385_v47  ;;  %vm515_vm6 = vcmask 1042432   ;;  %v658_v0 = vrot.slane %v656_v52, 5 }
  0x37   : > { %v1038_v59 = vcombine.low %v353_v35, %v367_v54  ;;  %v376_v60 = vrot.slane %v375_v50, 4  ;;  %v664_v1 = vrot.slane %v662_v53, 5  ;;  %vm516_vm7 = vcmask 1046532  }
  0x38   : > { %v390_v2 = vrot.slane %v389_v55, 4  ;;  %v1044_v4 = vrot.slane %v1403_v5, 9  ;;  %v1045_v9 = vrot.slane %v1409_v7, 9  ;;  %v659_v10 = vor.u32 %v658_v0, %v655_v56  ;;  %vm1520_vm8 = vmor %vm515_vm6, %vm516_vm7  ;;  %v277_v0 = vld [vmem:[#allocation2 + $0x20] sm:$0xff] }
  0x39   : > { %1128 = vmatprep.mubr.msk.bf16.mxu1 %vm409_vm4, %v1038_v59  ;;  %v381_v3 = vsel %vm1441_vm5, %v376_v60, %v380_v44  ;;  %v1046_v13 = vrot.slane %v1424_v20, 9  ;;  %v1047_v14 = vrot.slane %v1431_v27, 9  ;;  %v536_v27 = vrot.slane %v1453_v42, 5  ;;  %v274_v44 = vld [vmem:[#allocation2 + $0x8] sm:$0xff]  ;;  %v279_v59 = vld [vmem:[#allocation2 + $0x30] sm:$0xff] }
  0x3a   : > { %v1064_v15 = vcombine.low %v367_v54, %v381_v3  ;;  %v395_v5 = vsel %vm1441_vm5, %v390_v2, %v394_v51  ;;  %v521_v7 = vsel %vm1520_vm8, %v1044_v4, %v520_v19  ;;  %v525_v16 = vsel %vm1520_vm8, %v1045_v9, %v524_v41  ;;  %v280_v2 = vld [vmem:[#allocation2 + $0x38] sm:$0xff] }
  0x3b   : > { %v1039_v18 = vcombine.low %v381_v3, %v395_v5  ;;  %v660_v21 = vrot.slane %v659_v10, 4  ;;  %v1053_v22 = vcombine.low %v521_v7, %v525_v16  ;;  %v529_v20 = vsel %vm1520_vm8, %v1046_v13, %v528_v61  ;;  %v278_v3 = vld [vmem:[#allocation2 + $0x28] sm:$0xff] }
  0x3c   : > { %1148 = vmatprep.mubr.msk.bf16.mxu0 %vm409_vm4, %v1064_v15  ;;  %v1049_v6 = vrot.slane %v1464_v57, 9  ;;  %v1048_v19 = vrot.slane %v1437_v29, 9  ;;  %v1072_v41 = vcombine.low %v525_v16, %v529_v20  ;;  %v540_v23 = vrot.slane %v1467_v58, 5 }
  0x3d   : > { %1129 = vmatmul.mubr.msk.bf16.gmra.mrb[4].mxu1 %vm409_vm4, %v1039_v18  ;;  %v665_v8 = vsel %vm1441_vm5, %v660_v21, %v664_v1  ;;  %v533_v42 = vsel %vm1520_vm8, %v1047_v14, %v532_v62  ;;  %v1050_v57 = vrot.slane %v1472_v63, 9  ;;  %v544_v61 = vrot.slane %v1482_v12, 5 }
  0x3e   : > { %v1065_v24 = vcombine.low %v395_v5, %v665_v8  ;;  %1134 = vmatprep.mubr.msk.bf16.mxu1 %vm409_vm4, %v1053_v22  ;;  %v541_v30 = vsel %vm1520_vm8, %v1049_v6, %v540_v23  ;;  %v537_v29 = vsel %vm1520_vm8, %v1048_v19, %v536_v27  ;;  %v1054_v58 = vcombine.low %v529_v20, %v533_v42  ;;  %v1081_v6 = vld [vmem:[%s1628_s2] ss:$0 sm:$0xff] (!%p1080_p10) }
  0x3f   : > { %v1055_v26 = vcombine.low %v537_v29, %v541_v30  ;;  %v545_v28 = vsel %vm1520_vm8, %v1050_v57, %v544_v61  ;;  %v1051_v62 = vrot.slane %v1489_v17, 9  ;;  %v548_v63 = vrot.slane %v1492_v25, 5 }
  0x40   : > { %1149 = vmatmul.mubr.msk.bf16.gmra.mrb[4].mxu0 %vm409_vm4, %v1065_v24  ;;  %v1073_v12 = vcombine.low %v533_v42, %v537_v29  ;;  %v1074_v31 = vcombine.low %v541_v30, %v545_v28  ;;  %v1070_v32 = vrot.slane %v1498_v34, 9  ;;  %v765_v33 = vrot.slane %v1506_v39, 5  ;;  %v275_v34 = vld [vmem:[#allocation2 + $0x10] sm:$0xff]  ;;  %v276_v39 = vld [vmem:[#allocation2 + $0x18] sm:$0xff] }
  0x41   : > { %1154 = vmatprep.mubr.msk.bf16.mxu0 %vm409_vm4, %v1072_v41  ;;  %v549_v35 = vsel %vm1520_vm8, %v1051_v62, %v548_v63  ;;  %vm862_vm9 = vcmask 261120   ;;  %vm922_vm10 = vcmask (!%p1080_p10), 257024  }
  0x42   : > { %v1056_v17 = vcombine.low %v545_v28, %v549_v35  ;;  %v766_v25 = vsel %vm1520_vm8, %v1070_v32, %v765_v33 }
  0x43   : > { %v1075_v36 = vcombine.low %v549_v35, %v766_v25 }
  0x45   : > { %1135 = vmatmul.mubr.msk.bf16.vlgmr.msra.gmra.mrb[0].mxu1 %vm409_vm4, %v1054_v58 }
  0x46   : > { %1138 = vmatprep.mubr.msk.bf16.mxu1 %vm409_vm4, %v1055_v26 }
  0x48   : > { %1155 = vmatmul.mubr.msk.bf16.vlgmr.msra.gmra.mrb[0].mxu0 %vm409_vm4, %v1073_v12 }
  0x49   : > { %1158 = vmatprep.mubr.msk.bf16.mxu0 %vm409_vm4, %v1074_v31 }
  0x4d   : > { %1139 = vmatmul.mubr.msk.bf16.gmra.mrb[4].mxu1 %vm409_vm4, %v1056_v17 }
  0x50   : > { %1159 = vmatmul.mubr.msk.bf16.gmra.mrb[4].mxu0 %vm409_vm4, %v1075_v36 }
 0x118   : > { %v1136_v38 = vpop.f32.mrb[0].mxu1 }
 0x119   : > { %v1162_v40 = vadd.f32 %v1136_v38, %v275_v34  ;;  %v613_v43 = vpop.f32.mrb[1].mxu1 }
 0x11a   : > { %v1164_v45 = vadd.f32 %v613_v43, %v273_v37  ;;  %v1137_v46 = vpop.f32.mrb[2].mxu1 }
 0x11b   : > { %v1156_v47 = vpop.f32.mrb[0].mxu0  ;;  %v1166_v48 = vadd.f32 %v1137_v46, %v276_v39  ;;  %v616_v49 = vpop.f32.mrb[3].mxu1 }
 0x11c   : > { %v1163_v50 = vadd.f32 %v1162_v40, %v1156_v47  ;;  %v823_v51 = vpop.f32.mrb[1].mxu0  ;;  %v1168_v52 = vadd.f32 %v616_v49, %v274_v44 }
 0x11d   : > { %v1165_v53 = vadd.f32 %v1164_v45, %v823_v51  ;;  %v1157_v54 = vpop.f32.mrb[2].mxu0 }
 0x11e   : > { %865 = vst.msk [vmem:[#allocation2 + $0x10] sm:$0xff] %vm862_vm9, %v1163_v50  ;;  %v1167_v55 = vadd.f32 %v1166_v48, %v1157_v54  ;;  %v826_v56 = vpop.f32.mrb[3].mxu0  ;;  %v884_v41 = vadd.f32 (!%p1080_p10), %v1163_v50, %v1081_v6 }
 0x11f   : > { %863 = vst.msk [vmem:[#allocation2] sm:$0xff] %vm862_vm9, %v1165_v53  ;;  %v1169_v60 = vadd.f32 %v1168_v52, %v826_v56  ;;  %v882_v8 = vadd.f32 (!%p1080_p10), %v1165_v53, %v1081_v6 }
 0x120   : > { %866 = vst.msk [vmem:[#allocation2 + $0x18] sm:$0xff] %vm862_vm9, %v1167_v55  ;;  %v1140_v1 = vpop.f32.mrb[4].mxu1  ;;  %v885_v23 = vadd.f32 (!%p1080_p10), %v1167_v55, %v1081_v6  ;;  %v1096_v58 = vpack.c.bf16 (!%p1080_p10), %v884_v41, %v884_v41 }
 0x121   : > { %864 = vst.msk [vmem:[#allocation2 + $0x8] sm:$0xff] %vm862_vm9, %v1169_v60  ;;  %v1170_v4 = vadd.f32 %v1140_v1, %v279_v59  ;;  %v629_v9 = vpop.f32.mrb[5].mxu1  ;;  %v883_v19 = vadd.f32 (!%p1080_p10), %v1169_v60, %v1081_v6  ;;  %v1094_v30 = vpack.c.bf16 (!%p1080_p10), %v882_v8, %v882_v8 }
 0x122   : > { %v1172_v10 = vadd.f32 %v629_v9, %v277_v0  ;;  %v1141_v11 = vpop.f32.mrb[6].mxu1  ;;  %v1097_v26 = vpack.c.bf16 (!%p1080_p10), %v885_v23, %v885_v23  ;;  %925 = vst.msk [vmem:[%s1393_s13 + $0x8] sm:$0xf] (!%p1080_p10), %vm922_vm10, %v1096_v58 }
 0x123   : > { %v1160_v13 = vpop.f32.mrb[4].mxu0  ;;  %v1174_v14 = vadd.f32 %v1141_v11, %v280_v2  ;;  %v632_v15 = vpop.f32.mrb[7].mxu1  ;;  %874 = sbr.rel (%p1080_p10) target bundleno = 302 (0x12e), region = 40  ;;  %v1095_v29 = vpack.c.bf16 (!%p1080_p10), %v883_v19, %v883_v19  ;;  %923 = vst.msk [vmem:[%s1393_s13] sm:$0xf] (!%p1080_p10), %vm922_vm10, %v1094_v30 }
 0x124   : > { %v1171_v5 = vadd.f32 %v1170_v4, %v1160_v13  ;;  %v839_v7 = vpop.f32.mrb[5].mxu0  ;;  %v1176_v16 = vadd.f32 %v632_v15, %v278_v3  ;;  %926 = vst.msk [vmem:[%s1393_s13 + $0xc] sm:$0xf] (!%p1080_p10), %vm922_vm10, %v1097_v26 }
 0x125   : > { %v1173_v18 = vadd.f32 %v1172_v10, %v839_v7  ;;  %v1161_v21 = vpop.f32.mrb[6].mxu0  ;;  %924 = vst.msk [vmem:[%s1393_s13 + $0x4] sm:$0xf] (!%p1080_p10), %vm922_vm10, %v1095_v29 }
 0x126   : > { %869 = vst.msk [vmem:[#allocation2 + $0x30] sm:$0xff] %vm862_vm9, %v1171_v5  ;;  %v1175_v22 = vadd.f32 %v1174_v14, %v1161_v21  ;;  %v842_v20 = vpop.f32.mrb[7].mxu0  ;;  %v888_v57 = vadd.f32 (!%p1080_p10), %v1171_v5, %v1081_v6 }
 0x127   : > { %867 = vst.msk [vmem:[#allocation2 + $0x20] sm:$0xff] %vm862_vm9, %v1173_v18  ;;  %v1177_v27 = vadd.f32 %v1176_v16, %v842_v20  ;;  %v886_v24 = vadd.f32 (!%p1080_p10), %v1173_v18, %v1081_v6 }
 0x128   : > { %870 = vst.msk [vmem:[#allocation2 + $0x38] sm:$0xff] %vm862_vm9, %v1175_v22  ;;  %v889_v61 = vadd.f32 (!%p1080_p10), %v1175_v22, %v1081_v6  ;;  %v1100_v63 = vpack.c.bf16 (!%p1080_p10), %v888_v57, %v888_v57 }
 0x129   : > { %868 = vst.msk [vmem:[#allocation2 + $0x28] sm:$0xff] %vm862_vm9, %v1177_v27  ;;  %v887_v42 = vadd.f32 (!%p1080_p10), %v1177_v27, %v1081_v6  ;;  %v1098_v28 = vpack.c.bf16 (!%p1080_p10), %v886_v24, %v886_v24 }
 0x12a   : > { %v1101_v12 = vpack.c.bf16 %v889_v61, %v889_v61  ;;  %929 = vst.msk [vmem:[%s1393_s13 + $0x18] sm:$0xf] %vm922_vm10, %v1100_v63 }
 0x12b   : > { %v1099_v62 = vpack.c.bf16 %v887_v42, %v887_v42  ;;  %927 = vst.msk [vmem:[%s1393_s13 + $0x10] sm:$0xf] %vm922_vm10, %v1098_v28 }
 0x12c   : > { %930 = vst.msk [vmem:[%s1393_s13 + $0x1c] sm:$0xf] %vm922_vm10, %v1101_v12 }
 0x12d   : > { %928 = vst.msk [vmem:[%s1393_s13 + $0x14] sm:$0xf] %vm922_vm10, %v1099_v62 }
 0x12e PF: > { %s13_s18 = sadd.s32 1, %s1310_s18   ;;  %s1634_s12 = smov %s1298_s15 }
 0x12f   : > { %p10_p11 = scmp.ge.s32.totalorder %s13_s18, 34   ;;  %s1635_s13 = smov %s1302_s16 }
 0x130   : > { %s1636_s14 = smov %s1306_s17  ;;  %s1637_s15 = smov %s1641_s19 }
 0x131   : > { %s1638_s16 = smov %s1645_s20  ;;  %s1639_s17 = smov %s1649_s21 }
 0x132   :  { %12 = sbr.rel (!%p10_p11) target bundleno = 4 (0x4), region = 76 }

// kernel: _lambda_.15
= control target key start
LH: loop header
LB: loop body
LE: loop exit
PB: predicated region body
PF: predicated region fallthrough
CT: control target
= control target key end

     0   :  { %s1284_s12 = smov 0   ;;  %s1286_s13 = smov 0   ;;  %s1476_s0 = inlined_call_operand.vmem [shape: bf16[14,10,10,8], index: 0, kind: input, shape index: {}]   ;;  %s1477_s1 = inlined_call_operand.vmem [shape: bf16[4,4,8,32], index: 1, kind: input, shape index: {}]   ;;  %s1478_s2 = inlined_call_operand.vmem [shape: f32[1,32], index: 2, kind: input, shape index: {}]   ;;  %s1479_s3 = inlined_call_operand.vmem [shape: bf16[8,64,32], index: 3, kind: output, shape index: {}]  }
   0x1   :  { %s1288_s14 = smov 0   ;;  %s1290_s15 = smov 0  }
   0x2   :  { %s1292_s16 = smov 0   ;;  %s1294_s17 = smov 0  }
   0x3   :  { %s1296_s18 = smov 0  }
   0x4 LB: > { %s25_s19 = sadd.s32 1, %s1249_s15  ;;  %s28_s20 = sadd.s32 1, %s1253_s16  ;;  %s1261_s18 = sphi %s1296_s18, %s13_s18   ;;  %s1257_s17 = sphi %s1294_s17, %s1487_s17   ;;  %s1253_s16 = sphi %s1292_s16, %s1486_s16   ;;  %s1249_s15 = sphi %s1290_s15, %s1485_s15   ;;  %s1245_s14 = sphi %s1288_s14, %s1484_s14   ;;  %s1241_s13 = sphi %s1286_s13, %s1483_s13   ;;  %s1237_s12 = sphi %s1284_s12, %s1482_s12  }
   0x5   : > { %p26_p0 = scmp.ge.s32.totalorder %s25_s19, 4  ;;  %p980_p1 = scmp.ge.s32.totalorder %s1261_s18, 1 }
   0x6   : > { %p182_p2 = scmp.lt.s32.totalorder %s1261_s18, 33  ;;  %s32_s21 = sadd.s32 1, %s1257_s17 }
   0x7   : > { %s1489_s19 = smov (%p26_p0, %s25_s19), 0  ;;  %s1491_s20 = smov (!%p26_p0, %s28_s20), %s1253_s16 }
   0x8   : > { %p183_p3 = pnand %p980_p1, %p182_p2  ;;  %p30_p4 = scmp.ge.s32.totalorder %s1491_s20, 4 }
   0x9   : > { %s216_s22 = smul.u32 (!%p183_p3), 7, %s1245_s14  ;;  %p227_p6 = scmp.lt.s32.totalorder (!%p183_p3), %s1237_s12, 3 }
   0xa   : > { %s1493_s20 = smov (%p30_p4, %s1491_s20), 0  ;;  %s1495_s21 = smov (!%p30_p4, %s32_s21), %s1257_s17 }
   0xb   : > { %p34_p5 = scmp.ge.s32.totalorder %s1495_s21, 2  ;;  %186 = sbr.rel (%p183_p3) target bundleno = 285 (0x11d), region = 32 }
   0xc   : > { %s984_s23 = sshll.u32 (!%p183_p3), %s1245_s14, 2  ;;  %s217_s24 = sadd.s32 (!%p183_p3), %s1241_s13, %s216_s22 }
   0xd   : > { %s1497_s21 = smov (%p34_p5, %s1495_s21), 0  ;;  %s233_s25 = sadd.s32 (!%p183_p3), %s1241_s13, %s984_s23 }
   0xe   : > { %s218_s26 = sadd.s32 (!%p183_p3), %s1237_s12, %s217_s24  ;;  %p234_p8 = scmp.lt.s32.totalorder (!%p183_p3), %s233_s25, 7 }
   0xf   : > { %p219_p7 = scmp.lt.s32.totalorder (!%p183_p3), %s218_s26, 13  ;;  %p987_p9 = scmp.ne.s32.totalorder (!%p183_p3), %s1237_s12, 0 }
  0x12   : > { %s228_s27 = scalar_select %p227_p6, %s1237_s12, 3 }
  0x13   : > { %s1499_s26 = smov (!%p219_p7, %s218_s26), 13  ;;  %s1501_s25 = smov (!%p234_p8, %s233_s25), 7 }
  0x14   : > { %s1035_s28 = sshll.u32 %s228_s27, 4  ;;  %s1141_s29 = smul.u32 80, %s1499_s26  ;;  %vm246_vm0 = vcmask (!%p987_p9), 261120   ;;  %v1263_v0 = vmov (!%p987_p9), 0.0  }
  0x15   : > { %s1334_s5 = scalar_lea.vmem %s1477_s1, %s1035_s28  ;;  %s1036_s9 = sshll.u32 %s1501_s25, 5  ;;  %247 = vst.msk [vmem:[#allocation2] sm:$0xff] (!%p987_p9), %vm246_vm0, %v1263_v0  ;;  %248 = vst.msk [vmem:[#allocation2 + $0x8] sm:$0xff] (!%p987_p9), %vm246_vm0, %v1263_v0 }
  0x16   : > { %s1339_s8 = scalar_lea.vmem %s1476_s0, %s1141_s29  ;;  %s1344_s13 = scalar_lea.vmem %s1479_s3, %s1036_s9  ;;  %249 = vst.msk [vmem:[#allocation2 + $0x10] sm:$0xff] (!%p987_p9), %vm246_vm0, %v1263_v0  ;;  %250 = vst.msk [vmem:[#allocation2 + $0x18] sm:$0xff] (!%p987_p9), %vm246_vm0, %v1263_v0 }
  0x17   : > { %245 = sbr.rel (%p987_p9) target bundleno = 30 (0x1e), region = 36  ;;  %251 = vst.msk [vmem:[#allocation2 + $0x20] sm:$0xff] (!%p987_p9), %vm246_vm0, %v1263_v0  ;;  %252 = vst.msk [vmem:[#allocation2 + $0x28] sm:$0xff] (!%p987_p9), %vm246_vm0, %v1263_v0 }
  0x18   : > { %253 = vst.msk [vmem:[#allocation2 + $0x30] sm:$0xff] (!%p987_p9), %vm246_vm0, %v1263_v0  ;;  %254 = vst.msk [vmem:[#allocation2 + $0x38] sm:$0xff] (!%p987_p9), %vm246_vm0, %v1263_v0 }
  0x1e PF: > { %v281_v1 = vld [vmem:[%s1334_s5] sm:$0xf]  ;;  %vm315_vm1 = vcmask 1043456   ;;  %v1005_v2 = vld [vmem:[%s1334_s5 + $0x8] sm:$0xf]  ;;  %vm302_vm2 = vcmask 64512  }
  0x1f   : > { %1137 = vmatprep.subr.msk.bf16.mxu1 %vm315_vm1, %v281_v1  ;;  %1139 = vmatprep.subr.msk.bf16.mxu0 %vm315_vm1, %v1005_v2  ;;  %v317_v3 = vsel %vm315_vm1, %v281_v1, 0  ;;  %v630_v4 = vsel %vm315_vm1, %v1005_v2, 0  ;;  %v255_v5 = vld [vmem:[%s1339_s8 + $0x8] sm:$0xf]  ;;  %v257_v6 = vld [vmem:[%s1339_s8 + $0x10] sm:$0xf] }
  0x20   : > { %1066 = vmatpush3.bf16.msra.mxu1 %v317_v3  ;;  %1086 = vmatpush3.bf16.msra.mxu0 %v630_v4  ;;  %v988_v7 = vcombine.low %v255_v5, %v257_v6  ;;  %v396_v8 = vshrl.u32 %v255_v5, 16  ;;  %v399_v9 = vshll.u32 %v255_v5, 16  ;;  %v410_v10 = vshrl.u32 %v257_v6, 16  ;;  %v259_v11 = vld [vmem:[%s1339_s8 + $0x18] sm:$0xf]  ;;  %p1023_p10 = scmp.ne.s32.totalorder %s1237_s12, 3 }
  0x21   : > { %v413_v12 = vshll.u32 %v257_v6, 16  ;;  %v424_v13 = vshrl.u32 %v259_v11, 16  ;;  %v427_v14 = vshll.u32 %v259_v11, 16  ;;  %v1006_v15 = vcombine.low %v257_v6, %v259_v11  ;;  %v261_v16 = vld [vmem:[%s1339_s8 + $0x20] sm:$0xf] }
  0x22   : > { %1067 = vmatprep.mubr.msk.bf16.mxu1 %vm302_vm2, %v988_v7  ;;  %v398_v17 = vrot.slane %v396_v8, 4  ;;  %v401_v18 = vrot.slane %v399_v9, 5  ;;  %v412_v19 = vrot.slane %v410_v10, 4  ;;  %v989_v20 = vcombine.low %v259_v11, %v261_v16  ;;  %v996_v21 = vld [vmem:[%s1334_s5 + $0x4] sm:$0xf] }
  0x23   : > { %v415_v22 = vrot.slane %v413_v12, 5  ;;  %v426_v23 = vrot.slane %v424_v13, 4  ;;  %v429_v24 = vrot.slane %v427_v14, 5  ;;  %1087 = vmatprep.mubr.msk.bf16.mxu0 %vm302_vm2, %v1006_v15  ;;  %v438_v25 = vshrl.u32 %v261_v16, 16  ;;  %1138 = vmatprep.subr.msk.bf16.mxu1 %vm315_vm1, %v996_v21  ;;  %v263_v26 = vld [vmem:[%s1339_s8 + $0x28] sm:$0xf] }
  0x24   : > { %v402_v27 = vor.u32 %v401_v18, %v398_v17  ;;  %1068 = vmatmul.mubr.msk.bf16.vlgmr.msra.gmra.mrb[0].mxu1 %vm302_vm2, %v989_v20  ;;  %v441_v28 = vshll.u32 %v261_v16, 16  ;;  %v452_v29 = vshrl.u32 %v263_v26, 16  ;;  %v455_v30 = vshll.u32 %v263_v26, 16  ;;  %v1014_v31 = vld [vmem:[%s1334_s5 + $0xc] sm:$0xf] }
  0x25   : > { %v416_v32 = vor.u32 %v415_v22, %v412_v19  ;;  %v430_v33 = vor.u32 %v429_v24, %v426_v23  ;;  %v440_v34 = vrot.slane %v438_v25, 4  ;;  %v1007_v35 = vcombine.low %v261_v16, %v263_v26  ;;  %1140 = vmatprep.subr.msk.bf16.mxu0 %vm315_vm1, %v1014_v31  ;;  %v265_v36 = vld [vmem:[%s1339_s8 + $0x30] sm:$0xf]  ;;  %v1367_v37 = vld [vmem:[%s1339_s8 + $0x38] sm:$0xf] }
  0x26   : > { %v403_v38 = vrot.slane %v402_v27, 4  ;;  %v443_v39 = vrot.slane %v441_v28, 5  ;;  %v454_v40 = vrot.slane %v452_v29, 4  ;;  %v457_v41 = vrot.slane %v455_v30, 5  ;;  %v1370_v42 = vld [vmem:[%s1339_s8 + $0x40] sm:$0xf] }
  0x27   : > { %v417_v43 = vrot.slane %v416_v32, 4  ;;  %v431_v44 = vrot.slane %v430_v33, 4  ;;  %1088 = vmatmul.mubr.msk.bf16.vlgmr.msra.gmra.mrb[0].mxu0 %vm302_vm2, %v1007_v35  ;;  %v534_v45 = vsel %vm315_vm1, %v996_v21, 0  ;;  %v739_v46 = vsel %vm315_vm1, %v1014_v31, 0  ;;  %v271_v47 = vld [vmem:[%s1339_s8 + $0x48] sm:$0xf] }
  0x28   : > { %1076 = vmatpush3.bf16.msra.mxu1 %v534_v45  ;;  %1096 = vmatpush3.bf16.msra.mxu0 %v739_v46  ;;  %v990_v48 = vcombine.low %v263_v26, %v265_v36  ;;  %v466_v49 = vshrl.u32 %v265_v36, 16  ;;  %v469_v50 = vshll.u32 %v265_v36, 16  ;;  %v480_v51 = vshrl.u32 %v1367_v37, 16  ;;  %v256_v52 = vld [vmem:[%s1339_s8 + $0xc] sm:$0x1] }
  0x29   : > { %v483_v53 = vshll.u32 %v1367_v37, 16  ;;  %v1008_v54 = vcombine.low %v265_v36, %v1367_v37  ;;  %v991_v55 = vcombine.low %v1367_v37, %v1370_v42  ;;  %v494_v56 = vshrl.u32 %v1370_v42, 16  ;;  %v258_v57 = vld [vmem:[%s1339_s8 + $0x14] sm:$0x1]  ;;  %v260_v58 = vld [vmem:[%s1339_s8 + $0x1c] sm:$0x1] }
  0x2a   : > { %1071 = vmatprep.mubr.msk.bf16.mxu1 %vm302_vm2, %v990_v48  ;;  %v497_v59 = vshll.u32 %v1370_v42, 16  ;;  %v1009_v60 = vcombine.low %v1370_v42, %v271_v47  ;;  %v706_v61 = vshrl.u32 %v271_v47, 16  ;;  %v709_v62 = vshll.u32 %v271_v47, 16  ;;  %v262_v63 = vld [vmem:[%s1339_s8 + $0x24] sm:$0x1] }
  0x2b   : > { %1091 = vmatprep.mubr.msk.bf16.mxu0 %vm302_vm2, %v1008_v54  ;;  %vm392_vm3 = vsmask.f32 3328  ;;  %vm393_vm4 = vsmask.f32 7440  ;;  %v405_v0 = vshll.u32 %v256_v52, 16  ;;  %v419_v1 = vshll.u32 %v258_v57, 16 }
  0x2c   : > { %1072 = vmatmul.mubr.msk.bf16.gmra.mrb[4].mxu1 %vm302_vm2, %v991_v55  ;;  %v708_v2 = vrot.slane %v706_v61, 4  ;;  %v711_v3 = vrot.slane %v709_v62, 5  ;;  %vm1391_vm5 = vmor %vm392_vm3, %vm393_vm4  ;;  %v264_v5 = vld [vmem:[%s1339_s8 + $0x2c] sm:$0x1]  ;;  %v433_v6 = vshll.u32 %v260_v58, 16  ;;  %v444_v7 = vor.u32 %v443_v39, %v440_v34  ;;  %v275_v61 = vld [vmem:[#allocation2 + $0x10] sm:$0xff] }
  0x2d   : > { %v407_v8 = vrot.slane %v405_v0, 5  ;;  %v421_v9 = vrot.slane %v419_v1, 5  ;;  %v447_v10 = vshll.u32 %v262_v63, 16  ;;  %v458_v11 = vor.u32 %v457_v41, %v454_v40  ;;  %v266_v15 = vld [vmem:[%s1339_s8 + $0x34] sm:$0x1]  ;;  %v273_v62 = vld [vmem:[#allocation2] sm:$0xff] }
  0x2e   : > { %v435_v12 = vrot.slane %v433_v6, 5  ;;  %v445_v13 = vrot.slane %v444_v7, 4  ;;  %v461_v14 = vshll.u32 %v264_v5, 16  ;;  %v468_v16 = vrot.slane %v466_v49, 4  ;;  %v268_v25 = vld [vmem:[%s1339_s8 + $0x3c] sm:$0x1] }
  0x2f   : > { %1092 = vmatmul.mubr.msk.bf16.gmra.mrb[4].mxu0 %vm302_vm2, %v1009_v60  ;;  %v408_v17 = vsel %vm1391_vm5, %v403_v38, %v407_v8  ;;  %v422_v18 = vsel %vm1391_vm5, %v417_v43, %v421_v9  ;;  %v449_v19 = vrot.slane %v447_v10, 5  ;;  %v459_v20 = vrot.slane %v458_v11, 4  ;;  %v270_v30 = vld [vmem:[%s1339_s8 + $0x44] sm:$0x1]  ;;  %v272_v35 = vld [vmem:[%s1339_s8 + $0x4c] sm:$0x1] }
  0x30   : > { %v997_v21 = vcombine.low %v408_v17, %v422_v18  ;;  %v436_v22 = vsel %vm1391_vm5, %v431_v44, %v435_v12  ;;  %v463_v23 = vrot.slane %v461_v14, 5  ;;  %v471_v24 = vrot.slane %v469_v50, 5  ;;  %v276_v0 = vld [vmem:[#allocation2 + $0x18] sm:$0xff]  ;;  %v279_v17 = vld [vmem:[#allocation2 + $0x30] sm:$0xff] }
  0x31   : > { %v450_v26 = vsel %vm1391_vm5, %v445_v13, %v449_v19  ;;  %v1015_v27 = vcombine.low %v422_v18, %v436_v22  ;;  %v475_v28 = vshll.u32 %v266_v15, 16  ;;  %v482_v29 = vrot.slane %v480_v51, 4  ;;  %v277_v18 = vld [vmem:[#allocation2 + $0x20] sm:$0xff] }
  0x32   : > { %1077 = vmatprep.mubr.msk.bf16.mxu1 %vm302_vm2, %v997_v21  ;;  %v464_v31 = vsel %vm1391_vm5, %v459_v20, %v463_v23  ;;  %v998_v32 = vcombine.low %v436_v22, %v450_v26  ;;  %v472_v33 = vor.u32 %v471_v24, %v468_v16  ;;  %v485_v34 = vrot.slane %v483_v53, 5  ;;  %v280_v20 = vld [vmem:[#allocation2 + $0x38] sm:$0xff]  ;;  %v278_v23 = vld [vmem:[#allocation2 + $0x28] sm:$0xff] }
  0x33   : > { %v1016_v36 = vcombine.low %v450_v26, %v464_v31  ;;  %1097 = vmatprep.mubr.msk.bf16.mxu0 %vm302_vm2, %v1015_v27  ;;  %v477_v37 = vrot.slane %v475_v28, 5  ;;  %v489_v38 = vshll.u32 %v268_v25, 16  ;;  %v496_v39 = vrot.slane %v494_v56, 4 }
  0x34   : > { %1078 = vmatmul.mubr.msk.bf16.vlgmr.msra.gmra.mrb[0].mxu1 %vm302_vm2, %v998_v32  ;;  %v473_v40 = vrot.slane %v472_v33, 4  ;;  %v486_v41 = vor.u32 %v485_v34, %v482_v29  ;;  %v499_v42 = vrot.slane %v497_v59, 5  ;;  %v503_v43 = vshll.u32 %v270_v30, 16 }
  0x35   : > { %v491_v44 = vrot.slane %v489_v38, 5  ;;  %v712_v45 = vor.u32 %v711_v3, %v708_v2  ;;  %v715_v46 = vshll.u32 %v272_v35, 16  ;;  %v274_v3 = vld [vmem:[#allocation2 + $0x8] sm:$0xff]  ;;  %vm814_vm6 = vcmask 261120  }
  0x36   : > { %v478_v47 = vsel %vm1391_vm5, %v473_v40, %v477_v37  ;;  %v487_v48 = vrot.slane %v486_v41, 4  ;;  %v500_v49 = vor.u32 %v499_v42, %v496_v39  ;;  %v505_v50 = vrot.slane %v503_v43, 5  ;;  %v1024_v37 = vld [vmem:[%s1478_s2] ss:$0 sm:$0xff] (!%p1023_p10) }
  0x37   : > { %1098 = vmatmul.mubr.msk.bf16.vlgmr.msra.gmra.mrb[0].mxu0 %vm302_vm2, %v1016_v36  ;;  %v999_v51 = vcombine.low %v464_v31, %v478_v47  ;;  %v713_v52 = vrot.slane %v712_v45, 4  ;;  %v717_v53 = vrot.slane %v715_v46, 5  ;;  %vm874_vm7 = vcmask (!%p1023_p10), 257024  }
  0x38   : > { %v492_v54 = vsel %vm1391_vm5, %v487_v48, %v491_v44  ;;  %v501_v55 = vrot.slane %v500_v49, 4 }
  0x39   : > { %1081 = vmatprep.mubr.msk.bf16.mxu1 %vm302_vm2, %v999_v51  ;;  %v1017_v56 = vcombine.low %v478_v47, %v492_v54  ;;  %v718_v57 = vsel %vm1391_vm5, %v713_v52, %v717_v53 }
  0x3a   : > { %v506_v58 = vsel %vm1391_vm5, %v501_v55, %v505_v50 }
  0x3b   : > { %1101 = vmatprep.mubr.msk.bf16.mxu0 %vm302_vm2, %v1017_v56  ;;  %v1000_v59 = vcombine.low %v492_v54, %v506_v58  ;;  %v1018_v60 = vcombine.low %v506_v58, %v718_v57 }
  0x3d   : > { %1082 = vmatmul.mubr.msk.bf16.gmra.mrb[4].mxu1 %vm302_vm2, %v1000_v59 }
  0x3f   : > { %1102 = vmatmul.mubr.msk.bf16.gmra.mrb[4].mxu0 %vm302_vm2, %v1018_v60 }
 0x107   : > { %v1079_v63 = vpop.f32.mrb[0].mxu1 }
 0x108   : > { %v1105_v1 = vadd.f32 %v1079_v63, %v275_v61  ;;  %v570_v2 = vpop.f32.mrb[1].mxu1 }
 0x109   : > { %v1107_v5 = vadd.f32 %v570_v2, %v273_v62  ;;  %v1080_v6 = vpop.f32.mrb[2].mxu1 }
 0x10a   : > { %v1099_v7 = vpop.f32.mrb[0].mxu0  ;;  %v1109_v4 = vadd.f32 %v1080_v6, %v276_v0  ;;  %v573_v8 = vpop.f32.mrb[3].mxu1 }
 0x10b   : > { %v1106_v9 = vadd.f32 %v1105_v1, %v1099_v7  ;;  %v775_v10 = vpop.f32.mrb[1].mxu0  ;;  %v1111_v11 = vadd.f32 %v573_v8, %v274_v3 }
 0x10c   : > { %v1108_v12 = vadd.f32 %v1107_v5, %v775_v10  ;;  %v1100_v13 = vpop.f32.mrb[2].mxu0 }
 0x10d   : > { %817 = vst.msk [vmem:[#allocation2 + $0x10] sm:$0xff] %vm814_vm6, %v1106_v9  ;;  %v1110_v14 = vadd.f32 %v1109_v4, %v1100_v13  ;;  %v778_v15 = vpop.f32.mrb[3].mxu0  ;;  %v836_v40 = vadd.f32 (!%p1023_p10), %v1106_v9, %v1024_v37 }
 0x10e   : > { %815 = vst.msk [vmem:[#allocation2] sm:$0xff] %vm814_vm6, %v1108_v12  ;;  %v1112_v16 = vadd.f32 %v1111_v11, %v778_v15  ;;  %v834_v38 = vadd.f32 (!%p1023_p10), %v1108_v12, %v1024_v37 }
 0x10f   : > { %818 = vst.msk [vmem:[#allocation2 + $0x18] sm:$0xff] %vm814_vm6, %v1110_v14  ;;  %v837_v41 = vadd.f32 (!%p1023_p10), %v1110_v14, %v1024_v37  ;;  %v1039_v48 = vpack.c.bf16 (!%p1023_p10), %v836_v40, %v836_v40 }
 0x110   : > { %816 = vst.msk [vmem:[#allocation2 + $0x8] sm:$0xff] %vm814_vm6, %v1112_v16  ;;  %v1083_v19 = vpop.f32.mrb[4].mxu1  ;;  %v835_v39 = vadd.f32 (!%p1023_p10), %v1112_v16, %v1024_v37  ;;  %v1037_v46 = vpack.c.bf16 (!%p1023_p10), %v834_v38, %v834_v38 }
 0x111   : > { %v1113_v21 = vadd.f32 %v1083_v19, %v279_v17  ;;  %v586_v22 = vpop.f32.mrb[5].mxu1  ;;  %v1040_v49 = vpack.c.bf16 (!%p1023_p10), %v837_v41, %v837_v41  ;;  %877 = vst.msk [vmem:[%s1344_s13 + $0x8] sm:$0xf] (!%p1023_p10), %vm874_vm7, %v1039_v48 }
 0x112   : > { %v1103_v24 = vpop.f32.mrb[4].mxu0  ;;  %v1115_v25 = vadd.f32 %v586_v22, %v277_v18  ;;  %v1084_v26 = vpop.f32.mrb[6].mxu1  ;;  %826 = sbr.rel (%p1023_p10) target bundleno = 285 (0x11d), region = 40  ;;  %v1038_v47 = vpack.c.bf16 (!%p1023_p10), %v835_v39, %v835_v39  ;;  %875 = vst.msk [vmem:[%s1344_s13] sm:$0xf] (!%p1023_p10), %vm874_vm7, %v1037_v46 }
 0x113   : > { %v1114_v27 = vadd.f32 %v1113_v21, %v1103_v24  ;;  %v791_v28 = vpop.f32.mrb[5].mxu0  ;;  %v1117_v29 = vadd.f32 %v1084_v26, %v280_v20  ;;  %v589_v30 = vpop.f32.mrb[7].mxu1  ;;  %878 = vst.msk [vmem:[%s1344_s13 + $0xc] sm:$0xf] (!%p1023_p10), %vm874_vm7, %v1040_v49 }
 0x114   : > { %v1116_v31 = vadd.f32 %v1115_v25, %v791_v28  ;;  %v1104_v32 = vpop.f32.mrb[6].mxu0  ;;  %v1119_v33 = vadd.f32 %v589_v30, %v278_v23  ;;  %876 = vst.msk [vmem:[%s1344_s13 + $0x4] sm:$0xf] (!%p1023_p10), %vm874_vm7, %v1038_v47 }
 0x115   : > { %821 = vst.msk [vmem:[#allocation2 + $0x30] sm:$0xff] %vm814_vm6, %v1114_v27  ;;  %v1118_v34 = vadd.f32 %v1117_v29, %v1104_v32  ;;  %v794_v35 = vpop.f32.mrb[7].mxu0  ;;  %v840_v44 = vadd.f32 (!%p1023_p10), %v1114_v27, %v1024_v37 }
 0x116   : > { %819 = vst.msk [vmem:[#allocation2 + $0x20] sm:$0xff] %vm814_vm6, %v1116_v31  ;;  %v1120_v36 = vadd.f32 %v1119_v33, %v794_v35  ;;  %v838_v42 = vadd.f32 (!%p1023_p10), %v1116_v31, %v1024_v37 }
 0x117   : > { %822 = vst.msk [vmem:[#allocation2 + $0x38] sm:$0xff] %vm814_vm6, %v1118_v34  ;;  %v841_v45 = vadd.f32 (!%p1023_p10), %v1118_v34, %v1024_v37  ;;  %v1043_v52 = vpack.c.bf16 (!%p1023_p10), %v840_v44, %v840_v44 }
 0x118   : > { %820 = vst.msk [vmem:[#allocation2 + $0x28] sm:$0xff] %vm814_vm6, %v1120_v36  ;;  %v839_v43 = vadd.f32 (!%p1023_p10), %v1120_v36, %v1024_v37  ;;  %v1041_v50 = vpack.c.bf16 (!%p1023_p10), %v838_v42, %v838_v42 }
 0x119   : > { %v1044_v53 = vpack.c.bf16 %v841_v45, %v841_v45  ;;  %881 = vst.msk [vmem:[%s1344_s13 + $0x18] sm:$0xf] %vm874_vm7, %v1043_v52 }
 0x11a   : > { %v1042_v51 = vpack.c.bf16 %v839_v43, %v839_v43  ;;  %879 = vst.msk [vmem:[%s1344_s13 + $0x10] sm:$0xf] %vm874_vm7, %v1041_v50 }
 0x11b   : > { %882 = vst.msk [vmem:[%s1344_s13 + $0x1c] sm:$0xf] %vm874_vm7, %v1044_v53 }
 0x11c   : > { %880 = vst.msk [vmem:[%s1344_s13 + $0x14] sm:$0xf] %vm874_vm7, %v1042_v51 }
 0x11d PF: > { %s13_s18 = sadd.s32 1, %s1261_s18   ;;  %s1482_s12 = smov %s1249_s15 }
 0x11e   : > { %p10_p11 = scmp.ge.s32.totalorder %s13_s18, 34   ;;  %s1483_s13 = smov %s1253_s16 }
 0x11f   : > { %s1484_s14 = smov %s1257_s17  ;;  %s1485_s15 = smov %s1489_s19 }
 0x120   : > { %s1486_s16 = smov %s1493_s20  ;;  %s1487_s17 = smov %s1497_s21 }
 0x121   :  { %12 = sbr.rel (!%p10_p11) target bundleno = 4 (0x4), region = 76 }

// kernel: _lambda_.14
= control target key start
LH: loop header
LB: loop body
LE: loop exit
PB: predicated region body
PF: predicated region fallthrough
CT: control target
= control target key end

     0   :  { %s1333_s12 = smov 0   ;;  %s1335_s13 = smov 0   ;;  %s1626_s0 = inlined_call_operand.vmem [shape: bf16[14,10,10,8], index: 0, kind: input, shape index: {}]   ;;  %s1627_s1 = inlined_call_operand.vmem [shape: bf16[4,4,8,32], index: 1, kind: input, shape index: {}]   ;;  %s1628_s2 = inlined_call_operand.vmem [shape: f32[1,32], index: 2, kind: input, shape index: {}]   ;;  %s1629_s3 = inlined_call_operand.vmem [shape: bf16[8,64,32], index: 3, kind: output, shape index: {}]  }
   0x1   :  { %s1337_s14 = smov 0   ;;  %s1339_s15 = smov 0  }
   0x2   :  { %s1341_s16 = smov 0   ;;  %s1343_s17 = smov 0  }
   0x3   :  { %s1345_s18 = smov 0  }
   0x4 LB: > { %s25_s19 = sadd.s32 1, %s1298_s15  ;;  %s28_s20 = sadd.s32 1, %s1302_s16  ;;  %s1310_s18 = sphi %s1345_s18, %s13_s18   ;;  %s1306_s17 = sphi %s1343_s17, %s1639_s17   ;;  %s1302_s16 = sphi %s1341_s16, %s1638_s16   ;;  %s1298_s15 = sphi %s1339_s15, %s1637_s15   ;;  %s1294_s14 = sphi %s1337_s14, %s1636_s14   ;;  %s1290_s13 = sphi %s1335_s13, %s1635_s13   ;;  %s1286_s12 = sphi %s1333_s12, %s1634_s12  }
   0x5   : > { %p26_p0 = scmp.ge.s32.totalorder %s25_s19, 4  ;;  %p1028_p1 = scmp.ge.s32.totalorder %s1310_s18, 1 }
   0x6   : > { %p182_p2 = scmp.lt.s32.totalorder %s1310_s18, 33  ;;  %s32_s21 = sadd.s32 1, %s1306_s17 }
   0x7   : > { %s1641_s19 = smov (%p26_p0, %s25_s19), 0  ;;  %s1643_s20 = smov (!%p26_p0, %s28_s20), %s1302_s16 }
   0x8   : > { %p183_p3 = pnand %p1028_p1, %p182_p2  ;;  %p30_p4 = scmp.ge.s32.totalorder %s1643_s20, 4 }
   0x9   : > { %s216_s22 = smul.u32 (!%p183_p3), 7, %s1294_s14  ;;  %p227_p6 = scmp.lt.s32.totalorder (!%p183_p3), %s1286_s12, 3 }
   0xa   : > { %s1645_s20 = smov (%p30_p4, %s1643_s20), 0  ;;  %s1647_s21 = smov (!%p30_p4, %s32_s21), %s1306_s17 }
   0xb   : > { %p34_p5 = scmp.ge.s32.totalorder %s1647_s21, 2  ;;  %186 = sbr.rel (%p183_p3) target bundleno = 302 (0x12e), region = 32 }
   0xc   : > { %s1032_s23 = sshll.u32 (!%p183_p3), %s1294_s14, 2  ;;  %s217_s24 = sadd.s32 (!%p183_p3), %s1290_s13, %s216_s22 }
   0xd   : > { %s1649_s21 = smov (%p34_p5, %s1647_s21), 0  ;;  %s233_s25 = sadd.s32 (!%p183_p3), %s1290_s13, %s1032_s23 }
   0xe   : > { %s218_s26 = sadd.s32 (!%p183_p3), %s1286_s12, %s217_s24  ;;  %p234_p8 = scmp.lt.s32.totalorder (!%p183_p3), %s233_s25, 7 }
   0xf   : > { %p219_p7 = scmp.lt.s32.totalorder (!%p183_p3), %s218_s26, 13  ;;  %p1035_p9 = scmp.ne.s32.totalorder (!%p183_p3), %s1286_s12, 0 }
  0x12   : > { %s228_s27 = scalar_select %p227_p6, %s1286_s12, 3 }
  0x13   : > { %s1651_s26 = smov (!%p219_p7, %s218_s26), 13  ;;  %s1653_s25 = smov (!%p234_p8, %s233_s25), 7 }
  0x14   : > { %s1092_s28 = sshll.u32 %s228_s27, 4  ;;  %s1198_s29 = smul.u32 80, %s1651_s26  ;;  %vm246_vm0 = vcmask (!%p1035_p9), 261120   ;;  %v1312_v0 = vmov (!%p1035_p9), 0.0  }
  0x15   : > { %s1383_s5 = scalar_lea.vmem %s1627_s1, %s1092_s28  ;;  %s1093_s9 = sshll.u32 %s1653_s25, 5  ;;  %247 = vst.msk [vmem:[#allocation2] sm:$0xff] (!%p1035_p9), %vm246_vm0, %v1312_v0  ;;  %248 = vst.msk [vmem:[#allocation2 + $0x8] sm:$0xff] (!%p1035_p9), %vm246_vm0, %v1312_v0 }
  0x16   : > { %s1388_s8 = scalar_lea.vmem %s1626_s0, %s1198_s29  ;;  %s1393_s13 = scalar_lea.vmem %s1629_s3, %s1093_s9  ;;  %249 = vst.msk [vmem:[#allocation2 + $0x10] sm:$0xff] (!%p1035_p9), %vm246_vm0, %v1312_v0  ;;  %250 = vst.msk [vmem:[#allocation2 + $0x18] sm:$0xff] (!%p1035_p9), %vm246_vm0, %v1312_v0 }
  0x17   : > { %245 = sbr.rel (%p1035_p9) target bundleno = 30 (0x1e), region = 36  ;;  %251 = vst.msk [vmem:[#allocation2 + $0x20] sm:$0xff] (!%p1035_p9), %vm246_vm0, %v1312_v0  ;;  %252 = vst.msk [vmem:[#allocation2 + $0x28] sm:$0xff] (!%p1035_p9), %vm246_vm0, %v1312_v0 }
  0x18   : > { %253 = vst.msk [vmem:[#allocation2 + $0x30] sm:$0xff] (!%p1035_p9), %vm246_vm0, %v1312_v0  ;;  %254 = vst.msk [vmem:[#allocation2 + $0x38] sm:$0xff] (!%p1035_p9), %vm246_vm0, %v1312_v0 }
  0x1e PF: > { %v396_v1 = vld [vmem:[%s1383_s5] sm:$0xf]  ;;  %vm422_vm1 = vcmask 1043456   ;;  %v1061_v2 = vld [vmem:[%s1383_s5 + $0x8] sm:$0xf]  ;;  %vm409_vm4 = vcmask 64512  }
  0x1f   : > { %1194 = vmatprep.subr.msk.bf16.mxu1 %vm422_vm1, %v396_v1  ;;  %v424_v3 = vsel %vm422_vm1, %v396_v1, 0  ;;  %1196 = vmatprep.subr.msk.bf16.mxu0 %vm422_vm1, %v1061_v2  ;;  %v686_v4 = vsel %vm422_vm1, %v1061_v2, 0  ;;  %v1403_v5 = vld [vmem:[%s1388_s8] sm:$0xf]  ;;  %v1406_v6 = vld [vmem:[%s1388_s8 + $0x4] sm:$0x1] }
  0x20   : > { %1123 = vmatpush3.bf16.msra.mxu1 %v424_v3  ;;  %1143 = vmatpush3.bf16.msra.mxu0 %v686_v4  ;;  %v1409_v7 = vld [vmem:[%s1388_s8 + $0x8] sm:$0xf]  ;;  %v1412_v8 = vld [vmem:[%s1388_s8 + $0xc] sm:$0x1]  ;;  %vm281_vm2 = vsmask.f32 3328 }
  0x21   : > { %vm282_vm3 = vsmask.f32 7440  ;;  %v285_v9 = vshrl.u32 %v1403_v5, 16  ;;  %v288_v10 = vshll.u32 %v1403_v5, 16  ;;  %v294_v11 = vshll.u32 %v1406_v6, 16  ;;  %p1080_p10 = scmp.ne.s32.totalorder %s1286_s12, 3 }
  0x22   : > { %v299_v12 = vshrl.u32 %v1409_v7, 16  ;;  %v302_v13 = vshll.u32 %v1409_v7, 16  ;;  %v308_v14 = vshll.u32 %v1412_v8, 16  ;;  %v1052_v15 = vld [vmem:[%s1383_s5 + $0x4] sm:$0xf]  ;;  %v520_v19 = vrot.slane %v1406_v6, 5  ;;  %vm1441_vm5 = vmor %vm281_vm2, %vm282_vm3 }
  0x23   : > { %v287_v16 = vrot.slane %v285_v9, 4  ;;  %v290_v17 = vrot.slane %v288_v10, 5  ;;  %v296_v18 = vrot.slane %v294_v11, 5  ;;  %1195 = vmatprep.subr.msk.bf16.mxu1 %vm422_vm1, %v1052_v15  ;;  %v1424_v20 = vld [vmem:[%s1388_s8 + $0x10] sm:$0xf]  ;;  %v524_v41 = vrot.slane %v1412_v8, 5 }
  0x24   : > { %v301_v21 = vrot.slane %v299_v12, 4  ;;  %v304_v22 = vrot.slane %v302_v13, 5  ;;  %v310_v23 = vrot.slane %v308_v14, 5  ;;  %v1427_v24 = vld [vmem:[%s1388_s8 + $0x14] sm:$0x1]  ;;  %v313_v25 = vshrl.u32 %v1424_v20, 16 }
  0x25   : > { %v291_v26 = vor.u32 %v290_v17, %v287_v16  ;;  %v1431_v27 = vld [vmem:[%s1388_s8 + $0x18] sm:$0xf]  ;;  %v1434_v28 = vld [vmem:[%s1388_s8 + $0x1c] sm:$0x1]  ;;  %v1437_v29 = vld [vmem:[%s1388_s8 + $0x20] sm:$0xf] }
  0x26   : > { %v305_v31 = vor.u32 %v304_v22, %v301_v21  ;;  %v315_v32 = vrot.slane %v313_v25, 4  ;;  %v316_v33 = vshll.u32 %v1424_v20, 16  ;;  %v322_v34 = vshll.u32 %v1427_v24, 16  ;;  %v1071_v39 = vld [vmem:[%s1383_s5 + $0xc] sm:$0xf] }
  0x27   : > { %v292_v35 = vrot.slane %v291_v26, 4  ;;  %v327_v36 = vshrl.u32 %v1431_v27, 16  ;;  %v330_v37 = vshll.u32 %v1431_v27, 16  ;;  %v336_v38 = vshll.u32 %v1434_v28, 16  ;;  %v1453_v42 = vld [vmem:[%s1388_s8 + $0x24] sm:$0x1]  ;;  %1197 = vmatprep.subr.msk.bf16.mxu0 %vm422_vm1, %v1071_v39 }
  0x28   : > { %v306_v40 = vrot.slane %v305_v31, 4  ;;  %v318_v43 = vrot.slane %v316_v33, 5  ;;  %v341_v44 = vshrl.u32 %v1437_v29, 16  ;;  %v324_v46 = vrot.slane %v322_v34, 5  ;;  %v1464_v57 = vld [vmem:[%s1388_s8 + $0x28] sm:$0xf] }
  0x29   : > { %v297_v45 = vsel %vm1441_vm5, %v292_v35, %v296_v18  ;;  %v329_v47 = vrot.slane %v327_v36, 4  ;;  %v332_v48 = vrot.slane %v330_v37, 5  ;;  %v344_v52 = vshll.u32 %v1437_v29, 16  ;;  %v1467_v58 = vld [vmem:[%s1388_s8 + $0x2c] sm:$0x1] }
  0x2a   : > { %v311_v49 = vsel %vm1441_vm5, %v306_v40, %v310_v23  ;;  %v319_v50 = vor.u32 %v318_v43, %v315_v32  ;;  %v343_v51 = vrot.slane %v341_v44, 4  ;;  %v338_v55 = vrot.slane %v336_v38, 5  ;;  %v1472_v63 = vld [vmem:[%s1388_s8 + $0x30] sm:$0xf]  ;;  %v1482_v12 = vld [vmem:[%s1388_s8 + $0x34] sm:$0x1] }
  0x2b   : > { %v1036_v53 = vcombine.low %v297_v45, %v311_v49  ;;  %v333_v54 = vor.u32 %v332_v48, %v329_v47  ;;  %v350_v56 = vshll.u32 %v1453_v42, 16  ;;  %v346_v60 = vrot.slane %v344_v52, 5  ;;  %v1489_v17 = vld [vmem:[%s1388_s8 + $0x38] sm:$0xf]  ;;  %v1492_v25 = vld [vmem:[%s1388_s8 + $0x3c] sm:$0x1] }
  0x2c   : > { %v320_v59 = vrot.slane %v319_v50, 4  ;;  %v528_v61 = vrot.slane %v1427_v24, 5  ;;  %v532_v62 = vrot.slane %v1434_v28, 5  ;;  %v577_v2 = vsel %vm422_vm1, %v1052_v15, 0  ;;  %v1498_v34 = vld [vmem:[%s1388_s8 + $0x40] sm:$0xf] }
  0x2d   : > { %1124 = vmatprep.mubr.msk.bf16.mxu1 %vm409_vm4, %v1036_v53  ;;  %v334_v0 = vrot.slane %v333_v54, 4  ;;  %v352_v1 = vrot.slane %v350_v56, 5  ;;  %v787_v3 = vsel %vm422_vm1, %v1071_v39, 0  ;;  %v347_v9 = vor.u32 %v346_v60, %v343_v51  ;;  %v1506_v39 = vld [vmem:[%s1388_s8 + $0x44] sm:$0x1] }
  0x2e   : > { %v325_v4 = vsel %vm1441_vm5, %v320_v59, %v324_v46  ;;  %v355_v10 = vshrl.u32 %v1464_v57, 16  ;;  %v358_v11 = vshll.u32 %v1464_v57, 16  ;;  %v364_v15 = vshll.u32 %v1467_v58, 16 }
  0x2f   : > { %v339_v13 = vsel %vm1441_vm5, %v334_v0, %v338_v55  ;;  %v1062_v14 = vcombine.low %v311_v49, %v325_v4  ;;  %v369_v16 = vshrl.u32 %v1472_v63, 16  ;;  %v348_v18 = vrot.slane %v347_v9, 4 }
  0x30   : > { %v1037_v21 = vcombine.low %v325_v4, %v339_v13  ;;  %v357_v22 = vrot.slane %v355_v10, 4  ;;  %v360_v23 = vrot.slane %v358_v11, 5  ;;  %v366_v26 = vrot.slane %v364_v15, 5 }
  0x31   : > { %1144 = vmatprep.mubr.msk.bf16.mxu0 %vm409_vm4, %v1062_v14  ;;  %v371_v31 = vrot.slane %v369_v16, 4  ;;  %v372_v32 = vshll.u32 %v1472_v63, 16  ;;  %v378_v33 = vshll.u32 %v1482_v12, 16  ;;  %v353_v35 = vsel %vm1441_vm5, %v348_v18, %v352_v1 }
  0x32   : > { %1125 = vmatmul.mubr.msk.bf16.vlgmr.msra.gmra.mrb[0].mxu1 %vm409_vm4, %v1037_v21  ;;  %v361_v36 = vor.u32 %v360_v23, %v357_v22  ;;  %v383_v37 = vshrl.u32 %v1489_v17, 16  ;;  %v386_v38 = vshll.u32 %v1489_v17, 16  ;;  %v1063_v40 = vcombine.low %v339_v13, %v353_v35 }
  0x33   : > { %1133 = vmatpush3.bf16.msra.mxu1 %v577_v2  ;;  %v374_v43 = vrot.slane %v372_v32, 5  ;;  %v380_v44 = vrot.slane %v378_v33, 5  ;;  %v392_v45 = vshll.u32 %v1492_v25, 16  ;;  %v653_v49 = vshrl.u32 %v1498_v34, 16 }
  0x34   : > { %v362_v46 = vrot.slane %v361_v36, 4  ;;  %v385_v47 = vrot.slane %v383_v37, 4  ;;  %v388_v48 = vrot.slane %v386_v38, 5  ;;  %1145 = vmatmul.mubr.msk.bf16.vlgmr.msra.gmra.mrb[0].mxu0 %vm409_vm4, %v1063_v40  ;;  %v656_v52 = vshll.u32 %v1498_v34, 16  ;;  %v273_v37 = vld [vmem:[#allocation2] sm:$0xff] }
  0x35   : > { %v375_v50 = vor.u32 %v374_v43, %v371_v31  ;;  %v394_v51 = vrot.slane %v392_v45, 5  ;;  %v662_v53 = vshll.u32 %v1506_v39, 16  ;;  %1153 = vmatpush3.bf16.msra.mxu0 %v787_v3  ;;  %v655_v56 = vrot.slane %v653_v49, 4 }
  0x36   : > { %v367_v54 = vsel %vm1441_vm5, %v362_v46, %v366_v26  ;;  %v389_v55 = vor.u32 %v388_v48, %v385_v47  ;;  %vm515_vm6 = vcmask 1042432   ;;  %v658_v0 = vrot.slane %v656_v52, 5 }
  0x37   : > { %v1038_v59 = vcombine.low %v353_v35, %v367_v54  ;;  %v376_v60 = vrot.slane %v375_v50, 4  ;;  %v664_v1 = vrot.slane %v662_v53, 5  ;;  %vm516_vm7 = vcmask 1046532  }
  0x38   : > { %v390_v2 = vrot.slane %v389_v55, 4  ;;  %v1044_v4 = vrot.slane %v1403_v5, 9  ;;  %v1045_v9 = vrot.slane %v1409_v7, 9  ;;  %v659_v10 = vor.u32 %v658_v0, %v655_v56  ;;  %vm1520_vm8 = vmor %vm515_vm6, %vm516_vm7  ;;  %v277_v0 = vld [vmem:[#allocation2 + $0x20] sm:$0xff] }
  0x39   : > { %1128 = vmatprep.mubr.msk.bf16.mxu1 %vm409_vm4, %v1038_v59  ;;  %v381_v3 = vsel %vm1441_vm5, %v376_v60, %v380_v44  ;;  %v1046_v13 = vrot.slane %v1424_v20, 9  ;;  %v1047_v14 = vrot.slane %v1431_v27, 9  ;;  %v536_v27 = vrot.slane %v1453_v42, 5  ;;  %v274_v44 = vld [vmem:[#allocation2 + $0x8] sm:$0xff]  ;;  %v279_v59 = vld [vmem:[#allocation2 + $0x30] sm:$0xff] }
  0x3a   : > { %v1064_v15 = vcombine.low %v367_v54, %v381_v3  ;;  %v395_v5 = vsel %vm1441_vm5, %v390_v2, %v394_v51  ;;  %v521_v7 = vsel %vm1520_vm8, %v1044_v4, %v520_v19  ;;  %v525_v16 = vsel %vm1520_vm8, %v1045_v9, %v524_v41  ;;  %v280_v2 = vld [vmem:[#allocation2 + $0x38] sm:$0xff] }
  0x3b   : > { %v1039_v18 = vcombine.low %v381_v3, %v395_v5  ;;  %v660_v21 = vrot.slane %v659_v10, 4  ;;  %v1053_v22 = vcombine.low %v521_v7, %v525_v16  ;;  %v529_v20 = vsel %vm1520_vm8, %v1046_v13, %v528_v61  ;;  %v278_v3 = vld [vmem:[#allocation2 + $0x28] sm:$0xff] }
  0x3c   : > { %1148 = vmatprep.mubr.msk.bf16.mxu0 %vm409_vm4, %v1064_v15  ;;  %v1049_v6 = vrot.slane %v1464_v57, 9  ;;  %v1048_v19 = vrot.slane %v1437_v29, 9  ;;  %v1072_v41 = vcombine.low %v525_v16, %v529_v20  ;;  %v540_v23 = vrot.slane %v1467_v58, 5 }
  0x3d   : > { %1129 = vmatmul.mubr.msk.bf16.gmra.mrb[4].mxu1 %vm409_vm4, %v1039_v18  ;;  %v665_v8 = vsel %vm1441_vm5, %v660_v21, %v664_v1  ;;  %v533_v42 = vsel %vm1520_vm8, %v1047_v14, %v532_v62  ;;  %v1050_v57 = vrot.slane %v1472_v63, 9  ;;  %v544_v61 = vrot.slane %v1482_v12, 5 }
  0x3e   : > { %v1065_v24 = vcombine.low %v395_v5, %v665_v8  ;;  %1134 = vmatprep.mubr.msk.bf16.mxu1 %vm409_vm4, %v1053_v22  ;;  %v541_v30 = vsel %vm1520_vm8, %v1049_v6, %v540_v23  ;;  %v537_v29 = vsel %vm1520_vm8, %v1048_v19, %v536_v27  ;;  %v1054_v58 = vcombine.low %v529_v20, %v533_v42  ;;  %v1081_v6 = vld [vmem:[%s1628_s2] ss:$0 sm:$0xff] (!%p1080_p10) }
  0x3f   : > { %v1055_v26 = vcombine.low %v537_v29, %v541_v30  ;;  %v545_v28 = vsel %vm1520_vm8, %v1050_v57, %v544_v61  ;;  %v1051_v62 = vrot.slane %v1489_v17, 9  ;;  %v548_v63 = vrot.slane %v1492_v25, 5 }
  0x40   : > { %1149 = vmatmul.mubr.msk.bf16.gmra.mrb[4].mxu0 %vm409_vm4, %v1065_v24  ;;  %v1073_v12 = vcombine.low %v533_v42, %v537_v29  ;;  %v1074_v31 = vcombine.low %v541_v30, %v545_v28  ;;  %v1070_v32 = vrot.slane %v1498_v34, 9  ;;  %v765_v33 = vrot.slane %v1506_v39, 5  ;;  %v275_v34 = vld [vmem:[#allocation2 + $0x10] sm:$0xff]  ;;  %v276_v39 = vld [vmem:[#allocation2 + $0x18] sm:$0xff] }
  0x41   : > { %1154 = vmatprep.mubr.msk.bf16.mxu0 %vm409_vm4, %v1072_v41  ;;  %v549_v35 = vsel %vm1520_vm8, %v1051_v62, %v548_v63  ;;  %vm862_vm9 = vcmask 261120   ;;  %vm922_vm10 = vcmask (!%p1080_p10), 257024  }
  0x42   : > { %v1056_v17 = vcombine.low %v545_v28, %v549_v35  ;;  %v766_v25 = vsel %vm1520_vm8, %v1070_v32, %v765_v33 }
  0x43   : > { %v1075_v36 = vcombine.low %v549_v35, %v766_v25 }
  0x45   : > { %1135 = vmatmul.mubr.msk.bf16.vlgmr.msra.gmra.mrb[0].mxu1 %vm409_vm4, %v1054_v58 }
  0x46   : > { %1138 = vmatprep.mubr.msk.bf16.mxu1 %vm409_vm4, %v1055_v26 }
  0x48   : > { %1155 = vmatmul.mubr.msk.bf16.vlgmr.msra.gmra.mrb[0].mxu0 %vm409_vm4, %v1073_v12 }
  0x49   : > { %1158 = vmatprep.mubr.msk.bf16.mxu0 %vm409_vm4, %v1074_v31 }
  0x4d   : > { %1139 = vmatmul.mubr.msk.bf16.gmra.mrb[4].mxu1 %vm409_vm4, %v1056_v17 }
  0x50   : > { %1159 = vmatmul.mubr.msk.bf16.gmra.mrb[4].mxu0 %vm409_vm4, %v1075_v36 }
 0x118   : > { %v1136_v38 = vpop.f32.mrb[0].mxu1 }
 0x119   : > { %v1162_v40 = vadd.f32 %v1136_v38, %v275_v34  ;;  %v613_v43 = vpop.f32.mrb[1].mxu1 }
 0x11a   : > { %v1164_v45 = vadd.f32 %v613_v43, %v273_v37  ;;  %v1137_v46 = vpop.f32.mrb[2].mxu1 }
 0x11b   : > { %v1156_v47 = vpop.f32.mrb[0].mxu0  ;;  %v1166_v48 = vadd.f32 %v1137_v46, %v276_v39  ;;  %v616_v49 = vpop.f32.mrb[3].mxu1 }
 0x11c   : > { %v1163_v50 = vadd.f32 %v1162_v40, %v1156_v47  ;;  %v823_v51 = vpop.f32.mrb[1].mxu0  ;;  %v1168_v52 = vadd.f32 %v616_v49, %v274_v44 }
 0x11d   : > { %v1165_v53 = vadd.f32 %v1164_v45, %v823_v51  ;;  %v1157_v54 = vpop.f32.mrb[2].mxu0 }
 0x11e   : > { %865 = vst.msk [vmem:[#allocation2 + $0x10] sm:$0xff] %vm862_vm9, %v1163_v50  ;;  %v1167_v55 = vadd.f32 %v1166_v48, %v1157_v54  ;;  %v826_v56 = vpop.f32.mrb[3].mxu0  ;;  %v884_v41 = vadd.f32 (!%p1080_p10), %v1163_v50, %v1081_v6 }
 0x11f   : > { %863 = vst.msk [vmem:[#allocation2] sm:$0xff] %vm862_vm9, %v1165_v53  ;;  %v1169_v60 = vadd.f32 %v1168_v52, %v826_v56  ;;  %v882_v8 = vadd.f32 (!%p1080_p10), %v1165_v53, %v1081_v6 }
 0x120   : > { %866 = vst.msk [vmem:[#allocation2 + $0x18] sm:$0xff] %vm862_vm9, %v1167_v55  ;;  %v1140_v1 = vpop.f32.mrb[4].mxu1  ;;  %v885_v23 = vadd.f32 (!%p1080_p10), %v1167_v55, %v1081_v6  ;;  %v1096_v58 = vpack.c.bf16 (!%p1080_p10), %v884_v41, %v884_v41 }
 0x121   : > { %864 = vst.msk [vmem:[#allocation2 + $0x8] sm:$0xff] %vm862_vm9, %v1169_v60  ;;  %v1170_v4 = vadd.f32 %v1140_v1, %v279_v59  ;;  %v629_v9 = vpop.f32.mrb[5].mxu1  ;;  %v883_v19 = vadd.f32 (!%p1080_p10), %v1169_v60, %v1081_v6  ;;  %v1094_v30 = vpack.c.bf16 (!%p1080_p10), %v882_v8, %v882_v8 }
 0x122   : > { %v1172_v10 = vadd.f32 %v629_v9, %v277_v0  ;;  %v1141_v11 = vpop.f32.mrb[6].mxu1  ;;  %v1097_v26 = vpack.c.bf16 (!%p1080_p10), %v885_v23, %v885_v23  ;;  %925 = vst.msk [vmem:[%s1393_s13 + $0x8] sm:$0xf] (!%p1080_p10), %vm922_vm10, %v1096_v58 }
 0x123   : > { %v1160_v13 = vpop.f32.mrb[4].mxu0  ;;  %v1174_v14 = vadd.f32 %v1141_v11, %v280_v2  ;;  %v632_v15 = vpop.f32.mrb[7].mxu1  ;;  %874 = sbr.rel (%p1080_p10) target bundleno = 302 (0x12e), region = 40  ;;  %v1095_v29 = vpack.c.bf16 (!%p1080_p10), %v883_v19, %v883_v19  ;;  %923 = vst.msk [vmem:[%s1393_s13] sm:$0xf] (!%p1080_p10), %vm922_vm10, %v1094_v30 }
 0x124   : > { %v1171_v5 = vadd.f32 %v1170_v4, %v1160_v13  ;;  %v839_v7 = vpop.f32.mrb[5].mxu0  ;;  %v1176_v16 = vadd.f32 %v632_v15, %v278_v3  ;;  %926 = vst.msk [vmem:[%s1393_s13 + $0xc] sm:$0xf] (!%p1080_p10), %vm922_vm10, %v1097_v26 }
 0x125   : > { %v1173_v18 = vadd.f32 %v1172_v10, %v839_v7  ;;  %v1161_v21 = vpop.f32.mrb[6].mxu0  ;;  %924 = vst.msk [vmem:[%s1393_s13 + $0x4] sm:$0xf] (!%p1080_p10), %vm922_vm10, %v1095_v29 }
 0x126   : > { %869 = vst.msk [vmem:[#allocation2 + $0x30] sm:$0xff] %vm862_vm9, %v1171_v5  ;;  %v1175_v22 = vadd.f32 %v1174_v14, %v1161_v21  ;;  %v842_v20 = vpop.f32.mrb[7].mxu0  ;;  %v888_v57 = vadd.f32 (!%p1080_p10), %v1171_v5, %v1081_v6 }
 0x127   : > { %867 = vst.msk [vmem:[#allocation2 + $0x20] sm:$0xff] %vm862_vm9, %v1173_v18  ;;  %v1177_v27 = vadd.f32 %v1176_v16, %v842_v20  ;;  %v886_v24 = vadd.f32 (!%p1080_p10), %v1173_v18, %v1081_v6 }
 0x128   : > { %870 = vst.msk [vmem:[#allocation2 + $0x38] sm:$0xff] %vm862_vm9, %v1175_v22  ;;  %v889_v61 = vadd.f32 (!%p1080_p10), %v1175_v22, %v1081_v6  ;;  %v1100_v63 = vpack.c.bf16 (!%p1080_p10), %v888_v57, %v888_v57 }
 0x129   : > { %868 = vst.msk [vmem:[#allocation2 + $0x28] sm:$0xff] %vm862_vm9, %v1177_v27  ;;  %v887_v42 = vadd.f32 (!%p1080_p10), %v1177_v27, %v1081_v6  ;;  %v1098_v28 = vpack.c.bf16 (!%p1080_p10), %v886_v24, %v886_v24 }
 0x12a   : > { %v1101_v12 = vpack.c.bf16 %v889_v61, %v889_v61  ;;  %929 = vst.msk [vmem:[%s1393_s13 + $0x18] sm:$0xf] %vm922_vm10, %v1100_v63 }
 0x12b   : > { %v1099_v62 = vpack.c.bf16 %v887_v42, %v887_v42  ;;  %927 = vst.msk [vmem:[%s1393_s13 + $0x10] sm:$0xf] %vm922_vm10, %v1098_v28 }
 0x12c   : > { %930 = vst.msk [vmem:[%s1393_s13 + $0x1c] sm:$0xf] %vm922_vm10, %v1101_v12 }
 0x12d   : > { %928 = vst.msk [vmem:[%s1393_s13 + $0x14] sm:$0xf] %vm922_vm10, %v1099_v62 }
 0x12e PF: > { %s13_s18 = sadd.s32 1, %s1310_s18   ;;  %s1634_s12 = smov %s1298_s15 }
 0x12f   : > { %p10_p11 = scmp.ge.s32.totalorder %s13_s18, 34   ;;  %s1635_s13 = smov %s1302_s16 }
 0x130   : > { %s1636_s14 = smov %s1306_s17  ;;  %s1637_s15 = smov %s1641_s19 }
 0x131   : > { %s1638_s16 = smov %s1645_s20  ;;  %s1639_s17 = smov %s1649_s21 }
 0x132   :  { %12 = sbr.rel (!%p10_p11) target bundleno = 4 (0x4), region = 76 }

// kernel: _lambda_.13
= control target key start
LH: loop header
LB: loop body
LE: loop exit
PB: predicated region body
PF: predicated region fallthrough
CT: control target
= control target key end

     0   :  { %s1284_s12 = smov 0   ;;  %s1286_s13 = smov 0   ;;  %s1476_s0 = inlined_call_operand.vmem [shape: bf16[14,10,10,8], index: 0, kind: input, shape index: {}]   ;;  %s1477_s1 = inlined_call_operand.vmem [shape: bf16[4,4,8,32], index: 1, kind: input, shape index: {}]   ;;  %s1478_s2 = inlined_call_operand.vmem [shape: f32[1,32], index: 2, kind: input, shape index: {}]   ;;  %s1479_s3 = inlined_call_operand.vmem [shape: bf16[8,64,32], index: 3, kind: output, shape index: {}]  }
   0x1   :  { %s1288_s14 = smov 0   ;;  %s1290_s15 = smov 0  }
   0x2   :  { %s1292_s16 = smov 0   ;;  %s1294_s17 = smov 0  }
   0x3   :  { %s1296_s18 = smov 0  }
   0x4 LB: > { %s25_s19 = sadd.s32 1, %s1249_s15  ;;  %s28_s20 = sadd.s32 1, %s1253_s16  ;;  %s1261_s18 = sphi %s1296_s18, %s13_s18   ;;  %s1257_s17 = sphi %s1294_s17, %s1487_s17   ;;  %s1253_s16 = sphi %s1292_s16, %s1486_s16   ;;  %s1249_s15 = sphi %s1290_s15, %s1485_s15   ;;  %s1245_s14 = sphi %s1288_s14, %s1484_s14   ;;  %s1241_s13 = sphi %s1286_s13, %s1483_s13   ;;  %s1237_s12 = sphi %s1284_s12, %s1482_s12  }
   0x5   : > { %p26_p0 = scmp.ge.s32.totalorder %s25_s19, 4  ;;  %p980_p1 = scmp.ge.s32.totalorder %s1261_s18, 1 }
   0x6   : > { %p182_p2 = scmp.lt.s32.totalorder %s1261_s18, 33  ;;  %s32_s21 = sadd.s32 1, %s1257_s17 }
   0x7   : > { %s1489_s19 = smov (%p26_p0, %s25_s19), 0  ;;  %s1491_s20 = smov (!%p26_p0, %s28_s20), %s1253_s16 }
   0x8   : > { %p183_p3 = pnand %p980_p1, %p182_p2  ;;  %p30_p4 = scmp.ge.s32.totalorder %s1491_s20, 4 }
   0x9   : > { %s216_s22 = smul.u32 (!%p183_p3), 7, %s1245_s14  ;;  %p227_p6 = scmp.lt.s32.totalorder (!%p183_p3), %s1237_s12, 3 }
   0xa   : > { %s1493_s20 = smov (%p30_p4, %s1491_s20), 0  ;;  %s1495_s21 = smov (!%p30_p4, %s32_s21), %s1257_s17 }
   0xb   : > { %p34_p5 = scmp.ge.s32.totalorder %s1495_s21, 2  ;;  %186 = sbr.rel (%p183_p3) target bundleno = 285 (0x11d), region = 32 }
   0xc   : > { %s984_s23 = sshll.u32 (!%p183_p3), %s1245_s14, 2  ;;  %s217_s24 = sadd.s32 (!%p183_p3), %s1241_s13, %s216_s22 }
   0xd   : > { %s1497_s21 = smov (%p34_p5, %s1495_s21), 0  ;;  %s233_s25 = sadd.s32 (!%p183_p3), %s1241_s13, %s984_s23 }
   0xe   : > { %s218_s26 = sadd.s32 (!%p183_p3), %s1237_s12, %s217_s24  ;;  %p234_p8 = scmp.lt.s32.totalorder (!%p183_p3), %s233_s25, 7 }
   0xf   : > { %p219_p7 = scmp.lt.s32.totalorder (!%p183_p3), %s218_s26, 13  ;;  %p987_p9 = scmp.ne.s32.totalorder (!%p183_p3), %s1237_s12, 0 }
  0x12   : > { %s228_s27 = scalar_select %p227_p6, %s1237_s12, 3 }
  0x13   : > { %s1499_s26 = smov (!%p219_p7, %s218_s26), 13  ;;  %s1501_s25 = smov (!%p234_p8, %s233_s25), 7 }
  0x14   : > { %s1035_s28 = sshll.u32 %s228_s27, 4  ;;  %s1141_s29 = smul.u32 80, %s1499_s26  ;;  %vm246_vm0 = vcmask (!%p987_p9), 261120   ;;  %v1263_v0 = vmov (!%p987_p9), 0.0  }
  0x15   : > { %s1334_s5 = scalar_lea.vmem %s1477_s1, %s1035_s28  ;;  %s1036_s9 = sshll.u32 %s1501_s25, 5  ;;  %247 = vst.msk [vmem:[#allocation2] sm:$0xff] (!%p987_p9), %vm246_vm0, %v1263_v0  ;;  %248 = vst.msk [vmem:[#allocation2 + $0x8] sm:$0xff] (!%p987_p9), %vm246_vm0, %v1263_v0 }
  0x16   : > { %s1339_s8 = scalar_lea.vmem %s1476_s0, %s1141_s29  ;;  %s1344_s13 = scalar_lea.vmem %s1479_s3, %s1036_s9  ;;  %249 = vst.msk [vmem:[#allocation2 + $0x10] sm:$0xff] (!%p987_p9), %vm246_vm0, %v1263_v0  ;;  %250 = vst.msk [vmem:[#allocation2 + $0x18] sm:$0xff] (!%p987_p9), %vm246_vm0, %v1263_v0 }
  0x17   : > { %245 = sbr.rel (%p987_p9) target bundleno = 30 (0x1e), region = 36  ;;  %251 = vst.msk [vmem:[#allocation2 + $0x20] sm:$0xff] (!%p987_p9), %vm246_vm0, %v1263_v0  ;;  %252 = vst.msk [vmem:[#allocation2 + $0x28] sm:$0xff] (!%p987_p9), %vm246_vm0, %v1263_v0 }
  0x18   : > { %253 = vst.msk [vmem:[#allocation2 + $0x30] sm:$0xff] (!%p987_p9), %vm246_vm0, %v1263_v0  ;;  %254 = vst.msk [vmem:[#allocation2 + $0x38] sm:$0xff] (!%p987_p9), %vm246_vm0, %v1263_v0 }
  0x1e PF: > { %v281_v1 = vld [vmem:[%s1334_s5] sm:$0xf]  ;;  %vm315_vm1 = vcmask 1043456   ;;  %v1005_v2 = vld [vmem:[%s1334_s5 + $0x8] sm:$0xf]  ;;  %vm302_vm2 = vcmask 64512  }
  0x1f   : > { %1137 = vmatprep.subr.msk.bf16.mxu1 %vm315_vm1, %v281_v1  ;;  %1139 = vmatprep.subr.msk.bf16.mxu0 %vm315_vm1, %v1005_v2  ;;  %v317_v3 = vsel %vm315_vm1, %v281_v1, 0  ;;  %v630_v4 = vsel %vm315_vm1, %v1005_v2, 0  ;;  %v255_v5 = vld [vmem:[%s1339_s8] sm:$0xf]  ;;  %v257_v6 = vld [vmem:[%s1339_s8 + $0x8] sm:$0xf] }
  0x20   : > { %1066 = vmatpush3.bf16.msra.mxu1 %v317_v3  ;;  %1086 = vmatpush3.bf16.msra.mxu0 %v630_v4  ;;  %v988_v7 = vcombine.low %v255_v5, %v257_v6  ;;  %v396_v8 = vshrl.u32 %v255_v5, 16  ;;  %v399_v9 = vshll.u32 %v255_v5, 16  ;;  %v410_v10 = vshrl.u32 %v257_v6, 16  ;;  %v259_v11 = vld [vmem:[%s1339_s8 + $0x10] sm:$0xf]  ;;  %p1023_p10 = scmp.ne.s32.totalorder %s1237_s12, 3 }
  0x21   : > { %v413_v12 = vshll.u32 %v257_v6, 16  ;;  %v424_v13 = vshrl.u32 %v259_v11, 16  ;;  %v427_v14 = vshll.u32 %v259_v11, 16  ;;  %v1006_v15 = vcombine.low %v257_v6, %v259_v11  ;;  %v261_v16 = vld [vmem:[%s1339_s8 + $0x18] sm:$0xf] }
  0x22   : > { %1067 = vmatprep.mubr.msk.bf16.mxu1 %vm302_vm2, %v988_v7  ;;  %v398_v17 = vrot.slane %v396_v8, 4  ;;  %v401_v18 = vrot.slane %v399_v9, 5  ;;  %v412_v19 = vrot.slane %v410_v10, 4  ;;  %v989_v20 = vcombine.low %v259_v11, %v261_v16  ;;  %v996_v21 = vld [vmem:[%s1334_s5 + $0x4] sm:$0xf] }
  0x23   : > { %v415_v22 = vrot.slane %v413_v12, 5  ;;  %v426_v23 = vrot.slane %v424_v13, 4  ;;  %v429_v24 = vrot.slane %v427_v14, 5  ;;  %1087 = vmatprep.mubr.msk.bf16.mxu0 %vm302_vm2, %v1006_v15  ;;  %v438_v25 = vshrl.u32 %v261_v16, 16  ;;  %1138 = vmatprep.subr.msk.bf16.mxu1 %vm315_vm1, %v996_v21  ;;  %v263_v26 = vld [vmem:[%s1339_s8 + $0x20] sm:$0xf] }
  0x24   : > { %v402_v27 = vor.u32 %v401_v18, %v398_v17  ;;  %1068 = vmatmul.mubr.msk.bf16.vlgmr.msra.gmra.mrb[0].mxu1 %vm302_vm2, %v989_v20  ;;  %v441_v28 = vshll.u32 %v261_v16, 16  ;;  %v452_v29 = vshrl.u32 %v263_v26, 16  ;;  %v455_v30 = vshll.u32 %v263_v26, 16  ;;  %v1014_v31 = vld [vmem:[%s1334_s5 + $0xc] sm:$0xf] }
  0x25   : > { %v416_v32 = vor.u32 %v415_v22, %v412_v19  ;;  %v430_v33 = vor.u32 %v429_v24, %v426_v23  ;;  %v440_v34 = vrot.slane %v438_v25, 4  ;;  %v1007_v35 = vcombine.low %v261_v16, %v263_v26  ;;  %1140 = vmatprep.subr.msk.bf16.mxu0 %vm315_vm1, %v1014_v31  ;;  %v265_v36 = vld [vmem:[%s1339_s8 + $0x28] sm:$0xf]  ;;  %v1367_v37 = vld [vmem:[%s1339_s8 + $0x30] sm:$0xf] }
  0x26   : > { %v403_v38 = vrot.slane %v402_v27, 4  ;;  %v443_v39 = vrot.slane %v441_v28, 5  ;;  %v454_v40 = vrot.slane %v452_v29, 4  ;;  %v457_v41 = vrot.slane %v455_v30, 5  ;;  %v1370_v42 = vld [vmem:[%s1339_s8 + $0x38] sm:$0xf] }
  0x27   : > { %v417_v43 = vrot.slane %v416_v32, 4  ;;  %v431_v44 = vrot.slane %v430_v33, 4  ;;  %1088 = vmatmul.mubr.msk.bf16.vlgmr.msra.gmra.mrb[0].mxu0 %vm302_vm2, %v1007_v35  ;;  %v534_v45 = vsel %vm315_vm1, %v996_v21, 0  ;;  %v739_v46 = vsel %vm315_vm1, %v1014_v31, 0  ;;  %v271_v47 = vld [vmem:[%s1339_s8 + $0x40] sm:$0xf] }
  0x28   : > { %1076 = vmatpush3.bf16.msra.mxu1 %v534_v45  ;;  %1096 = vmatpush3.bf16.msra.mxu0 %v739_v46  ;;  %v990_v48 = vcombine.low %v263_v26, %v265_v36  ;;  %v466_v49 = vshrl.u32 %v265_v36, 16  ;;  %v469_v50 = vshll.u32 %v265_v36, 16  ;;  %v480_v51 = vshrl.u32 %v1367_v37, 16  ;;  %v256_v52 = vld [vmem:[%s1339_s8 + $0x4] sm:$0x1] }
  0x29   : > { %v483_v53 = vshll.u32 %v1367_v37, 16  ;;  %v1008_v54 = vcombine.low %v265_v36, %v1367_v37  ;;  %v991_v55 = vcombine.low %v1367_v37, %v1370_v42  ;;  %v494_v56 = vshrl.u32 %v1370_v42, 16  ;;  %v258_v57 = vld [vmem:[%s1339_s8 + $0xc] sm:$0x1]  ;;  %v260_v58 = vld [vmem:[%s1339_s8 + $0x14] sm:$0x1] }
  0x2a   : > { %1071 = vmatprep.mubr.msk.bf16.mxu1 %vm302_vm2, %v990_v48  ;;  %v497_v59 = vshll.u32 %v1370_v42, 16  ;;  %v1009_v60 = vcombine.low %v1370_v42, %v271_v47  ;;  %v706_v61 = vshrl.u32 %v271_v47, 16  ;;  %v709_v62 = vshll.u32 %v271_v47, 16  ;;  %v262_v63 = vld [vmem:[%s1339_s8 + $0x1c] sm:$0x1] }
  0x2b   : > { %1091 = vmatprep.mubr.msk.bf16.mxu0 %vm302_vm2, %v1008_v54  ;;  %vm392_vm3 = vsmask.f32 3328  ;;  %vm393_vm4 = vsmask.f32 7440  ;;  %v405_v0 = vshll.u32 %v256_v52, 16  ;;  %v419_v1 = vshll.u32 %v258_v57, 16 }
  0x2c   : > { %1072 = vmatmul.mubr.msk.bf16.gmra.mrb[4].mxu1 %vm302_vm2, %v991_v55  ;;  %v708_v2 = vrot.slane %v706_v61, 4  ;;  %v711_v3 = vrot.slane %v709_v62, 5  ;;  %vm1391_vm5 = vmor %vm392_vm3, %vm393_vm4  ;;  %v264_v5 = vld [vmem:[%s1339_s8 + $0x24] sm:$0x1]  ;;  %v433_v6 = vshll.u32 %v260_v58, 16  ;;  %v444_v7 = vor.u32 %v443_v39, %v440_v34  ;;  %v275_v61 = vld [vmem:[#allocation2 + $0x10] sm:$0xff] }
  0x2d   : > { %v407_v8 = vrot.slane %v405_v0, 5  ;;  %v421_v9 = vrot.slane %v419_v1, 5  ;;  %v447_v10 = vshll.u32 %v262_v63, 16  ;;  %v458_v11 = vor.u32 %v457_v41, %v454_v40  ;;  %v266_v15 = vld [vmem:[%s1339_s8 + $0x2c] sm:$0x1]  ;;  %v273_v62 = vld [vmem:[#allocation2] sm:$0xff] }
  0x2e   : > { %v435_v12 = vrot.slane %v433_v6, 5  ;;  %v445_v13 = vrot.slane %v444_v7, 4  ;;  %v461_v14 = vshll.u32 %v264_v5, 16  ;;  %v468_v16 = vrot.slane %v466_v49, 4  ;;  %v268_v25 = vld [vmem:[%s1339_s8 + $0x34] sm:$0x1] }
  0x2f   : > { %1092 = vmatmul.mubr.msk.bf16.gmra.mrb[4].mxu0 %vm302_vm2, %v1009_v60  ;;  %v408_v17 = vsel %vm1391_vm5, %v403_v38, %v407_v8  ;;  %v422_v18 = vsel %vm1391_vm5, %v417_v43, %v421_v9  ;;  %v449_v19 = vrot.slane %v447_v10, 5  ;;  %v459_v20 = vrot.slane %v458_v11, 4  ;;  %v270_v30 = vld [vmem:[%s1339_s8 + $0x3c] sm:$0x1]  ;;  %v272_v35 = vld [vmem:[%s1339_s8 + $0x44] sm:$0x1] }
  0x30   : > { %v997_v21 = vcombine.low %v408_v17, %v422_v18  ;;  %v436_v22 = vsel %vm1391_vm5, %v431_v44, %v435_v12  ;;  %v463_v23 = vrot.slane %v461_v14, 5  ;;  %v471_v24 = vrot.slane %v469_v50, 5  ;;  %v276_v0 = vld [vmem:[#allocation2 + $0x18] sm:$0xff]  ;;  %v279_v17 = vld [vmem:[#allocation2 + $0x30] sm:$0xff] }
  0x31   : > { %v450_v26 = vsel %vm1391_vm5, %v445_v13, %v449_v19  ;;  %v1015_v27 = vcombine.low %v422_v18, %v436_v22  ;;  %v475_v28 = vshll.u32 %v266_v15, 16  ;;  %v482_v29 = vrot.slane %v480_v51, 4  ;;  %v277_v18 = vld [vmem:[#allocation2 + $0x20] sm:$0xff] }
  0x32   : > { %1077 = vmatprep.mubr.msk.bf16.mxu1 %vm302_vm2, %v997_v21  ;;  %v464_v31 = vsel %vm1391_vm5, %v459_v20, %v463_v23  ;;  %v998_v32 = vcombine.low %v436_v22, %v450_v26  ;;  %v472_v33 = vor.u32 %v471_v24, %v468_v16  ;;  %v485_v34 = vrot.slane %v483_v53, 5  ;;  %v280_v20 = vld [vmem:[#allocation2 + $0x38] sm:$0xff]  ;;  %v278_v23 = vld [vmem:[#allocation2 + $0x28] sm:$0xff] }
  0x33   : > { %v1016_v36 = vcombine.low %v450_v26, %v464_v31  ;;  %1097 = vmatprep.mubr.msk.bf16.mxu0 %vm302_vm2, %v1015_v27  ;;  %v477_v37 = vrot.slane %v475_v28, 5  ;;  %v489_v38 = vshll.u32 %v268_v25, 16  ;;  %v496_v39 = vrot.slane %v494_v56, 4 }
  0x34   : > { %1078 = vmatmul.mubr.msk.bf16.vlgmr.msra.gmra.mrb[0].mxu1 %vm302_vm2, %v998_v32  ;;  %v473_v40 = vrot.slane %v472_v33, 4  ;;  %v486_v41 = vor.u32 %v485_v34, %v482_v29  ;;  %v499_v42 = vrot.slane %v497_v59, 5  ;;  %v503_v43 = vshll.u32 %v270_v30, 16 }
  0x35   : > { %v491_v44 = vrot.slane %v489_v38, 5  ;;  %v712_v45 = vor.u32 %v711_v3, %v708_v2  ;;  %v715_v46 = vshll.u32 %v272_v35, 16  ;;  %v274_v3 = vld [vmem:[#allocation2 + $0x8] sm:$0xff]  ;;  %vm814_vm6 = vcmask 261120  }
  0x36   : > { %v478_v47 = vsel %vm1391_vm5, %v473_v40, %v477_v37  ;;  %v487_v48 = vrot.slane %v486_v41, 4  ;;  %v500_v49 = vor.u32 %v499_v42, %v496_v39  ;;  %v505_v50 = vrot.slane %v503_v43, 5  ;;  %v1024_v37 = vld [vmem:[%s1478_s2] ss:$0 sm:$0xff] (!%p1023_p10) }
  0x37   : > { %1098 = vmatmul.mubr.msk.bf16.vlgmr.msra.gmra.mrb[0].mxu0 %vm302_vm2, %v1016_v36  ;;  %v999_v51 = vcombine.low %v464_v31, %v478_v47  ;;  %v713_v52 = vrot.slane %v712_v45, 4  ;;  %v717_v53 = vrot.slane %v715_v46, 5  ;;  %vm874_vm7 = vcmask (!%p1023_p10), 257024  }
  0x38   : > { %v492_v54 = vsel %vm1391_vm5, %v487_v48, %v491_v44  ;;  %v501_v55 = vrot.slane %v500_v49, 4 }
  0x39   : > { %1081 = vmatprep.mubr.msk.bf16.mxu1 %vm302_vm2, %v999_v51  ;;  %v1017_v56 = vcombine.low %v478_v47, %v492_v54  ;;  %v718_v57 = vsel %vm1391_vm5, %v713_v52, %v717_v53 }
  0x3a   : > { %v506_v58 = vsel %vm1391_vm5, %v501_v55, %v505_v50 }
  0x3b   : > { %1101 = vmatprep.mubr.msk.bf16.mxu0 %vm302_vm2, %v1017_v56  ;;  %v1000_v59 = vcombine.low %v492_v54, %v506_v58  ;;  %v1018_v60 = vcombine.low %v506_v58, %v718_v57 }
  0x3d   : > { %1082 = vmatmul.mubr.msk.bf16.gmra.mrb[4].mxu1 %vm302_vm2, %v1000_v59 }
  0x3f   : > { %1102 = vmatmul.mubr.msk.bf16.gmra.mrb[4].mxu0 %vm302_vm2, %v1018_v60 }
 0x107   : > { %v1079_v63 = vpop.f32.mrb[0].mxu1 }
 0x108   : > { %v1105_v1 = vadd.f32 %v1079_v63, %v275_v61  ;;  %v570_v2 = vpop.f32.mrb[1].mxu1 }
 0x109   : > { %v1107_v5 = vadd.f32 %v570_v2, %v273_v62  ;;  %v1080_v6 = vpop.f32.mrb[2].mxu1 }
 0x10a   : > { %v1099_v7 = vpop.f32.mrb[0].mxu0  ;;  %v1109_v4 = vadd.f32 %v1080_v6, %v276_v0  ;;  %v573_v8 = vpop.f32.mrb[3].mxu1 }
 0x10b   : > { %v1106_v9 = vadd.f32 %v1105_v1, %v1099_v7  ;;  %v775_v10 = vpop.f32.mrb[1].mxu0  ;;  %v1111_v11 = vadd.f32 %v573_v8, %v274_v3 }
 0x10c   : > { %v1108_v12 = vadd.f32 %v1107_v5, %v775_v10  ;;  %v1100_v13 = vpop.f32.mrb[2].mxu0 }
 0x10d   : > { %817 = vst.msk [vmem:[#allocation2 + $0x10] sm:$0xff] %vm814_vm6, %v1106_v9  ;;  %v1110_v14 = vadd.f32 %v1109_v4, %v1100_v13  ;;  %v778_v15 = vpop.f32.mrb[3].mxu0  ;;  %v836_v40 = vadd.f32 (!%p1023_p10), %v1106_v9, %v1024_v37 }
 0x10e   : > { %815 = vst.msk [vmem:[#allocation2] sm:$0xff] %vm814_vm6, %v1108_v12  ;;  %v1112_v16 = vadd.f32 %v1111_v11, %v778_v15  ;;  %v834_v38 = vadd.f32 (!%p1023_p10), %v1108_v12, %v1024_v37 }
 0x10f   : > { %818 = vst.msk [vmem:[#allocation2 + $0x18] sm:$0xff] %vm814_vm6, %v1110_v14  ;;  %v837_v41 = vadd.f32 (!%p1023_p10), %v1110_v14, %v1024_v37  ;;  %v1039_v48 = vpack.c.bf16 (!%p1023_p10), %v836_v40, %v836_v40 }
 0x110   : > { %816 = vst.msk [vmem:[#allocation2 + $0x8] sm:$0xff] %vm814_vm6, %v1112_v16  ;;  %v1083_v19 = vpop.f32.mrb[4].mxu1  ;;  %v835_v39 = vadd.f32 (!%p1023_p10), %v1112_v16, %v1024_v37  ;;  %v1037_v46 = vpack.c.bf16 (!%p1023_p10), %v834_v38, %v834_v38 }
 0x111   : > { %v1113_v21 = vadd.f32 %v1083_v19, %v279_v17  ;;  %v586_v22 = vpop.f32.mrb[5].mxu1  ;;  %v1040_v49 = vpack.c.bf16 (!%p1023_p10), %v837_v41, %v837_v41  ;;  %877 = vst.msk [vmem:[%s1344_s13 + $0x8] sm:$0xf] (!%p1023_p10), %vm874_vm7, %v1039_v48 }
 0x112   : > { %v1103_v24 = vpop.f32.mrb[4].mxu0  ;;  %v1115_v25 = vadd.f32 %v586_v22, %v277_v18  ;;  %v1084_v26 = vpop.f32.mrb[6].mxu1  ;;  %826 = sbr.rel (%p1023_p10) target bundleno = 285 (0x11d), region = 40  ;;  %v1038_v47 = vpack.c.bf16 (!%p1023_p10), %v835_v39, %v835_v39  ;;  %875 = vst.msk [vmem:[%s1344_s13] sm:$0xf] (!%p1023_p10), %vm874_vm7, %v1037_v46 }
 0x113   : > { %v1114_v27 = vadd.f32 %v1113_v21, %v1103_v24  ;;  %v791_v28 = vpop.f32.mrb[5].mxu0  ;;  %v1117_v29 = vadd.f32 %v1084_v26, %v280_v20  ;;  %v589_v30 = vpop.f32.mrb[7].mxu1  ;;  %878 = vst.msk [vmem:[%s1344_s13 + $0xc] sm:$0xf] (!%p1023_p10), %vm874_vm7, %v1040_v49 }
 0x114   : > { %v1116_v31 = vadd.f32 %v1115_v25, %v791_v28  ;;  %v1104_v32 = vpop.f32.mrb[6].mxu0  ;;  %v1119_v33 = vadd.f32 %v589_v30, %v278_v23  ;;  %876 = vst.msk [vmem:[%s1344_s13 + $0x4] sm:$0xf] (!%p1023_p10), %vm874_vm7, %v1038_v47 }
 0x115   : > { %821 = vst.msk [vmem:[#allocation2 + $0x30] sm:$0xff] %vm814_vm6, %v1114_v27  ;;  %v1118_v34 = vadd.f32 %v1117_v29, %v1104_v32  ;;  %v794_v35 = vpop.f32.mrb[7].mxu0  ;;  %v840_v44 = vadd.f32 (!%p1023_p10), %v1114_v27, %v1024_v37 }
 0x116   : > { %819 = vst.msk [vmem:[#allocation2 + $0x20] sm:$0xff] %vm814_vm6, %v1116_v31  ;;  %v1120_v36 = vadd.f32 %v1119_v33, %v794_v35  ;;  %v838_v42 = vadd.f32 (!%p1023_p10), %v1116_v31, %v1024_v37 }
 0x117   : > { %822 = vst.msk [vmem:[#allocation2 + $0x38] sm:$0xff] %vm814_vm6, %v1118_v34  ;;  %v841_v45 = vadd.f32 (!%p1023_p10), %v1118_v34, %v1024_v37  ;;  %v1043_v52 = vpack.c.bf16 (!%p1023_p10), %v840_v44, %v840_v44 }
 0x118   : > { %820 = vst.msk [vmem:[#allocation2 + $0x28] sm:$0xff] %vm814_vm6, %v1120_v36  ;;  %v839_v43 = vadd.f32 (!%p1023_p10), %v1120_v36, %v1024_v37  ;;  %v1041_v50 = vpack.c.bf16 (!%p1023_p10), %v838_v42, %v838_v42 }
 0x119   : > { %v1044_v53 = vpack.c.bf16 %v841_v45, %v841_v45  ;;  %881 = vst.msk [vmem:[%s1344_s13 + $0x18] sm:$0xf] %vm874_vm7, %v1043_v52 }
 0x11a   : > { %v1042_v51 = vpack.c.bf16 %v839_v43, %v839_v43  ;;  %879 = vst.msk [vmem:[%s1344_s13 + $0x10] sm:$0xf] %vm874_vm7, %v1041_v50 }
 0x11b   : > { %882 = vst.msk [vmem:[%s1344_s13 + $0x1c] sm:$0xf] %vm874_vm7, %v1044_v53 }
 0x11c   : > { %880 = vst.msk [vmem:[%s1344_s13 + $0x14] sm:$0xf] %vm874_vm7, %v1042_v51 }
 0x11d PF: > { %s13_s18 = sadd.s32 1, %s1261_s18   ;;  %s1482_s12 = smov %s1249_s15 }
 0x11e   : > { %p10_p11 = scmp.ge.s32.totalorder %s13_s18, 34   ;;  %s1483_s13 = smov %s1253_s16 }
 0x11f   : > { %s1484_s14 = smov %s1257_s17  ;;  %s1485_s15 = smov %s1489_s19 }
 0x120   : > { %s1486_s16 = smov %s1493_s20  ;;  %s1487_s17 = smov %s1497_s21 }
 0x121   :  { %12 = sbr.rel (!%p10_p11) target bundleno = 4 (0x4), region = 76 }

// kernel: _lambda_.17
= control target key start
LH: loop header
LB: loop body
LE: loop exit
PB: predicated region body
PF: predicated region fallthrough
CT: control target
= control target key end

     0   :  { %s583_s9 = smov 0   ;;  %s856_s0 = inlined_call_operand.vmem [shape: bf16[8,16,16,32], index: 0, kind: input, shape index: {}]   ;;  %s857_s1 = inlined_call_operand.vmem [shape: f32[8,1,32], index: 1, kind: output, shape index: {0}]   ;;  %s858_s2 = inlined_call_operand.vmem [shape: f32[8,1,32], index: 2, kind: output, shape index: {1}]  }
   0x1 LB: > { %s463_s10 = sadd.s32 4294967295, %s566_s9   ;;  %p467_p0 = scmp.ge.s32.totalorder %s566_s9, 1  ;;  %s566_s9 = sphi %s583_s9, %s13_s9  }
   0x2   : > { %p115_p1 = scmp.lt.s32.totalorder %s566_s9, 9 }
   0x4   : > { %p116_p2 = pnand %p467_p0, %p115_p1 }
   0x5   : > { %p138_p3 = scmp.lt.s32.totalorder (!%p116_p2), %s463_s10, 7  ;;  %vm213_vm0 = vcmask (!%p116_p2), 261120   ;;  %vm379_vm1 = vcmask (!%p116_p2), 253952  }
   0x6   : > { %119 = sbr.rel (%p116_p2) target bundleno = 92 (0x5c), region = 24 }
   0xd   : > { %s860_s10 = smov (!%p138_p3, %s463_s10), 7 }
   0xe   : > { %s472_s11 = sshll.u32 %s860_s10, 7  ;;  %s145_s17 = scalar_lea.vmem %s857_s1, %s860_s10 }
   0xf   : > { %s597_s14 = scalar_lea.vmem %s856_s0, %s472_s11  ;;  %s148_s20 = scalar_lea.vmem %s858_s2, %s860_s10 }
  0x10   : > { %v474_v0 = vld [vmem:[%s597_s14] sm:$0xff]   ;;  %v537_v1 = vld [vmem:[%s597_s14 + $0x8] sm:$0xff]   ;;  %v538_v2 = vld [vmem:[%s597_s14 + $0x10] sm:$0xff]  }
  0x11   : > { %v539_v3 = vld [vmem:[%s597_s14 + $0x18] sm:$0xff]   ;;  %v603_v4 = vunpack.c.l.bf16 %v474_v0  ;;  %v605_v5 = vunpack.c.l.bf16 %v537_v1  ;;  %v607_v6 = vunpack.c.l.bf16 %v538_v2  ;;  %v540_v7 = vld [vmem:[%s597_s14 + $0x20] sm:$0xff]   ;;  %v541_v9 = vld [vmem:[%s597_s14 + $0x28] sm:$0xff]   ;;  %v620_v14 = vunpack.c.h.bf16 %v474_v0 }
  0x12   : > { %v610_v8 = vunpack.c.l.bf16 %v539_v3  ;;  %v542_v10 = vld [vmem:[%s597_s14 + $0x30] sm:$0xff]   ;;  %v622_v15 = vunpack.c.h.bf16 %v537_v1  ;;  %v624_v16 = vunpack.c.h.bf16 %v538_v2  ;;  %v626_v18 = vunpack.c.h.bf16 %v539_v3  ;;  %v543_v21 = vld [vmem:[%s597_s14 + $0x38] sm:$0xff]   ;;  %v544_v26 = vld [vmem:[%s597_s14 + $0x40] sm:$0xff]  }
  0x13   : > { %v214_v11 = vsel %vm213_vm0, %v603_v4, 0.0  ;;  %v215_v12 = vsel %vm213_vm0, %v605_v5, 0.0  ;;  %v217_v13 = vsel %vm213_vm0, %v607_v6, 0.0  ;;  %v628_v19 = vunpack.c.l.bf16 %v540_v7  ;;  %v545_v29 = vld [vmem:[%s597_s14 + $0x48] sm:$0xff]   ;;  %v546_v34 = vld [vmem:[%s597_s14 + $0x50] sm:$0xff]   ;;  %v547_v40 = vld [vmem:[%s597_s14 + $0x58] sm:$0xff]  }
  0x14   : > { %v216_v17 = vadd.f32 %v215_v12, %v214_v11  ;;  %v630_v20 = vunpack.c.h.bf16 %v540_v7  ;;  %v219_v22 = vsel %vm213_vm0, %v610_v8, 0.0  ;;  %v635_v23 = vunpack.c.l.bf16 %v541_v9  ;;  %v548_v45 = vld [vmem:[%s597_s14 + $0x60] sm:$0xff]   ;;  %v549_v50 = vld [vmem:[%s597_s14 + $0x68] sm:$0xff]   ;;  %v550_v55 = vld [vmem:[%s597_s14 + $0x70] sm:$0xff]  }
  0x15   : > { %v637_v24 = vunpack.c.h.bf16 %v541_v9  ;;  %v639_v25 = vunpack.c.l.bf16 %v542_v10  ;;  %v642_v28 = vunpack.c.h.bf16 %v542_v10  ;;  %v221_v30 = vsel %vm213_vm0, %v628_v19, 0.0  ;;  %v551_v60 = vld [vmem:[%s597_s14 + $0x78] sm:$0xff]  }
  0x16   : > { %v218_v27 = vadd.f32 %v217_v13, %v216_v17  ;;  %v245_v31 = vsel %vm213_vm0, %v620_v14, 0.0  ;;  %v246_v32 = vsel %vm213_vm0, %v622_v15, 0.0  ;;  %v651_v33 = vunpack.c.l.bf16 %v543_v21 }
  0x17   : > { %v247_v36 = vadd.f32 %v246_v32, %v245_v31  ;;  %v248_v37 = vsel %vm213_vm0, %v624_v16, 0.0  ;;  %v656_v38 = vunpack.c.h.bf16 %v543_v21  ;;  %v658_v39 = vunpack.c.l.bf16 %v544_v26 }
  0x18   : > { %v220_v35 = vadd.f32 %v219_v22, %v218_v27  ;;  %v223_v41 = vsel %vm213_vm0, %v635_v23, 0.0  ;;  %v250_v42 = vsel %vm213_vm0, %v626_v18, 0.0  ;;  %v665_v43 = vunpack.c.h.bf16 %v544_v26 }
  0x19   : > { %v667_v44 = vunpack.c.l.bf16 %v545_v29  ;;  %v249_v47 = vadd.f32 %v248_v37, %v247_v36  ;;  %v670_v48 = vunpack.c.h.bf16 %v545_v29  ;;  %v672_v49 = vunpack.c.l.bf16 %v546_v34 }
  0x1a   : > { %v222_v46 = vadd.f32 %v221_v30, %v220_v35  ;;  %v225_v51 = vsel %vm213_vm0, %v639_v25, 0.0  ;;  %v252_v52 = vsel %vm213_vm0, %v630_v20, 0.0  ;;  %v679_v53 = vunpack.c.h.bf16 %v546_v34 }
  0x1b   : > { %v681_v54 = vunpack.c.l.bf16 %v547_v40  ;;  %v251_v57 = vadd.f32 %v250_v42, %v249_v47  ;;  %v684_v58 = vunpack.c.h.bf16 %v547_v40  ;;  %v686_v59 = vunpack.c.l.bf16 %v548_v45 }
  0x1c   : > { %v224_v56 = vadd.f32 %v223_v41, %v222_v46  ;;  %v227_v61 = vsel %vm213_vm0, %v651_v33, 0.0  ;;  %v254_v62 = vsel %vm213_vm0, %v637_v24, 0.0  ;;  %v693_v63 = vunpack.c.h.bf16 %v548_v45 }
  0x1d   : > { %v695_v0 = vunpack.c.l.bf16 %v549_v50  ;;  %v253_v2 = vadd.f32 %v252_v52, %v251_v57  ;;  %v697_v3 = vunpack.c.h.bf16 %v549_v50  ;;  %v699_v7 = vunpack.c.l.bf16 %v550_v55 }
  0x1e   : > { %v226_v1 = vadd.f32 %v225_v51, %v224_v56  ;;  %v229_v9 = vsel %vm213_vm0, %v658_v39, 0.0  ;;  %v256_v10 = vsel %vm213_vm0, %v642_v28, 0.0  ;;  %v705_v11 = vunpack.c.h.bf16 %v550_v55 }
  0x1f   : > { %v707_v12 = vunpack.c.l.bf16 %v551_v60  ;;  %v255_v17 = vadd.f32 %v254_v62, %v253_v2  ;;  %v709_v21 = vunpack.c.h.bf16 %v551_v60  ;;  %v231_v22 = vsel %vm213_vm0, %v667_v44, 0.0 }
  0x20   : > { %v228_v13 = vadd.f32 %v227_v61, %v226_v1  ;;  %v233_v26 = vsel %vm213_vm0, %v672_v49, 0.0  ;;  %v258_v27 = vsel %vm213_vm0, %v656_v38, 0.0  ;;  %v235_v30 = vsel %vm213_vm0, %v681_v54, 0.0 }
  0x21   : > { %v237_v31 = vsel %vm213_vm0, %v686_v59, 0.0  ;;  %v257_v32 = vadd.f32 %v256_v10, %v255_v17  ;;  %v239_v34 = vsel %vm213_vm0, %v695_v0, 0.0  ;;  %v260_v35 = vsel %vm213_vm0, %v665_v43, 0.0 }
  0x22   : > { %v230_v29 = vadd.f32 %v229_v9, %v228_v13  ;;  %v276_v36 = vmul.f32 %v603_v4, %v603_v4  ;;  %v278_v37 = vmul.f32 %v605_v5, %v605_v5  ;;  %v241_v41 = vsel %vm213_vm0, %v699_v7, 0.0 }
  0x23   : > { %v259_v42 = vadd.f32 %v258_v27, %v257_v32  ;;  %v280_v45 = vmul.f32 %v607_v6, %v607_v6  ;;  %v243_v46 = vsel %vm213_vm0, %v707_v12, 0.0  ;;  %v262_v47 = vsel %vm213_vm0, %v670_v48, 0.0 }
  0x24   : > { %v232_v40 = vadd.f32 %v231_v22, %v230_v29  ;;  %v264_v4 = vsel %vm213_vm0, %v679_v53, 0.0  ;;  %v282_v5 = vmul.f32 %v610_v8, %v610_v8  ;;  %v266_v52 = vsel %vm213_vm0, %v684_v58, 0.0 }
  0x25   : > { %v261_v51 = vadd.f32 %v260_v35, %v259_v42  ;;  %v268_v6 = vsel %vm213_vm0, %v693_v63, 0.0  ;;  %v270_v55 = vsel %vm213_vm0, %v697_v3, 0.0  ;;  %v284_v56 = vmul.f32 %v628_v19, %v628_v19 }
  0x26   : > { %v234_v50 = vadd.f32 %v233_v26, %v232_v40  ;;  %v308_v57 = vsel %vm213_vm0, %v276_v36, 0.0  ;;  %v309_v60 = vsel %vm213_vm0, %v278_v37, 0.0  ;;  %v311_v1 = vsel %vm213_vm0, %v280_v45, 0.0 }
  0x27   : > { %v263_v8 = vadd.f32 %v262_v47, %v261_v51  ;;  %v310_v62 = vadd.f32 %v309_v60, %v308_v57  ;;  %v272_v2 = vsel %vm213_vm0, %v705_v11, 0.0  ;;  %v277_v9 = vmul.f32 %v620_v14, %v620_v14 }
  0x28   : > { %v236_v61 = vadd.f32 %v235_v30, %v234_v50  ;;  %v286_v10 = vmul.f32 %v635_v23, %v635_v23  ;;  %v313_v19 = vsel %vm213_vm0, %v282_v5, 0.0  ;;  %v279_v22 = vmul.f32 %v622_v15, %v622_v15 }
  0x29   : > { %v265_v17 = vadd.f32 %v264_v4, %v263_v8  ;;  %v312_v26 = vadd.f32 %v311_v1, %v310_v62  ;;  %v274_v27 = vsel %vm213_vm0, %v709_v21, 0.0  ;;  %v281_v29 = vmul.f32 %v624_v16, %v624_v16 }
  0x2a   : > { %v238_v13 = vadd.f32 %v237_v31, %v236_v61  ;;  %v288_v14 = vmul.f32 %v639_v25, %v639_v25  ;;  %v315_v30 = vsel %vm213_vm0, %v284_v56, 0.0  ;;  %v283_v31 = vmul.f32 %v626_v18, %v626_v18 }
  0x2b   : > { %v267_v32 = vadd.f32 %v266_v52, %v265_v17  ;;  %v314_v35 = vadd.f32 %v313_v19, %v312_v26  ;;  %v285_v15 = vmul.f32 %v630_v20, %v630_v20  ;;  %v290_v36 = vmul.f32 %v651_v33, %v651_v33 }
  0x2c   : > { %v240_v23 = vadd.f32 %v239_v34, %v238_v13  ;;  %v317_v37 = vsel %vm213_vm0, %v286_v10, 0.0  ;;  %v339_v16 = vsel %vm213_vm0, %v277_v9, 0.0  ;;  %v340_v34 = vsel %vm213_vm0, %v279_v22, 0.0 }
  0x2d   : > { %v269_v25 = vadd.f32 %v268_v6, %v267_v32  ;;  %v316_v42 = vadd.f32 %v315_v30, %v314_v35  ;;  %v292_v45 = vmul.f32 %v658_v39, %v658_v39  ;;  %v319_v18 = vsel %vm213_vm0, %v288_v14, 0.0 }
  0x2e   : > { %v242_v40 = vadd.f32 %v241_v41, %v240_v23  ;;  %v341_v47 = vadd.f32 %v340_v34, %v339_v16  ;;  %v342_v20 = vsel %vm213_vm0, %v281_v29, 0.0  ;;  %v287_v33 = vmul.f32 %v637_v24, %v637_v24 }
  0x2f   : > { %v271_v4 = vadd.f32 %v270_v55, %v269_v25  ;;  %v318_v5 = vadd.f32 %v317_v37, %v316_v42  ;;  %v344_v50 = vsel %vm213_vm0, %v283_v31, 0.0  ;;  %v294_v51 = vmul.f32 %v667_v44, %v667_v44 }
  0x30   : > { %v244_v41 = vadd.f32 %v243_v46, %v242_v40  ;;  %v321_v52 = vsel %vm213_vm0, %v290_v36, 0.0  ;;  %v343_v6 = vadd.f32 %v342_v20, %v341_v47  ;;  %v289_v56 = vmul.f32 %v642_v28, %v642_v28 }
  0x31   : > { %v273_v39 = vadd.f32 %v272_v2, %v271_v4  ;;  %v320_v57 = vadd.f32 %v319_v18, %v318_v5  ;;  %v346_v55 = vsel %vm213_vm0, %v285_v15, 0.0  ;;  %v296_v24 = vmul.f32 %v672_v49, %v672_v49 }
  0x32   : > { %v323_v60 = vsel %vm213_vm0, %v292_v45, 0.0  ;;  %v345_v61 = vadd.f32 %v344_v50, %v343_v6  ;;  %v291_v44 = vmul.f32 %v656_v38, %v656_v38  ;;  %v348_v62 = vsel %vm213_vm0, %v287_v33, 0.0 }
  0x33   : > { %v275_v46 = vadd.f32 %v274_v27, %v273_v39  ;;  %v322_v8 = vadd.f32 %v321_v52, %v320_v57  ;;  %v298_v1 = vmul.f32 %v681_v54, %v681_v54  ;;  %v325_v28 = vsel %vm213_vm0, %v294_v51, 0.0 }
  0x34   : > { %v347_v2 = vadd.f32 %v346_v55, %v345_v61  ;;  %v370_v9 = vsel %vm213_vm0, %v244_v41, 0.0  ;;  %v293_v49 = vmul.f32 %v665_v43, %v665_v43  ;;  %v350_v19 = vsel %vm213_vm0, %v289_v56, 0.0 }
  0x35   : > { %v324_v10 = vadd.f32 %v323_v60, %v322_v8  ;;  %v371_v13 = vsel %vm213_vm0, %v275_v46, 0.0  ;;  %v300_v38 = vmul.f32 %v686_v59, %v686_v59  ;;  %v327_v17 = vsel %vm213_vm0, %v296_v24, 0.0 }
  0x36   : > { %v349_v22 = vadd.f32 %v348_v62, %v347_v2  ;;  %v372_v54 = vadd.f32 %v371_v13, %v370_v9  ;;  %v295_v26 = vmul.f32 %v670_v48, %v670_v48  ;;  %v352_v29 = vsel %vm213_vm0, %v291_v44, 0.0 }
  0x37   : > { %v326_v27 = vadd.f32 %v325_v28, %v324_v10  ;;  %v302_v43 = vmul.f32 %v695_v0, %v695_v0  ;;  %v329_v14 = vsel %vm213_vm0, %v298_v1, 0.0  ;;  %v297_v59 = vmul.f32 %v679_v53, %v679_v53 }
  0x38   : > { %v351_v30 = vadd.f32 %v350_v19, %v349_v22  ;;  %v373_v23 = vrot.slane %v372_v54, 4  ;;  %v354_v31 = vsel %vm213_vm0, %v293_v49, 0.0  ;;  %v331_v35 = vsel %vm213_vm0, %v300_v38, 0.0 }
  0x39   : > { %v328_v32 = vadd.f32 %v327_v17, %v326_v27  ;;  %v299_v36 = vmul.f32 %v684_v58, %v684_v58  ;;  %v304_v0 = vmul.f32 %v699_v7, %v699_v7  ;;  %v356_v16 = vsel %vm213_vm0, %v295_v26, 0.0 }
  0x3a   : > { %v353_v15 = vadd.f32 %v352_v29, %v351_v30  ;;  %v374_v48 = vadd.f32 %v373_v23, %v372_v54  ;;  %v333_v40 = vsel %vm213_vm0, %v302_v43, 0.0  ;;  %v301_v42 = vmul.f32 %v693_v63, %v693_v63 }
  0x3b   : > { %v330_v37 = vadd.f32 %v329_v14, %v328_v32  ;;  %v358_v45 = vsel %vm213_vm0, %v297_v59, 0.0  ;;  %v303_v58 = vmul.f32 %v697_v3, %v697_v3  ;;  %v306_v7 = vmul.f32 %v707_v12, %v707_v12 }
  0x3c   : > { %v355_v53 = vadd.f32 %v354_v31, %v353_v15  ;;  %v375_v25 = vrot.slane %v374_v48, 2  ;;  %v335_v4 = vsel %vm213_vm0, %v304_v0, 0.0  ;;  %v360_v33 = vsel %vm213_vm0, %v299_v36, 0.0 }
  0x3d   : > { %v332_v34 = vadd.f32 %v331_v35, %v330_v37  ;;  %v305_v63 = vmul.f32 %v705_v11, %v705_v11  ;;  %v362_v3 = vsel %vm213_vm0, %v301_v42, 0.0  ;;  %v307_v52 = vmul.f32 %v709_v21, %v709_v21 }
  0x3e   : > { %v357_v18 = vadd.f32 %v356_v16, %v355_v53  ;;  %v376_v47 = vadd.f32 %v375_v25, %v374_v48  ;;  %v337_v6 = vsel %vm213_vm0, %v306_v7, 0.0  ;;  %v364_v39 = vsel %vm213_vm0, %v303_v58, 0.0 }
  0x3f   : > { %v334_v20 = vadd.f32 %v333_v40, %v332_v34  ;;  %v366_v57 = vsel %vm213_vm0, %v305_v63, 0.0  ;;  %v368_v24 = vsel %vm213_vm0, %v307_v52, 0.0 }
  0x40   : > { %v359_v5 = vadd.f32 %v358_v45, %v357_v18  ;;  %v377_v50 = vrot.slane %v376_v47, 1 }
  0x41   : > { %v336_v41 = vadd.f32 %v335_v4, %v334_v20 }
  0x42   : > { %v361_v51 = vadd.f32 %v360_v33, %v359_v5  ;;  %v378_v12 = vadd.f32 %v377_v50, %v376_v47 }
  0x43   : > { %v338_v11 = vadd.f32 %v337_v6, %v336_v41 }
  0x44   : > { %v363_v56 = vadd.f32 %v362_v3, %v361_v51  ;;  %380 = vst.msk [vmem:[%s145_s17] sm:$0x1] %vm379_vm1, %v378_v12 }
  0x45   : > { %v381_v46 = vsel %vm213_vm0, %v338_v11, 0.0 }
  0x46   : > { %v365_v55 = vadd.f32 %v364_v39, %v363_v56 }
  0x48   : > { %v367_v60 = vadd.f32 %v366_v57, %v365_v55 }
  0x4a   : > { %v369_v61 = vadd.f32 %v368_v24, %v367_v60 }
  0x4c   : > { %v382_v21 = vsel %vm213_vm0, %v369_v61, 0.0 }
  0x4d   : > { %v383_v44 = vadd.f32 %v382_v21, %v381_v46 }
  0x4f   : > { %v384_v8 = vrot.slane %v383_v44, 4 }
  0x51   : > { %v385_v62 = vadd.f32 %v384_v8, %v383_v44 }
  0x53   : > { %v386_v1 = vrot.slane %v385_v62, 2 }
  0x55   : > { %v387_v28 = vadd.f32 %v386_v1, %v385_v62 }
  0x57   : > { %v388_v2 = vrot.slane %v387_v28, 1 }
  0x59   : > { %v389_v9 = vadd.f32 %v388_v2, %v387_v28 }
  0x5b   : > { %390 = vst.msk [vmem:[%s148_s20] sm:$0x1] %vm379_vm1, %v389_v9 }
  0x5c PF: > { %s13_s9 = sadd.s32 1, %s566_s9  }
  0x5d   : > { %p10_p4 = scmp.ge.s32.totalorder %s13_s9, 10  }
  0x5f   :  { %12 = sbr.rel (!%p10_p4) target bundleno = 1 (0x1), region = 66 }

// kernel: _lambda_.18
= control target key start
LH: loop header
LB: loop body
LE: loop exit
PB: predicated region body
PF: predicated region fallthrough
CT: control target
= control target key end

     0   :  { %s5155_s18 = smov 0   ;;  %s5157_s19 = smov 0   ;;  %s6524_s0 = inlined_call_operand.vmem [shape: bf16[12,18,18,32], index: 0, kind: input, shape index: {}]   ;;  %s6525_s1 = inlined_call_operand.vmem [shape: bf16[3,9,32,32], index: 1, kind: input, shape index: {}]   ;;  %s6526_s2 = inlined_call_operand.vmem [shape: f32[1,32], index: 2, kind: input, shape index: {}]   ;;  %s6527_s3 = inlined_call_operand.vmem [shape: f32[2,1,32], index: 3, kind: input, shape index: {}]   ;;  %s6528_s4 = inlined_call_operand.vmem [shape: f32[2,1,32], index: 4, kind: input, shape index: {}]   ;;  %s6529_s5 = inlined_call_operand.vmem [shape: bf16[8,256,32], index: 5, kind: output, shape index: {}]  }
   0x1   :  { %s5159_s20 = smov 0   ;;  %s5161_s21 = smov 0  }
   0x2   :  { %s5163_s22 = smov 0   ;;  %s5165_s23 = smov 0  }
   0x3   :  { %s5167_s24 = smov 0  }
   0x4 LB: > { %s27_s25 = sadd.s32 1, %s5110_s21  ;;  %s30_s26 = sadd.s32 1, %s5114_s22  ;;  %s5122_s24 = sphi %s5167_s24, %s15_s24   ;;  %s5118_s23 = sphi %s5165_s23, %s6558_s23   ;;  %s5114_s22 = sphi %s5163_s22, %s6557_s22   ;;  %s5110_s21 = sphi %s5161_s21, %s6556_s21   ;;  %s5106_s20 = sphi %s5159_s20, %s6555_s20   ;;  %s5102_s19 = sphi %s5157_s19, %s6554_s19   ;;  %s5098_s18 = sphi %s5155_s18, %s6553_s18  }
   0x5   : > { %p28_p0 = scmp.ge.s32.totalorder %s27_s25, 3  ;;  %p3676_p1 = scmp.ge.s32.totalorder %s5122_s24, 1 }
   0x6   : > { %p248_p2 = scmp.lt.s32.totalorder %s5122_s24, 25  ;;  %s34_s27 = sadd.s32 1, %s5118_s23 }
   0x7   : > { %s6560_s25 = smov (%p28_p0, %s27_s25), 0  ;;  %s6562_s26 = smov (!%p28_p0, %s30_s26), %s5114_s22 }
   0x8   : > { %p249_p3 = pnand %p3676_p1, %p248_p2  ;;  %p32_p4 = scmp.ge.s32.totalorder %s6562_s26, 4 }
   0xa   : > { %s6564_s26 = smov (%p32_p4, %s6562_s26), 0  ;;  %s6566_s27 = smov (!%p32_p4, %s34_s27), %s5118_s23 }
   0xb   : > { %p36_p5 = scmp.ge.s32.totalorder %s6566_s27, 2  ;;  %252 = sbr.rel (%p249_p3) target bundleno = 649 (0x289), region = 40 }
   0xd   : > { %s6568_s27 = smov (%p36_p5, %s6566_s27), 0 }
  0x12   : > { %s292_s28 = smul.u32 6, %s5106_s20  ;;  %p303_p6 = scmp.lt.s32.totalorder %s5098_s18, 2 }
  0x13   : > { %s3679_s29 = sshll.u32 %s5106_s20, 2  ;;  %p308_p8 = scmp.lt.s32.totalorder %s5106_s20, 1 }
  0x14   : > { %s293_s30 = sadd.s32 %s5102_s19, %s292_s28  ;;  %s315_s7 = sadd.s32 %s5102_s19, %s3679_s29 }
  0x15   : > { %s294_s6 = sadd.s32 %s5098_s18, %s293_s30  ;;  %p316_p9 = scmp.lt.s32.totalorder %s315_s7, 7 }
  0x16   : > { %p295_p7 = scmp.lt.s32.totalorder %s294_s6, 11  ;;  %s6572_s20 = smov (!%p308_p8, %s5106_s20), 1 }
  0x17   : > { %s304_s8 = scalar_select %p303_p6, %s5098_s18, 2 }
  0x18   : > { %s6570_s6 = smov (!%p295_p7, %s294_s6), 11  ;;  %s6574_s7 = smov (!%p316_p9, %s315_s7), 7 }
  0x19   : > { %s4771_s9 = smul.u32 144, %s304_s8  ;;  %s5221_s28 = scalar_lea.vmem %s6527_s3, %s6572_s20 }
  0x1a   : > { %s4770_s10 = smul.u32 216, %s6570_s6  ;;  %s5226_s6 = scalar_lea.vmem %s6528_s4, %s6572_s20 }
  0x1b   : > { %s5210_s13 = scalar_lea.vmem %s6525_s1, %s4771_s9  ;;  %s3915_s8 = sshll.u32 %s6574_s7, 7 }
  0x1c   : > { %s5215_s16 = scalar_lea.vmem %s6524_s0, %s4770_s10  ;;  %s5231_s12 = scalar_lea.vmem %s6529_s5, %s3915_s8 }
  0x1d   : > { %p3682_p10 = scmp.ne.s32.totalorder %s5098_s18, 0 }
  0x1e   : > { %vm328_vm0 = vcmask (!%p3682_p10), 261120   ;;  %v5124_v0 = vmov (!%p3682_p10), 0.0  }
  0x1f   : > { %327 = sbr.rel (%p3682_p10) target bundleno = 47 (0x2f), region = 44  ;;  %329 = vst.msk [vmem:[#allocation2] sm:$0xff] (!%p3682_p10), %vm328_vm0, %v5124_v0  ;;  %330 = vst.msk [vmem:[#allocation2 + $0x8] sm:$0xff] (!%p3682_p10), %vm328_vm0, %v5124_v0 }
  0x20   : > { %331 = vst.msk [vmem:[#allocation2 + $0x10] sm:$0xff] (!%p3682_p10), %vm328_vm0, %v5124_v0  ;;  %332 = vst.msk [vmem:[#allocation2 + $0x18] sm:$0xff] (!%p3682_p10), %vm328_vm0, %v5124_v0 }
  0x21   : > { %333 = vst.msk [vmem:[#allocation2 + $0x20] sm:$0xff] (!%p3682_p10), %vm328_vm0, %v5124_v0  ;;  %334 = vst.msk [vmem:[#allocation2 + $0x28] sm:$0xff] (!%p3682_p10), %vm328_vm0, %v5124_v0 }
  0x22   : > { %335 = vst.msk [vmem:[#allocation2 + $0x30] sm:$0xff] (!%p3682_p10), %vm328_vm0, %v5124_v0  ;;  %336 = vst.msk [vmem:[#allocation2 + $0x38] sm:$0xff] (!%p3682_p10), %vm328_vm0, %v5124_v0 }
  0x23   : > { %337 = vst.msk [vmem:[#allocation2 + $0x40] sm:$0xff] (!%p3682_p10), %vm328_vm0, %v5124_v0  ;;  %338 = vst.msk [vmem:[#allocation2 + $0x48] sm:$0xff] (!%p3682_p10), %vm328_vm0, %v5124_v0 }
  0x24   : > { %339 = vst.msk [vmem:[#allocation2 + $0x50] sm:$0xff] (!%p3682_p10), %vm328_vm0, %v5124_v0  ;;  %340 = vst.msk [vmem:[#allocation2 + $0x58] sm:$0xff] (!%p3682_p10), %vm328_vm0, %v5124_v0 }
  0x25   : > { %341 = vst.msk [vmem:[#allocation2 + $0x60] sm:$0xff] (!%p3682_p10), %vm328_vm0, %v5124_v0  ;;  %342 = vst.msk [vmem:[#allocation2 + $0x68] sm:$0xff] (!%p3682_p10), %vm328_vm0, %v5124_v0 }
  0x26   : > { %343 = vst.msk [vmem:[#allocation2 + $0x70] sm:$0xff] %vm328_vm0, %v5124_v0  ;;  %344 = vst.msk [vmem:[#allocation2 + $0x78] sm:$0xff] %vm328_vm0, %v5124_v0 }
  0x27   : > { %345 = vst.msk [vmem:[#allocation2 + $0x80] sm:$0xff] %vm328_vm0, %v5124_v0  ;;  %346 = vst.msk [vmem:[#allocation2 + $0x88] sm:$0xff] %vm328_vm0, %v5124_v0 }
  0x28   : > { %347 = vst.msk [vmem:[#allocation2 + $0x90] sm:$0xff] %vm328_vm0, %v5124_v0  ;;  %348 = vst.msk [vmem:[#allocation2 + $0x98] sm:$0xff] %vm328_vm0, %v5124_v0 }
  0x29   : > { %349 = vst.msk [vmem:[#allocation2 + $0xa0] sm:$0xff] %vm328_vm0, %v5124_v0  ;;  %350 = vst.msk [vmem:[#allocation2 + $0xa8] sm:$0xff] %vm328_vm0, %v5124_v0 }
  0x2a   : > { %351 = vst.msk [vmem:[#allocation2 + $0xb0] sm:$0xff] %vm328_vm0, %v5124_v0  ;;  %352 = vst.msk [vmem:[#allocation2 + $0xb8] sm:$0xff] %vm328_vm0, %v5124_v0 }
  0x2b   : > { %353 = vst.msk [vmem:[#allocation2 + $0xc0] sm:$0xff] %vm328_vm0, %v5124_v0  ;;  %354 = vst.msk [vmem:[#allocation2 + $0xc8] sm:$0xff] %vm328_vm0, %v5124_v0 }
  0x2c   : > { %355 = vst.msk [vmem:[#allocation2 + $0xd0] sm:$0xff] %vm328_vm0, %v5124_v0  ;;  %356 = vst.msk [vmem:[#allocation2 + $0xd8] sm:$0xff] %vm328_vm0, %v5124_v0 }
  0x2d   : > { %357 = vst.msk [vmem:[#allocation2 + $0xe0] sm:$0xff] %vm328_vm0, %v5124_v0  ;;  %358 = vst.msk [vmem:[#allocation2 + $0xe8] sm:$0xff] %vm328_vm0, %v5124_v0 }
  0x2e   : > { %359 = vst.msk [vmem:[#allocation2 + $0xf0] sm:$0xff] %vm328_vm0, %v5124_v0  ;;  %360 = vst.msk [vmem:[#allocation2 + $0xf8] sm:$0xff] %vm328_vm0, %v5124_v0 }
  0x2f PF: > { %v4829_v1 = vld [vmem:[%s5210_s13] sm:$0xff]   ;;  %v4830_v2 = vld [vmem:[%s5210_s13 + $0x8] sm:$0xff]   ;;  %v5281_v15 = vld [vmem:[%s5210_s13 + $0x10] sm:$0xff]   ;;  %vm999_vm1 = vcmask 261120   ;;  %vm1241_vm2 = vsmask.f32 7424 }
  0x30   : > { %4154 = vmatprep.subr.bf16.mxu1 %v4829_v1  ;;  %v4831_v3 = vld [vmem:[%s5210_s13 + $0x40] sm:$0xff]   ;;  %v364_v9 = vld [vmem:[%s5215_s16 + $0xc] sm:$0xff]   ;;  %v366_v16 = vld [vmem:[%s5215_s16 + $0x14] sm:$0x1]  ;;  %vm1708_vm3 = vcmask 1046528   ;;  %p3879_p11 = scmp.ne.s32.totalorder %s5098_s18, 2 }
  0x31   : > { %4155 = vmatpush3.bf16.msra.mxu1 %v4829_v1  ;;  %v3949_v4 = vld [vmem:[%s5215_s16] sm:$0xff]   ;;  %4298 = vmatprep.subr.bf16.mxu0 %v4831_v3  ;;  %v418_v10 = vunpack.c.l.bf16 %v364_v9  ;;  %v419_v11 = vunpack.c.h.bf16 %v364_v9  ;;  %v4832_v12 = vld [vmem:[%s5210_s13 + $0x48] sm:$0xff]   ;;  %v5285_v17 = vld [vmem:[%s5210_s13 + $0x50] sm:$0xff]   ;;  %v420_v20 = vunpack.c.l.bf16 %v366_v16  ;;  %vm3528_vm4 = vcmask (!%p3879_p11), 257024  }
  0x32   : > { %v5271_v5 = vld [vmem:[%s5221_s28] ss:$0 sm:$0xff]  ;;  %4156 = vmatprep.subr.bf16.mxu1 %v4830_v2  ;;  %v3950_v7 = vunpack.c.l.bf16 %v3949_v4  ;;  %v3951_v8 = vunpack.c.h.bf16 %v3949_v4  ;;  %4299 = vmatpush3.bf16.msra.mxu0 %v4831_v3  ;;  %v3984_v21 = vld [vmem:[%s5215_s16 + $0x18] sm:$0xff]   ;;  %v370_v39 = vld [vmem:[%s5215_s16 + $0x24] sm:$0xff]  }
  0x33   : > { %v5274_v6 = vld [vmem:[%s5226_s6] ss:$0 sm:$0xff]  ;;  %v479_v18 = vmul.f32 %v5271_v5, %v418_v10  ;;  %v480_v19 = vmul.f32 %v5271_v5, %v419_v11  ;;  %4300 = vmatprep.subr.bf16.mxu0 %v4832_v12  ;;  %v3954_v24 = vunpack.c.l.bf16 %v3984_v21  ;;  %v3955_v25 = vunpack.c.h.bf16 %v3984_v21  ;;  %v372_v51 = vld [vmem:[%s5215_s16 + $0x2c] sm:$0x1]  ;;  %v3985_v55 = vld [vmem:[%s5215_s16 + $0x30] sm:$0xff]  }
  0x34   : > { %v476_v13 = vmul.f32 %v3950_v7, %v5271_v5  ;;  %v477_v14 = vmul.f32 %v3951_v8, %v5271_v5  ;;  %v369_v26 = vld [vmem:[%s5215_s16 + $0x20] sm:$0x1]  ;;  %v481_v29 = vmul.f32 %v5271_v5, %v420_v20  ;;  %v424_v50 = vunpack.c.l.bf16 %v370_v39  ;;  %v375_v56 = vld [vmem:[%s5215_s16 + $0x38] sm:$0x1] }
  0x35   : > { %4157 = vmatpush3.bf16.msra.mxu1 %v4830_v2  ;;  %v5299_v27 = vadd.f32 %v5274_v6, %v479_v18  ;;  %v5302_v28 = vadd.f32 %v5274_v6, %v480_v19  ;;  %v423_v30 = vunpack.c.l.bf16 %v369_v26  ;;  %v482_v33 = vmul.f32 %v3954_v24, %v5271_v5  ;;  %v376_v7 = vld [vmem:[%s5215_s16 + $0x3c] sm:$0xff]  }
  0x36   : > { %v5291_v22 = vadd.f32 %v5274_v6, %v476_v13  ;;  %v5294_v23 = vadd.f32 %v5274_v6, %v477_v14  ;;  %4190 = vmatprep.subr.bf16.mxu1 %v5281_v15  ;;  %4301 = vmatpush3.bf16.msra.mxu0 %v4832_v12  ;;  %v483_v34 = vmul.f32 %v3955_v25, %v5271_v5  ;;  %v425_v54 = vunpack.c.h.bf16 %v370_v39 }
  0x37   : > { %4334 = vmatprep.subr.bf16.mxu0 %v5285_v17  ;;  %v594_v35 = vsub.f32 0.0, %v5299_v27  ;;  %v595_v36 = vsub.f32 0.0, %v5302_v28  ;;  %v5313_v37 = vadd.f32 %v5274_v6, %v481_v29  ;;  %v484_v38 = vmul.f32 %v5271_v5, %v423_v30 }
  0x38   : > { %v591_v31 = vsub.f32 0.0, %v5291_v22  ;;  %v592_v32 = vsub.f32 0.0, %v5294_v23  ;;  %v5318_v42 = vadd.f32 %v5274_v6, %v482_v33  ;;  %v5321_v43 = vadd.f32 %v5274_v6, %v483_v34 }
  0x39   : > { %v651_v44 = vmul.f32 1.442695, %v594_v35  ;;  %v653_v45 = vmul.f32 1.442695, %v595_v36  ;;  %v596_v46 = vsub.f32 0.0, %v5313_v37  ;;  %v5325_v47 = vadd.f32 %v5274_v6, %v484_v38 }
  0x3a   : > { %v645_v40 = vmul.f32 1.442695, %v591_v31  ;;  %v647_v41 = vmul.f32 1.442695, %v592_v32  ;;  %v597_v48 = vsub.f32 0.0, %v5318_v42  ;;  %v598_v49 = vsub.f32 0.0, %v5321_v43 }
  0x3b   : > { %v655_v52 = vmul.f32 1.442695, %v596_v46  ;;  %v599_v53 = vsub.f32 0.0, %v5325_v47  ;;  %v485_v59 = vmul.f32 %v5271_v5, %v424_v50  ;;  %v486_v61 = vmul.f32 %v5271_v5, %v425_v54  ;;  %v378_v36 = vld [vmem:[%s5215_s16 + $0x44] sm:$0x1] }
  0x3c   : > { %4847 = vpow2.f32 %v645_v40  ;;  %v657_v57 = vmul.f32 1.442695, %v597_v48  ;;  %v659_v58 = vmul.f32 1.442695, %v598_v49  ;;  %v426_v62 = vunpack.c.l.bf16 %v372_v51 }
  0x3d   : > { %4849 = vpow2.f32 %v647_v41  ;;  %v661_v60 = vmul.f32 1.442695, %v599_v53  ;;  %v5336_v63 = vadd.f32 %v5274_v6, %v485_v59  ;;  %v3958_v0 = vunpack.c.l.bf16 %v3985_v55  ;;  %v381_v59 = vld [vmem:[%s5215_s16 + $0x50] sm:$0x1] }
  0x3e   : > { %4851 = vpow2.f32 %v651_v44  ;;  %v3959_v1 = vunpack.c.h.bf16 %v3985_v55  ;;  %v5339_v2 = vadd.f32 %v5274_v6, %v486_v61  ;;  %v487_v3 = vmul.f32 %v5271_v5, %v426_v62 }
  0x3f   : > { %4853 = vpow2.f32 %v653_v45  ;;  %v429_v4 = vunpack.c.l.bf16 %v375_v56  ;;  %v600_v8 = vsub.f32 0.0, %v5336_v63  ;;  %v488_v9 = vmul.f32 %v3958_v0, %v5271_v5  ;;  %v3986_v45 = vld [vmem:[%s5215_s16 + $0x48] sm:$0xff]  }
  0x40   : > { %4855 = vpow2.f32 %v655_v52  ;;  %v489_v10 = vmul.f32 %v3959_v1, %v5271_v5  ;;  %v601_v11 = vsub.f32 0.0, %v5339_v2  ;;  %v5348_v12 = vadd.f32 %v5274_v6, %v487_v3 }
  0x41   : > { %4857 = vpow2.f32 %v657_v57  ;;  %v490_v13 = vmul.f32 %v5271_v5, %v429_v4  ;;  %v663_v14 = vmul.f32 1.442695, %v600_v8  ;;  %v5352_v16 = vadd.f32 %v5274_v6, %v488_v9  ;;  %v382_v8 = vld [vmem:[%s5215_s16 + $0x54] sm:$0xff]  }
  0x42   : > { %4859 = vpow2.f32 %v659_v58  ;;  %v5355_v18 = vadd.f32 %v5274_v6, %v489_v10  ;;  %v430_v19 = vunpack.c.l.bf16 %v376_v7  ;;  %v665_v20 = vmul.f32 1.442695, %v601_v11 }
  0x43   : > { %4861 = vpow2.f32 %v661_v60  ;;  %v602_v21 = vsub.f32 0.0, %v5348_v12  ;;  %v5359_v24 = vadd.f32 %v5274_v6, %v490_v13  ;;  %v431_v25 = vunpack.c.h.bf16 %v376_v7 }
  0x44   : > { %4863 = vpow2.f32 %v663_v14  ;;  %v603_v29 = vsub.f32 0.0, %v5352_v16  ;;  %v604_v30 = vsub.f32 0.0, %v5355_v18  ;;  %v491_v31 = vmul.f32 %v5271_v5, %v430_v19 }
  0x45   : > { %4865 = vpow2.f32 %v665_v20  ;;  %v667_v34 = vmul.f32 1.442695, %v602_v21  ;;  %v605_v35 = vsub.f32 0.0, %v5359_v24  ;;  %v492_v44 = vmul.f32 %v5271_v5, %v431_v25 }
  0x46   : > { %v4848_v26 = vpop.eup %4847  ;;  %v669_v40 = vmul.f32 1.442695, %v603_v29  ;;  %v5366_v41 = vmul.f32 1.442695, %v604_v30  ;;  %v5373_v50 = vadd.f32 %v5274_v6, %v491_v31  ;;  %v432_v54 = vunpack.c.l.bf16 %v378_v36 }
  0x47   : > { %v4850_v32 = vpop.eup %4849  ;;  %v753_v33 = vadd.f32 1.0, %v4848_v26  ;;  %v5370_v49 = vmul.f32 1.442695, %v605_v35  ;;  %v5376_v53 = vadd.f32 %v5274_v6, %v492_v44  ;;  %v3962_v58 = vunpack.c.l.bf16 %v3986_v45 }
  0x48   : > { %v4852_v38 = vpop.eup %4851  ;;  %v754_v39 = vadd.f32 1.0, %v4850_v32  ;;  %v606_v57 = vsub.f32 0.0, %v5373_v50  ;;  %v493_v0 = vmul.f32 %v5271_v5, %v432_v54  ;;  %v3963_v7 = vunpack.c.h.bf16 %v3986_v45 }
  0x49   : > { %v4854_v46 = vpop.eup %4853  ;;  %4867 = vrcp.f32 %v753_v33  ;;  %v756_v48 = vadd.f32 1.0, %v4852_v38  ;;  %v607_v62 = vsub.f32 0.0, %v5376_v53  ;;  %v494_v13 = vmul.f32 %v3962_v58, %v5271_v5 }
  0x4a   : > { %v4856_v51 = vpop.eup %4855  ;;  %4869 = vrcp.f32 %v754_v39  ;;  %v757_v52 = vadd.f32 1.0, %v4854_v46  ;;  %v675_v4 = vmul.f32 1.442695, %v606_v57  ;;  %v5384_v11 = vadd.f32 %v5274_v6, %v493_v0 }
  0x4b   : > { %v4858_v55 = vpop.eup %4857  ;;  %4871 = vrcp.f32 %v756_v48  ;;  %v758_v56 = vadd.f32 1.0, %v4856_v51  ;;  %v677_v10 = vmul.f32 1.442695, %v607_v62  ;;  %v495_v14 = vmul.f32 %v3963_v7, %v5271_v5 }
  0x4c   : > { %v4860_v60 = vpop.eup %4859  ;;  %4873 = vrcp.f32 %v757_v52  ;;  %v759_v61 = vadd.f32 1.0, %v4858_v55  ;;  %v435_v19 = vunpack.c.l.bf16 %v381_v59  ;;  %v608_v21 = vsub.f32 0.0, %v5384_v11 }
  0x4d   : > { %v4862_v1 = vpop.eup %4861  ;;  %4875 = vrcp.f32 %v758_v56  ;;  %v760_v3 = vadd.f32 1.0, %v4860_v60  ;;  %v436_v25 = vunpack.c.l.bf16 %v382_v8  ;;  %v437_v26 = vunpack.c.h.bf16 %v382_v8 }
  0x4e   : > { %4877 = vrcp.f32 %v759_v61  ;;  %v761_v9 = vadd.f32 1.0, %v4862_v1  ;;  %v4864_v20 = vpop.eup %4863  ;;  %v5390_v31 = vadd.f32 %v5274_v6, %v494_v13  ;;  %v5393_v32 = vadd.f32 %v5274_v6, %v495_v14 }
  0x4f   : > { %4879 = vrcp.f32 %v760_v3  ;;  %v4866_v29 = vpop.eup %4865  ;;  %v762_v30 = vadd.f32 1.0, %v4864_v20  ;;  %v679_v35 = vmul.f32 1.442695, %v608_v21  ;;  %v496_v36 = vmul.f32 %v5271_v5, %v435_v19 }
  0x50   : > { %4881 = vrcp.f32 %v761_v9  ;;  %v763_v33 = vadd.f32 1.0, %v4866_v29  ;;  %v609_v39 = vsub.f32 0.0, %v5390_v31  ;;  %v610_v44 = vsub.f32 0.0, %v5393_v32 }
  0x51   : > { %4883 = vpow2.f32 %v667_v34  ;;  %v497_v45 = vmul.f32 %v5271_v5, %v436_v25  ;;  %v5401_v48 = vadd.f32 %v5274_v6, %v496_v36 }
  0x52   : > { %4885 = vpow2.f32 %v669_v40  ;;  %v498_v40 = vmul.f32 %v5271_v5, %v437_v26  ;;  %v681_v54 = vmul.f32 1.442695, %v609_v39  ;;  %v683_v55 = vmul.f32 1.442695, %v610_v44 }
  0x53   : > { %v4868_v38 = vpop.eup %4867  ;;  %4887 = vrcp.f32 %v762_v30  ;;  %v5410_v58 = vadd.f32 %v5274_v6, %v497_v45 }
  0x54   : > { %v4870_v34 = vpop.eup %4869  ;;  %v808_v46 = vmul.f32 %v4868_v38, %v5291_v22  ;;  %4889 = vrcp.f32 %v763_v33  ;;  %v611_v22 = vsub.f32 0.0, %v5401_v48  ;;  %v4838_v33 = vld [vmem:[%s5210_s13 + $0x20] sm:$0xff]  }
  0x55   : > { %v4872_v51 = vpop.eup %4871  ;;  %v810_v52 = vmul.f32 %v4870_v34, %v5294_v23  ;;  %4891 = vpow2.f32 %v5366_v41  ;;  %v5416_v41 = vadd.f32 %v5274_v6, %v498_v40  ;;  %v612_v62 = vsub.f32 0.0, %v5410_v58 }
  0x56   : > { %v4874_v56 = vpop.eup %4873  ;;  %v814_v57 = vmul.f32 %v4872_v51, %v5299_v27  ;;  %4893 = vpow2.f32 %v5370_v49  ;;  %v685_v49 = vmul.f32 1.442695, %v611_v22 }
  0x57   : > { %v4876_v59 = vpop.eup %4875  ;;  %v5412_v60 = vpack.c.bf16 %v810_v52, %v808_v46  ;;  %v816_v23 = vmul.f32 %v4874_v56, %v5302_v28  ;;  %4895 = vpow2.f32 %v675_v4  ;;  %v613_v28 = vsub.f32 0.0, %v5416_v41  ;;  %v4836_v4 = vld [vmem:[%s5210_s13 + $0x18] sm:$0xff]  }
  0x58   : > { %v4878_v61 = vpop.eup %4877  ;;  %v818_v27 = vmul.f32 %v4876_v59, %v5313_v37  ;;  %4897 = vpow2.f32 %v677_v10  ;;  %v687_v9 = vmul.f32 1.442695, %v612_v62 }
  0x59   : > { %v4880_v0 = vpop.eup %4879  ;;  %4158 = vmatprep.mubr.msk.bf16.mxu1 %vm999_vm1, %v5412_v60  ;;  %v5422_v1 = vpack.c.bf16 %v816_v23, %v814_v57  ;;  %v820_v3 = vmul.f32 %v4878_v61, %v5318_v42  ;;  %4899 = vpow2.f32 %v679_v35  ;;  %v689_v52 = vmul.f32 1.442695, %v613_v28  ;;  %v384_v57 = vld [vmem:[%s5215_s16 + $0x5c] sm:$0x1]  ;;  %v3987_v61 = vld [vmem:[%s5215_s16 + $0x60] sm:$0xff]  }
  0x5a   : > { %v4882_v7 = vpop.eup %4881  ;;  %v5427_v8 = vpack.c.bf16 %v818_v27, %v818_v27  ;;  %v822_v37 = vmul.f32 %v4880_v0, %v5321_v43  ;;  %4901 = vpow2.f32 %v681_v54 }
  0x5b   : > { %6539 = vst [vmem:[#allocation3_spill] sm:$0xff] %v5422_v1  ;;  %v4884_v10 = vpop.eup %4883  ;;  %4159 = vmatmul.mubr.msk.bf16.vlgmr.msra.gmra.mrb[0].mxu1 %vm999_vm1, %v5422_v1  ;;  %v1253_v13 = vshrl.u32 %v5422_v1, 16  ;;  %v1255_v42 = vshll.u32 %v5422_v1, 16  ;;  %v824_v14 = vmul.f32 %v4882_v7, %v5325_v47  ;;  %4903 = vpow2.f32 %v683_v55 }
  0x5c   : > { %v4886_v19 = vpop.eup %4885  ;;  %4191 = vmatpush3.bf16.msra.mxu1 %v5281_v15  ;;  %v1260_v20 = vshll.u32 %v5427_v8, 16  ;;  %v5437_v43 = vpack.c.bf16 %v822_v37, %v820_v3  ;;  %v764_v21 = vadd.f32 1.0, %v4884_v10  ;;  %4905 = vpow2.f32 %v685_v49  ;;  %v4835_v3 = vld [vmem:[%s5210_s13 + $0x58] sm:$0xff]  }
  0x5d   : > { %v4888_v25 = vpop.eup %4887  ;;  %v1257_v26 = vrot.slane %v1255_v42, 1  ;;  %v5439_v29 = vpack.c.bf16 %v824_v14, %v824_v14  ;;  %v765_v30 = vadd.f32 1.0, %v4886_v19  ;;  %4907 = vpow2.f32 %v687_v9  ;;  %4192 = vmatprep.subr.bf16.mxu1 %v4836_v4 }
  0x5e   : > { %6540 = vst [vmem:[#allocation4_spill] sm:$0xff] %v5437_v43  ;;  %v4890_v35 = vpop.eup %4889  ;;  %v1262_v47 = vrot.slane %v1260_v20, 1  ;;  %4162 = vmatprep.mubr.msk.bf16.mxu1 %vm999_vm1, %v5437_v43  ;;  %v1264_v15 = vshrl.u32 %v5437_v43, 16  ;;  %v1266_v36 = vshll.u32 %v5437_v43, 16  ;;  %v826_v38 = vmul.f32 %v4888_v25, %v5336_v63  ;;  %v387_v25 = vld [vmem:[%s5215_s16 + $0x68] sm:$0x1] }
  0x5f   : > { %v4892_v39 = vpop.eup %4891  ;;  %v1258_v44 = vor.u32 %v1257_v26, %v1253_v13  ;;  %v1271_v45 = vshll.u32 %v5439_v29, 16  ;;  %v828_v34 = vmul.f32 %v4890_v35, %v5339_v2  ;;  %4909 = vrcp.f32 %v764_v21  ;;  %v388_v26 = vld [vmem:[%s5215_s16 + $0x6c] sm:$0xff]  }
  0x60   : > { %v4894_v46 = vpop.eup %4893  ;;  %v1268_v40 = vrot.slane %v1266_v36, 1  ;;  %v766_v51 = vadd.f32 1.0, %v4892_v39  ;;  %4193 = vmatpush3.bf16.msra.mxu1 %v4836_v4  ;;  %4911 = vrcp.f32 %v765_v30  ;;  %v438_v37 = vunpack.c.l.bf16 %v384_v57 }
  0x61   : > { %v4896_v54 = vpop.eup %4895  ;;  %v5450_v55 = vsel %vm1241_vm2, %v1258_v44, %v1262_v47  ;;  %v1273_v56 = vrot.slane %v1271_v45, 1  ;;  %v5452_v63 = vpack.c.bf16 %v828_v34, %v826_v38  ;;  %4226 = vmatprep.subr.bf16.mxu1 %v4838_v33  ;;  %v767_v59 = vadd.f32 1.0, %v4894_v46 }
  0x62   : > { %v4898_v22 = vpop.eup %4897  ;;  %4302 = vmatprep.mubr.msk.bf16.mxu0 %vm999_vm1, %v5450_v55  ;;  %v1269_v2 = vor.u32 %v1268_v40, %v1264_v15  ;;  %4913 = vrcp.f32 %v766_v51  ;;  %v768_v23 = vadd.f32 1.0, %v4896_v54  ;;  %v3966_v42 = vunpack.c.l.bf16 %v3987_v61  ;;  %v5476_v15 = vld [vmem:[%s5210_s13 + $0x60] sm:$0xff]  }
  0x63   : > { %v4900_v27 = vpop.eup %4899  ;;  %4163 = vmatmul.mubr.msk.bf16.gmra.mrb[4].mxu1 %vm999_vm1, %v5452_v63  ;;  %v1275_v49 = vshrl.u32 %v5452_v63, 16  ;;  %v1277_v62 = vshll.u32 %v5452_v63, 16  ;;  %v769_v0 = vadd.f32 1.0, %v4898_v22  ;;  %4915 = vpow2.f32 %v689_v52 }
  0x64   : > { %v4902_v28 = vpop.eup %4901  ;;  %v5464_v4 = vsel %vm1241_vm2, %v1269_v2, %v1273_v56  ;;  %4917 = vrcp.f32 %v767_v59  ;;  %v770_v7 = vadd.f32 1.0, %v4900_v27  ;;  %v499_v20 = vmul.f32 %v5271_v5, %v438_v37 }
  0x65   : > { %v4904_v9 = vpop.eup %4903  ;;  %4303 = vmatmul.mubr.msk.bf16.vlgmr.msra.gmra.mrb[0].mxu0 %vm999_vm1, %v5464_v4  ;;  %v1279_v10 = vrot.slane %v1277_v62, 1  ;;  %4919 = vrcp.f32 %v768_v23  ;;  %v771_v13 = vadd.f32 1.0, %v4902_v28  ;;  %v3967_v21 = vunpack.c.h.bf16 %v3987_v61 }
  0x66   : > { %v4906_v14 = vpop.eup %4905  ;;  %4335 = vmatpush3.bf16.msra.mxu0 %v5285_v17  ;;  %4921 = vrcp.f32 %v769_v0  ;;  %v772_v19 = vadd.f32 1.0, %v4904_v9  ;;  %v500_v47 = vmul.f32 %v3966_v42, %v5271_v5  ;;  %v5479_v17 = vadd.f32 %v5274_v6, %v499_v20 }
  0x67   : > { %v4908_v30 = vpop.eup %4907  ;;  %v5472_v33 = vor.u32 %v1279_v10, %v1275_v49  ;;  %4923 = vrcp.f32 %v770_v7  ;;  %4336 = vmatprep.subr.bf16.mxu0 %v4835_v3  ;;  %v773_v35 = vadd.f32 1.0, %v4906_v14  ;;  %v501_v38 = vmul.f32 %v3967_v21, %v5271_v5 }
  0x68   : > { %4925 = vrcp.f32 %v771_v13  ;;  %v774_v36 = vadd.f32 1.0, %v4908_v30  ;;  %v5483_v39 = vadd.f32 %v5274_v6, %v500_v47  ;;  %v441_v44 = vunpack.c.l.bf16 %v387_v25 }
  0x69   : > { %4927 = vrcp.f32 %v772_v19  ;;  %v442_v45 = vunpack.c.l.bf16 %v388_v26  ;;  %v4910_v34 = vpop.eup %4909  ;;  %v614_v46 = vsub.f32 0.0, %v5479_v17  ;;  %v5487_v40 = vadd.f32 %v5274_v6, %v501_v38 }
  0x6a   : > { %4929 = vrcp.f32 %v773_v35  ;;  %4337 = vmatpush3.bf16.msra.mxu0 %v4835_v3  ;;  %v443_v51 = vunpack.c.h.bf16 %v388_v26  ;;  %v4912_v52 = vpop.eup %4911  ;;  %v830_v54 = vmul.f32 %v4910_v34, %v5348_v12  ;;  %v615_v56 = vsub.f32 0.0, %v5483_v39 }
  0x6b   : > { %4931 = vrcp.f32 %v774_v36  ;;  %v502_v57 = vmul.f32 %v5271_v5, %v441_v44  ;;  %4370 = vmatprep.subr.bf16.mxu0 %v5476_v15  ;;  %v832_v2 = vmul.f32 %v4912_v52, %v5352_v16  ;;  %v691_v59 = vmul.f32 1.442695, %v614_v46 }
  0x6c   : > { %v4914_v22 = vpop.eup %4913  ;;  %v616_v23 = vsub.f32 0.0, %v5487_v40  ;;  %v503_v61 = vmul.f32 %v5271_v5, %v442_v45  ;;  %v5496_v49 = vpack.c.bf16 %v830_v54, %v830_v54  ;;  %v693_v62 = vmul.f32 1.442695, %v615_v56 }
  0x6d   : > { %v4916_v27 = vpop.eup %4915  ;;  %v834_v12 = vmul.f32 %v4914_v22, %v5355_v18  ;;  %v5500_v0 = vadd.f32 %v5274_v6, %v502_v57  ;;  %4933 = vpow2.f32 %v691_v59  ;;  %v504_v16 = vmul.f32 %v5271_v5, %v443_v51 }
  0x6e   : > { %v4918_v3 = vpop.eup %4917  ;;  %v775_v28 = vadd.f32 1.0, %v4916_v27  ;;  %v695_v7 = vmul.f32 1.442695, %v616_v23  ;;  %v1282_v9 = vshll.u32 %v5496_v49, 16  ;;  %4935 = vpow2.f32 %v693_v62 }
  0x6f   : > { %v4920_v37 = vpop.eup %4919  ;;  %v5504_v10 = vpack.c.bf16 %v834_v12, %v832_v2  ;;  %v836_v13 = vmul.f32 %v4918_v3, %v5359_v24  ;;  %v617_v14 = vsub.f32 0.0, %v5500_v0  ;;  %v5510_v19 = vadd.f32 %v5274_v6, %v503_v61 }
  0x70   : > { %v4922_v42 = vpop.eup %4921  ;;  %v838_v18 = vmul.f32 %v4920_v37, %v5373_v50  ;;  %4937 = vrcp.f32 %v775_v28  ;;  %v1284_v21 = vrot.slane %v1282_v9, 1  ;;  %v5535_v57 = vadd.f32 %v5274_v6, %v504_v16 }
  0x71   : > { %6541 = vst [vmem:[#allocation5_spill] sm:$0xff] %v5504_v10  ;;  %v4924_v20 = vpop.eup %4923  ;;  %4166 = vmatprep.mubr.msk.bf16.mxu1 %vm999_vm1, %v5504_v10  ;;  %v5514_v25 = vpack.c.bf16 %v836_v13, %v836_v13  ;;  %v1286_v26 = vshrl.u32 %v5504_v10, 16  ;;  %v1288_v24 = vshll.u32 %v5504_v10, 16  ;;  %v840_v50 = vmul.f32 %v4922_v42, %v5376_v53 }
  0x72   : > { %v4926_v30 = vpop.eup %4925  ;;  %v842_v35 = vmul.f32 %v4924_v20, %v5384_v11  ;;  %4939 = vpow2.f32 %v695_v7  ;;  %v697_v47 = vmul.f32 1.442695, %v617_v14  ;;  %v5522_v38 = vsel %vm1241_vm2, %v5472_v33, %v1284_v21  ;;  %v3988_v20 = vld [vmem:[%s5215_s16 + $0x78] sm:$0xff]  }
  0x73   : > { %v4928_v36 = vpop.eup %4927  ;;  %v1290_v44 = vrot.slane %v1288_v24, 1  ;;  %v1293_v45 = vshll.u32 %v5514_v25, 16  ;;  %v844_v34 = vmul.f32 %v4926_v30, %v5390_v31  ;;  %4306 = vmatprep.mubr.msk.bf16.mxu0 %vm999_vm1, %v5522_v38  ;;  %v5528_v51 = vpack.c.bf16 %v840_v50, %v838_v18 }
  0x74   : > { %v4930_v46 = vpop.eup %4929  ;;  %v5530_v53 = vpack.c.bf16 %v842_v35, %v842_v35  ;;  %v846_v11 = vmul.f32 %v4928_v36, %v5393_v32  ;;  %4941 = vpow2.f32 %v697_v47  ;;  %v618_v61 = vsub.f32 0.0, %v5510_v19 }
  0x75   : > { %v4932_v52 = vpop.eup %4931  ;;  %v1291_v54 = vor.u32 %v1290_v44, %v1286_v26  ;;  %v1295_v33 = vrot.slane %v1293_v45, 1  ;;  %v848_v56 = vmul.f32 %v4930_v46, %v5401_v48  ;;  %4167 = vmatmul.mubr.msk.bf16.gmra.mrb[8].mxu1 %vm999_vm1, %v5528_v51  ;;  %v1297_v31 = vshrl.u32 %v5528_v51, 16  ;;  %v394_v45 = vld [vmem:[%s5215_s16 + $0x84] sm:$0xff]  }
  0x76   : > { %v1299_v22 = vshll.u32 %v5528_v51, 16  ;;  %v1304_v2 = vshll.u32 %v5530_v53, 16  ;;  %v5542_v59 = vpack.c.bf16 %v846_v11, %v844_v34  ;;  %v850_v48 = vmul.f32 %v4932_v52, %v5410_v58 }
  0x77   : > { %v5545_v32 = vsel %vm1241_vm2, %v1291_v54, %v1295_v33  ;;  %v5547_v23 = vpack.c.bf16 %v848_v56, %v848_v56  ;;  %v4934_v27 = vpop.eup %4933  ;;  %v619_v37 = vsub.f32 0.0, %v5535_v57  ;;  %v699_v9 = vmul.f32 1.442695, %v618_v61 }
  0x78   : > { %4307 = vmatmul.mubr.msk.bf16.gmra.mrb[4].mxu0 %vm999_vm1, %v5545_v32  ;;  %v1301_v12 = vrot.slane %v1299_v22, 1  ;;  %v1306_v62 = vrot.slane %v1304_v2, 1  ;;  %4170 = vmatprep.mubr.msk.bf16.mxu1 %vm999_vm1, %v5542_v59  ;;  %v1308_v3 = vshrl.u32 %v5542_v59, 16  ;;  %v1310_v28 = vshll.u32 %v5542_v59, 16  ;;  %v4936_v7 = vpop.eup %4935 }
  0x79   : > { %v1315_v16 = vshll.u32 %v5547_v23, 16  ;;  %v776_v58 = vadd.f32 1.0, %v4934_v27  ;;  %v777_v14 = vadd.f32 1.0, %v4936_v7  ;;  %v701_v24 = vmul.f32 1.442695, %v619_v37 }
  0x7a   : > { %v4938_v13 = vpop.eup %4937  ;;  %v1302_v42 = vor.u32 %v1301_v12, %v1297_v31  ;;  %v1312_v18 = vrot.slane %v1310_v28, 1  ;;  %v3970_v44 = vunpack.c.l.bf16 %v3988_v20  ;;  %v3971_v46 = vunpack.c.h.bf16 %v3988_v20  ;;  %v3989_v31 = vld [vmem:[%s5215_s16 + $0x90] sm:$0xff]  }
  0x7b   : > { %v1317_v21 = vrot.slane %v1315_v16, 1  ;;  %v852_v26 = vmul.f32 %v4938_v13, %v5416_v41  ;;  %4943 = vrcp.f32 %v776_v58  ;;  %v448_v56 = vunpack.c.l.bf16 %v394_v45 }
  0x7c   : > { %v4940_v30 = vpop.eup %4939  ;;  %v5562_v50 = vsel %vm1241_vm2, %v1302_v42, %v1306_v62  ;;  %v1313_v35 = vor.u32 %v1312_v18, %v1308_v3  ;;  %4945 = vrcp.f32 %v777_v14  ;;  %v506_v54 = vmul.f32 %v3970_v44, %v5271_v5 }
  0x7d   : > { %4310 = vmatprep.mubr.msk.bf16.mxu0 %vm999_vm1, %v5562_v50  ;;  %v5566_v47 = vpack.c.bf16 %v852_v26, %v850_v48  ;;  %v778_v36 = vadd.f32 1.0, %v4940_v30  ;;  %4947 = vpow2.f32 %v699_v9  ;;  %v507_v33 = vmul.f32 %v3971_v46, %v5271_v5 }
  0x7e   : > { %v4942_v34 = vpop.eup %4941  ;;  %v5570_v41 = vsel %vm1241_vm2, %v1313_v35, %v1317_v21  ;;  %4949 = vpow2.f32 %v701_v24  ;;  %v449_v48 = vunpack.c.h.bf16 %v394_v45  ;;  %v1716_v61 = vrot.slane %v5439_v29, 1 }
  0x7f   : > { %4171 = vmatmul.mubr.msk.bf16.gmra.mrb[12].mxu1 %vm999_vm1, %v5566_v47  ;;  %v1321_v11 = vshll.u32 %v5566_v47, 16  ;;  %4951 = vrcp.f32 %v778_v36  ;;  %v779_v52 = vadd.f32 1.0, %v4942_v34  ;;  %v1319_v22 = vshrl.u32 %v5566_v47, 16 }
  0x80   : > { %4311 = vmatmul.mubr.msk.bf16.gmra.mrb[8].mxu0 %vm999_vm1, %v5570_v41  ;;  %v5583_v27 = vadd.f32 %v5274_v6, %v506_v54  ;;  %v5586_v12 = vadd.f32 %v5274_v6, %v507_v33  ;;  %v509_v62 = vmul.f32 %v5271_v5, %v448_v56  ;;  %v1712_v3 = vrot.slane %v5422_v1, 1  ;;  %v400_v33 = vld [vmem:[%s5215_s16 + $0x9c] sm:$0xff]  }
  0x81   : > { %v1323_v2 = vrot.slane %v1321_v11, 1  ;;  %4953 = vrcp.f32 %v779_v52  ;;  %v1713_v28 = vrot.slane %v5427_v8, 1  ;;  %v510_v7 = vmul.f32 %v5271_v5, %v449_v48 }
  0x82   : > { %v3974_v16 = vunpack.c.l.bf16 %v3989_v31  ;;  %v621_v58 = vsub.f32 0.0, %v5583_v27  ;;  %v622_v37 = vsub.f32 0.0, %v5586_v12  ;;  %v5595_v9 = vadd.f32 %v5274_v6, %v509_v62 }
  0x83   : > { %v3975_v13 = vunpack.c.h.bf16 %v3989_v31  ;;  %v1324_v18 = vor.u32 %v1323_v2, %v1319_v22  ;;  %v1715_v14 = vrot.slane %v5437_v43, 1  ;;  %v5599_v20 = vadd.f32 %v5274_v6, %v510_v7 }
  0x84   : > { %v512_v8 = vmul.f32 %v3974_v16, %v5271_v5  ;;  %v705_v24 = vmul.f32 1.442695, %v621_v58  ;;  %v707_v30 = vmul.f32 1.442695, %v622_v37  ;;  %v624_v35 = vsub.f32 0.0, %v5595_v9 }
  0x85   : > { %v4944_v42 = vpop.eup %4943  ;;  %v625_v45 = vsub.f32 0.0, %v5599_v20  ;;  %v513_v34 = vmul.f32 %v3975_v13, %v5271_v5  ;;  %v1718_v7 = vrot.slane %v5452_v63, 1  ;;  %v454_v58 = vunpack.c.l.bf16 %v400_v33 }
  0x86   : > { %v4946_v21 = vpop.eup %4945  ;;  %v854_v26 = vmul.f32 %v4944_v42, %v5479_v17  ;;  %v5608_v46 = vadd.f32 %v5274_v6, %v512_v8  ;;  %4955 = vpow2.f32 %v705_v24  ;;  %v711_v17 = vmul.f32 1.442695, %v624_v35  ;;  %v5641_v35 = vld [vmem:[%s5221_s28] ss:$0 sm:$0xff] }
  0x87   : > { %v4948_v36 = vpop.eup %4947  ;;  %v856_v44 = vmul.f32 %v4946_v21, %v5483_v39  ;;  %4957 = vpow2.f32 %v707_v30  ;;  %v713_v22 = vmul.f32 1.442695, %v625_v45  ;;  %v5614_v39 = vadd.f32 %v5274_v6, %v513_v34  ;;  %v3990_v30 = vld [vmem:[%s5215_s16 + $0xa8] sm:$0xff]  }
  0x88   : > { %v4950_v11 = vpop.eup %4949  ;;  %v5610_v52 = vpack.c.bf16 %v854_v26, %v854_v26  ;;  %v780_v54 = vadd.f32 1.0, %v4948_v36  ;;  %v627_v48 = vsub.f32 0.0, %v5608_v46  ;;  %v515_v36 = vmul.f32 %v5641_v35, %v454_v58 }
  0x89   : > { %v4952_v56 = vpop.eup %4951  ;;  %v781_v31 = vadd.f32 1.0, %v4950_v11  ;;  %v628_v16 = vsub.f32 0.0, %v5614_v39  ;;  %v5648_v34 = vsel %vm1708_vm3, %v1715_v14, %v1716_v61  ;;  %v1721_v29 = vrot.slane %v5504_v10, 1 }
  0x8a   : > { %v1326_v2 = vshll.u32 %v5610_v52, 16  ;;  %v858_v5 = vmul.f32 %v4952_v56, %v5487_v40  ;;  %4959 = vrcp.f32 %v780_v54  ;;  %v1719_v40 = vrot.slane %v5496_v49, 1  ;;  %v5652_v54 = vld [vmem:[%s5226_s6] ss:$0 sm:$0xff] }
  0x8b   : > { %v4954_v62 = vpop.eup %4953  ;;  %4961 = vrcp.f32 %v781_v31  ;;  %v717_v42 = vmul.f32 1.442695, %v627_v48  ;;  %v719_v8 = vmul.f32 1.442695, %v628_v16  ;;  %v5638_v49 = vsel %vm1708_vm3, %v1712_v3, %v1713_v28 }
  0x8c   : > { %v1328_v37 = vrot.slane %v1326_v2, 1  ;;  %v5621_v13 = vpack.c.bf16 %v858_v5, %v856_v44  ;;  %v860_v6 = vmul.f32 %v4954_v62, %v5500_v0  ;;  %4963 = vpow2.f32 %v711_v17 }
  0x8d   : > { %4965 = vpow2.f32 %v713_v22  ;;  %v5655_v3 = vadd.f32 %v5652_v54, %v515_v36  ;;  %v3978_v28 = vunpack.c.l.bf16 %v3990_v30  ;;  %v3979_v17 = vunpack.c.h.bf16 %v3990_v30 }
  0x8e   : > { %v5626_v21 = vsel %vm1241_vm2, %v1324_v18, %v1328_v37  ;;  %4174 = vmatprep.mubr.msk.bf16.mxu1 %vm999_vm1, %v5621_v13  ;;  %v5630_v26 = vpack.c.bf16 %v860_v6, %v860_v6  ;;  %v1330_v24 = vshrl.u32 %v5621_v13, 16  ;;  %v1332_v0 = vshll.u32 %v5621_v13, 16 }
  0x8f   : > { %4314 = vmatprep.mubr.msk.bf16.mxu0 %vm999_vm1, %v5626_v21  ;;  %4967 = vpow2.f32 %v717_v42  ;;  %v455_v18 = vunpack.c.h.bf16 %v400_v33  ;;  %v5658_v22 = vsel %vm1708_vm3, %v1718_v7, %v1719_v40  ;;  %v630_v5 = vsub.f32 0.0, %v5655_v3 }
  0x90   : > { %v1334_v44 = vrot.slane %v1332_v0, 1  ;;  %v1337_v45 = vshll.u32 %v5630_v26, 16  ;;  %4969 = vpow2.f32 %v719_v8  ;;  %v4956_v33 = vpop.eup %4955  ;;  %v518_v48 = vmul.f32 %v5641_v35, %v3978_v28 }
  0x91   : > { %v516_v11 = vmul.f32 %v5641_v35, %v455_v18  ;;  %v4958_v61 = vpop.eup %4957  ;;  %v783_v14 = vadd.f32 1.0, %v4956_v33  ;;  %v1722_v7 = vrot.slane %v5514_v25, 1  ;;  %v519_v37 = vmul.f32 %v5641_v35, %v3979_v17  ;;  %v406_v18 = vld [vmem:[%s5215_s16 + $0xb4] sm:$0xff]  }
  0x92   : > { %v1335_v56 = vor.u32 %v1334_v44, %v1330_v24  ;;  %v1339_v31 = vrot.slane %v1337_v45, 1  ;;  %v784_v58 = vadd.f32 1.0, %v4958_v61  ;;  %v723_v8 = vmul.f32 1.442695, %v630_v5 }
  0x93   : > { %v5662_v2 = vadd.f32 %v5652_v54, %v516_v11  ;;  %4971 = vrcp.f32 %v783_v14  ;;  %v5679_v25 = vadd.f32 %v5652_v54, %v518_v48  ;;  %v5682_v30 = vadd.f32 %v5652_v54, %v519_v37  ;;  %v363_v14 = vld [vmem:[%s5215_s16 + $0x8] sm:$0x1] }
  0x94   : > { %v4960_v62 = vpop.eup %4959  ;;  %v5667_v16 = vsel %vm1241_vm2, %v1335_v56, %v1339_v31  ;;  %4973 = vrcp.f32 %v784_v58  ;;  %v1724_v45 = vrot.slane %v5528_v51, 1  ;;  %v1725_v56 = vrot.slane %v5530_v53, 1 }
  0x95   : > { %v4962_v6 = vpop.eup %4961  ;;  %4315 = vmatmul.mubr.msk.bf16.gmra.mrb[12].mxu0 %vm999_vm1, %v5667_v16  ;;  %v862_v40 = vmul.f32 %v4960_v62, %v5510_v19  ;;  %v631_v42 = vsub.f32 0.0, %v5662_v2  ;;  %4975 = vpow2.f32 %v723_v8  ;;  %v633_v28 = vsub.f32 0.0, %v5679_v25 }
  0x96   : > { %v4964_v24 = vpop.eup %4963  ;;  %v864_v0 = vmul.f32 %v4962_v6, %v5535_v57  ;;  %4338 = vmatprep.mubr.msk.bf16.mxu0 %vm999_vm1, %v5638_v49  ;;  %v634_v17 = vsub.f32 0.0, %v5682_v30  ;;  %v460_v31 = vunpack.c.l.bf16 %v406_v18  ;;  %v461_v61 = vunpack.c.h.bf16 %v406_v18 }
  0x97   : > { %v4966_v19 = vpop.eup %4965  ;;  %v786_v36 = vadd.f32 1.0, %v4964_v24  ;;  %v725_v44 = vmul.f32 1.442695, %v631_v42  ;;  %v729_v62 = vmul.f32 1.442695, %v633_v28  ;;  %v4839_v42 = vld [vmem:[%s5210_s13 + $0x68] sm:$0xff]   ;;  %v417_v24 = vunpack.c.l.bf16 %v363_v14 }
  0x98   : > { %v5686_v11 = vpack.c.bf16 %v864_v0, %v862_v40  ;;  %v787_v57 = vadd.f32 1.0, %v4966_v19  ;;  %v731_v58 = vmul.f32 1.442695, %v634_v17  ;;  %v521_v6 = vmul.f32 %v5641_v35, %v460_v31  ;;  %v390_v19 = vld [vmem:[%s5215_s16 + $0x74] sm:$0x1] }
  0x99   : > { %v4968_v33 = vpop.eup %4967  ;;  %4977 = vrcp.f32 %v786_v36  ;;  %v522_v40 = vmul.f32 %v5641_v35, %v461_v61  ;;  %v1727_v53 = vrot.slane %v5542_v59, 1  ;;  %v1728_v8 = vrot.slane %v5547_v23, 1 }
  0x9a   : > { %v4970_v5 = vpop.eup %4969  ;;  %4175 = vmatmul.mubr.msk.bf16.gmra.mrb[16].mxu1 %vm999_vm1, %v5686_v11  ;;  %4979 = vrcp.f32 %v787_v57  ;;  %v789_v48 = vadd.f32 1.0, %v4968_v33  ;;  %v5702_v0 = vadd.f32 %v5652_v54, %v521_v6  ;;  %v5712_v23 = vsel %vm1708_vm3, %v1721_v29, %v1722_v7 }
  0x9b   : > { %v790_v37 = vadd.f32 1.0, %v4970_v5  ;;  %4981 = vpow2.f32 %v725_v44  ;;  %v5705_v18 = vadd.f32 %v5652_v54, %v522_v40  ;;  %v478_v36 = vmul.f32 %v5641_v35, %v417_v24  ;;  %v396_v24 = vld [vmem:[%s5215_s16 + $0x8c] sm:$0x1] }
  0x9c   : > { %4983 = vrcp.f32 %v789_v48  ;;  %v5716_v57 = vsel %vm1708_vm3, %v1724_v45, %v1725_v56  ;;  %v636_v28 = vsub.f32 0.0, %v5702_v0  ;;  %v5725_v29 = vsel %vm1708_vm3, %v1727_v53, %v1728_v8  ;;  %v393_v45 = vld [vmem:[%s5215_s16 + $0x80] sm:$0x1] }
  0x9d   : > { %4339 = vmatmul.mubr.msk.bf16.vlgmr.msra.gmra.mrb[0].mxu0 %vm999_vm1, %v5648_v34  ;;  %4985 = vrcp.f32 %v790_v37  ;;  %v4972_v44 = vpop.eup %4971  ;;  %v637_v17 = vsub.f32 0.0, %v5705_v18  ;;  %v5728_v7 = vadd.f32 %v5652_v54, %v478_v36  ;;  %v444_v61 = vunpack.c.l.bf16 %v390_v19 }
  0x9e   : > { %4371 = vmatpush3.bf16.msra.mxu0 %v5476_v15  ;;  %4342 = vmatprep.mubr.msk.bf16.mxu0 %vm999_vm1, %v5658_v22  ;;  %4987 = vpow2.f32 %v729_v62  ;;  %v5721_v15 = vld [vmem:[%s5210_s13 + $0x70] sm:$0xff]   ;;  %v4974_v33 = vpop.eup %4973  ;;  %v868_v31 = vmul.f32 %v4972_v44, %v5583_v27  ;;  %v735_v5 = vmul.f32 1.442695, %v636_v28  ;;  %v1730_v62 = vrot.slane %v5566_v47, 1  ;;  %v399_v28 = vld [vmem:[%s5215_s16 + $0x98] sm:$0x1] }
  0x9f   : > { %4989 = vpow2.f32 %v731_v58  ;;  %4372 = vmatprep.subr.bf16.mxu0 %v4839_v42  ;;  %v4976_v56 = vpop.eup %4975  ;;  %v870_v14 = vmul.f32 %v4974_v33, %v5586_v12  ;;  %v737_v48 = vmul.f32 1.442695, %v637_v17  ;;  %v1731_v37 = vrot.slane %v5610_v52, 1 }
  0xa0   : > { %v792_v58 = vadd.f32 1.0, %v4976_v56  ;;  %v593_v27 = vsub.f32 0.0, %v5728_v7  ;;  %v505_v6 = vmul.f32 %v5641_v35, %v444_v61  ;;  %4991 = vpow2.f32 %v735_v5 }
  0xa1   : > { %v5736_v53 = vpack.c.bf16 %v870_v14, %v868_v31  ;;  %v1733_v8 = vrot.slane %v5621_v13, 1  ;;  %v447_v12 = vunpack.c.l.bf16 %v393_v45  ;;  %v1734_v33 = vrot.slane %v5630_v26, 1 }
  0xa2   : > { %4373 = vmatpush3.bf16.msra.mxu0 %v4839_v42  ;;  %4993 = vrcp.f32 %v792_v58  ;;  %v649_v52 = vmul.f32 1.442695, %v593_v27  ;;  %v5743_v44 = vadd.f32 %v5652_v54, %v505_v6  ;;  %v450_v56 = vunpack.c.l.bf16 %v396_v24 }
  0xa3   : > { %v4978_v40 = vpop.eup %4977  ;;  %4406 = vmatprep.subr.bf16.mxu0 %v5721_v15  ;;  %4178 = vmatprep.mubr.msk.bf16.mxu1 %vm999_vm1, %v5736_v53  ;;  %4995 = vpow2.f32 %v737_v48  ;;  %v453_v48 = vunpack.c.l.bf16 %v399_v28 }
  0xa4   : > { %v4980_v19 = vpop.eup %4979  ;;  %v874_v36 = vmul.f32 %v4978_v40, %v5595_v9  ;;  %v508_v9 = vmul.f32 %v5641_v35, %v447_v12  ;;  %4997 = vpow2.f32 %v649_v52  ;;  %v620_v45 = vsub.f32 0.0, %v5743_v44  ;;  %v402_v12 = vld [vmem:[%s5215_s16 + $0xa4] sm:$0x1] }
  0xa5   : > { %v4982_v42 = vpop.eup %4981  ;;  %v876_v17 = vmul.f32 %v4980_v19, %v5599_v20  ;;  %4343 = vmatmul.mubr.msk.bf16.gmra.mrb[4].mxu0 %vm999_vm1, %v5712_v23  ;;  %v511_v40 = vmul.f32 %v5641_v35, %v450_v56  ;;  %v514_v52 = vmul.f32 %v5641_v35, %v453_v48 }
  0xa6   : > { %v4984_v31 = vpop.eup %4983  ;;  %v793_v61 = vadd.f32 1.0, %v4982_v42  ;;  %4346 = vmatprep.mubr.msk.bf16.mxu0 %vm999_vm1, %v5716_v57  ;;  %v5760_v26 = vadd.f32 %v5652_v54, %v508_v9  ;;  %v703_v6 = vmul.f32 1.442695, %v620_v45  ;;  %v408_v9 = vld [vmem:[%s5215_s16 + $0xbc] sm:$0x1]  ;;  %v5786_v45 = vsel %vm1708_vm3, %v1733_v8, %v1734_v33 }
  0xa7   : > { %v4986_v14 = vpop.eup %4985  ;;  %v5756_v20 = vpack.c.bf16 %v876_v17, %v874_v36  ;;  %v880_v5 = vmul.f32 %v4984_v31, %v5608_v46  ;;  %v5768_v46 = vsel %vm1708_vm3, %v1730_v62, %v1731_v37  ;;  %v5776_v17 = vadd.f32 %v5652_v54, %v511_v40  ;;  %v3991_v37 = vld [vmem:[%s5215_s16 + $0xc0] sm:$0xff]   ;;  %6542 = vst [vmem:[#allocation6_spill] sm:$0xff] %v5786_v45 }
  0xa8   : > { %v4988_v58 = vpop.eup %4987  ;;  %v882_v27 = vmul.f32 %v4986_v14, %v5614_v39  ;;  %4999 = vrcp.f32 %v793_v61  ;;  %v623_v36 = vsub.f32 0.0, %v5760_v26  ;;  %v405_v39 = vld [vmem:[%s5215_s16 + $0xb0] sm:$0x1]  ;;  %v5780_v61 = vadd.f32 %v5652_v54, %v514_v52 }
  0xa9   : > { %v4990_v24 = vpop.eup %4989  ;;  %4179 = vmatmul.mubr.msk.bf16.gmra.mrb[20].mxu1 %vm999_vm1, %v5756_v20  ;;  %v795_v19 = vadd.f32 1.0, %v4988_v58  ;;  %5001 = vpow2.f32 %v703_v6  ;;  %v456_v62 = vunpack.c.l.bf16 %v402_v12  ;;  %v626_v56 = vsub.f32 0.0, %v5776_v17 }
  0xaa   : > { %v5773_v28 = vpack.c.bf16 %v882_v27, %v880_v5  ;;  %v796_v42 = vadd.f32 1.0, %v4990_v24  ;;  %v709_v31 = vmul.f32 1.442695, %v623_v36  ;;  %v459_v14 = vunpack.c.l.bf16 %v405_v39  ;;  %v4992_v5 = vpop.eup %4991 }
  0xab   : > { %5003 = vrcp.f32 %v795_v19  ;;  %v629_v48 = vsub.f32 0.0, %v5780_v61  ;;  %v517_v58 = vmul.f32 %v5641_v35, %v456_v62  ;;  %v462_v27 = vunpack.c.l.bf16 %v408_v9 }
  0xac   : > { %4182 = vmatprep.mubr.msk.bf16.mxu1 %vm999_vm1, %v5773_v28  ;;  %5005 = vrcp.f32 %v796_v42  ;;  %v4994_v6 = vpop.eup %4993  ;;  %v798_v40 = vadd.f32 1.0, %v4992_v5  ;;  %v715_v8 = vmul.f32 1.442695, %v626_v56  ;;  %v520_v33 = vmul.f32 %v5641_v35, %v459_v14  ;;  %v411_v42 = vld [vmem:[%s5215_s16 + $0xc8] sm:$0x1] }
  0xad   : > { %4347 = vmatmul.mubr.msk.bf16.gmra.mrb[8].mxu0 %vm999_vm1, %v5725_v29  ;;  %5007 = vpow2.f32 %v709_v31  ;;  %v3982_v12 = vunpack.c.l.bf16 %v3991_v37  ;;  %v4996_v24 = vpop.eup %4995  ;;  %v886_v19 = vmul.f32 %v4994_v6, %v5655_v3  ;;  %v721_v36 = vmul.f32 1.442695, %v629_v48 }
  0xae   : > { %4350 = vmatprep.mubr.msk.bf16.mxu0 %vm999_vm1, %v5768_v46  ;;  %v5798_v52 = vadd.f32 %v5652_v54, %v517_v58  ;;  %v523_v39 = vmul.f32 %v5641_v35, %v462_v27  ;;  %v4998_v9 = vpop.eup %4997  ;;  %v799_v31 = vadd.f32 1.0, %v4996_v24  ;;  %5009 = vrcp.f32 %v798_v40 }
  0xaf   : > { %v5803_v62 = vadd.f32 %v5652_v54, %v520_v33  ;;  %v3983_v56 = vunpack.c.h.bf16 %v3991_v37  ;;  %v755_v5 = vadd.f32 1.0, %v4998_v9  ;;  %5011 = vpow2.f32 %v715_v8 }
  0xb0   : > { %v632_v14 = vsub.f32 0.0, %v5798_v52  ;;  %v5807_v3 = vadd.f32 %v5652_v54, %v523_v39  ;;  %5013 = vrcp.f32 %v799_v31  ;;  %v465_v27 = vunpack.c.l.bf16 %v411_v42 }
  0xb1   : > { %v635_v58 = vsub.f32 0.0, %v5803_v62  ;;  %v524_v6 = vmul.f32 %v5641_v35, %v3982_v12  ;;  %5015 = vrcp.f32 %v755_v5  ;;  %v525_v9 = vmul.f32 %v5641_v35, %v3983_v56 }
  0xb2   : > { %v5000_v48 = vpop.eup %4999  ;;  %v727_v33 = vmul.f32 1.442695, %v632_v14  ;;  %v638_v37 = vsub.f32 0.0, %v5807_v3  ;;  %5017 = vpow2.f32 %v721_v36  ;;  %v526_v39 = vmul.f32 %v5641_v35, %v465_v27 }
  0xb3   : > { %v888_v40 = vmul.f32 %v5000_v48, %v5662_v2  ;;  %v5002_v24 = vpop.eup %5001  ;;  %v733_v8 = vmul.f32 1.442695, %v635_v58  ;;  %v5821_v36 = vadd.f32 %v5652_v54, %v524_v6  ;;  %v5824_v56 = vadd.f32 %v5652_v54, %v525_v9 }
  0xb4   : > { %v782_v12 = vadd.f32 1.0, %v5002_v24  ;;  %5019 = vpow2.f32 %v727_v33  ;;  %v739_v2 = vmul.f32 1.442695, %v638_v37  ;;  %v5830_v48 = vadd.f32 %v5652_v54, %v526_v39 }
  0xb5   : > { %v5004_v1 = vpop.eup %5003  ;;  %v5815_v31 = vpack.c.bf16 %v888_v40, %v886_v19  ;;  %4351 = vmatmul.mubr.msk.bf16.gmra.mrb[12].mxu0 %vm999_vm1, %v5786_v45  ;;  %5021 = vpow2.f32 %v733_v8  ;;  %v1244_v33 = vshll.u32 %v5412_v60, 16 }
  0xb6   : > { %v5006_v42 = vpop.eup %5005  ;;  %v892_v5 = vmul.f32 %v5004_v1, %v5679_v25  ;;  %5023 = vrcp.f32 %v782_v12  ;;  %v639_v1 = vsub.f32 0.0, %v5821_v36  ;;  %v640_v25 = vsub.f32 0.0, %v5824_v56 }
  0xb7   : > { %v5008_v14 = vpop.eup %5007  ;;  %4183 = vmatmul.mubr.msk.bf16.gmra.mrb[24].mxu1 %vm999_vm1, %v5815_v31  ;;  %v894_v19 = vmul.f32 %v5006_v42, %v5682_v30  ;;  %5025 = vpow2.f32 %v739_v2  ;;  %v641_v6 = vsub.f32 0.0, %v5830_v48 }
  0xb8   : > { %v785_v58 = vadd.f32 1.0, %v5008_v14  ;;  %v5010_v40 = vpop.eup %5009  ;;  %v741_v37 = vmul.f32 1.442695, %v639_v1  ;;  %v743_v30 = vmul.f32 1.442695, %v640_v25 }
  0xb9   : > { %v5834_v27 = vpack.c.bf16 %v894_v19, %v892_v5  ;;  %v5012_v24 = vpop.eup %5011  ;;  %v898_v8 = vmul.f32 %v5010_v40, %v5702_v0  ;;  %v745_v9 = vmul.f32 1.442695, %v641_v6  ;;  %v1242_v19 = vshrl.u32 %v5412_v60, 16 }
  0xba   : > { %5027 = vrcp.f32 %v785_v58  ;;  %v5014_v39 = vpop.eup %5013  ;;  %v788_v12 = vadd.f32 1.0, %v5012_v24  ;;  %v1246_v58 = vrot.slane %v1244_v33, 1 }
  0xbb   : > { %4186 = vmatprep.mubr.msk.bf16.mxu1 %vm999_vm1, %v5834_v27  ;;  %5029 = vpow2.f32 %v741_v37  ;;  %v5016_v2 = vpop.eup %5015  ;;  %v900_v42 = vmul.f32 %v5014_v39, %v5705_v18 }
  0xbc   : > { %5031 = vpow2.f32 %v743_v30  ;;  %v5018_v5 = vpop.eup %5017  ;;  %v812_v14 = vmul.f32 %v5016_v2, %v5728_v7  ;;  %v1247_v30 = vor.u32 %v1246_v58, %v1242_v19  ;;  %v1736_v2 = vrot.slane %v5686_v11, 1 }
  0xbd   : > { %5033 = vrcp.f32 %v788_v12  ;;  %v5844_v25 = vpack.c.bf16 %v900_v42, %v898_v8  ;;  %v791_v45 = vadd.f32 1.0, %v5018_v5  ;;  %v1739_v58 = vrot.slane %v5736_v53, 1 }
  0xbe   : > { %v5020_v1 = vpop.eup %5019  ;;  %5035 = vpow2.f32 %v745_v9  ;;  %v5846_v6 = vpack.c.bf16 %v812_v14, %v812_v14 }
  0xbf   : > { %v5022_v0 = vpop.eup %5021  ;;  %v794_v40 = vadd.f32 1.0, %v5020_v1  ;;  %4187 = vmatmul.mubr.msk.bf16.gmra.mrb[28].mxu1 %vm999_vm1, %v5844_v25  ;;  %5037 = vrcp.f32 %v791_v45 }
  0xc0   : > { %v5024_v37 = vpop.eup %5023  ;;  %v797_v18 = vadd.f32 1.0, %v5022_v0  ;;  %v1249_v33 = vshll.u32 %v5846_v6, 16  ;;  %v4840_v0 = vld [vmem:[%s5210_s13 + $0x28] sm:$0xff]  }
  0xc1   : > { %v5026_v7 = vpop.eup %5025  ;;  %v866_v24 = vmul.f32 %v5024_v37, %v5743_v44  ;;  %5039 = vrcp.f32 %v794_v40 }
  0xc2   : > { %5041 = vrcp.f32 %v797_v18  ;;  %v800_v8 = vadd.f32 1.0, %v5026_v7  ;;  %v1251_v39 = vrot.slane %v1249_v33, 1  ;;  %v5065_v33 = vld [vmem:[%s5210_s13 + $0x20] sm:$0xff]  }
  0xc3   : > { %v5852_v12 = vpack.c.bf16 %v866_v24, %v866_v24 }
  0xc4   : > { %v5028_v9 = vpop.eup %5027  ;;  %5043 = vrcp.f32 %v800_v8  ;;  %v1252_v5 = vsel %vm1241_vm2, %v1247_v30, %v1251_v39  ;;  %v1742_v39 = vrot.slane %v5756_v20, 1 }
  0xc5   : > { %v872_v42 = vmul.f32 %v5028_v9, %v5760_v26  ;;  %v5030_v45 = vpop.eup %5029  ;;  %v1737_v14 = vrot.slane %v5852_v12, 1  ;;  %4194 = vmatprep.mubr.msk.bf16.mxu1 %vm999_vm1, %v1252_v5 }
  0xc6   : > { %v5032_v44 = vpop.eup %5031  ;;  %v801_v1 = vadd.f32 1.0, %v5030_v45 }
  0xc7   : > { %v5859_v19 = vpack.c.bf16 %v872_v42, %v872_v42  ;;  %v5034_v40 = vpop.eup %5033  ;;  %v5864_v37 = vsel %vm1708_vm3, %v1736_v2, %v1737_v14  ;;  %v802_v26 = vadd.f32 1.0, %v5032_v44  ;;  %4195 = vmatmul.mubr.msk.bf16.vlgmr.msra.gmra.mrb[0].mxu1 %vm999_vm1, %v5450_v55  ;;  %v5882_v2 = vld [vmem:[%s5210_s13 + $0x30] sm:$0xff]  }
  0xc8   : > { %v5036_v18 = vpop.eup %5035  ;;  %4354 = vmatprep.mubr.msk.bf16.mxu0 %vm999_vm1, %v5864_v37  ;;  %v878_v30 = vmul.f32 %v5034_v40, %v5776_v17  ;;  %5045 = vrcp.f32 %v801_v1  ;;  %4227 = vmatpush3.bf16.msra.mxu1 %v5065_v33 }
  0xc9   : > { %v1740_v7 = vrot.slane %v5859_v19, 1  ;;  %4198 = vmatprep.mubr.msk.bf16.mxu1 %vm999_vm1, %v5464_v4  ;;  %v803_v24 = vadd.f32 1.0, %v5036_v18  ;;  %5047 = vrcp.f32 %v802_v26  ;;  %v5038_v8 = vpop.eup %5037  ;;  %4228 = vmatprep.subr.bf16.mxu1 %v4840_v0 }
  0xca   : > { %v5878_v55 = vpack.c.bf16 %v878_v30, %v878_v30  ;;  %v884_v42 = vmul.f32 %v5038_v8, %v5780_v61  ;;  %v1748_v61 = vrot.slane %v5815_v31, 1 }
  0xcb   : > { %v5876_v9 = vsel %vm1708_vm3, %v1739_v58, %v1740_v7  ;;  %v5040_v17 = vpop.eup %5039  ;;  %5049 = vrcp.f32 %v803_v24  ;;  %v1745_v58 = vrot.slane %v5773_v28, 1 }
  0xcc   : > { %4355 = vmatmul.mubr.msk.bf16.gmra.mrb[16].mxu0 %vm999_vm1, %v5876_v9  ;;  %v5042_v45 = vpop.eup %5041  ;;  %v1743_v5 = vrot.slane %v5878_v55, 1  ;;  %v890_v14 = vmul.f32 %v5040_v17, %v5798_v52  ;;  %v5889_v44 = vpack.c.bf16 %v884_v42, %v884_v42  ;;  %4229 = vmatpush3.bf16.msra.mxu1 %v4840_v0 }
  0xcd   : > { %v896_v1 = vmul.f32 %v5042_v45, %v5803_v62  ;;  %4262 = vmatprep.subr.bf16.mxu1 %v5882_v2 }
  0xce   : > { %v5044_v40 = vpop.eup %5043  ;;  %v5894_v26 = vsel %vm1708_vm3, %v1742_v39, %v1743_v5  ;;  %v5896_v18 = vpack.c.bf16 %v890_v14, %v890_v14  ;;  %v1746_v52 = vrot.slane %v5889_v44, 1  ;;  %v1751_v39 = vrot.slane %v5834_v27, 1 }
  0xcf   : > { %4358 = vmatprep.mubr.msk.bf16.mxu0 %vm999_vm1, %v5894_v26  ;;  %v902_v7 = vmul.f32 %v5044_v40, %v5807_v3  ;;  %4199 = vmatmul.mubr.msk.bf16.gmra.mrb[4].mxu1 %vm999_vm1, %v5522_v38  ;;  %v5907_v0 = vpack.c.bf16 %v896_v1, %v896_v1  ;;  %v1754_v14 = vrot.slane %v5844_v25, 1 }
  0xd0   : > { %v1749_v62 = vrot.slane %v5896_v18, 1  ;;  %4202 = vmatprep.mubr.msk.bf16.mxu1 %vm999_vm1, %v5545_v32  ;;  %v5912_v30 = vsel %vm1708_vm3, %v1745_v58, %v1746_v52 }
  0xd1   : > { %v5914_v33 = vpack.c.bf16 %v902_v7, %v902_v7  ;;  %v1752_v17 = vrot.slane %v5907_v0, 1 }
  0xd2   : > { %v5046_v24 = vpop.eup %5045  ;;  %v5917_v8 = vsel %vm1708_vm3, %v1748_v61, %v1749_v62 }
  0xd3   : > { %v5048_v3 = vpop.eup %5047  ;;  %v904_v42 = vmul.f32 %v5046_v24, %v5821_v36  ;;  %v1755_v58 = vrot.slane %v5914_v33, 1  ;;  %v5933_v40 = vsel %vm1708_vm3, %v1751_v39, %v1752_v17  ;;  %v1341_v24 = vshrl.u32 %v5686_v11, 16 }
  0xd4   : > { %4359 = vmatmul.mubr.msk.bf16.gmra.mrb[20].mxu0 %vm999_vm1, %v5912_v30  ;;  %v906_v45 = vmul.f32 %v5048_v3, %v5824_v56  ;;  %v1343_v56 = vshll.u32 %v5686_v11, 16  ;;  %v1348_v39 = vshll.u32 %v5852_v12, 16  ;;  %v1352_v17 = vshrl.u32 %v5736_v53, 16 }
  0xd5   : > { %4362 = vmatprep.mubr.msk.bf16.mxu0 %vm999_vm1, %v5917_v8  ;;  %v5050_v5 = vpop.eup %5049  ;;  %v5942_v36 = vsel %vm1708_vm3, %v1754_v14, %v1755_v58 }
  0xd6   : > { %v908_v1 = vmul.f32 %v5050_v5, %v5830_v48  ;;  %v5935_v61 = vpack.c.bf16 %v906_v45, %v904_v42  ;;  %6544 = vst [vmem:[#allocation8_spill] sm:$0xff] %v5942_v36  ;;  %v1354_v48 = vshll.u32 %v5736_v53, 16  ;;  %v1345_v3 = vrot.slane %v1343_v56, 1 }
  0xd7   : > { %4203 = vmatmul.mubr.msk.bf16.gmra.mrb[8].mxu1 %vm999_vm1, %v5562_v50  ;;  %v1359_v45 = vshll.u32 %v5859_v19, 16  ;;  %v1350_v58 = vrot.slane %v1348_v39, 1  ;;  %v412_v19 = vld [vmem:[%s5215_s16 + $0xcc] sm:$0xff]   ;;  %v1374_v39 = vshrl.u32 %v5773_v28, 16 }
  0xd8   : > { %v5937_v52 = vpack.c.bf16 %v908_v1, %v908_v1  ;;  %4206 = vmatprep.mubr.msk.bf16.mxu1 %vm999_vm1, %v5570_v41  ;;  %v2454_v7 = vrot.slane %v5935_v61, 1  ;;  %v1356_v42 = vrot.slane %v1354_v48, 1  ;;  %v1346_v14 = vor.u32 %v1345_v3, %v1341_v24 }
  0xd9   : > { %v1365_v1 = vshll.u32 %v5756_v20, 16  ;;  %v1361_v56 = vrot.slane %v1359_v45, 1  ;;  %v1376_v48 = vshll.u32 %v5773_v28, 16  ;;  %v1370_v3 = vshll.u32 %v5878_v55, 16 }
  0xda   : > { %6543 = vst [vmem:[#allocation7_spill] sm:$0xff] %v5937_v52  ;;  %v2455_v62 = vrot.slane %v5937_v52, 1  ;;  %v1357_v12 = vor.u32 %v1356_v42, %v1352_v17  ;;  %v414_v17 = vld [vmem:[%s5215_s16 + $0xd4] sm:$0x1]  ;;  %v466_v52 = vunpack.c.l.bf16 %v412_v19 }
  0xdb   : > { %v1367_v24 = vrot.slane %v1365_v1, 1  ;;  %v1378_v45 = vrot.slane %v1376_v48, 1  ;;  %v1372_v55 = vrot.slane %v1370_v3, 1  ;;  %v1387_v1 = vshll.u32 %v5815_v31, 16 }
  0xdc   : > { %4363 = vmatmul.mubr.msk.bf16.gmra.mrb[24].mxu0 %vm999_vm1, %v5933_v40  ;;  %v5959_v5 = vsel %vm1708_vm3, %v2454_v7, %v2455_v62  ;;  %v1363_v7 = vshrl.u32 %v5756_v20, 16  ;;  %v5972_v62 = vsel %vm1241_vm2, %v1346_v14, %v1350_v58  ;;  %v5978_v42 = vsel %vm1241_vm2, %v1357_v12, %v1361_v56 }
  0xdd   : > { %4366 = vmatprep.mubr.msk.bf16.mxu0 %vm999_vm1, %v5942_v36  ;;  %6545 = vst [vmem:[#allocation9_spill] sm:$0xff] %v5959_v5  ;;  %v468_v14 = vunpack.c.l.bf16 %v414_v17  ;;  %v4843_v36 = vld [vmem:[%s5210_s13 + $0x78] sm:$0xff]   ;;  %v1379_v12 = vor.u32 %v1378_v45, %v1374_v39  ;;  %v1398_v48 = vshll.u32 %v5834_v27, 16  ;;  %v1389_v3 = vrot.slane %v1387_v1, 1  ;;  %v6003_v17 = vld [vmem:[%s5210_s13 + $0x80] sm:$0xff]  }
  0xde   : > { %v1368_v58 = vor.u32 %v1367_v24, %v1363_v7  ;;  %v1385_v7 = vshrl.u32 %v5815_v31, 16  ;;  %v1396_v39 = vshrl.u32 %v5834_v27, 16  ;;  %v1403_v45 = vshll.u32 %v5907_v0, 16 }
  0xdf   : > { %4207 = vmatmul.mubr.msk.bf16.gmra.mrb[12].mxu1 %vm999_vm1, %v5626_v21  ;;  %v529_v24 = vmul.f32 %v5641_v35, %v468_v14  ;;  %v1409_v0 = vshll.u32 %v5844_v25, 16 }
  0xe0   : > { %4210 = vmatprep.mubr.msk.bf16.mxu1 %vm999_vm1, %v5667_v16  ;;  %v1390_v14 = vor.u32 %v1389_v3, %v1385_v7  ;;  %v1405_v1 = vrot.slane %v1403_v45, 1  ;;  %v1709_v45 = vrot.slane %v5412_v60, 1 }
  0xe4   : > { %4367 = vmatmul.mubr.msk.bf16.gmra.mrb[28].mxu0 %vm999_vm1, %v5959_v5  ;;  %v1381_v5 = vshll.u32 %v5889_v44, 16  ;;  %v527_v44 = vmul.f32 %v5641_v35, %v466_v52  ;;  %v1392_v52 = vshll.u32 %v5896_v18, 16  ;;  %v6018_v18 = vadd.f32 %v5652_v54, %v529_v24 }
  0xe5   : > { %4374 = vmatprep.mubr.msk.bf16.mxu0 %vm999_vm1, %v5437_v43  ;;  %v467_v43 = vunpack.c.h.bf16 %v412_v19 }
  0xe6   : > { %v1383_v56 = vrot.slane %v1381_v5, 1  ;;  %v5998_v5 = vsel %vm1241_vm2, %v1368_v58, %v1372_v55  ;;  %v1394_v58 = vrot.slane %v1392_v52, 1 }
  0xe7   : > { %4211 = vmatmul.mubr.msk.bf16.gmra.mrb[16].mxu1 %vm999_vm1, %v5972_v62  ;;  %v528_v19 = vmul.f32 %v5641_v35, %v467_v43 }
  0xe8   : > { %4214 = vmatprep.mubr.msk.bf16.mxu1 %vm999_vm1, %v5978_v42  ;;  %v6006_v43 = vsel %vm1241_vm2, %v1379_v12, %v1383_v56  ;;  %v6032_v56 = vsel %vm1241_vm2, %v1390_v14, %v1394_v58  ;;  %v1710_v14 = vrot.slane %v5846_v6, 1 }
  0xe9   : > { %v6013_v35 = vadd.f32 %v5652_v54, %v528_v19  ;;  %v1414_v19 = vshll.u32 %v5914_v33, 16 }
  0xea   : > { %v1711_v58 = vsel %vm1708_vm3, %v1709_v45, %v1710_v14  ;;  %v6546_v45 = vld [vmem:[#allocation6_spill] sm:$0xff] }
  0xec   : > { %4375 = vmatmul.mubr.msk.bf16.vlgmr.msra.gmra.mrb[0].mxu0 %vm999_vm1, %v5452_v63 }
  0xed   : > { %4407 = vmatpush3.bf16.msra.mxu0 %v5721_v15  ;;  %4378 = vmatprep.mubr.msk.bf16.mxu0 %vm999_vm1, %v5504_v10  ;;  %v1400_v15 = vrot.slane %v1398_v48, 1  ;;  %v6010_v10 = vadd.f32 %v5652_v54, %v527_v44  ;;  %v644_v54 = vsub.f32 0.0, %v6018_v18  ;;  %v1407_v48 = vshrl.u32 %v5844_v25, 16 }
  0xee   : > { %4408 = vmatprep.subr.bf16.mxu0 %v4843_v36  ;;  %v1411_v44 = vrot.slane %v1409_v0, 1 }
  0xef   : > { %4215 = vmatmul.mubr.msk.bf16.gmra.mrb[20].mxu1 %vm999_vm1, %v5998_v5  ;;  %v1401_v55 = vor.u32 %v1400_v15, %v1396_v39  ;;  %v642_v12 = vsub.f32 0.0, %v6010_v10  ;;  %v751_v52 = vmul.f32 1.442695, %v644_v54  ;;  %v1416_v15 = vrot.slane %v1414_v19, 1  ;;  %v5066_v54 = vld [vmem:[%s5210_s13 + $0x40] sm:$0xff]  }
  0xf0   : > { %4218 = vmatprep.mubr.msk.bf16.mxu1 %vm999_vm1, %v6006_v43  ;;  %v1412_v39 = vor.u32 %v1411_v44, %v1407_v48 }
  0xf1   : > { %4409 = vmatpush3.bf16.msra.mxu0 %v4843_v36  ;;  %v643_v36 = vsub.f32 0.0, %v6013_v35  ;;  %v6037_v7 = vsel %vm1241_vm2, %v1401_v55, %v1405_v1  ;;  %v747_v24 = vmul.f32 1.442695, %v642_v12  ;;  %v4844_v55 = vld [vmem:[%s5210_s13 + $0x38] sm:$0xff]  }
  0xf2   : > { %4442 = vmatprep.subr.bf16.mxu0 %v6003_v17  ;;  %v6050_v33 = vsel %vm1241_vm2, %v1412_v39, %v1416_v15 }
  0xf3   : > { %v749_v3 = vmul.f32 1.442695, %v643_v36  ;;  %5051 = vpow2.f32 %v747_v24 }
  0xf4   : > { %4379 = vmatmul.mubr.msk.bf16.gmra.mrb[4].mxu0 %vm999_vm1, %v5528_v51 }
  0xf5   : > { %4382 = vmatprep.mubr.msk.bf16.mxu0 %vm999_vm1, %v5542_v59  ;;  %5053 = vpow2.f32 %v749_v3 }
  0xf6   : > { %5055 = vpow2.f32 %v751_v52 }
  0xf7   : > { %4219 = vmatmul.mubr.msk.bf16.gmra.mrb[24].mxu1 %vm999_vm1, %v6032_v56 }
  0xf8   : > { %4222 = vmatprep.mubr.msk.bf16.mxu1 %vm999_vm1, %v6037_v7 }
  0xfc   : > { %4383 = vmatmul.mubr.msk.bf16.gmra.mrb[8].mxu0 %vm999_vm1, %v5566_v47 }
  0xfd   : > { %4386 = vmatprep.mubr.msk.bf16.mxu0 %vm999_vm1, %v5621_v13  ;;  %v5052_v60 = vpop.eup %5051 }
  0xfe   : > { %v804_v1 = vadd.f32 1.0, %v5052_v60 }
  0xff   : > { %4223 = vmatmul.mubr.msk.bf16.gmra.mrb[28].mxu1 %vm999_vm1, %v6050_v33  ;;  %v5054_v6 = vpop.eup %5053 }
 0x100   : > { %4230 = vmatprep.mubr.msk.bf16.mxu1 %vm999_vm1, %v1711_v58  ;;  %v5056_v0 = vpop.eup %5055  ;;  %v805_v12 = vadd.f32 1.0, %v5054_v6  ;;  %5057 = vrcp.f32 %v804_v1 }
 0x101   : > { %v806_v36 = vadd.f32 1.0, %v5056_v0 }
 0x102   : > { %5059 = vrcp.f32 %v805_v12 }
 0x103   : > { %5061 = vrcp.f32 %v806_v36 }
 0x104   : > { %4387 = vmatmul.mubr.msk.bf16.gmra.mrb[12].mxu0 %vm999_vm1, %v5686_v11 }
 0x105   : > { %4390 = vmatprep.mubr.msk.bf16.mxu0 %vm999_vm1, %v5736_v53 }
 0x107   : > { %4231 = vmatmul.mubr.msk.bf16.vlgmr.msra.gmra.mrb[0].mxu1 %vm999_vm1, %v5638_v49 }
 0x108   : > { %4263 = vmatpush3.bf16.msra.mxu1 %v5882_v2  ;;  %4234 = vmatprep.mubr.msk.bf16.mxu1 %vm999_vm1, %v5648_v34 }
 0x109   : > { %4264 = vmatprep.subr.bf16.mxu1 %v4844_v55 }
 0x10a   : > { %v5058_v49 = vpop.eup %5057 }
 0x10b   : > { %v910_v44 = vmul.f32 %v5058_v49, %v6010_v10 }
 0x10c   : > { %4391 = vmatmul.mubr.msk.bf16.gmra.mrb[16].mxu0 %vm999_vm1, %v5756_v20  ;;  %4265 = vmatpush3.bf16.msra.mxu1 %v4844_v55  ;;  %v5060_v2 = vpop.eup %5059 }
 0x10d   : > { %4394 = vmatprep.mubr.msk.bf16.mxu0 %vm999_vm1, %v5773_v28  ;;  %4478 = vmatprep.subr.bf16.mxu1 %v5066_v54  ;;  %v5062_v48 = vpop.eup %5061  ;;  %v912_v19 = vmul.f32 %v5060_v2, %v6013_v35  ;;  %v4846_v35 = vld [vmem:[%s5210_s13 + $0x88] sm:$0xff]   ;;  %v957_v2 = vld [vmem:[#allocation2 + $0x30] sm:$0xff] }
 0x10e   : > { %v914_v24 = vmul.f32 %v5062_v48, %v6018_v18 }
 0x10f   : > { %4235 = vmatmul.mubr.msk.bf16.gmra.mrb[4].mxu1 %vm999_vm1, %v5658_v22  ;;  %v949_v3 = vpack.c.bf16 %v912_v19, %v910_v44  ;;  %v955_v44 = vld [vmem:[#allocation2 + $0x20] sm:$0xff]  ;;  %v958_v19 = vld [vmem:[#allocation2 + $0x38] sm:$0xff] }
 0x110   : > { %4238 = vmatprep.mubr.msk.bf16.mxu1 %vm999_vm1, %v5712_v23  ;;  %v950_v52 = vpack.c.bf16 %v914_v24, %v914_v24 }
 0x111   : > { %v3109_v39 = vrot.slane %v949_v3, 1  ;;  %v2885_v14 = vshll.u32 %v949_v3, 16  ;;  %v2883_v6 = vshrl.u32 %v949_v3, 16 }
 0x112   : > { %v3110_v15 = vrot.slane %v950_v52, 1 }
 0x113   : > { %v2887_v0 = vrot.slane %v2885_v14, 1 }
 0x114   : > { %4395 = vmatmul.mubr.msk.bf16.gmra.mrb[20].mxu0 %vm999_vm1, %v5815_v31  ;;  %v6095_v10 = vsel %vm1708_vm3, %v3109_v39, %v3110_v15 }
 0x115   : > { %4398 = vmatprep.mubr.msk.bf16.mxu0 %vm999_vm1, %v5834_v27  ;;  %v2888_v1 = vor.u32 %v2887_v0, %v2883_v6 }
 0x117   : > { %4239 = vmatmul.mubr.msk.bf16.gmra.mrb[8].mxu1 %vm999_vm1, %v5716_v57 }
 0x118   : > { %4242 = vmatprep.mubr.msk.bf16.mxu1 %vm999_vm1, %v5725_v29 }
 0x11c   : > { %4399 = vmatmul.mubr.msk.bf16.gmra.mrb[24].mxu0 %vm999_vm1, %v5844_v25 }
 0x11d   : > { %4402 = vmatprep.mubr.msk.bf16.mxu0 %vm999_vm1, %v5935_v61 }
 0x11f   : > { %4243 = vmatmul.mubr.msk.bf16.gmra.mrb[12].mxu1 %vm999_vm1, %v5768_v46 }
 0x120   : > { %4246 = vmatprep.mubr.msk.bf16.mxu1 %vm999_vm1, %v6546_v45 }
 0x124   : > { %4403 = vmatmul.mubr.msk.bf16.gmra.mrb[28].mxu0 %vm999_vm1, %v949_v3  ;;  %v956_v3 = vld [vmem:[#allocation2 + $0x28] sm:$0xff] }
 0x125   : > { %4410 = vmatprep.mubr.msk.bf16.mxu0 %vm999_vm1, %v5464_v4  ;;  %v6547_v4 = vld [vmem:[#allocation8_spill] sm:$0xff] }
 0x127   : > { %4247 = vmatmul.mubr.msk.bf16.gmra.mrb[16].mxu1 %vm999_vm1, %v5864_v37 }
 0x128   : > { %4250 = vmatprep.mubr.msk.bf16.mxu1 %vm999_vm1, %v5876_v9 }
 0x12c   : > { %4411 = vmatmul.mubr.msk.bf16.vlgmr.msra.gmra.mrb[0].mxu0 %vm999_vm1, %v5522_v38  ;;  %v6548_v38 = vld [vmem:[#allocation3_spill] sm:$0xff] }
 0x12d   : > { %4443 = vmatpush3.bf16.msra.mxu0 %v6003_v17  ;;  %4414 = vmatprep.mubr.msk.bf16.mxu0 %vm999_vm1, %v5545_v32  ;;  %v6549_v32 = vld [vmem:[#allocation4_spill] sm:$0xff]  ;;  %v6551_v17 = vld [vmem:[#allocation7_spill] sm:$0xff] }
 0x12e   : > { %4444 = vmatprep.subr.bf16.mxu0 %v4846_v35  ;;  %v2235_v18 = vshll.u32 %v6551_v17, 16 }
 0x12f   : > { %4251 = vmatmul.mubr.msk.bf16.gmra.mrb[20].mxu1 %vm999_vm1, %v5894_v26 }
 0x130   : > { %4254 = vmatprep.mubr.msk.bf16.mxu1 %vm999_vm1, %v5912_v30  ;;  %v2237_v60 = vrot.slane %v2235_v18, 1  ;;  %v960_v18 = vld [vmem:[#allocation2 + $0x48] sm:$0xff] }
 0x131   : > { %4445 = vmatpush3.bf16.msra.mxu0 %v4846_v35 }
 0x134   : > { %4415 = vmatmul.mubr.msk.bf16.gmra.mrb[4].mxu0 %vm999_vm1, %v5562_v50  ;;  %v5067_v50 = vld [vmem:[%s5210_s13 + $0x48] sm:$0xff]  }
 0x135   : > { %4418 = vmatprep.mubr.msk.bf16.mxu0 %vm999_vm1, %v5570_v41  ;;  %v2230_v41 = vshll.u32 %v5935_v61, 16 }
 0x137   : > { %4255 = vmatmul.mubr.msk.bf16.gmra.mrb[24].mxu1 %vm999_vm1, %v5917_v8 }
 0x138   : > { %4258 = vmatprep.mubr.msk.bf16.mxu1 %vm999_vm1, %v5933_v40 }
 0x13c   : > { %4419 = vmatmul.mubr.msk.bf16.gmra.mrb[8].mxu0 %vm999_vm1, %v5626_v21  ;;  %v6550_v21 = vld [vmem:[#allocation5_spill] sm:$0xff] }
 0x13d   : > { %4422 = vmatprep.mubr.msk.bf16.mxu0 %vm999_vm1, %v5667_v16  ;;  %v2228_v16 = vshrl.u32 %v5935_v61, 16 }
 0x13f   : > { %4259 = vmatmul.mubr.msk.bf16.gmra.mrb[28].mxu1 %vm999_vm1, %v6547_v4 }
 0x140   : > { %4266 = vmatprep.mubr.msk.bf16.mxu1 %vm999_vm1, %v6548_v38 }
 0x144   : > { %4423 = vmatmul.mubr.msk.bf16.gmra.mrb[12].mxu0 %vm999_vm1, %v5972_v62 }
 0x145   : > { %4426 = vmatprep.mubr.msk.bf16.mxu0 %vm999_vm1, %v5978_v42 }
 0x147   : > { %4267 = vmatmul.mubr.msk.bf16.vlgmr.msra.gmra.mrb[0].mxu1 %vm999_vm1, %v6549_v32 }
 0x148   : > { %4480 = vmatpush3.bf16.msra.mxu1 %v5066_v54  ;;  %4270 = vmatprep.mubr.msk.bf16.mxu1 %vm999_vm1, %v5452_v63  ;;  %v2232_v63 = vrot.slane %v2230_v41, 1  ;;  %v961_v41 = vld [vmem:[#allocation2 + $0x50] sm:$0xff] }
 0x149   : > { %4479 = vmatprep.subr.bf16.mxu1 %v5067_v50 }
 0x14a   : > { %v2233_v58 = vor.u32 %v2232_v63, %v2228_v16  ;;  %v959_v16 = vld [vmem:[#allocation2 + $0x40] sm:$0xff]  ;;  %v962_v63 = vld [vmem:[#allocation2 + $0x58] sm:$0xff] }
 0x14c   : > { %4427 = vmatmul.mubr.msk.bf16.gmra.mrb[16].mxu0 %vm999_vm1, %v5998_v5  ;;  %4481 = vmatpush3.bf16.msra.mxu1 %v5067_v50  ;;  %v2238_v55 = vsel %vm1241_vm2, %v2233_v58, %v2237_v60 }
 0x14d   : > { %4430 = vmatprep.mubr.msk.bf16.mxu0 %vm999_vm1, %v6006_v43 }
 0x14f   : > { %4271 = vmatmul.mubr.msk.bf16.gmra.mrb[4].mxu1 %vm999_vm1, %v6550_v21 }
 0x150   : > { %4274 = vmatprep.mubr.msk.bf16.mxu1 %vm999_vm1, %v5528_v51  ;;  %v2890_v51 = vshll.u32 %v950_v52, 16 }
 0x152   : > { %v2892_v12 = vrot.slane %v2890_v51, 1 }
 0x154   : > { %4431 = vmatmul.mubr.msk.bf16.gmra.mrb[20].mxu0 %vm999_vm1, %v6032_v56 }
 0x155   : > { %4434 = vmatprep.mubr.msk.bf16.mxu0 %vm999_vm1, %v6037_v7 }
 0x157   : > { %4275 = vmatmul.mubr.msk.bf16.gmra.mrb[8].mxu1 %vm999_vm1, %v5542_v59  ;;  %v2893_v59 = vsel %vm1241_vm2, %v2888_v1, %v2892_v12 }
 0x158   : > { %4278 = vmatprep.mubr.msk.bf16.mxu1 %vm999_vm1, %v5566_v47  ;;  %v6552_v47 = vld [vmem:[#allocation9_spill] sm:$0xff] }
 0x15c   : > { %4435 = vmatmul.mubr.msk.bf16.gmra.mrb[24].mxu0 %vm999_vm1, %v6050_v33 }
 0x15d   : > { %4438 = vmatprep.mubr.msk.bf16.mxu0 %vm999_vm1, %v2238_v55 }
 0x15f   : > { %4279 = vmatmul.mubr.msk.bf16.gmra.mrb[12].mxu1 %vm999_vm1, %v5621_v13 }
 0x160   : > { %4282 = vmatprep.mubr.msk.bf16.mxu1 %vm999_vm1, %v5686_v11 }
 0x164   : > { %4439 = vmatmul.mubr.msk.bf16.gmra.mrb[28].mxu0 %vm999_vm1, %v2893_v59 }
 0x165   : > { %4446 = vmatprep.mubr.msk.bf16.mxu0 %vm999_vm1, %v5648_v34 }
 0x167   : > { %4283 = vmatmul.mubr.msk.bf16.gmra.mrb[16].mxu1 %vm999_vm1, %v5736_v53 }
 0x168   : > { %4286 = vmatprep.mubr.msk.bf16.mxu1 %vm999_vm1, %v5756_v20 }
 0x16c   : > { %4447 = vmatmul.mubr.msk.bf16.vlgmr.msra.gmra.mrb[0].mxu0 %vm999_vm1, %v5658_v22 }
 0x16d   : > { %4450 = vmatprep.mubr.msk.bf16.mxu0 %vm999_vm1, %v5712_v23 }
 0x16f   : > { %4287 = vmatmul.mubr.msk.bf16.gmra.mrb[20].mxu1 %vm999_vm1, %v5773_v28 }
 0x170   : > { %4290 = vmatprep.mubr.msk.bf16.mxu1 %vm999_vm1, %v5815_v31 }
 0x174   : > { %4451 = vmatmul.mubr.msk.bf16.gmra.mrb[4].mxu0 %vm999_vm1, %v5716_v57 }
 0x175   : > { %4454 = vmatprep.mubr.msk.bf16.mxu0 %vm999_vm1, %v5725_v29 }
 0x177   : > { %4291 = vmatmul.mubr.msk.bf16.gmra.mrb[24].mxu1 %vm999_vm1, %v5834_v27 }
 0x178   : > { %4294 = vmatprep.mubr.msk.bf16.mxu1 %vm999_vm1, %v5844_v25 }
 0x17c   : > { %4455 = vmatmul.mubr.msk.bf16.gmra.mrb[8].mxu0 %vm999_vm1, %v5768_v46 }
 0x17d   : > { %4458 = vmatprep.mubr.msk.bf16.mxu0 %vm999_vm1, %v6546_v45 }
 0x17f   : > { %4295 = vmatmul.mubr.msk.bf16.gmra.mrb[28].mxu1 %vm999_vm1, %v5935_v61  ;;  %v952_v61 = vld [vmem:[#allocation2 + $0x8] sm:$0xff] }
 0x180   : > { %4318 = vmatprep.mubr.msk.bf16.mxu1 %vm999_vm1, %v5972_v62 }
 0x184   : > { %4459 = vmatmul.mubr.msk.bf16.gmra.mrb[12].mxu0 %vm999_vm1, %v5864_v37 }
 0x185   : > { %4462 = vmatprep.mubr.msk.bf16.mxu0 %vm999_vm1, %v5876_v9 }
 0x187   : > { %4319 = vmatmul.mubr.msk.bf16.vlgmr.msra.gmra.mrb[16].mxu1 %vm999_vm1, %v5978_v42 }
 0x188   : > { %4322 = vmatprep.mubr.msk.bf16.mxu1 %vm999_vm1, %v5998_v5 }
 0x18c   : > { %4463 = vmatmul.mubr.msk.bf16.gmra.mrb[16].mxu0 %vm999_vm1, %v5894_v26  ;;  %v953_v26 = vld [vmem:[#allocation2 + $0x10] sm:$0xff] }
 0x18d   : > { %4466 = vmatprep.mubr.msk.bf16.mxu0 %vm999_vm1, %v5912_v30  ;;  %v951_v30 = vld [vmem:[#allocation2] sm:$0xff] }
 0x18f   : > { %4323 = vmatmul.mubr.msk.bf16.gmra.mrb[20].mxu1 %vm999_vm1, %v6006_v43 }
 0x190   : > { %4326 = vmatprep.mubr.msk.bf16.mxu1 %vm999_vm1, %v6032_v56 }
 0x194   : > { %4467 = vmatmul.mubr.msk.bf16.gmra.mrb[20].mxu0 %vm999_vm1, %v5917_v8  ;;  %v954_v8 = vld [vmem:[#allocation2 + $0x18] sm:$0xff] }
 0x195   : > { %4470 = vmatprep.mubr.msk.bf16.mxu0 %vm999_vm1, %v5933_v40 }
 0x197   : > { %4327 = vmatmul.mubr.msk.bf16.gmra.mrb[24].mxu1 %vm999_vm1, %v6037_v7 }
 0x198   : > { %4330 = vmatprep.mubr.msk.bf16.mxu1 %vm999_vm1, %v6050_v33 }
 0x19c   : > { %4471 = vmatmul.mubr.msk.bf16.gmra.mrb[24].mxu0 %vm999_vm1, %v6547_v4 }
 0x19d   : > { %4474 = vmatprep.mubr.msk.bf16.mxu0 %vm999_vm1, %v6552_v47  ;;  %v965_v47 = vld [vmem:[#allocation2 + $0x70] sm:$0xff] }
 0x19f   : > { %4331 = vmatmul.mubr.msk.bf16.gmra.mrb[28].mxu1 %vm999_vm1, %v2238_v55 }
 0x1a4   : > { %4475 = vmatmul.mubr.msk.bf16.gmra.mrb[28].mxu0 %vm999_vm1, %v6095_v10 }
 0x21a   : > { %v4268_v13 = vpop.f32.mrb[0].mxu1 }
 0x21b   : > { %v2069_v34 = vpop.f32.mrb[1].mxu1  ;;  %v4482_v40 = vadd.f32 %v4268_v13, %v953_v26 }
 0x21c   : > { %v4269_v22 = vpop.f32.mrb[2].mxu1  ;;  %v4484_v62 = vadd.f32 %v2069_v34, %v951_v30  ;;  %v963_v34 = vld [vmem:[#allocation2 + $0x60] sm:$0xff] }
 0x21d   : > { %v2072_v11 = vpop.f32.mrb[3].mxu1  ;;  %v4486_v5 = vadd.f32 %v4269_v22, %v954_v8  ;;  %v966_v22 = vld [vmem:[#allocation2 + $0x78] sm:$0xff]  ;;  %v969_v8 = vld [vmem:[#allocation2 + $0x90] sm:$0xff] }
 0x21e   : > { %v4488_v7 = vadd.f32 %v2072_v11, %v952_v61  ;;  %v970_v61 = vld [vmem:[#allocation2 + $0x98] sm:$0xff] }
 0x222   : > { %v4272_v23 = vpop.f32.mrb[4].mxu1 }
 0x223   : > { %v2085_v57 = vpop.f32.mrb[5].mxu1  ;;  %v4490_v24 = vadd.f32 %v4272_v23, %v957_v2  ;;  %v964_v23 = vld [vmem:[#allocation2 + $0x68] sm:$0xff] }
 0x224   : > { %v4273_v29 = vpop.f32.mrb[6].mxu1  ;;  %v4492_v52 = vadd.f32 %v2085_v57, %v955_v44 }
 0x225   : > { %v2088_v53 = vpop.f32.mrb[7].mxu1  ;;  %v4494_v15 = vadd.f32 %v4273_v29, %v958_v19 }
 0x226   : > { %v4496_v35 = vadd.f32 %v2088_v53, %v956_v3 }
 0x22a   : > { %v4276_v20 = vpop.f32.mrb[8].mxu1 }
 0x22b   : > { %v2101_v46 = vpop.f32.mrb[9].mxu1  ;;  %v4498_v17 = vadd.f32 %v4276_v20, %v961_v41  ;;  %v974_v41 = vld [vmem:[#allocation2 + $0xb8] sm:$0xff] }
 0x22c   : > { %v4277_v28 = vpop.f32.mrb[10].mxu1  ;;  %v4500_v14 = vadd.f32 %v2101_v46, %v959_v16 }
 0x22d   : > { %v2104_v31 = vpop.f32.mrb[11].mxu1  ;;  %v4502_v60 = vadd.f32 %v4277_v28, %v962_v63 }
 0x22e   : > { %v4504_v51 = vadd.f32 %v2104_v31, %v960_v18 }
 0x232   : > { %v6229_v27 = vpop.f32.mrb[12].mxu1 }
 0x233   : > { %v6231_v25 = vpop.f32.mrb[13].mxu1  ;;  %v4506_v11 = vadd.f32 %v6229_v27, %v965_v47 }
 0x234   : > { %v6233_v37 = vpop.f32.mrb[14].mxu1  ;;  %v4508_v57 = vadd.f32 %v6231_v25, %v963_v34 }
 0x235   : > { %v6235_v9 = vpop.f32.mrb[15].mxu1  ;;  %v4510_v53 = vadd.f32 %v6233_v37, %v966_v22 }
 0x236   : > { %v4512_v28 = vadd.f32 %v6235_v9, %v964_v23 }
 0x23f   : > { %v4448_v42 = vpop.f32.mrb[0].mxu0 }
 0x240   : > { %v6237_v43 = vadd.f32 %v4482_v40, %v4448_v42  ;;  %v3166_v56 = vpop.f32.mrb[1].mxu0  ;;  %v967_v40 = vld [vmem:[#allocation2 + $0x80] sm:$0xff] }
 0x241   : > { %v6239_v33 = vadd.f32 %v4484_v62, %v3166_v56  ;;  %v4449_v36 = vpop.f32.mrb[2].mxu0 }
 0x242   : > { %3327 = vst.msk [vmem:[#allocation2 + $0x10] sm:$0xff] %vm999_vm1, %v6237_v43  ;;  %v6243_v54 = vadd.f32 %v4486_v5, %v4449_v36  ;;  %v3169_v49 = vpop.f32.mrb[3].mxu0  ;;  %v968_v5 = vld [vmem:[#allocation2 + $0x88] sm:$0xff] }
 0x243   : > { %3325 = vst.msk [vmem:[#allocation2] sm:$0xff] %vm999_vm1, %v6239_v33  ;;  %v6247_v48 = vadd.f32 %v4488_v7, %v3169_v49 }
 0x244   : > { %3328 = vst.msk [vmem:[#allocation2 + $0x18] sm:$0xff] %vm999_vm1, %v6243_v54 }
 0x245   : > { %3326 = vst.msk [vmem:[#allocation2 + $0x8] sm:$0xff] %vm999_vm1, %v6247_v48 }
 0x247   : > { %v4452_v39 = vpop.f32.mrb[4].mxu0 }
 0x248   : > { %v6253_v45 = vadd.f32 %v4490_v24, %v4452_v39  ;;  %v3182_v10 = vpop.f32.mrb[5].mxu0 }
 0x249   : > { %v6255_v4 = vadd.f32 %v4492_v52, %v3182_v10  ;;  %v4453_v38 = vpop.f32.mrb[6].mxu0 }
 0x24a   : > { %3331 = vst.msk [vmem:[#allocation2 + $0x30] sm:$0xff] %vm999_vm1, %v6253_v45  ;;  %v6259_v32 = vadd.f32 %v4494_v15, %v4453_v38  ;;  %v3185_v50 = vpop.f32.mrb[7].mxu0  ;;  %v973_v15 = vld [vmem:[#allocation2 + $0xb0] sm:$0xff]  ;;  %v971_v38 = vld [vmem:[#allocation2 + $0xa0] sm:$0xff] }
 0x24b   : > { %3329 = vst.msk [vmem:[#allocation2 + $0x20] sm:$0xff] %vm999_vm1, %v6255_v4  ;;  %v6263_v21 = vadd.f32 %v4496_v35, %v3185_v50 }
 0x24c   : > { %3332 = vst.msk [vmem:[#allocation2 + $0x38] sm:$0xff] %vm999_vm1, %v6259_v32 }
 0x24d   : > { %3330 = vst.msk [vmem:[#allocation2 + $0x28] sm:$0xff] %vm999_vm1, %v6263_v21 }
 0x24f   : > { %v4456_v58 = vpop.f32.mrb[8].mxu0 }
 0x250   : > { %v6269_v6 = vadd.f32 %v4498_v17, %v4456_v58  ;;  %v3198_v0 = vpop.f32.mrb[9].mxu0  ;;  %v972_v17 = vld [vmem:[#allocation2 + $0xa8] sm:$0xff] }
 0x251   : > { %v6271_v55 = vadd.f32 %v4500_v14, %v3198_v0  ;;  %v4457_v1 = vpop.f32.mrb[10].mxu0 }
 0x252   : > { %3335 = vst.msk [vmem:[#allocation2 + $0x50] sm:$0xff] %vm999_vm1, %v6269_v6  ;;  %v6275_v12 = vadd.f32 %v4502_v60, %v4457_v1  ;;  %v3201_v59 = vpop.f32.mrb[11].mxu0 }
 0x253   : > { %3333 = vst.msk [vmem:[#allocation2 + $0x40] sm:$0xff] %vm999_vm1, %v6271_v55  ;;  %v6279_v13 = vadd.f32 %v4504_v51, %v3201_v59 }
 0x254   : > { %3336 = vst.msk [vmem:[#allocation2 + $0x58] sm:$0xff] %vm999_vm1, %v6275_v12 }
 0x255   : > { %3334 = vst.msk [vmem:[#allocation2 + $0x48] sm:$0xff] %vm999_vm1, %v6279_v13 }
 0x257   : > { %v4460_v29 = vpop.f32.mrb[12].mxu0 }
 0x258   : > { %v6288_v20 = vadd.f32 %v4506_v11, %v4460_v29  ;;  %v3214_v46 = vpop.f32.mrb[13].mxu0  ;;  %v977_v11 = vld [vmem:[#allocation2 + $0xd0] sm:$0xff]  ;;  %v975_v29 = vld [vmem:[#allocation2 + $0xc0] sm:$0xff] }
 0x259   : > { %v6291_v31 = vadd.f32 %v4508_v57, %v3214_v46  ;;  %v4461_v26 = vpop.f32.mrb[14].mxu0  ;;  %v978_v46 = vld [vmem:[#allocation2 + $0xd8] sm:$0xff] }
 0x25a   : > { %3339 = vst.msk [vmem:[#allocation2 + $0x70] sm:$0xff] %vm999_vm1, %v6288_v20  ;;  %v6295_v30 = vadd.f32 %v4510_v53, %v4461_v26  ;;  %v3217_v27 = vpop.f32.mrb[15].mxu0  ;;  %v4320_v37 = vpop.f32.mrb[16].mxu1 }
 0x25b   : > { %3337 = vst.msk [vmem:[#allocation2 + $0x60] sm:$0xff] %vm999_vm1, %v6291_v31  ;;  %v6299_v25 = vadd.f32 %v4512_v28, %v3217_v27  ;;  %v2357_v9 = vpop.f32.mrb[17].mxu1  ;;  %v4514_v62 = vadd.f32 %v4320_v37, %v969_v8  ;;  %v976_v27 = vld [vmem:[#allocation2 + $0xc8] sm:$0xff] }
 0x25c   : > { %3340 = vst.msk [vmem:[#allocation2 + $0x78] sm:$0xff] %vm999_vm1, %v6295_v30  ;;  %v4321_v42 = vpop.f32.mrb[18].mxu1  ;;  %v4516_v56 = vadd.f32 %v2357_v9, %v967_v40 }
 0x25d   : > { %3338 = vst.msk [vmem:[#allocation2 + $0x68] sm:$0xff] %vm999_vm1, %v6299_v25  ;;  %v2360_v7 = vpop.f32.mrb[19].mxu1  ;;  %v4518_v49 = vadd.f32 %v4321_v42, %v970_v61 }
 0x25e   : > { %v4520_v19 = vadd.f32 %v2360_v7, %v968_v5 }
 0x25f   : > { %v4464_v36 = vpop.f32.mrb[16].mxu0 }
 0x260   : > { %v6305_v2 = vadd.f32 %v4514_v62, %v4464_v36  ;;  %v3230_v44 = vpop.f32.mrb[17].mxu0 }
 0x261   : > { %v6307_v24 = vadd.f32 %v4516_v56, %v3230_v44  ;;  %v4465_v3 = vpop.f32.mrb[18].mxu0 }
 0x262   : > { %3343 = vst.msk [vmem:[#allocation2 + $0x90] sm:$0xff] %vm999_vm1, %v6305_v2  ;;  %v6311_v52 = vadd.f32 %v4518_v49, %v4465_v3  ;;  %v3233_v39 = vpop.f32.mrb[19].mxu0  ;;  %v4324_v35 = vpop.f32.mrb[20].mxu1  ;;  %v981_v49 = vld [vmem:[#allocation2 + $0xf0] sm:$0xff]  ;;  %v979_v3 = vld [vmem:[#allocation2 + $0xe0] sm:$0xff] }
 0x263   : > { %3341 = vst.msk [vmem:[#allocation2 + $0x80] sm:$0xff] %vm999_vm1, %v6307_v24  ;;  %v6315_v10 = vadd.f32 %v4520_v19, %v3233_v39  ;;  %v2373_v50 = vpop.f32.mrb[21].mxu1  ;;  %v4522_v16 = vadd.f32 %v4324_v35, %v973_v15  ;;  %v982_v15 = vld [vmem:[#allocation2 + $0xf8] sm:$0xff] }
 0x264   : > { %3344 = vst.msk [vmem:[#allocation2 + $0x98] sm:$0xff] %vm999_vm1, %v6311_v52  ;;  %v4325_v63 = vpop.f32.mrb[22].mxu1  ;;  %v4524_v18 = vadd.f32 %v2373_v50, %v971_v38  ;;  %v980_v50 = vld [vmem:[#allocation2 + $0xe8] sm:$0xff] }
 0x265   : > { %3342 = vst.msk [vmem:[#allocation2 + $0x88] sm:$0xff] %vm999_vm1, %v6315_v10  ;;  %v2376_v14 = vpop.f32.mrb[23].mxu1  ;;  %v4526_v60 = vadd.f32 %v4325_v63, %v974_v41 }
 0x266   : > { %v4528_v1 = vadd.f32 %v2376_v14, %v972_v17 }
 0x267   : > { %v4468_v58 = vpop.f32.mrb[20].mxu0 }
 0x268   : > { %v6321_v0 = vadd.f32 %v4522_v16, %v4468_v58  ;;  %v3246_v51 = vpop.f32.mrb[21].mxu0 }
 0x269   : > { %v6323_v59 = vadd.f32 %v4524_v18, %v3246_v51  ;;  %v4469_v47 = vpop.f32.mrb[22].mxu0 }
 0x26a   : > { %3347 = vst.msk [vmem:[#allocation2 + $0xb0] sm:$0xff] %vm999_vm1, %v6321_v0  ;;  %v6327_v34 = vadd.f32 %v4526_v60, %v4469_v47  ;;  %v3249_v22 = vpop.f32.mrb[23].mxu0  ;;  %v4328_v57 = vpop.f32.mrb[24].mxu1 }
 0x26b   : > { %3345 = vst.msk [vmem:[#allocation2 + $0xa0] sm:$0xff] %vm999_vm1, %v6323_v59  ;;  %v6331_v23 = vadd.f32 %v4528_v1, %v3249_v22  ;;  %v2389_v53 = vpop.f32.mrb[25].mxu1  ;;  %v4530_v28 = vadd.f32 %v4328_v57, %v977_v11  ;;  %v6373_v11 = vld [vmem:[%s6526_s2] ss:$0 sm:$0xff] (!%p3879_p11) }
 0x26c   : > { %3348 = vst.msk [vmem:[#allocation2 + $0xb8] sm:$0xff] %vm999_vm1, %v6327_v34  ;;  %v4329_v26 = vpop.f32.mrb[26].mxu1  ;;  %v4532_v8 = vadd.f32 %v2389_v53, %v975_v29  ;;  %v3368_v57 = vadd.f32 (!%p3879_p11), %v6239_v33, %v6373_v11  ;;  %v3369_v29 = vadd.f32 (!%p3879_p11), %v6247_v48, %v6373_v11  ;;  %v3370_v53 = vadd.f32 (!%p3879_p11), %v6237_v43, %v6373_v11 }
 0x26d   : > { %3346 = vst.msk [vmem:[#allocation2 + $0xa8] sm:$0xff] %vm999_vm1, %v6331_v23  ;;  %v2392_v37 = vpop.f32.mrb[27].mxu1  ;;  %v4534_v9 = vadd.f32 %v4329_v26, %v978_v46  ;;  %v3371_v46 = vadd.f32 (!%p3879_p11), %v6243_v54, %v6373_v11  ;;  %v3373_v26 = vadd.f32 (!%p3879_p11), %v6263_v21, %v6373_v11  ;;  %v3374_v33 = vadd.f32 (!%p3879_p11), %v6253_v45, %v6373_v11 }
 0x26e   : > { %v4536_v42 = vadd.f32 %v2392_v37, %v976_v27  ;;  %v3375_v48 = vadd.f32 (!%p3879_p11), %v6259_v32, %v6373_v11  ;;  %v3916_v27 = vpack.c.bf16 (!%p3879_p11), %v3368_v57, %v3368_v57  ;;  %v3917_v43 = vpack.c.bf16 (!%p3879_p11), %v3369_v29, %v3369_v29 }
 0x26f   : > { %v4472_v40 = vpop.f32.mrb[24].mxu0  ;;  %v3919_v54 = vpack.c.bf16 (!%p3879_p11), %v3371_v46, %v3371_v46  ;;  %v3376_v45 = vadd.f32 (!%p3879_p11), %v6271_v55, %v6373_v11  ;;  %v3377_v32 = vadd.f32 (!%p3879_p11), %v6279_v13, %v6373_v11  ;;  %v3378_v21 = vadd.f32 (!%p3879_p11), %v6269_v6, %v6373_v11 }
 0x270   : > { %v6337_v61 = vadd.f32 %v4530_v28, %v4472_v40  ;;  %v3262_v62 = vpop.f32.mrb[25].mxu0  ;;  %v3372_v28 = vadd.f32 (!%p3879_p11), %v6255_v4, %v6373_v11  ;;  %v3921_v40 = vpack.c.bf16 (!%p3879_p11), %v3373_v26, %v3373_v26  ;;  %v3922_v4 = vpack.c.bf16 (!%p3879_p11), %v3374_v33, %v3374_v33  ;;  %3529 = vst.msk [vmem:[%s5231_s12] sm:$0xf] (!%p3879_p11), %vm3528_vm4, %v3916_v27 }
 0x271   : > { %v6339_v5 = vadd.f32 %v4532_v8, %v3262_v62  ;;  %v4473_v56 = vpop.f32.mrb[26].mxu0  ;;  %v3918_v8 = vpack.c.bf16 (!%p3879_p11), %v3370_v53, %v3370_v53  ;;  %3530 = vst.msk [vmem:[%s5231_s12 + $0x4] sm:$0xf] (!%p3879_p11), %vm3528_vm4, %v3917_v43  ;;  %3532 = vst.msk [vmem:[%s5231_s12 + $0xc] sm:$0xf] (!%p3879_p11), %vm3528_vm4, %v3919_v54  ;;  %v3379_v62 = vadd.f32 (!%p3879_p11), %v6275_v12, %v6373_v11 }
 0x272   : > { %3351 = vst.msk [vmem:[#allocation2 + $0xd0] sm:$0xff] %vm999_vm1, %v6337_v61  ;;  %v6343_v7 = vadd.f32 %v4534_v9, %v4473_v56  ;;  %v3265_v36 = vpop.f32.mrb[27].mxu0  ;;  %v4332_v19 = vpop.f32.mrb[28].mxu1  ;;  %v3920_v37 = vpack.c.bf16 (!%p3879_p11), %v3372_v28, %v3372_v28  ;;  %v3923_v9 = vpack.c.bf16 (!%p3879_p11), %v3375_v48, %v3375_v48  ;;  %v3380_v55 = vadd.f32 (!%p3879_p11), %v6291_v31, %v6373_v11 }
 0x273   : > { %3349 = vst.msk [vmem:[#allocation2 + $0xc0] sm:$0xff] %vm999_vm1, %v6339_v5  ;;  %v6347_v44 = vadd.f32 %v4536_v42, %v3265_v36  ;;  %v2405_v39 = vpop.f32.mrb[29].mxu1  ;;  %v4538_v35 = vadd.f32 %v4332_v19, %v981_v49  ;;  %v3381_v6 = vadd.f32 (!%p3879_p11), %v6299_v25, %v6373_v11  ;;  %v3382_v12 = vadd.f32 (!%p3879_p11), %v6288_v20, %v6373_v11 }
 0x274   : > { %3352 = vst.msk [vmem:[#allocation2 + $0xd8] sm:$0xff] %vm999_vm1, %v6343_v7  ;;  %v4333_v38 = vpop.f32.mrb[30].mxu1  ;;  %v4540_v41 = vadd.f32 %v2405_v39, %v979_v3  ;;  %v3383_v13 = vadd.f32 (!%p3879_p11), %v6295_v30, %v6373_v11  ;;  %v3924_v42 = vpack.c.bf16 (!%p3879_p11), %v3376_v45, %v3376_v45  ;;  %v3925_v56 = vpack.c.bf16 (!%p3879_p11), %v3377_v32, %v3377_v32 }
 0x275   : > { %3350 = vst.msk [vmem:[#allocation2 + $0xc8] sm:$0xff] %vm999_vm1, %v6347_v44  ;;  %v2408_v16 = vpop.f32.mrb[31].mxu1  ;;  %v4542_v17 = vadd.f32 %v4333_v38, %v982_v15  ;;  %v3926_v36 = vpack.c.bf16 (!%p3879_p11), %v3378_v21, %v3378_v21  ;;  %v3927_v49 = vpack.c.bf16 (!%p3879_p11), %v3379_v62, %v3379_v62  ;;  %v3928_v19 = vpack.c.bf16 (!%p3879_p11), %v3380_v55, %v3380_v55 }
 0x276   : > { %v4544_v58 = vadd.f32 %v2408_v16, %v980_v50  ;;  %3531 = vst.msk [vmem:[%s5231_s12 + $0x8] sm:$0xf] (!%p3879_p11), %vm3528_vm4, %v3918_v8  ;;  %3533 = vst.msk [vmem:[%s5231_s12 + $0x10] sm:$0xf] (!%p3879_p11), %vm3528_vm4, %v3920_v37  ;;  %v3929_v3 = vpack.c.bf16 (!%p3879_p11), %v3381_v6, %v3381_v6  ;;  %v3930_v31 = vpack.c.bf16 (!%p3879_p11), %v3382_v12, %v3382_v12 }
 0x277   : > { %v4476_v63 = vpop.f32.mrb[28].mxu0  ;;  %3360 = sbr.rel (%p3879_p11) target bundleno = 649 (0x289), region = 48  ;;  %3534 = vst.msk [vmem:[%s5231_s12 + $0x14] sm:$0xf] (!%p3879_p11), %vm3528_vm4, %v3921_v40  ;;  %3535 = vst.msk [vmem:[%s5231_s12 + $0x18] sm:$0xf] (!%p3879_p11), %vm3528_vm4, %v3922_v4  ;;  %v3931_v39 = vpack.c.bf16 (!%p3879_p11), %v3383_v13, %v3383_v13  ;;  %v3384_v20 = vadd.f32 (!%p3879_p11), %v6307_v24, %v6373_v11  ;;  %v3385_v30 = vadd.f32 (!%p3879_p11), %v6315_v10, %v6373_v11 }
 0x278   : > { %v6353_v18 = vadd.f32 %v4538_v35, %v4476_v63  ;;  %v3278_v14 = vpop.f32.mrb[29].mxu0  ;;  %3536 = vst.msk [vmem:[%s5231_s12 + $0x1c] sm:$0xf] (!%p3879_p11), %vm3528_vm4, %v3923_v9  ;;  %3537 = vst.msk [vmem:[%s5231_s12 + $0x20] sm:$0xf] (!%p3879_p11), %vm3528_vm4, %v3924_v42  ;;  %v3386_v25 = vadd.f32 (!%p3879_p11), %v6305_v2, %v6373_v11  ;;  %v3387_v15 = vadd.f32 (!%p3879_p11), %v6311_v52, %v6373_v11 }
 0x279   : > { %v6355_v60 = vadd.f32 %v4540_v41, %v3278_v14  ;;  %v4477_v51 = vpop.f32.mrb[30].mxu0  ;;  %3538 = vst.msk [vmem:[%s5231_s12 + $0x24] sm:$0xf] (!%p3879_p11), %vm3528_vm4, %v3925_v56  ;;  %3539 = vst.msk [vmem:[%s5231_s12 + $0x28] sm:$0xf] (!%p3879_p11), %vm3528_vm4, %v3926_v36  ;;  %v3388_v24 = vadd.f32 (!%p3879_p11), %v6323_v59, %v6373_v11  ;;  %v3389_v2 = vadd.f32 (!%p3879_p11), %v6331_v23, %v6373_v11 }
 0x27a   : > { %3355 = vst.msk [vmem:[#allocation2 + $0xf0] sm:$0xff] %vm999_vm1, %v6353_v18  ;;  %v6359_v1 = vadd.f32 %v4542_v17, %v4477_v51  ;;  %v3281_v47 = vpop.f32.mrb[31].mxu0  ;;  %v3390_v52 = vadd.f32 (!%p3879_p11), %v6321_v0, %v6373_v11  ;;  %v3391_v10 = vadd.f32 (!%p3879_p11), %v6327_v34, %v6373_v11  ;;  %v3932_v35 = vpack.c.bf16 (!%p3879_p11), %v3384_v20, %v3384_v20 }
 0x27b   : > { %3353 = vst.msk [vmem:[#allocation2 + $0xe0] sm:$0xff] %vm999_vm1, %v6355_v60  ;;  %v6363_v22 = vadd.f32 %v4544_v58, %v3281_v47  ;;  %v3933_v38 = vpack.c.bf16 (!%p3879_p11), %v3385_v30, %v3385_v30  ;;  %v3934_v50 = vpack.c.bf16 (!%p3879_p11), %v3386_v25, %v3386_v25  ;;  %v3935_v41 = vpack.c.bf16 (!%p3879_p11), %v3387_v15, %v3387_v15 }
 0x27c   : > { %3356 = vst.msk [vmem:[#allocation2 + $0xf8] sm:$0xff] %vm999_vm1, %v6359_v1  ;;  %v3936_v16 = vpack.c.bf16 (!%p3879_p11), %v3388_v24, %v3388_v24  ;;  %v3937_v63 = vpack.c.bf16 (!%p3879_p11), %v3389_v2, %v3389_v2  ;;  %v3938_v59 = vpack.c.bf16 (!%p3879_p11), %v3390_v52, %v3390_v52  ;;  %v3939_v17 = vpack.c.bf16 (!%p3879_p11), %v3391_v10, %v3391_v10 }
 0x27d   : > { %3354 = vst.msk [vmem:[#allocation2 + $0xe8] sm:$0xff] %vm999_vm1, %v6363_v22  ;;  %v3392_v0 = vadd.f32 (!%p3879_p11), %v6339_v5, %v6373_v11  ;;  %v3393_v34 = vadd.f32 (!%p3879_p11), %v6347_v44, %v6373_v11  ;;  %v3394_v23 = vadd.f32 (!%p3879_p11), %v6337_v61, %v6373_v11  ;;  %v3395_v14 = vadd.f32 (!%p3879_p11), %v6343_v7, %v6373_v11 }
 0x27e   : > { %3540 = vst.msk [vmem:[%s5231_s12 + $0x2c] sm:$0xf] %vm3528_vm4, %v3927_v49  ;;  %3541 = vst.msk [vmem:[%s5231_s12 + $0x30] sm:$0xf] %vm3528_vm4, %v3928_v19  ;;  %v3396_v5 = vadd.f32 %v6355_v60, %v6373_v11  ;;  %v3397_v61 = vadd.f32 %v6363_v22, %v6373_v11  ;;  %v3398_v7 = vadd.f32 %v6353_v18, %v6373_v11 }
 0x27f   : > { %3542 = vst.msk [vmem:[%s5231_s12 + $0x34] sm:$0xf] %vm3528_vm4, %v3929_v3  ;;  %3543 = vst.msk [vmem:[%s5231_s12 + $0x38] sm:$0xf] %vm3528_vm4, %v3930_v31  ;;  %v3399_v44 = vadd.f32 %v6359_v1, %v6373_v11  ;;  %v3940_v58 = vpack.c.bf16 %v3392_v0, %v3392_v0  ;;  %v3941_v51 = vpack.c.bf16 %v3393_v34, %v3393_v34 }
 0x280   : > { %3544 = vst.msk [vmem:[%s5231_s12 + $0x3c] sm:$0xf] %vm3528_vm4, %v3931_v39  ;;  %3545 = vst.msk [vmem:[%s5231_s12 + $0x40] sm:$0xf] %vm3528_vm4, %v3932_v35  ;;  %v3942_v47 = vpack.c.bf16 %v3394_v23, %v3394_v23  ;;  %v3943_v57 = vpack.c.bf16 %v3395_v14, %v3395_v14  ;;  %v3944_v29 = vpack.c.bf16 %v3396_v5, %v3396_v5 }
 0x281   : > { %3546 = vst.msk [vmem:[%s5231_s12 + $0x44] sm:$0xf] %vm3528_vm4, %v3933_v38  ;;  %3547 = vst.msk [vmem:[%s5231_s12 + $0x48] sm:$0xf] %vm3528_vm4, %v3934_v50  ;;  %v3945_v53 = vpack.c.bf16 %v3397_v61, %v3397_v61  ;;  %v3946_v60 = vpack.c.bf16 %v3398_v7, %v3398_v7  ;;  %v3947_v46 = vpack.c.bf16 %v3399_v44, %v3399_v44 }
 0x282   : > { %3548 = vst.msk [vmem:[%s5231_s12 + $0x4c] sm:$0xf] %vm3528_vm4, %v3935_v41  ;;  %3549 = vst.msk [vmem:[%s5231_s12 + $0x50] sm:$0xf] %vm3528_vm4, %v3936_v16 }
 0x283   : > { %3550 = vst.msk [vmem:[%s5231_s12 + $0x54] sm:$0xf] %vm3528_vm4, %v3937_v63  ;;  %3551 = vst.msk [vmem:[%s5231_s12 + $0x58] sm:$0xf] %vm3528_vm4, %v3938_v59 }
 0x284   : > { %3552 = vst.msk [vmem:[%s5231_s12 + $0x5c] sm:$0xf] %vm3528_vm4, %v3939_v17  ;;  %3553 = vst.msk [vmem:[%s5231_s12 + $0x60] sm:$0xf] %vm3528_vm4, %v3940_v58 }
 0x285   : > { %3554 = vst.msk [vmem:[%s5231_s12 + $0x64] sm:$0xf] %vm3528_vm4, %v3941_v51  ;;  %3555 = vst.msk [vmem:[%s5231_s12 + $0x68] sm:$0xf] %vm3528_vm4, %v3942_v47 }
 0x286   : > { %3556 = vst.msk [vmem:[%s5231_s12 + $0x6c] sm:$0xf] %vm3528_vm4, %v3943_v57  ;;  %3557 = vst.msk [vmem:[%s5231_s12 + $0x70] sm:$0xf] %vm3528_vm4, %v3944_v29 }
 0x287   : > { %3558 = vst.msk [vmem:[%s5231_s12 + $0x74] sm:$0xf] %vm3528_vm4, %v3945_v53  ;;  %3559 = vst.msk [vmem:[%s5231_s12 + $0x78] sm:$0xf] %vm3528_vm4, %v3946_v60 }
 0x288   : > { %3560 = vst.msk [vmem:[%s5231_s12 + $0x7c] sm:$0xf] %vm3528_vm4, %v3947_v46 }
 0x289 PF: > { %s15_s24 = sadd.s32 1, %s5122_s24   ;;  %s6553_s18 = smov %s5110_s21 }
 0x28a   : > { %p12_p12 = scmp.ge.s32.totalorder %s15_s24, 26   ;;  %s6554_s19 = smov %s5114_s22 }
 0x28b   : > { %s6555_s20 = smov %s5118_s23  ;;  %s6556_s21 = smov %s6560_s25 }
 0x28c   : > { %s6557_s22 = smov %s6564_s26  ;;  %s6558_s23 = smov %s6568_s27 }
 0x28d   :  { %14 = sbr.rel (!%p12_p12) target bundleno = 4 (0x4), region = 95 }

// kernel: _lambda_.25
= control target key start
LH: loop header
LB: loop body
LE: loop exit
PB: predicated region body
PF: predicated region fallthrough
CT: control target
= control target key end

     0   :  { %s4825_s12 = smov 0   ;;  %s4827_s13 = smov 0   ;;  %s6206_s0 = inlined_call_operand.vmem [shape: bf16[12,18,18,32], index: 0, kind: input, shape index: {}]   ;;  %s6207_s1 = inlined_call_operand.vmem [shape: bf16[3,9,32,3], index: 1, kind: input, shape index: {}]   ;;  %s6208_s2 = inlined_call_operand.vmem [shape: f32[1,3], index: 2, kind: input, shape index: {}]   ;;  %s6209_s3 = inlined_call_operand.vmem [shape: bf16[8,256,3], index: 3, kind: output, shape index: {}]  }
   0x1   :  { %s4829_s14 = smov 0   ;;  %s4831_s15 = smov 0  }
   0x2   :  { %s4833_s16 = smov 0   ;;  %s4835_s17 = smov 0  }
   0x3   :  { %s4837_s18 = smov 0  }
   0x4 LB: > { %s25_s19 = sadd.s32 1, %s4790_s15  ;;  %s28_s20 = sadd.s32 1, %s4794_s16  ;;  %s4802_s18 = sphi %s4837_s18, %s13_s18   ;;  %s4798_s17 = sphi %s4835_s17, %s6354_s17   ;;  %s4794_s16 = sphi %s4833_s16, %s6353_s16   ;;  %s4790_s15 = sphi %s4831_s15, %s6352_s15   ;;  %s4786_s14 = sphi %s4829_s14, %s6351_s14   ;;  %s4782_s13 = sphi %s4827_s13, %s6350_s13   ;;  %s4778_s12 = sphi %s4825_s12, %s6349_s12  }
   0x5   : > { %p26_p0 = scmp.ge.s32.totalorder %s25_s19, 3  ;;  %p3531_p1 = scmp.ge.s32.totalorder %s4802_s18, 1 }
   0x6   : > { %p182_p2 = scmp.lt.s32.totalorder %s4802_s18, 25  ;;  %s32_s21 = sadd.s32 1, %s4798_s17 }
   0x7   : > { %s6356_s19 = smov (%p26_p0, %s25_s19), 0  ;;  %s6358_s20 = smov (!%p26_p0, %s28_s20), %s4794_s16 }
   0x8   : > { %p183_p3 = pnand %p3531_p1, %p182_p2  ;;  %p30_p4 = scmp.ge.s32.totalorder %s6358_s20, 4 }
   0xa   : > { %s6360_s20 = smov (%p30_p4, %s6358_s20), 0  ;;  %s6362_s21 = smov (!%p30_p4, %s32_s21), %s4798_s17 }
   0xb   : > { %p34_p5 = scmp.ge.s32.totalorder %s6362_s21, 2  ;;  %186 = sbr.rel (%p183_p3) target bundleno = 570 (0x23a), region = 32 }
   0xd   : > { %s6364_s21 = smov (%p34_p5, %s6362_s21), 0 }
  0x12   : > { %s216_s22 = smul.u32 6, %s4786_s14  ;;  %p227_p6 = scmp.lt.s32.totalorder %s4778_s12, 2 }
  0x13   : > { %s3534_s23 = sshll.u32 %s4786_s14, 2  ;;  %p3537_p9 = scmp.ne.s32.totalorder %s4778_s12, 0 }
  0x14   : > { %s217_s24 = sadd.s32 %s4782_s13, %s216_s22  ;;  %s233_s26 = sadd.s32 %s4782_s13, %s3534_s23  ;;  %vm246_vm0 = vcmask (!%p3537_p9), 23552   ;;  %v4804_v0 = vmov (!%p3537_p9), 0.0  }
  0x15   : > { %s218_s25 = sadd.s32 %s4778_s12, %s217_s24  ;;  %p234_p8 = scmp.lt.s32.totalorder %s233_s26, 7  ;;  %247 = vst.msk [vmem:[#allocation2] sm:$0xff] (!%p3537_p9), %vm246_vm0, %v4804_v0  ;;  %248 = vst.msk [vmem:[#allocation2 + $0x8] sm:$0xff] (!%p3537_p9), %vm246_vm0, %v4804_v0 }
  0x16   : > { %p219_p7 = scmp.lt.s32.totalorder %s218_s25, 11  ;;  %245 = sbr.rel (%p3537_p9) target bundleno = 39 (0x27), region = 36  ;;  %249 = vst.msk [vmem:[#allocation2 + $0x10] sm:$0xff] (!%p3537_p9), %vm246_vm0, %v4804_v0  ;;  %250 = vst.msk [vmem:[#allocation2 + $0x18] sm:$0xff] (!%p3537_p9), %vm246_vm0, %v4804_v0 }
  0x17   : > { %s228_s27 = scalar_select %p227_p6, %s4778_s12, 2 }
  0x18   : > { %s6366_s25 = smov (!%p219_p7, %s218_s25), 11  ;;  %s6368_s26 = smov (!%p234_p8, %s233_s26), 7 }
  0x19   : > { %s4652_s28 = smul.u32 144, %s228_s27  ;;  %s3840_s9 = sshll.u32 %s6368_s26, 7  ;;  %251 = vst.msk [vmem:[#allocation2 + $0x20] sm:$0xff] (!%p3537_p9), %vm246_vm0, %v4804_v0  ;;  %252 = vst.msk [vmem:[#allocation2 + $0x28] sm:$0xff] (!%p3537_p9), %vm246_vm0, %v4804_v0 }
  0x1a   : > { %s4651_s29 = smul.u32 216, %s6366_s25  ;;  %s4885_s13 = scalar_lea.vmem %s6209_s3, %s3840_s9  ;;  %253 = vst.msk [vmem:[#allocation2 + $0x30] sm:$0xff] (!%p3537_p9), %vm246_vm0, %v4804_v0  ;;  %254 = vst.msk [vmem:[#allocation2 + $0x38] sm:$0xff] (!%p3537_p9), %vm246_vm0, %v4804_v0 }
  0x1b   : > { %s4875_s5 = scalar_lea.vmem %s6207_s1, %s4652_s28  ;;  %255 = vst.msk [vmem:[#allocation2 + $0x40] sm:$0xff] (!%p3537_p9), %vm246_vm0, %v4804_v0  ;;  %256 = vst.msk [vmem:[#allocation2 + $0x48] sm:$0xff] (!%p3537_p9), %vm246_vm0, %v4804_v0 }
  0x1c   : > { %s4880_s8 = scalar_lea.vmem %s6206_s0, %s4651_s29  ;;  %257 = vst.msk [vmem:[#allocation2 + $0x50] sm:$0xff] (!%p3537_p9), %vm246_vm0, %v4804_v0  ;;  %258 = vst.msk [vmem:[#allocation2 + $0x58] sm:$0xff] (!%p3537_p9), %vm246_vm0, %v4804_v0 }
  0x1d   : > { %259 = vst.msk [vmem:[#allocation2 + $0x60] sm:$0xff] %vm246_vm0, %v4804_v0  ;;  %260 = vst.msk [vmem:[#allocation2 + $0x68] sm:$0xff] %vm246_vm0, %v4804_v0 }
  0x1e   : > { %261 = vst.msk [vmem:[#allocation2 + $0x70] sm:$0xff] %vm246_vm0, %v4804_v0  ;;  %262 = vst.msk [vmem:[#allocation2 + $0x78] sm:$0xff] %vm246_vm0, %v4804_v0 }
  0x1f   : > { %263 = vst.msk [vmem:[#allocation2 + $0x80] sm:$0xff] %vm246_vm0, %v4804_v0  ;;  %264 = vst.msk [vmem:[#allocation2 + $0x88] sm:$0xff] %vm246_vm0, %v4804_v0 }
  0x20   : > { %265 = vst.msk [vmem:[#allocation2 + $0x90] sm:$0xff] %vm246_vm0, %v4804_v0  ;;  %266 = vst.msk [vmem:[#allocation2 + $0x98] sm:$0xff] %vm246_vm0, %v4804_v0 }
  0x21   : > { %267 = vst.msk [vmem:[#allocation2 + $0xa0] sm:$0xff] %vm246_vm0, %v4804_v0  ;;  %268 = vst.msk [vmem:[#allocation2 + $0xa8] sm:$0xff] %vm246_vm0, %v4804_v0 }
  0x22   : > { %269 = vst.msk [vmem:[#allocation2 + $0xb0] sm:$0xff] %vm246_vm0, %v4804_v0  ;;  %270 = vst.msk [vmem:[#allocation2 + $0xb8] sm:$0xff] %vm246_vm0, %v4804_v0 }
  0x23   : > { %271 = vst.msk [vmem:[#allocation2 + $0xc0] sm:$0xff] %vm246_vm0, %v4804_v0  ;;  %272 = vst.msk [vmem:[#allocation2 + $0xc8] sm:$0xff] %vm246_vm0, %v4804_v0 }
  0x24   : > { %273 = vst.msk [vmem:[#allocation2 + $0xd0] sm:$0xff] %vm246_vm0, %v4804_v0  ;;  %274 = vst.msk [vmem:[#allocation2 + $0xd8] sm:$0xff] %vm246_vm0, %v4804_v0 }
  0x25   : > { %275 = vst.msk [vmem:[#allocation2 + $0xe0] sm:$0xff] %vm246_vm0, %v4804_v0  ;;  %276 = vst.msk [vmem:[#allocation2 + $0xe8] sm:$0xff] %vm246_vm0, %v4804_v0 }
  0x26   : > { %277 = vst.msk [vmem:[#allocation2 + $0xf0] sm:$0xff] %vm246_vm0, %v4804_v0  ;;  %278 = vst.msk [vmem:[#allocation2 + $0xf8] sm:$0xff] %vm246_vm0, %v4804_v0 }
  0x27 PF: > { %v4710_v1 = vld [vmem:[%s4875_s5] sm:$0xff]   ;;  %v4712_v3 = vld [vmem:[%s4875_s5 + $0x8] sm:$0xff]   ;;  %vm461_vm1 = vcmask 261120   ;;  %v4936_v9 = vld [vmem:[%s4880_s8 + $0x10] sm:$0xf]  ;;  %vm1412_vm5 = vcmask 1042432  }
  0x28   : > { %v4711_v2 = vld [vmem:[%s4875_s5 + $0x40] sm:$0xff]   ;;  %4035 = vmatprep.subr.bf16.mxu1 %v4710_v1  ;;  %v4713_v4 = vld [vmem:[%s4875_s5 + $0x48] sm:$0xff]   ;;  %v4716_v10 = vld [vmem:[%s4875_s5 + $0x10] sm:$0xff]   ;;  %vm703_vm2 = vsmask.f32 3328  ;;  %v740_v18 = vshll.u32 %v4936_v9, 16 }
  0x29   : > { %4036 = vmatpush3.bf16.msra.mxu1 %v4710_v1  ;;  %4179 = vmatprep.subr.bf16.mxu0 %v4711_v2  ;;  %v4925_v5 = vld [vmem:[%s4880_s8] sm:$0xf]  ;;  %v4928_v6 = vld [vmem:[%s4880_s8 + $0x4] sm:$0xf]  ;;  %v4931_v7 = vld [vmem:[%s4880_s8 + $0xc] sm:$0xf] }
  0x2a   : > { %4180 = vmatpush3.bf16.msra.mxu0 %v4711_v2  ;;  %4037 = vmatprep.subr.bf16.mxu1 %v4712_v3  ;;  %v3538_v8 = vcombine.low %v4925_v5, %v4928_v6  ;;  %v4941_v11 = vcombine.low %v4931_v7, %v4936_v9  ;;  %v4944_v12 = vld [vmem:[%s4875_s5 + $0x50] sm:$0xff]   ;;  %v731_v13 = vshrl.u32 %v4931_v7, 16  ;;  %v734_v16 = vshll.u32 %v4931_v7, 16  ;;  %v4953_v17 = vld [vmem:[%s4880_s8 + $0x18] sm:$0xf]  ;;  %v4989_v46 = vld [vmem:[%s4875_s5 + $0x20] sm:$0xff]  }
  0x2b   : > { %4181 = vmatprep.subr.bf16.mxu0 %v4713_v4  ;;  %v4949_v14 = vld [vmem:[%s4880_s8 + $0x14] sm:$0x1]  ;;  %v744_v19 = vshrl.u32 %v4936_v9, 16  ;;  %v4962_v21 = vld [vmem:[%s4880_s8 + $0x1c] sm:$0xf]  ;;  %v755_v24 = vshrl.u32 %v4953_v17, 16 }
  0x2c   : > { %6263 = vst [vmem:[#allocation3_spill] sm:$0xff] %v4941_v11  ;;  %4039 = vmatprep.mubr.msk.bf16.mxu1 %vm461_vm1, %v3538_v8  ;;  %v733_v15 = vrot.slane %v731_v13, 4  ;;  %v750_v20 = vshll.u32 %v4949_v14, 16  ;;  %vm704_vm3 = vsmask.f32 7440  ;;  %v736_v22 = vrot.slane %v734_v16, 5 }
  0x2d   : > { %4038 = vmatpush3.bf16.msra.mxu1 %v4712_v3  ;;  %v4965_v23 = vld [vmem:[%s4880_s8 + $0x20] sm:$0x1]  ;;  %v742_v25 = vrot.slane %v740_v18, 5  ;;  %v746_v26 = vrot.slane %v744_v19, 4  ;;  %v757_v28 = vrot.slane %v755_v24, 4  ;;  %v758_v29 = vshll.u32 %v4953_v17, 16  ;;  %vm4972_vm4 = vmor %vm703_vm2, %vm704_vm3 }
  0x2e   : > { %4182 = vmatpush3.bf16.msra.mxu0 %v4713_v4  ;;  %4071 = vmatprep.subr.bf16.mxu1 %v4716_v10  ;;  %v737_v27 = vor.u32 %v736_v22, %v733_v15  ;;  %v764_v30 = vshll.u32 %v4962_v21, 16  ;;  %v4727_v31 = vld [vmem:[%s4875_s5 + $0x18] sm:$0xff]   ;;  %v752_v34 = vrot.slane %v750_v20, 5  ;;  %v768_v35 = vshrl.u32 %v4962_v21, 16  ;;  %v4979_v37 = vld [vmem:[%s4880_s8 + $0x24] sm:$0xf] }
  0x2f   : > { %4215 = vmatprep.subr.bf16.mxu0 %v4944_v12  ;;  %v747_v33 = vor.u32 %v746_v26, %v742_v25  ;;  %v774_v36 = vshll.u32 %v4965_v23, 16  ;;  %v760_v39 = vrot.slane %v758_v29, 5  ;;  %v4982_v41 = vld [vmem:[%s4880_s8 + $0x28] sm:$0xf]  ;;  %v4986_v45 = vcombine.low %v4953_v17, %v4962_v21  ;;  %v4999_v51 = vld [vmem:[%s4880_s8 + $0x2c] sm:$0x1] }
  0x30   : > { %4040 = vmatmul.mubr.msk.bf16.vlgmr.msra.gmra.mrb[0].mxu1 %vm461_vm1, %v4941_v11  ;;  %v738_v38 = vrot.slane %v737_v27, 4  ;;  %v766_v40 = vrot.slane %v764_v30, 5  ;;  %v770_v43 = vrot.slane %v768_v35, 4  ;;  %v4995_v49 = vcombine.low %v4979_v37, %v4982_v41  ;;  %v5008_v56 = vld [vmem:[%s4880_s8 + $0x30] sm:$0xf]  ;;  %v4722_v20 = vld [vmem:[%s4875_s5 + $0x58] sm:$0xff]  }
  0x31   : > { %4072 = vmatpush3.bf16.msra.mxu1 %v4716_v10  ;;  %v748_v42 = vrot.slane %v747_v33, 4  ;;  %v776_v44 = vrot.slane %v774_v36, 5  ;;  %v761_v48 = vor.u32 %v760_v39, %v757_v28  ;;  %v779_v50 = vshrl.u32 %v4979_v37, 16  ;;  %4043 = vmatprep.mubr.msk.bf16.mxu1 %vm461_vm1, %v4986_v45  ;;  %v5017_v61 = vld [vmem:[%s4880_s8 + $0x34] sm:$0xf]  ;;  %p3804_p10 = scmp.ne.s32.totalorder %s4778_s12, 2 }
  0x32   : > { %4073 = vmatprep.subr.bf16.mxu1 %v4727_v31  ;;  %v743_v47 = vsel %vm4972_vm4, %v738_v38, %v742_v25  ;;  %v771_v53 = vor.u32 %v770_v43, %v766_v40  ;;  %v782_v54 = vshll.u32 %v4979_v37, 16  ;;  %v792_v55 = vshrl.u32 %v4982_v41, 16  ;;  %v5025_v4 = vld [vmem:[%s4880_s8 + $0x38] sm:$0x1]  ;;  %v5033_v19 = vld [vmem:[%s4880_s8 + $0x3c] sm:$0xf] }
  0x33   : > { %v753_v52 = vsel %vm4972_vm4, %v748_v42, %v752_v34  ;;  %v762_v58 = vrot.slane %v761_v48, 4  ;;  %v781_v59 = vrot.slane %v779_v50, 4  ;;  %v788_v60 = vshll.u32 %v4982_v41, 16  ;;  %v5058_v43 = vld [vmem:[%s4880_s8 + $0x44] sm:$0x1] }
  0x34   : > { %v5011_v57 = vcombine.low %v743_v47, %v753_v52  ;;  %v772_v62 = vrot.slane %v771_v53, 4  ;;  %v784_v63 = vrot.slane %v782_v54, 5  ;;  %v794_v0 = vrot.slane %v792_v55, 4  ;;  %v5067_v50 = vld [vmem:[%s4880_s8 + $0x48] sm:$0xf]  ;;  %v5070_v52 = vld [vmem:[%s4875_s5 + $0x60] sm:$0xff]  }
  0x35   : > { %4074 = vmatpush3.bf16.msra.mxu1 %v4727_v31  ;;  %v798_v1 = vshll.u32 %v4999_v51, 16  ;;  %v767_v2 = vsel %vm4972_vm4, %v762_v58, %v766_v40  ;;  %v790_v3 = vrot.slane %v788_v60, 5  ;;  %v803_v8 = vshrl.u32 %v5008_v56, 16  ;;  %v5041_v31 = vld [vmem:[%s4880_s8 + $0x40] sm:$0xf] }
  0x36   : > { %4107 = vmatprep.subr.bf16.mxu1 %v4989_v46  ;;  %4183 = vmatprep.mubr.msk.bf16.mxu0 %vm461_vm1, %v5011_v57  ;;  %v806_v10 = vshll.u32 %v5008_v56, 16  ;;  %v777_v13 = vsel %vm4972_vm4, %v772_v62, %v776_v44  ;;  %v785_v15 = vor.u32 %v784_v63, %v781_v59  ;;  %v812_v18 = vshll.u32 %v5017_v61, 16  ;;  %v5078_v59 = vld [vmem:[%s4880_s8 + $0x4c] sm:$0xf] }
  0x37   : > { %v800_v16 = vrot.slane %v798_v1, 5  ;;  %v5036_v22 = vcombine.low %v767_v2, %v777_v13  ;;  %v795_v24 = vor.u32 %v794_v0, %v790_v3  ;;  %v805_v25 = vrot.slane %v803_v8, 4  ;;  %v5084_v1 = vld [vmem:[%s4880_s8 + $0x50] sm:$0x1]  ;;  %v5091_v13 = vld [vmem:[%s4880_s8 + $0x54] sm:$0xf] }
  0x38   : > { %4044 = vmatmul.mubr.msk.bf16.gmra.mrb[4].mxu1 %vm461_vm1, %v4995_v49  ;;  %v808_v26 = vrot.slane %v806_v10, 5  ;;  %v786_v27 = vrot.slane %v785_v15, 4  ;;  %v814_v28 = vrot.slane %v812_v18, 5  ;;  %v816_v29 = vshrl.u32 %v5017_v61, 16 }
  0x39   : > { %6266 = vst [vmem:[#allocation4_spill] sm:$0xff] %v5036_v22  ;;  %v822_v30 = vshll.u32 %v5025_v4, 16  ;;  %4184 = vmatmul.mubr.msk.bf16.vlgmr.msra.gmra.mrb[0].mxu0 %vm461_vm1, %v5036_v22  ;;  %v796_v33 = vrot.slane %v795_v24, 4  ;;  %v5047_v35 = vcombine.low %v5008_v56, %v5017_v61  ;;  %v5051_v36 = vcombine.low %v5033_v19, %v5041_v31 }
  0x3a   : > { %v809_v34 = vor.u32 %v808_v26, %v805_v25  ;;  %4216 = vmatpush3.bf16.msra.mxu0 %v4944_v12  ;;  %v791_v38 = vsel %vm4972_vm4, %v786_v27, %v790_v3  ;;  %v818_v39 = vrot.slane %v816_v29, 4  ;;  %v827_v42 = vshrl.u32 %v5033_v19, 16 }
  0x3b   : > { %6267 = vst [vmem:[#allocation5_spill] sm:$0xff] %v5047_v35  ;;  %6268 = vst [vmem:[#allocation6_spill] sm:$0xff] %v5051_v36  ;;  %v824_v40 = vrot.slane %v822_v30, 5  ;;  %v801_v44 = vsel %vm4972_vm4, %v796_v33, %v800_v16  ;;  %4047 = vmatprep.mubr.msk.bf16.mxu1 %vm461_vm1, %v5047_v35  ;;  %v830_v12 = vshll.u32 %v5033_v19, 16  ;;  %v840_v48 = vshrl.u32 %v5041_v31, 16  ;;  %4217 = vmatprep.subr.bf16.mxu0 %v4722_v20 }
  0x3c   : > { %v810_v47 = vrot.slane %v809_v34, 4  ;;  %v5072_v53 = vcombine.low %v791_v38, %v801_v44  ;;  %v819_v54 = vor.u32 %v818_v39, %v814_v28  ;;  %v829_v55 = vrot.slane %v827_v42, 4  ;;  %v5106_v44 = vld [vmem:[%s4880_s8 + $0x58] sm:$0xf] }
  0x3d   : > { %v836_v58 = vshll.u32 %v5041_v31, 16  ;;  %v832_v62 = vrot.slane %v830_v12, 5  ;;  %v842_v63 = vrot.slane %v840_v48, 4  ;;  %v846_v0 = vshll.u32 %v5058_v43, 16 }
  0x3e   : > { %6269 = vst [vmem:[#allocation7_spill] sm:$0xff] %v5072_v53  ;;  %v815_v60 = vsel %vm4972_vm4, %v810_v47, %v814_v28  ;;  %4187 = vmatprep.mubr.msk.bf16.mxu0 %vm461_vm1, %v5072_v53  ;;  %v820_v2 = vrot.slane %v819_v54, 4  ;;  %v851_v8 = vshrl.u32 %v5067_v50, 16  ;;  %v854_v10 = vshll.u32 %v5067_v50, 16  ;;  %4218 = vmatpush3.bf16.msra.mxu0 %v4722_v20  ;;  %v5118_v54 = vld [vmem:[%s4880_s8 + $0x5c] sm:$0x1] }
  0x3f   : > { %v838_v3 = vrot.slane %v836_v58, 5  ;;  %v833_v15 = vor.u32 %v832_v62, %v829_v55  ;;  %v848_v16 = vrot.slane %v846_v0, 5  ;;  %v860_v18 = vshll.u32 %v5078_v59, 16  ;;  %4251 = vmatprep.subr.bf16.mxu0 %v5070_v52 }
  0x40   : > { %4048 = vmatmul.mubr.msk.bf16.gmra.mrb[8].mxu1 %vm461_vm1, %v5051_v36  ;;  %v864_v24 = vshrl.u32 %v5078_v59, 16  ;;  %v825_v25 = vsel %vm4972_vm4, %v820_v2, %v824_v40  ;;  %v853_v27 = vrot.slane %v851_v8, 4  ;;  %v856_v28 = vrot.slane %v854_v10, 5 }
  0x41   : > { %v843_v26 = vor.u32 %v842_v63, %v838_v3  ;;  %v5098_v29 = vcombine.low %v815_v60, %v825_v25  ;;  %v834_v20 = vrot.slane %v833_v15, 4  ;;  %v862_v30 = vrot.slane %v860_v18, 5  ;;  %v5126_v63 = vld [vmem:[%s4880_s8 + $0x60] sm:$0xf] }
  0x42   : > { %v866_v33 = vrot.slane %v864_v24, 4  ;;  %v857_v38 = vor.u32 %v856_v28, %v853_v27  ;;  %v870_v39 = vshll.u32 %v5084_v1, 16  ;;  %v5103_v42 = vcombine.low %v5067_v50, %v5078_v59  ;;  %v5138_v24 = vld [vmem:[%s4880_s8 + $0x64] sm:$0xf]  ;;  %v5145_v27 = vld [vmem:[%s4880_s8 + $0x68] sm:$0x1] }
  0x43   : > { %6270 = vst [vmem:[#allocation8_spill] sm:$0xff] %v5098_v29  ;;  %v844_v34 = vrot.slane %v843_v26, 4  ;;  %vm1413_vm6 = vcmask 1046532   ;;  %4188 = vmatmul.mubr.msk.bf16.gmra.mrb[4].mxu0 %vm461_vm1, %v5098_v29  ;;  %v839_v40 = vsel %vm4972_vm4, %v834_v20, %v838_v3  ;;  %v5114_v12 = vcombine.low %v5091_v13, %v5106_v44 }
  0x44   : > { %6271 = vst [vmem:[#allocation9_spill] sm:$0xff] %v5103_v42  ;;  %v867_v47 = vor.u32 %v866_v33, %v862_v30  ;;  %v875_v48 = vshrl.u32 %v5091_v13, 16  ;;  %v858_v58 = vrot.slane %v857_v38, 4  ;;  %v872_v60 = vrot.slane %v870_v39, 5  ;;  %4051 = vmatprep.mubr.msk.bf16.mxu1 %vm461_vm1, %v5103_v42  ;;  %v5152_v39 = vld [vmem:[%s4880_s8 + $0x6c] sm:$0xf]  ;;  %vm5182_vm7 = vmor %vm1412_vm5, %vm1413_vm6 }
  0x45   : > { %6272 = vst [vmem:[#allocation10_spill] sm:$0xff] %v5114_v12  ;;  %v849_v55 = vsel %vm4972_vm4, %v844_v34, %v848_v16  ;;  %v878_v62 = vshll.u32 %v5091_v13, 16  ;;  %v888_v3 = vshrl.u32 %v5106_v44, 16  ;;  %v884_v16 = vshll.u32 %v5106_v44, 16 }
  0x46   : > { %v5128_v0 = vcombine.low %v839_v40, %v849_v55  ;;  %v868_v2 = vrot.slane %v867_v47, 4  ;;  %v877_v8 = vrot.slane %v875_v48, 4  ;;  %v863_v10 = vsel %vm4972_vm4, %v858_v58, %v862_v30  ;;  %v5155_v40 = vld [vmem:[%s4880_s8 + $0x70] sm:$0xf] }
  0x47   : > { %v880_v15 = vrot.slane %v878_v62, 5  ;;  %v894_v18 = vshll.u32 %v5118_v54, 16  ;;  %v890_v26 = vrot.slane %v888_v3, 4  ;;  %v899_v28 = vshrl.u32 %v5126_v63, 16 }
  0x48   : > { %6273 = vst [vmem:[#allocation11_spill] sm:$0xff] %v5128_v0  ;;  %4052 = vmatmul.mubr.msk.bf16.gmra.mrb[12].mxu1 %vm461_vm1, %v5114_v12  ;;  %4191 = vmatprep.mubr.msk.bf16.mxu0 %vm461_vm1, %v5128_v0  ;;  %v873_v25 = vsel %vm4972_vm4, %v868_v2, %v872_v60  ;;  %v902_v20 = vshll.u32 %v5126_v63, 16  ;;  %v886_v34 = vrot.slane %v884_v16, 5  ;;  %v908_v55 = vshll.u32 %v5138_v24, 16 }
  0x49   : > { %v5149_v30 = vcombine.low %v863_v10, %v873_v25  ;;  %v881_v33 = vor.u32 %v880_v15, %v877_v8  ;;  %v896_v38 = vrot.slane %v894_v18, 5  ;;  %v901_v47 = vrot.slane %v899_v28, 4  ;;  %v5176_v28 = vld [vmem:[%s4880_s8 + $0x78] sm:$0xf] }
  0x4a   : > { %v904_v48 = vrot.slane %v902_v20, 5  ;;  %v912_v58 = vshrl.u32 %v5138_v24, 16  ;;  %v891_v62 = vor.u32 %v890_v26, %v886_v34  ;;  %v918_v2 = vshll.u32 %v5145_v27, 16 }
  0x4b   : > { %6274 = vst [vmem:[#allocation12_spill] sm:$0xff] %v5149_v30  ;;  %v882_v60 = vrot.slane %v881_v33, 4  ;;  %v5162_v3 = vcombine.low %v5126_v63, %v5138_v24  ;;  %4192 = vmatmul.mubr.msk.bf16.gmra.mrb[8].mxu0 %vm461_vm1, %v5149_v30  ;;  %v910_v10 = vrot.slane %v908_v55, 5  ;;  %v5168_v16 = vcombine.low %v5152_v39, %v5155_v40 }
  0x4c   : > { %v905_v8 = vor.u32 %v904_v48, %v901_v47  ;;  %v914_v15 = vrot.slane %v912_v58, 4  ;;  %v1431_v18 = vrot.slane %v4962_v21, 5  ;;  %v892_v26 = vrot.slane %v891_v62, 4 }
  0x4d   : > { %6275 = vst [vmem:[#allocation13_spill] sm:$0xff] %v5162_v3  ;;  %6276 = vst [vmem:[#allocation14_spill] sm:$0xff] %v5168_v16  ;;  %v887_v25 = vsel %vm4972_vm4, %v882_v60, %v886_v34  ;;  %4055 = vmatprep.mubr.msk.bf16.mxu1 %vm461_vm1, %v5162_v3  ;;  %v920_v47 = vrot.slane %v918_v2, 5  ;;  %v5187_v34 = vld [vmem:[%s4880_s8 + $0x7c] sm:$0xf]  ;;  %v1427_v48 = vrot.slane %v4949_v14, 5 }
  0x4e   : > { %v906_v20 = vrot.slane %v905_v8, 4  ;;  %v915_v33 = vor.u32 %v914_v15, %v910_v10  ;;  %v897_v55 = vsel %vm4972_vm4, %v892_v26, %v896_v38  ;;  %v3611_v58 = vrot.slane %v4931_v7, 9 }
  0x4f   : > { %v1424_v60 = vrot.slane %v4936_v9, 5  ;;  %v707_v62 = vshrl.u32 %v4925_v5, 16  ;;  %v5195_v2 = vcombine.low %v887_v25, %v897_v55  ;;  %v710_v11 = vshll.u32 %v4925_v5, 16  ;;  %v5207_v9 = vld [vmem:[%s4880_s8 + $0x84] sm:$0xf] }
  0x50   : > { %4056 = vmatmul.mubr.msk.bf16.gmra.mrb[16].mxu1 %vm461_vm1, %v5168_v16  ;;  %v911_v8 = vsel %vm4972_vm4, %v906_v20, %v910_v10  ;;  %v916_v15 = vrot.slane %v915_v33, 4  ;;  %v5204_v7 = vcombine.low %v5176_v28, %v5187_v34  ;;  %v5210_v25 = vld [vmem:[%s4880_s8 + $0x88] sm:$0xf]  ;;  %v1434_v26 = vrot.slane %v4965_v23, 5  ;;  %v5226_v23 = vld [vmem:[%s4880_s8 + $0x90] sm:$0xf] }
  0x51   : > { %v1425_v14 = vsel %vm5182_vm7, %v3611_v58, %v1424_v60  ;;  %v1426_v38 = vrot.slane %v1424_v60, 4  ;;  %4195 = vmatprep.mubr.msk.bf16.mxu0 %vm461_vm1, %v5195_v2  ;;  %v3612_v20 = vrot.slane %v4953_v17, 9  ;;  %v1433_v33 = vrot.slane %v1431_v18, 4  ;;  %v5229_v16 = vld [vmem:[%s4880_s8 + $0x94] sm:$0xf] }
  0x52   : > { %6279 = vst [vmem:[#allocation15_spill] sm:$0xff] %v5204_v7  ;;  %v921_v10 = vsel %vm4972_vm4, %v916_v15, %v920_v47  ;;  %v716_v55 = vshll.u32 %v4928_v6, 16  ;;  %4059 = vmatprep.mubr.msk.bf16.mxu1 %vm461_vm1, %v5204_v7  ;;  %v709_v3 = vrot.slane %v707_v62, 4  ;;  %v720_v47 = vshrl.u32 %v4928_v6, 16  ;;  %v5277_v7 = vld [vmem:[%s4880_s8 + $0xac] sm:$0xf] }
  0x53   : > { %v5219_v58 = vcombine.low %v911_v8, %v921_v10  ;;  %v1428_v60 = vsel %vm5182_vm7, %v1426_v38, %v1427_v48  ;;  %v5236_v8 = vcombine.low %v5207_v9, %v5210_v25  ;;  %v712_v15 = vrot.slane %v710_v11, 5 }
  0x54   : > { %v5232_v17 = vcombine.low %v1425_v14, %v1428_v60  ;;  %v3613_v48 = vrot.slane %v4979_v37, 9  ;;  %v1438_v38 = vrot.slane %v4982_v41, 5  ;;  %v1441_v62 = vrot.slane %v4999_v51, 5  ;;  %v5257_v41 = vld [vmem:[%s4880_s8 + $0x9c] sm:$0xf] }
  0x55   : > { %6281 = vst [vmem:[#allocation17_spill] sm:$0xff] %v5236_v8  ;;  %4196 = vmatmul.mubr.msk.bf16.gmra.mrb[12].mxu0 %vm461_vm1, %v5219_v58  ;;  %v1432_v14 = vsel %vm5182_vm7, %v3612_v20, %v1431_v18  ;;  %v1435_v11 = vsel %vm5182_vm7, %v1433_v33, %v1434_v26  ;;  %v1445_v10 = vrot.slane %v5017_v61, 5  ;;  %v5254_v37 = vcombine.low %v5226_v23, %v5229_v16  ;;  %v5264_v60 = vld [vmem:[%s4880_s8 + $0xa0] sm:$0xf]  ;;  %v5269_v26 = vld [vmem:[%s4880_s8 + $0xa8] sm:$0xf] }
  0x56   : > { %6280 = vst [vmem:[#allocation16_spill] sm:$0xff] %v5232_v17  ;;  %4219 = vmatprep.mubr.msk.bf16.mxu0 %vm461_vm1, %v5232_v17  ;;  %v5259_v51 = vrot.slane %v716_v55, 5  ;;  %v1439_v18 = vsel %vm5182_vm7, %v3613_v48, %v1438_v38  ;;  %v1440_v20 = vrot.slane %v1438_v38, 4  ;;  %v722_v61 = vrot.slane %v720_v47, 4 }
  0x57   : > { %6282 = vst [vmem:[#allocation18_spill] sm:$0xff] %v5254_v37  ;;  %v5271_v33 = vcombine.low %v1432_v14, %v1435_v11  ;;  %v3614_v55 = vrot.slane %v5008_v56, 9  ;;  %v1447_v38 = vrot.slane %v1445_v10, 4  ;;  %v1448_v17 = vrot.slane %v5025_v4, 5  ;;  %v4736_v14 = vld [vmem:[%s4875_s5 + $0x68] sm:$0xff]  }
  0x58   : > { %4060 = vmatmul.mubr.msk.bf16.gmra.mrb[20].mxu1 %vm461_vm1, %v5236_v8  ;;  %v1442_v8 = vsel %vm5182_vm7, %v1440_v20, %v1441_v62  ;;  %v1452_v12 = vrot.slane %v5041_v31, 5  ;;  %v3615_v47 = vrot.slane %v5033_v19, 9  ;;  %v1455_v62 = vrot.slane %v5058_v43, 5 }
  0x59   : > { %4063 = vmatprep.mubr.msk.bf16.mxu1 %vm461_vm1, %v5254_v37  ;;  %6283 = vst [vmem:[#allocation19_spill] sm:$0xff] %v5271_v33  ;;  %v5279_v48 = vcombine.low %v1439_v18, %v1442_v8  ;;  %v5285_v37 = vcombine.low %v5257_v41, %v5264_v60  ;;  %v713_v56 = vor.u32 %v712_v15, %v709_v3  ;;  %v1459_v4 = vrot.slane %v5078_v59, 5  ;;  %v5312_v15 = vld [vmem:[%s4880_s8 + $0x8] sm:$0x1] }
  0x5a   : > { %v1454_v11 = vrot.slane %v1452_v12, 4  ;;  %v5292_v8 = vcombine.low %v5269_v26, %v5277_v7  ;;  %v723_v19 = vor.u32 %v722_v61, %v5259_v51  ;;  %v1446_v31 = vsel %vm5182_vm7, %v3614_v55, %v1445_v10  ;;  %v5320_v10 = vld [vmem:[%s4880_s8 + $0xb4] sm:$0xf] }
  0x5b   : > { %6284 = vst [vmem:[#allocation20_spill] sm:$0xff] %v5279_v48  ;;  %6285 = vst [vmem:[#allocation21_spill] sm:$0xff] %v5285_v37  ;;  %v1449_v43 = vsel %vm5182_vm7, %v1447_v38, %v1448_v17  ;;  %v1453_v3 = vsel %vm5182_vm7, %v3615_v47, %v1452_v12  ;;  %v714_v18 = vrot.slane %v713_v56, 4  ;;  %v5323_v17 = vld [vmem:[%s4880_s8 + $0xb8] sm:$0xf]  ;;  %v1466_v20 = vrot.slane %v5106_v44, 5 }
  0x5c   : > { %6286 = vst [vmem:[#allocation22_spill] sm:$0xff] %v5292_v8  ;;  %v1456_v59 = vsel %vm5182_vm7, %v1454_v11, %v1455_v62  ;;  %v5326_v61 = vcombine.low %v1446_v31, %v1449_v43  ;;  %v3616_v12 = vrot.slane %v5067_v50, 9  ;;  %v1461_v55 = vrot.slane %v1459_v4, 4 }
  0x5d   : > { %4220 = vmatmul.mubr.msk.bf16.vlgmr.msra.gmra.mrb[0].mxu0 %vm461_vm1, %v5271_v33  ;;  %v1462_v38 = vrot.slane %v5084_v1, 5  ;;  %v724_v47 = vrot.slane %v723_v19, 4  ;;  %v6226_v62 = vrot.slane %v4928_v6, 5  ;;  %v5331_v56 = vcombine.low %v1453_v3, %v1456_v59 }
  0x5e   : > { %4252 = vmatpush3.bf16.msra.mxu0 %v5070_v52  ;;  %4223 = vmatprep.mubr.msk.bf16.mxu0 %vm461_vm1, %v5279_v48  ;;  %v5315_v52 = vld [vmem:[%s4875_s5 + $0x70] sm:$0xff]   ;;  %6287 = vst [vmem:[#allocation23_spill] sm:$0xff] %v5326_v61  ;;  %v726_v11 = vshll.u32 %v5312_v15, 16  ;;  %v3617_v44 = vrot.slane %v5091_v13, 9  ;;  %v1468_v31 = vrot.slane %v1466_v20, 4  ;;  %v1469_v50 = vrot.slane %v5118_v54, 5 }
  0x5f   : > { %4253 = vmatprep.subr.bf16.mxu0 %v4736_v14  ;;  %6288 = vst [vmem:[#allocation24_spill] sm:$0xff] %v5331_v56  ;;  %v719_v1 = vsel %vm4972_vm4, %v714_v18, %v5259_v51  ;;  %v1463_v13 = vsel %vm5182_vm7, %v1461_v55, %v1462_v38  ;;  %v1473_v54 = vrot.slane %v5138_v24, 5  ;;  %v5354_v3 = vrot.slane %v6226_v62, 4  ;;  %v5370_v38 = vld [vmem:[%s4880_s8 + $0x74] sm:$0x1] }
  0x60   : > { %4064 = vmatmul.mubr.msk.bf16.gmra.mrb[24].mxu1 %vm461_vm1, %v5285_v37  ;;  %v728_v19 = vrot.slane %v726_v11, 5  ;;  %v1480_v18 = vrot.slane %v5155_v40, 5  ;;  %v1467_v24 = vsel %vm5182_vm7, %v3617_v44, %v1466_v20  ;;  %v3618_v62 = vrot.slane %v5126_v63, 9  ;;  %v5397_v11 = vld [vmem:[%s4880_s8 + $0x8c] sm:$0x1] }
  0x61   : > { %4067 = vmatprep.mubr.msk.bf16.mxu1 %vm461_vm1, %v5292_v8  ;;  %v5336_v8 = vcombine.low %v5320_v10, %v5323_v17  ;;  %v1476_v20 = vrot.slane %v5145_v27, 5  ;;  %v3619_v44 = vrot.slane %v5152_v39, 9  ;;  %v5389_v27 = vld [vmem:[%s4880_s8 + $0x80] sm:$0x1]  ;;  %v990_v36 = vshll.u32 %v5397_v11, 16 }
  0x62   : > { %4254 = vmatpush3.bf16.msra.mxu0 %v4736_v14  ;;  %v1460_v14 = vsel %vm5182_vm7, %v3616_v12, %v1459_v4  ;;  %v729_v59 = vsel %vm4972_vm4, %v724_v47, %v728_v19  ;;  %v1470_v12 = vsel %vm5182_vm7, %v1468_v31, %v1469_v50  ;;  %v1475_v4 = vrot.slane %v1473_v54, 4 }
  0x63   : > { %6289 = vst [vmem:[#allocation25_spill] sm:$0xff] %v5336_v8  ;;  %4287 = vmatprep.subr.bf16.mxu0 %v5315_v52  ;;  %v3576_v55 = vcombine.low %v719_v1, %v729_v59  ;;  %v5375_v43 = vcombine.low %v1460_v14, %v1463_v13  ;;  %v5381_v31 = vcombine.low %v1467_v24, %v1470_v12  ;;  %v1482_v50 = vrot.slane %v1480_v18, 4  ;;  %v4737_v24 = vld [vmem:[%s4875_s5 + $0x28] sm:$0xff]  }
  0x64   : > { %v1483_v1 = vrot.slane %v5370_v38, 5  ;;  %v1487_v59 = vrot.slane %v5187_v34, 5  ;;  %v1474_v13 = vsel %vm5182_vm7, %v3618_v62, %v1473_v54  ;;  %v1477_v63 = vsel %vm5182_vm7, %v1475_v4, %v1476_v20 }
  0x65   : > { %4224 = vmatmul.mubr.msk.bf16.gmra.mrb[4].mxu0 %vm461_vm1, %v5326_v61  ;;  %6290 = vst [vmem:[#allocation26_spill] sm:$0xff] %v5375_v43  ;;  %6291 = vst [vmem:[#allocation27_spill] sm:$0xff] %v5381_v31  ;;  %v3620_v19 = vrot.slane %v5176_v28, 9  ;;  %v1481_v47 = vsel %vm5182_vm7, %v3619_v44, %v1480_v18  ;;  %v1490_v51 = vrot.slane %v5389_v27, 5  ;;  %v3621_v62 = vrot.slane %v5207_v9, 9 }
  0x66   : > { %4227 = vmatprep.mubr.msk.bf16.mxu0 %vm461_vm1, %v5331_v56  ;;  %v1484_v14 = vsel %vm5182_vm7, %v1482_v50, %v1483_v1  ;;  %v1489_v12 = vrot.slane %v1487_v59, 4  ;;  %v1497_v4 = vrot.slane %v5397_v11, 5  ;;  %v1501_v20 = vrot.slane %v5229_v16, 5  ;;  %v5436_v18 = vld [vmem:[%s4880_s8 + $0xa4] sm:$0x1] }
  0x67   : > { %v1508_v1 = vrot.slane %v5264_v60, 5  ;;  %v5432_v37 = vcombine.low %v1474_v13, %v1477_v63  ;;  %v3622_v44 = vrot.slane %v5226_v23, 9  ;;  %v5441_v50 = vcombine.low %v1481_v47, %v1484_v14  ;;  %v5491_v47 = vld [vmem:[%s4880_s8 + $0xc4] sm:$0xf] }
  0x68   : > { %4068 = vmatmul.mubr.msk.bf16.gmra.mrb[28].mxu1 %vm461_vm1, %v5336_v8  ;;  %v1491_v8 = vsel %vm5182_vm7, %v1489_v12, %v1490_v51  ;;  %v1511_v61 = vrot.slane %v5436_v18, 5  ;;  %v932_v51 = vshll.u32 %v5155_v40, 16  ;;  %vm3197_vm8 = vcmask 23552  }
  0x69   : > { %4075 = vmatprep.mubr.msk.bf16.mxu1 %vm461_vm1, %v3576_v55  ;;  %v1494_v55 = vrot.slane %v5210_v25, 5  ;;  %6292 = vst [vmem:[#allocation28_spill] sm:$0xff] %v5432_v37  ;;  %6294 = vst [vmem:[#allocation30_spill] sm:$0xff] %v5441_v50  ;;  %v1510_v14 = vrot.slane %v1508_v1, 4  ;;  %v1502_v12 = vsel %vm5182_vm7, %v3622_v44, %v1501_v20  ;;  %v6297_v44 = vshrl.u32 %v5152_v39, 16 }
  0x6a   : > { %vm3401_vm9 = vcmask (!%p3804_p10), 19456  }
  0x6b   : > { %v1496_v54 = vrot.slane %v1494_v55, 4  ;;  %v1495_v63 = vsel %vm5182_vm7, %v3621_v62, %v1494_v55  ;;  %v956_v62 = vshll.u32 %v5187_v34, 16 }
  0x6d   : > { %4228 = vmatmul.mubr.msk.bf16.gmra.mrb[8].mxu0 %vm461_vm1, %v5375_v43  ;;  %v1498_v13 = vsel %vm5182_vm7, %v1496_v54, %v1497_v4  ;;  %v1503_v43 = vrot.slane %v1501_v20, 4  ;;  %v3624_v4 = vrot.slane %v5269_v26, 9 }
  0x6e   : > { %4231 = vmatprep.mubr.msk.bf16.mxu0 %vm461_vm1, %v5381_v31  ;;  %v3623_v31 = vrot.slane %v5257_v41, 9  ;;  %v5470_v54 = vcombine.low %v1495_v63, %v1498_v13  ;;  %v925_v63 = vrot.slane %v6297_v44, 4  ;;  %v6298_v13 = vshll.u32 %v5152_v39, 16 }
  0x6f   : > { %v6300_v39 = vshrl.u32 %v5176_v28, 16 }
  0x70   : > { %4076 = vmatmul.mubr.msk.bf16.vlgmr.msra.gmra.mrb[0].mxu1 %vm461_vm1, %v5011_v57  ;;  %v5427_v57 = vld [vmem:[%s4880_s8 + $0x98] sm:$0x1]  ;;  %6296 = vst [vmem:[#allocation32_spill] sm:$0xff] %v5470_v54 }
  0x71   : > { %4108 = vmatpush3.bf16.msra.mxu1 %v4989_v46  ;;  %4079 = vmatprep.mubr.msk.bf16.mxu1 %vm461_vm1, %v5036_v22  ;;  %v5439_v46 = vld [vmem:[%s4875_s5 + $0x30] sm:$0xff]   ;;  %v1488_v22 = vsel %vm5182_vm7, %v3620_v19, %v1487_v59  ;;  %v1504_v56 = vrot.slane %v5427_v57, 5  ;;  %v928_v59 = vrot.slane %v6298_v13, 5  ;;  %v949_v13 = vrot.slane %v6300_v39, 4  ;;  %v5521_v39 = vld [vmem:[%s4880_s8 + $0xc8] sm:$0x1] }
  0x72   : > { %4109 = vmatprep.subr.bf16.mxu1 %v4737_v24  ;;  %6293 = vst [vmem:[#allocation29_spill] sm:$0xff] %v5439_v46  ;;  %v5456_v19 = vld [vmem:[%s4880_s8 + $0xb0] sm:$0x1]  ;;  %v5462_v55 = vcombine.low %v1488_v22, %v1491_v8  ;;  %v1515_v22 = vrot.slane %v5277_v7, 5 }
  0x73   : > { %v1505_v8 = vsel %vm5182_vm7, %v1503_v43, %v1504_v56  ;;  %v1518_v20 = vrot.slane %v5456_v19, 5  ;;  %v5493_v56 = vrot.slane %v932_v51, 5  ;;  %v6299_v43 = vshrl.u32 %v5155_v40, 16  ;;  %v5510_v40 = vld [vmem:[%s4880_s8 + $0xbc] sm:$0x1] }
  0x74   : > { %6295 = vst [vmem:[#allocation31_spill] sm:$0xff] %v5462_v55  ;;  %v1516_v51 = vsel %vm5182_vm7, %v3624_v4, %v1515_v22  ;;  %v1517_v48 = vrot.slane %v1515_v22, 4  ;;  %v942_v4 = vshll.u32 %v5370_v38, 16  ;;  %v6303_v22 = vshrl.u32 %v5207_v9, 16 }
  0x75   : > { %4110 = vmatpush3.bf16.msra.mxu1 %v4737_v24  ;;  %4232 = vmatmul.mubr.msk.bf16.gmra.mrb[12].mxu0 %vm461_vm1, %v5432_v37  ;;  %v1509_v24 = vsel %vm5182_vm7, %v3623_v31, %v1508_v1  ;;  %v1512_v31 = vsel %vm5182_vm7, %v1510_v14, %v1511_v61  ;;  %v3625_v1 = vrot.slane %v5320_v10, 9  ;;  %v938_v44 = vrot.slane %v6299_v43, 4 }
  0x76   : > { %4143 = vmatprep.subr.bf16.mxu1 %v5439_v46  ;;  %4235 = vmatprep.mubr.msk.bf16.mxu0 %vm461_vm1, %v5441_v50  ;;  %v5501_v50 = vrot.slane %v956_v62, 5  ;;  %v6302_v61 = vshrl.u32 %v5187_v34, 16  ;;  %v5505_v37 = vcombine.low %v1502_v12, %v1505_v8  ;;  %v980_v43 = vshll.u32 %v5210_v25, 16 }
  0x77   : > { %v5513_v33 = vcombine.low %v1509_v24, %v1512_v31  ;;  %v2294_v62 = vrot.slane %v5491_v47, 5  ;;  %v929_v34 = vor.u32 %v928_v59, %v925_v63  ;;  %v939_v12 = vor.u32 %v938_v44, %v5493_v56 }
  0x78   : > { %4080 = vmatmul.mubr.msk.bf16.gmra.mrb[4].mxu1 %vm461_vm1, %v5072_v53  ;;  %v6301_v53 = vshll.u32 %v5176_v28, 16  ;;  %v962_v14 = vrot.slane %v6302_v61, 4  ;;  %v1522_v28 = vrot.slane %v5323_v17, 5  ;;  %v973_v8 = vrot.slane %v6303_v22, 4 }
  0x79   : > { %4083 = vmatprep.mubr.msk.bf16.mxu1 %vm461_vm1, %v5098_v29  ;;  %v6304_v61 = vshll.u32 %v5207_v9, 16  ;;  %v1525_v31 = vrot.slane %v5510_v40, 5  ;;  %v966_v63 = vshll.u32 %v5389_v27, 16  ;;  %v1519_v38 = vsel %vm5182_vm7, %v1517_v48, %v1518_v20 }
  0x7a   : > { %v952_v29 = vrot.slane %v6301_v53, 5  ;;  %v5517_v53 = vld [vmem:[%s4880_s8 + $0xc0] sm:$0xf]  ;;  %v963_v59 = vor.u32 %v962_v14, %v5501_v50  ;;  %v5539_v9 = vrot.slane %v980_v43, 5  ;;  %v6305_v22 = vshrl.u32 %v5210_v25, 16 }
  0x7b   : > { %v976_v24 = vrot.slane %v6304_v61, 5  ;;  %v3710_v44 = vrot.slane %v5517_v53, 9  ;;  %v2297_v27 = vrot.slane %v5521_v39, 5  ;;  %v930_v14 = vrot.slane %v929_v34, 4 }
  0x7c   : > { %v953_v46 = vor.u32 %v952_v29, %v949_v13  ;;  %v986_v61 = vrot.slane %v6305_v22, 4  ;;  %v1524_v29 = vrot.slane %v1522_v28, 4  ;;  %v2296_v13 = vrot.slane %v2294_v62, 4 }
  0x7d   : > { %4236 = vmatmul.mubr.msk.bf16.gmra.mrb[16].mxu0 %vm461_vm1, %v5462_v55  ;;  %v944_v48 = vrot.slane %v942_v4, 5  ;;  %v977_v20 = vor.u32 %v976_v24, %v973_v8  ;;  %v1004_v43 = vshll.u32 %v5229_v16, 16  ;;  %v1523_v25 = vsel %vm5182_vm7, %v3625_v1, %v1522_v28 }
  0x7e   : > { %4239 = vmatprep.mubr.msk.bf16.mxu0 %vm461_vm1, %v5470_v54  ;;  %v940_v54 = vrot.slane %v939_v12, 4  ;;  %v954_v22 = vrot.slane %v953_v46, 4  ;;  %v964_v55 = vrot.slane %v963_v59, 4  ;;  %v968_v42 = vrot.slane %v966_v63, 5 }
  0x7f   : > { %v6306_v34 = vshrl.u32 %v5226_v23, 16  ;;  %v1526_v4 = vsel %vm5182_vm7, %v1524_v29, %v1525_v31  ;;  %v2295_v8 = vsel %vm5182_vm7, %v3710_v44, %v2294_v62  ;;  %v2298_v46 = vsel %vm5182_vm7, %v2296_v13, %v2297_v27 }
  0x80   : > { %4084 = vmatmul.mubr.msk.bf16.gmra.mrb[8].mxu1 %vm461_vm1, %v5128_v0  ;;  %v987_v0 = vor.u32 %v986_v61, %v5539_v9  ;;  %v935_v1 = vsel %vm4972_vm4, %v930_v14, %v5493_v56  ;;  %v945_v11 = vsel %vm4972_vm4, %v940_v54, %v944_v48  ;;  %v978_v28 = vrot.slane %v977_v20, 4 }
  0x81   : > { %4087 = vmatprep.mubr.msk.bf16.mxu1 %vm461_vm1, %v5149_v30  ;;  %v997_v35 = vrot.slane %v6306_v34, 4  ;;  %v6307_v30 = vshll.u32 %v5226_v23, 16  ;;  %v5568_v24 = vrot.slane %v1004_v43, 5  ;;  %v1080_v31 = vshrl.u32 %v5323_v17, 16 }
  0x82   : > { %v959_v62 = vsel %vm4972_vm4, %v954_v22, %v5501_v50  ;;  %v969_v56 = vsel %vm4972_vm4, %v964_v55, %v968_v42  ;;  %v1014_v54 = vshll.u32 %v5427_v57, 16  ;;  %v5583_v59 = vcombine.low %v1516_v51, %v1519_v38 }
  0x83   : > { %v1000_v12 = vrot.slane %v6307_v30, 5  ;;  %v6308_v30 = vshrl.u32 %v5229_v16, 16  ;;  %v988_v16 = vrot.slane %v987_v0, 4  ;;  %v992_v63 = vrot.slane %v990_v36, 5 }
  0x84   : > { %v5587_v61 = vcombine.low %v1523_v25, %v1526_v4  ;;  %v5589_v29 = vcombine.low %v2295_v8, %v2298_v46  ;;  %v5591_v50 = vcombine.low %v935_v1, %v945_v11  ;;  %v1028_v42 = vshll.u32 %v5264_v60, 16 }
  0x85   : > { %v1010_v23 = vrot.slane %v6308_v30, 4  ;;  %4240 = vmatmul.mubr.msk.bf16.gmra.mrb[20].mxu0 %vm461_vm1, %v5505_v37  ;;  %v1001_v44 = vor.u32 %v1000_v12, %v997_v35  ;;  %v5596_v57 = vcombine.low %v959_v62, %v969_v56  ;;  %v983_v35 = vsel %vm4972_vm4, %v978_v28, %v5539_v9 }
  0x86   : > { %4243 = vmatprep.mubr.msk.bf16.mxu0 %vm461_vm1, %v5513_v33  ;;  %v6309_v0 = vshrl.u32 %v5257_v41, 16  ;;  %v1016_v51 = vrot.slane %v1014_v54, 5  ;;  %v1052_v38 = vshll.u32 %v5277_v7, 16  ;;  %v6310_v13 = vrot.slane %v4928_v6, 5 }
  0x87   : > { %v1011_v36 = vor.u32 %v1010_v23, %v5568_v24  ;;  %v6311_v27 = vrot.slane %v4925_v5, 9  ;;  %v1420_v48 = vrot.slane %v5312_v15, 5  ;;  %v993_v9 = vsel %vm4972_vm4, %v988_v16, %v992_v63 }
  0x88   : > { %4088 = vmatmul.mubr.msk.bf16.gmra.mrb[12].mxu1 %vm461_vm1, %v5195_v2  ;;  %v1021_v55 = vrot.slane %v6309_v0, 4  ;;  %v1002_v20 = vrot.slane %v1001_v44, 4  ;;  %v6312_v43 = vshll.u32 %v5257_v41, 16  ;;  %v6313_v22 = vshrl.u32 %v5264_v60, 16 }
  0x89   : > { %4091 = vmatprep.mubr.msk.bf16.mxu1 %vm461_vm1, %v5219_v58  ;;  %v5611_v14 = vsel %vm5182_vm7, %v6311_v27, %v6310_v13  ;;  %v1030_v12 = vrot.slane %v1028_v42, 5  ;;  %v1038_v6 = vshll.u32 %v5436_v18, 16  ;;  %v6314_v5 = vshrl.u32 %v5269_v26, 16 }
  0x8a   : > { %v1024_v25 = vrot.slane %v6312_v43, 5  ;;  %v1034_v34 = vrot.slane %v6313_v22, 4  ;;  %v5626_v15 = vsel %vm5182_vm7, %v5354_v3, %v1420_v48  ;;  %v1012_v8 = vrot.slane %v1011_v36, 4 }
  0x8b   : > { %v1045_v4 = vrot.slane %v6314_v5, 4  ;;  %v6315_v46 = vshll.u32 %v5269_v26, 16  ;;  %v6316_v41 = vshrl.u32 %v5277_v7, 16  ;;  %v3630_v60 = vcombine.low %v5611_v14, %v5626_v15  ;;  %v6327_v14 = vld [vmem:[#allocation14_spill] sm:$0xff]  ;;  %v4746_v15 = vld [vmem:[%s4875_s5 + $0x40] sm:$0xff]  }
  0x8c   : > { %v1054_v18 = vrot.slane %v1052_v38, 5  ;;  %v2052_v28 = vshrl.u32 %v5517_v53, 16  ;;  %v2055_v30 = vshll.u32 %v5517_v53, 16  ;;  %v2061_v3 = vshll.u32 %v5491_v47, 16 }
  0x8d   : > { %v1048_v1 = vrot.slane %v6315_v46, 5  ;;  %v1058_v11 = vrot.slane %v6316_v41, 4  ;;  %4244 = vmatmul.mubr.msk.bf16.gmra.mrb[24].mxu0 %vm461_vm1, %v5583_v59  ;;  %v5641_v26 = vcombine.low %v983_v35, %v993_v9  ;;  %v1025_v7 = vor.u32 %v1024_v25, %v1021_v55 }
  0x8e   : > { %4247 = vmatprep.mubr.msk.bf16.mxu0 %vm461_vm1, %v5587_v61  ;;  %v2065_v23 = vshrl.u32 %v5491_v47, 16  ;;  %v2071_v62 = vshll.u32 %v5521_v39, 16  ;;  %v1035_v56 = vor.u32 %v1034_v34, %v1030_v12  ;;  %v2054_v54 = vrot.slane %v2052_v28, 4 }
  0x8f   : > { %v2057_v16 = vrot.slane %v2055_v30, 5  ;;  %v2063_v63 = vrot.slane %v2061_v3, 5  ;;  %v1007_v44 = vsel %vm4972_vm4, %v1002_v20, %v5568_v24  ;;  %v1017_v42 = vsel %vm4972_vm4, %v1012_v8, %v1016_v51 }
  0x90   : > { %4092 = vmatmul.mubr.msk.bf16.gmra.mrb[16].mxu1 %vm461_vm1, %v5591_v50  ;;  %v1076_v35 = vshll.u32 %v5323_v17, 16  ;;  %v2067_v39 = vrot.slane %v2065_v23, 4  ;;  %v1049_v36 = vor.u32 %v1048_v1, %v1045_v4  ;;  %v1059_v0 = vor.u32 %v1058_v11, %v1054_v18  ;;  %v4740_v23 = vld [vmem:[%s4875_s5 + $0x78] sm:$0xff]  }
  0x91   : > { %4095 = vmatprep.mubr.msk.bf16.mxu1 %vm461_vm1, %v5596_v57  ;;  %v1062_v55 = vshll.u32 %v5456_v19, 16  ;;  %v2058_v38 = vor.u32 %v2057_v16, %v2054_v54  ;;  %v1026_v13 = vrot.slane %v1025_v7, 4  ;;  %v1040_v27 = vrot.slane %v1038_v6, 5 }
  0x92   : > { %v2068_v48 = vor.u32 %v2067_v39, %v2063_v63  ;;  %v2073_v9 = vrot.slane %v2071_v62, 5  ;;  %v5656_v43 = vcombine.low %v1007_v44, %v1017_v42  ;;  %v1036_v25 = vrot.slane %v1035_v56, 4  ;;  %v6320_v42 = vld [vmem:[#allocation6_spill] sm:$0xff] }
  0x93   : > { %v6317_v24 = vshrl.u32 %v5320_v10, 16  ;;  %v2059_v22 = vrot.slane %v2058_v38, 4  ;;  %v6318_v51 = vshll.u32 %v5320_v10, 16  ;;  %v1078_v5 = vrot.slane %v1076_v35, 5  ;;  %v6321_v35 = vld [vmem:[#allocation9_spill] sm:$0xff]  ;;  %v6322_v39 = vld [vmem:[#allocation10_spill] sm:$0xff] }
  0x94   : > { %v1082_v4 = vrot.slane %v1080_v31, 4  ;;  %v2069_v19 = vrot.slane %v2068_v48, 4  ;;  %v1050_v6 = vrot.slane %v1049_v36, 4  ;;  %v1060_v8 = vrot.slane %v1059_v0, 4  ;;  %v4743_v36 = vld [vmem:[%s4875_s5 + $0x38] sm:$0xff]   ;;  %v6323_v0 = vld [vmem:[#allocation13_spill] sm:$0xff] }
  0x95   : > { %v1069_v20 = vrot.slane %v6317_v24, 4  ;;  %v1072_v34 = vrot.slane %v6318_v51, 5  ;;  %4248 = vmatmul.mubr.msk.bf16.gmra.mrb[28].mxu0 %vm461_vm1, %v5589_v29  ;;  %v1064_v46 = vrot.slane %v1062_v55, 5  ;;  %v2064_v1 = vsel %vm4972_vm4, %v2059_v22, %v2063_v63  ;;  %v6324_v55 = vld [vmem:[#allocation16_spill] sm:$0xff]  ;;  %v6325_v38 = vld [vmem:[#allocation29_spill] sm:$0xff]  ;;  %v6330_v48 = vld [vmem:[#allocation23_spill] sm:$0xff] }
  0x96   : > { %4255 = vmatprep.mubr.msk.bf16.mxu0 %vm461_vm1, %v4986_v45  ;;  %v2074_v10 = vsel %vm4972_vm4, %v2069_v19, %v2073_v9  ;;  %v1031_v17 = vsel %vm4972_vm4, %v1026_v13, %v1030_v12  ;;  %v1041_v41 = vsel %vm4972_vm4, %v1036_v25, %v1040_v27  ;;  %v1083_v28 = vor.u32 %v1082_v4, %v1078_v5  ;;  %v6326_v13 = vld [vmem:[#allocation19_spill] sm:$0xff]  ;;  %v6329_v27 = vld [vmem:[#allocation20_spill] sm:$0xff]  ;;  %v6331_v9 = vld [vmem:[#allocation17_spill] sm:$0xff] }
  0x97   : > { %v5676_v31 = vcombine.low %v2064_v1, %v2074_v10  ;;  %v1073_v11 = vor.u32 %v1072_v34, %v1069_v20  ;;  %v1086_v30 = vshll.u32 %v5510_v40, 16  ;;  %v1055_v3 = vsel %vm4972_vm4, %v1050_v6, %v1054_v18  ;;  %v6319_v40 = vld [vmem:[#allocation5_spill] sm:$0xff]  ;;  %v4744_v18 = vld [vmem:[%s4875_s5 + $0x80] sm:$0xff]   ;;  %v6332_v25 = vld [vmem:[#allocation18_spill] sm:$0xff] }
  0x98   : > { %4096 = vmatmul.mubr.msk.bf16.gmra.mrb[20].mxu1 %vm461_vm1, %v5641_v26  ;;  %v1065_v7 = vsel %vm4972_vm4, %v1060_v8, %v1064_v46  ;;  %v5687_v12 = vcombine.low %v1031_v17, %v1041_v41  ;;  %v1084_v54 = vrot.slane %v1083_v28, 4  ;;  %v6333_v24 = vld [vmem:[#allocation24_spill] sm:$0xff]  ;;  %v6334_v20 = vld [vmem:[#allocation26_spill] sm:$0xff]  ;;  %v6335_v22 = vld [vmem:[#allocation21_spill] sm:$0xff]  ;;  %v5755_v4 = vcombine.low %v5517_v53, %v5491_v47 }
  0x99   : > { %4099 = vmatprep.mubr.msk.bf16.mxu1 %vm461_vm1, %v5656_v43  ;;  %v5690_v62 = vcombine.low %v1055_v3, %v1065_v7  ;;  %v1074_v56 = vrot.slane %v1073_v11, 4  ;;  %v1088_v16 = vrot.slane %v1086_v30, 5  ;;  %v6336_v51 = vld [vmem:[#allocation22_spill] sm:$0xff]  ;;  %v6337_v34 = vld [vmem:[#allocation27_spill] sm:$0xff]  ;;  %v6339_v19 = vld [vmem:[#allocation25_spill] sm:$0xff] }
  0x9a   : > { %v5762_v6 = vld [vmem:[%s4880_s8 + $0xcc] sm:$0xf]  ;;  %v5765_v8 = vld [vmem:[%s4880_s8 + $0xd0] sm:$0xf]  ;;  %v6340_v46 = vld [vmem:[#allocation30_spill] sm:$0xff] }
  0x9b   : > { %v1079_v63 = vsel %vm4972_vm4, %v1074_v56, %v1078_v5  ;;  %v1089_v44 = vsel %vm4972_vm4, %v1084_v54, %v1088_v16  ;;  %v6338_v5 = vld [vmem:[#allocation28_spill] sm:$0xff]  ;;  %v6341_v1 = vld [vmem:[#allocation31_spill] sm:$0xff]  ;;  %v3738_v47 = vcombine.low %v5762_v6, %v5765_v8  ;;  %v2976_v32 = vrot.slane %v5765_v8, 5 }
  0x9c   : > { %v6342_v53 = vld [vmem:[#allocation4_spill] sm:$0xff]  ;;  %v6344_v41 = vld [vmem:[#allocation7_spill] sm:$0xff] }
  0x9d   : > { %4256 = vmatmul.mubr.msk.bf16.vlgmr.msra.gmra.mrb[0].mxu0 %vm461_vm1, %v4995_v49  ;;  %v6343_v10 = vld [vmem:[#allocation32_spill] sm:$0xff]  ;;  %v6346_v28 = vld [vmem:[#allocation11_spill] sm:$0xff] }
  0x9e   : > { %4288 = vmatpush3.bf16.msra.mxu0 %v5315_v52  ;;  %4259 = vmatprep.mubr.msk.bf16.mxu0 %vm461_vm1, %v6319_v40  ;;  %v5706_v52 = vcombine.low %v1079_v63, %v1089_v44  ;;  %v4745_v17 = vld [vmem:[%s4875_s5 + $0x88] sm:$0xff]   ;;  %v6348_v3 = vld [vmem:[#allocation3_spill] sm:$0xff] }
  0x9f   : > { %4289 = vmatprep.subr.bf16.mxu0 %v4740_v23  ;;  %v6345_v11 = vld [vmem:[#allocation8_spill] sm:$0xff] }
  0xa0   : > { %4100 = vmatmul.mubr.msk.bf16.gmra.mrb[24].mxu1 %vm461_vm1, %v5687_v12  ;;  %v6347_v30 = vld [vmem:[#allocation12_spill] sm:$0xff] }
  0xa1   : > { %4103 = vmatprep.mubr.msk.bf16.mxu1 %vm461_vm1, %v5690_v62  ;;  %v4747_v7 = vld [vmem:[%s4875_s5 + $0x48] sm:$0xff]  }
  0xa2   : > { %4290 = vmatpush3.bf16.msra.mxu0 %v4740_v23 }
  0xa3   : > { %4323 = vmatprep.subr.bf16.mxu0 %v4744_v18 }
  0xa5   : > { %4260 = vmatmul.mubr.msk.bf16.gmra.mrb[4].mxu0 %vm461_vm1, %v6320_v42 }
  0xa6   : > { %4263 = vmatprep.mubr.msk.bf16.mxu0 %vm461_vm1, %v6321_v35 }
  0xa8   : > { %4104 = vmatmul.mubr.msk.bf16.gmra.mrb[28].mxu1 %vm461_vm1, %v5706_v52 }
  0xa9   : > { %4111 = vmatprep.mubr.msk.bf16.mxu1 %vm461_vm1, %v3630_v60  ;;  %v6328_v60 = vld [vmem:[#allocation15_spill] sm:$0xff] }
  0xad   : > { %4264 = vmatmul.mubr.msk.bf16.gmra.mrb[8].mxu0 %vm461_vm1, %v6322_v39 }
  0xae   : > { %4267 = vmatprep.mubr.msk.bf16.mxu0 %vm461_vm1, %v6323_v0 }
  0xb0   : > { %4112 = vmatmul.mubr.msk.bf16.vlgmr.msra.gmra.mrb[0].mxu1 %vm461_vm1, %v6324_v55 }
  0xb1   : > { %4144 = vmatpush3.bf16.msra.mxu1 %v6325_v38  ;;  %4115 = vmatprep.mubr.msk.bf16.mxu1 %vm461_vm1, %v6326_v13 }
  0xb2   : > { %4145 = vmatprep.subr.bf16.mxu1 %v4743_v36 }
  0xb5   : > { %4146 = vmatpush3.bf16.msra.mxu1 %v4743_v36  ;;  %4268 = vmatmul.mubr.msk.bf16.gmra.mrb[12].mxu0 %vm461_vm1, %v6327_v14 }
  0xb6   : > { %4359 = vmatprep.subr.bf16.mxu1 %v4746_v15  ;;  %4271 = vmatprep.mubr.msk.bf16.mxu0 %vm461_vm1, %v6328_v60 }
  0xb8   : > { %4116 = vmatmul.mubr.msk.bf16.gmra.mrb[4].mxu1 %vm461_vm1, %v6329_v27 }
  0xb9   : > { %4119 = vmatprep.mubr.msk.bf16.mxu1 %vm461_vm1, %v6330_v48 }
  0xbd   : > { %4272 = vmatmul.mubr.msk.bf16.gmra.mrb[16].mxu0 %vm461_vm1, %v6331_v9 }
  0xbe   : > { %4275 = vmatprep.mubr.msk.bf16.mxu0 %vm461_vm1, %v6332_v25 }
  0xc0   : > { %4120 = vmatmul.mubr.msk.bf16.gmra.mrb[8].mxu1 %vm461_vm1, %v6333_v24 }
  0xc1   : > { %4123 = vmatprep.mubr.msk.bf16.mxu1 %vm461_vm1, %v6334_v20 }
  0xc5   : > { %4276 = vmatmul.mubr.msk.bf16.gmra.mrb[20].mxu0 %vm461_vm1, %v6335_v22 }
  0xc6   : > { %4279 = vmatprep.mubr.msk.bf16.mxu0 %vm461_vm1, %v6336_v51 }
  0xc8   : > { %4124 = vmatmul.mubr.msk.bf16.gmra.mrb[12].mxu1 %vm461_vm1, %v6337_v34 }
  0xc9   : > { %4127 = vmatprep.mubr.msk.bf16.mxu1 %vm461_vm1, %v6338_v5 }
  0xcd   : > { %4280 = vmatmul.mubr.msk.bf16.gmra.mrb[24].mxu0 %vm461_vm1, %v6339_v19 }
  0xce   : > { %4283 = vmatprep.mubr.msk.bf16.mxu0 %vm461_vm1, %v5755_v4 }
  0xd0   : > { %4128 = vmatmul.mubr.msk.bf16.gmra.mrb[16].mxu1 %vm461_vm1, %v6340_v46 }
  0xd1   : > { %4131 = vmatprep.mubr.msk.bf16.mxu1 %vm461_vm1, %v6341_v1 }
  0xd5   : > { %4284 = vmatmul.mubr.msk.bf16.gmra.mrb[28].mxu0 %vm461_vm1, %v3738_v47 }
  0xd6   : > { %4291 = vmatprep.mubr.msk.bf16.mxu0 %vm461_vm1, %v6342_v53 }
  0xd8   : > { %4132 = vmatmul.mubr.msk.bf16.gmra.mrb[20].mxu1 %vm461_vm1, %v6343_v10 }
  0xd9   : > { %4135 = vmatprep.mubr.msk.bf16.mxu1 %vm461_vm1, %v5505_v37 }
  0xdd   : > { %4292 = vmatmul.mubr.msk.bf16.vlgmr.msra.gmra.mrb[0].mxu0 %vm461_vm1, %v6344_v41  ;;  %v337_v41 = vld [vmem:[#allocation2 + $0x20] sm:$0xff] }
  0xde   : > { %4324 = vmatpush3.bf16.msra.mxu0 %v4744_v18  ;;  %4295 = vmatprep.mubr.msk.bf16.mxu0 %vm461_vm1, %v6345_v11  ;;  %v340_v11 = vld [vmem:[#allocation2 + $0x38] sm:$0xff] }
  0xdf   : > { %4325 = vmatprep.subr.bf16.mxu0 %v4745_v17 }
  0xe0   : > { %4136 = vmatmul.mubr.msk.bf16.gmra.mrb[24].mxu1 %vm461_vm1, %v5513_v33 }
  0xe1   : > { %4139 = vmatprep.mubr.msk.bf16.mxu1 %vm461_vm1, %v5583_v59 }
  0xe2   : > { %4326 = vmatpush3.bf16.msra.mxu0 %v4745_v17 }
  0xe5   : > { %4296 = vmatmul.mubr.msk.bf16.gmra.mrb[4].mxu0 %vm461_vm1, %v6346_v28 }
  0xe6   : > { %4299 = vmatprep.mubr.msk.bf16.mxu0 %vm461_vm1, %v6347_v30  ;;  %v338_v30 = vld [vmem:[#allocation2 + $0x28] sm:$0xff] }
  0xe8   : > { %4140 = vmatmul.mubr.msk.bf16.gmra.mrb[28].mxu1 %vm461_vm1, %v5587_v61 }
  0xe9   : > { %4147 = vmatprep.mubr.msk.bf16.mxu1 %vm461_vm1, %v6348_v3 }
  0xed   : > { %4300 = vmatmul.mubr.msk.bf16.gmra.mrb[8].mxu0 %vm461_vm1, %v5195_v2  ;;  %v2747_v2 = vshrl.u32 %v5765_v8, 16 }
  0xee   : > { %4303 = vmatprep.mubr.msk.bf16.mxu0 %vm461_vm1, %v5219_v58  ;;  %v2743_v58 = vshll.u32 %v5765_v8, 16 }
  0xef   : > { %v2749_v16 = vrot.slane %v2747_v2, 4 }
  0xf0   : > { %4148 = vmatmul.mubr.msk.bf16.vlgmr.msra.gmra.mrb[0].mxu1 %vm461_vm1, %v4986_v45  ;;  %v2734_v45 = vshrl.u32 %v5762_v6, 16  ;;  %v2745_v54 = vrot.slane %v2743_v58, 5 }
  0xf1   : > { %4361 = vmatpush3.bf16.msra.mxu1 %v4746_v15  ;;  %4151 = vmatprep.mubr.msk.bf16.mxu1 %vm461_vm1, %v4995_v49  ;;  %v2737_v49 = vshll.u32 %v5762_v6, 16 }
  0xf2   : > { %4360 = vmatprep.subr.bf16.mxu1 %v4747_v7  ;;  %v2736_v23 = vrot.slane %v2734_v45, 4  ;;  %v2750_v63 = vor.u32 %v2749_v16, %v2745_v54 }
  0xf3   : > { %v2739_v56 = vrot.slane %v2737_v49, 5 }
  0xf5   : > { %4362 = vmatpush3.bf16.msra.mxu1 %v4747_v7  ;;  %4304 = vmatmul.mubr.msk.bf16.gmra.mrb[12].mxu0 %vm461_vm1, %v5591_v50  ;;  %v2740_v18 = vor.u32 %v2739_v56, %v2736_v23 }
  0xf6   : > { %4307 = vmatprep.mubr.msk.bf16.mxu0 %vm461_vm1, %v5596_v57 }
  0xf8   : > { %4152 = vmatmul.mubr.msk.bf16.gmra.mrb[4].mxu1 %vm461_vm1, %v6319_v40  ;;  %v332_v40 = vld [vmem:[%s4880_s8 + $0xd4] sm:$0x1] }
  0xf9   : > { %4155 = vmatprep.mubr.msk.bf16.mxu1 %vm461_vm1, %v6320_v42  ;;  %v2753_v44 = vshll.u32 %v332_v40, 16  ;;  %v2741_v42 = vrot.slane %v2740_v18, 4 }
  0xfb   : > { %v2746_v36 = vsel %vm4972_vm4, %v2741_v42, %v2745_v54 }
  0xfd   : > { %4308 = vmatmul.mubr.msk.bf16.gmra.mrb[16].mxu0 %vm461_vm1, %v5641_v26 }
  0xfe   : > { %4311 = vmatprep.mubr.msk.bf16.mxu0 %vm461_vm1, %v5656_v43 }
 0x100   : > { %4156 = vmatmul.mubr.msk.bf16.gmra.mrb[8].mxu1 %vm461_vm1, %v6321_v35  ;;  %v2751_v35 = vrot.slane %v2750_v63, 4  ;;  %v341_v63 = vld [vmem:[#allocation2 + $0x40] sm:$0xff] }
 0x101   : > { %4159 = vmatprep.mubr.msk.bf16.mxu1 %vm461_vm1, %v6322_v39  ;;  %v2755_v39 = vrot.slane %v2753_v44, 5  ;;  %v344_v44 = vld [vmem:[#allocation2 + $0x58] sm:$0xff] }
 0x103   : > { %v2756_v55 = vsel %vm4972_vm4, %v2751_v35, %v2755_v39  ;;  %v342_v35 = vld [vmem:[#allocation2 + $0x48] sm:$0xff] }
 0x105   : > { %4312 = vmatmul.mubr.msk.bf16.gmra.mrb[20].mxu0 %vm461_vm1, %v5687_v12 }
 0x106   : > { %4315 = vmatprep.mubr.msk.bf16.mxu0 %vm461_vm1, %v5690_v62 }
 0x108   : > { %4160 = vmatmul.mubr.msk.bf16.gmra.mrb[12].mxu1 %vm461_vm1, %v6323_v0  ;;  %v3761_v0 = vcombine.low %v2746_v36, %v2756_v55 }
 0x109   : > { %4163 = vmatprep.mubr.msk.bf16.mxu1 %vm461_vm1, %v6327_v14 }
 0x10d   : > { %4316 = vmatmul.mubr.msk.bf16.gmra.mrb[24].mxu0 %vm461_vm1, %v5706_v52 }
 0x10e   : > { %4319 = vmatprep.mubr.msk.bf16.mxu0 %vm461_vm1, %v5676_v31 }
 0x110   : > { %4164 = vmatmul.mubr.msk.bf16.gmra.mrb[16].mxu1 %vm461_vm1, %v6328_v60 }
 0x111   : > { %4167 = vmatprep.mubr.msk.bf16.mxu1 %vm461_vm1, %v6331_v9 }
 0x115   : > { %4320 = vmatmul.mubr.msk.bf16.gmra.mrb[28].mxu0 %vm461_vm1, %v3761_v0 }
 0x116   : > { %4327 = vmatprep.mubr.msk.bf16.mxu0 %vm461_vm1, %v6326_v13 }
 0x118   : > { %4168 = vmatmul.mubr.msk.bf16.gmra.mrb[20].mxu1 %vm461_vm1, %v6332_v25  ;;  %v335_v25 = vld [vmem:[#allocation2 + $0x10] sm:$0xff] }
 0x119   : > { %4171 = vmatprep.mubr.msk.bf16.mxu1 %vm461_vm1, %v6335_v22 }
 0x11d   : > { %4328 = vmatmul.mubr.msk.bf16.vlgmr.msra.gmra.mrb[0].mxu0 %vm461_vm1, %v6329_v27 }
 0x11e   : > { %4331 = vmatprep.mubr.msk.bf16.mxu0 %vm461_vm1, %v6330_v48 }
 0x120   : > { %4172 = vmatmul.mubr.msk.bf16.gmra.mrb[24].mxu1 %vm461_vm1, %v6336_v51  ;;  %v334_v51 = vld [vmem:[#allocation2 + $0x8] sm:$0xff] }
 0x121   : > { %4175 = vmatprep.mubr.msk.bf16.mxu1 %vm461_vm1, %v6339_v19 }
 0x125   : > { %4332 = vmatmul.mubr.msk.bf16.gmra.mrb[4].mxu0 %vm461_vm1, %v6333_v24  ;;  %v333_v24 = vld [vmem:[#allocation2] sm:$0xff] }
 0x126   : > { %4335 = vmatprep.mubr.msk.bf16.mxu0 %vm461_vm1, %v6334_v20  ;;  %v336_v20 = vld [vmem:[#allocation2 + $0x18] sm:$0xff] }
 0x128   : > { %4176 = vmatmul.mubr.msk.bf16.gmra.mrb[28].mxu1 %vm461_vm1, %v5755_v4 }
 0x129   : > { %4199 = vmatprep.mubr.msk.bf16.mxu1 %vm461_vm1, %v5591_v50  ;;  %v3780_v50 = vrot.slane %v5762_v6, 9 }
 0x12d   : > { %4336 = vmatmul.mubr.msk.bf16.gmra.mrb[8].mxu0 %vm461_vm1, %v6337_v34 }
 0x12e   : > { %4339 = vmatprep.mubr.msk.bf16.mxu0 %vm461_vm1, %v6338_v5 }
 0x130   : > { %4200 = vmatmul.mubr.msk.bf16.vlgmr.msra.gmra.mrb[16].mxu1 %vm461_vm1, %v5596_v57  ;;  %v2979_v57 = vrot.slane %v332_v40, 5  ;;  %v343_v40 = vld [vmem:[#allocation2 + $0x50] sm:$0xff] }
 0x131   : > { %4203 = vmatprep.mubr.msk.bf16.mxu1 %vm461_vm1, %v5641_v26 }
 0x135   : > { %4340 = vmatmul.mubr.msk.bf16.gmra.mrb[12].mxu0 %vm461_vm1, %v6340_v46 }
 0x136   : > { %4343 = vmatprep.mubr.msk.bf16.mxu0 %vm461_vm1, %v6341_v1 }
 0x138   : > { %4204 = vmatmul.mubr.msk.bf16.gmra.mrb[20].mxu1 %vm461_vm1, %v5656_v43 }
 0x139   : > { %4207 = vmatprep.mubr.msk.bf16.mxu1 %vm461_vm1, %v5687_v12 }
 0x13d   : > { %4344 = vmatmul.mubr.msk.bf16.gmra.mrb[16].mxu0 %vm461_vm1, %v6343_v10  ;;  %v339_v10 = vld [vmem:[#allocation2 + $0x30] sm:$0xff] }
 0x13e   : > { %4347 = vmatprep.mubr.msk.bf16.mxu0 %vm461_vm1, %v5505_v37  ;;  %v2978_v37 = vrot.slane %v2976_v32, 4 }
 0x140   : > { %4208 = vmatmul.mubr.msk.bf16.gmra.mrb[24].mxu1 %vm461_vm1, %v5690_v62 }
 0x141   : > { %4211 = vmatprep.mubr.msk.bf16.mxu1 %vm461_vm1, %v5706_v52 }
 0x145   : > { %4348 = vmatmul.mubr.msk.bf16.gmra.mrb[20].mxu0 %vm461_vm1, %v5513_v33  ;;  %v2977_v33 = vsel %vm5182_vm7, %v3780_v50, %v2976_v32 }
 0x146   : > { %4351 = vmatprep.mubr.msk.bf16.mxu0 %vm461_vm1, %v5583_v59  ;;  %v2980_v59 = vsel %vm5182_vm7, %v2978_v37, %v2979_v57 }
 0x147   : > { %v3785_v26 = vcombine.low %v2977_v33, %v2980_v59 }
 0x148   : > { %4212 = vmatmul.mubr.msk.bf16.gmra.mrb[28].mxu1 %vm461_vm1, %v5676_v31 }
 0x14d   : > { %4352 = vmatmul.mubr.msk.bf16.gmra.mrb[24].mxu0 %vm461_vm1, %v5587_v61 }
 0x14e   : > { %4355 = vmatprep.mubr.msk.bf16.mxu0 %vm461_vm1, %v5589_v29 }
 0x155   : > { %4356 = vmatmul.mubr.msk.bf16.gmra.mrb[28].mxu0 %vm461_vm1, %v3785_v26 }
 0x1c3   : > { %v4149_v43 = vpop.f32.mrb[0].mxu1 }
 0x1c4   : > { %v1892_v31 = vpop.f32.mrb[1].mxu1  ;;  %v4363_v22 = vadd.f32 %v4149_v43, %v335_v25 }
 0x1c5   : > { %v4150_v12 = vpop.f32.mrb[2].mxu1  ;;  %v4365_v34 = vadd.f32 %v1892_v31, %v333_v24  ;;  %v347_v31 = vld [vmem:[#allocation2 + $0x70] sm:$0xff] }
 0x1c6   : > { %v1895_v62 = vpop.f32.mrb[3].mxu1  ;;  %v4367_v4 = vadd.f32 %v4150_v12, %v336_v20 }
 0x1c7   : > { %v4369_v8 = vadd.f32 %v1895_v62, %v334_v51 }
 0x1cb   : > { %v4153_v52 = vpop.f32.mrb[4].mxu1 }
 0x1cc   : > { %v1908_v38 = vpop.f32.mrb[5].mxu1  ;;  %v4371_v28 = vadd.f32 %v4153_v52, %v339_v10  ;;  %v345_v52 = vld [vmem:[#allocation2 + $0x60] sm:$0xff] }
 0x1cd   : > { %v4154_v13 = vpop.f32.mrb[6].mxu1  ;;  %v4373_v3 = vadd.f32 %v1908_v38, %v337_v41 }
 0x1ce   : > { %v1911_v61 = vpop.f32.mrb[7].mxu1  ;;  %v4375_v45 = vadd.f32 %v4154_v13, %v340_v11  ;;  %v348_v13 = vld [vmem:[#allocation2 + $0x78] sm:$0xff] }
 0x1cf   : > { %v4377_v58 = vadd.f32 %v1911_v61, %v338_v30 }
 0x1d3   : > { %v4157_v14 = vpop.f32.mrb[8].mxu1 }
 0x1d4   : > { %v1924_v15 = vpop.f32.mrb[9].mxu1  ;;  %v4379_v42 = vadd.f32 %v4157_v14, %v343_v40  ;;  %v346_v14 = vld [vmem:[#allocation2 + $0x68] sm:$0xff] }
 0x1d5   : > { %v4158_v29 = vpop.f32.mrb[10].mxu1  ;;  %v4381_v39 = vadd.f32 %v1924_v15, %v341_v63  ;;  %v353_v63 = vld [vmem:[#allocation2 + $0xa0] sm:$0xff] }
 0x1d6   : > { %v1927_v60 = vpop.f32.mrb[11].mxu1  ;;  %v4383_v55 = vadd.f32 %v4158_v29, %v344_v44 }
 0x1d7   : > { %v4385_v50 = vadd.f32 %v1927_v60, %v342_v35  ;;  %v356_v35 = vld [vmem:[#allocation2 + $0xb8] sm:$0xff] }
 0x1db   : > { %v5911_v27 = vpop.f32.mrb[12].mxu1 }
 0x1dc   : > { %v5913_v48 = vpop.f32.mrb[13].mxu1  ;;  %v4387_v61 = vadd.f32 %v5911_v27, %v347_v31 }
 0x1dd   : > { %v5915_v21 = vpop.f32.mrb[14].mxu1  ;;  %v4389_v15 = vadd.f32 %v5913_v48, %v345_v52  ;;  %v349_v48 = vld [vmem:[#allocation2 + $0x80] sm:$0xff] }
 0x1de   : > { %v5917_v9 = vpop.f32.mrb[15].mxu1  ;;  %v4391_v60 = vadd.f32 %v5915_v21, %v348_v13 }
 0x1df   : > { %v4393_v20 = vadd.f32 %v5917_v9, %v346_v14 }
 0x1f0   : > { %v4329_v5 = vpop.f32.mrb[0].mxu0 }
 0x1f1   : > { %v5919_v19 = vadd.f32 %v4363_v22, %v4329_v5  ;;  %v3038_v6 = vpop.f32.mrb[1].mxu0 }
 0x1f2   : > { %v5921_v46 = vadd.f32 %v4365_v34, %v3038_v6  ;;  %v4330_v1 = vpop.f32.mrb[2].mxu0  ;;  %v351_v34 = vld [vmem:[#allocation2 + $0x90] sm:$0xff] }
 0x1f3   : > { %3200 = vst.msk [vmem:[#allocation2 + $0x10] sm:$0xff] %vm3197_vm8, %v5919_v19  ;;  %v5925_v47 = vadd.f32 %v4367_v4, %v4330_v1  ;;  %v3041_v53 = vpop.f32.mrb[3].mxu0 }
 0x1f4   : > { %3198 = vst.msk [vmem:[#allocation2] sm:$0xff] %vm3197_vm8, %v5921_v46  ;;  %v5929_v17 = vadd.f32 %v4369_v8, %v3041_v53  ;;  %v352_v8 = vld [vmem:[#allocation2 + $0x98] sm:$0xff]  ;;  %v350_v53 = vld [vmem:[#allocation2 + $0x88] sm:$0xff] }
 0x1f5   : > { %3201 = vst.msk [vmem:[#allocation2 + $0x18] sm:$0xff] %vm3197_vm8, %v5925_v47 }
 0x1f6   : > { %3199 = vst.msk [vmem:[#allocation2 + $0x8] sm:$0xff] %vm3197_vm8, %v5929_v17 }
 0x1f8   : > { %v4333_v7 = vpop.f32.mrb[4].mxu0 }
 0x1f9   : > { %v5935_v49 = vadd.f32 %v4371_v28, %v4333_v7  ;;  %v3054_v2 = vpop.f32.mrb[5].mxu0 }
 0x1fa   : > { %v5937_v23 = vadd.f32 %v4373_v3, %v3054_v2  ;;  %v4334_v56 = vpop.f32.mrb[6].mxu0 }
 0x1fb   : > { %3204 = vst.msk [vmem:[#allocation2 + $0x30] sm:$0xff] %vm3197_vm8, %v5935_v49  ;;  %v5941_v54 = vadd.f32 %v4375_v45, %v4334_v56  ;;  %v3057_v16 = vpop.f32.mrb[7].mxu0 }
 0x1fc   : > { %3202 = vst.msk [vmem:[#allocation2 + $0x20] sm:$0xff] %vm3197_vm8, %v5937_v23  ;;  %v5945_v18 = vadd.f32 %v4377_v58, %v3057_v16  ;;  %v355_v58 = vld [vmem:[#allocation2 + $0xb0] sm:$0xff] }
 0x1fd   : > { %3205 = vst.msk [vmem:[#allocation2 + $0x38] sm:$0xff] %vm3197_vm8, %v5941_v54 }
 0x1fe   : > { %3203 = vst.msk [vmem:[#allocation2 + $0x28] sm:$0xff] %vm3197_vm8, %v5945_v18 }
 0x200   : > { %v4337_v36 = vpop.f32.mrb[8].mxu0 }
 0x201   : > { %v5951_v0 = vadd.f32 %v4379_v42, %v4337_v36  ;;  %v3070_v32 = vpop.f32.mrb[9].mxu0 }
 0x202   : > { %v5953_v37 = vadd.f32 %v4381_v39, %v3070_v32  ;;  %v4338_v57 = vpop.f32.mrb[10].mxu0 }
 0x203   : > { %v4201_v33 = vpop.f32.mrb[16].mxu1  ;;  %3208 = vst.msk [vmem:[#allocation2 + $0x50] sm:$0xff] %vm3197_vm8, %v5951_v0  ;;  %v5957_v59 = vadd.f32 %v4383_v55, %v4338_v57  ;;  %v3073_v26 = vpop.f32.mrb[11].mxu0  ;;  %v354_v55 = vld [vmem:[#allocation2 + $0xa8] sm:$0xff] }
 0x204   : > { %v2196_v43 = vpop.f32.mrb[17].mxu1  ;;  %3206 = vst.msk [vmem:[#allocation2 + $0x40] sm:$0xff] %vm3197_vm8, %v5953_v37  ;;  %v5961_v12 = vadd.f32 %v4385_v50, %v3073_v26  ;;  %v4395_v1 = vadd.f32 %v4201_v33, %v351_v34  ;;  %v358_v34 = vld [vmem:[#allocation2 + $0xc8] sm:$0xff] }
 0x205   : > { %v4202_v62 = vpop.f32.mrb[18].mxu1  ;;  %3209 = vst.msk [vmem:[#allocation2 + $0x58] sm:$0xff] %vm3197_vm8, %v5957_v59  ;;  %v4397_v41 = vadd.f32 %v2196_v43, %v349_v48 }
 0x206   : > { %v2199_v38 = vpop.f32.mrb[19].mxu1  ;;  %3207 = vst.msk [vmem:[#allocation2 + $0x48] sm:$0xff] %vm3197_vm8, %v5961_v12  ;;  %v4399_v11 = vadd.f32 %v4202_v62, %v352_v8 }
 0x207   : > { %v4401_v30 = vadd.f32 %v2199_v38, %v350_v53  ;;  %v359_v38 = vld [vmem:[#allocation2 + $0xd0] sm:$0xff] }
 0x208   : > { %v4341_v29 = vpop.f32.mrb[12].mxu0 }
 0x209   : > { %v5970_v25 = vadd.f32 %v4387_v61, %v4341_v29  ;;  %v3086_v24 = vpop.f32.mrb[13].mxu0 }
 0x20a   : > { %v5973_v22 = vadd.f32 %v4389_v15, %v3086_v24  ;;  %v4342_v51 = vpop.f32.mrb[14].mxu0  ;;  %v357_v15 = vld [vmem:[#allocation2 + $0xc0] sm:$0xff]  ;;  %v360_v24 = vld [vmem:[#allocation2 + $0xd8] sm:$0xff] }
 0x20b   : > { %v4205_v5 = vpop.f32.mrb[20].mxu1  ;;  %3212 = vst.msk [vmem:[#allocation2 + $0x70] sm:$0xff] %vm3197_vm8, %v5970_v25  ;;  %v5977_v27 = vadd.f32 %v4391_v60, %v4342_v51  ;;  %v3089_v4 = vpop.f32.mrb[15].mxu0 }
 0x20c   : > { %v2212_v6 = vpop.f32.mrb[21].mxu1  ;;  %3210 = vst.msk [vmem:[#allocation2 + $0x60] sm:$0xff] %vm3197_vm8, %v5973_v22  ;;  %v5981_v21 = vadd.f32 %v4393_v20, %v3089_v4  ;;  %v4403_v36 = vadd.f32 %v4205_v5, %v355_v58 }
 0x20d   : > { %v4206_v9 = vpop.f32.mrb[22].mxu1  ;;  %3213 = vst.msk [vmem:[#allocation2 + $0x78] sm:$0xff] %vm3197_vm8, %v5977_v27  ;;  %v4405_v50 = vadd.f32 %v2212_v6, %v353_v63 }
 0x20e   : > { %v2215_v10 = vpop.f32.mrb[23].mxu1  ;;  %3211 = vst.msk [vmem:[#allocation2 + $0x68] sm:$0xff] %vm3197_vm8, %v5981_v21  ;;  %v4407_v57 = vadd.f32 %v4206_v9, %v356_v35 }
 0x20f   : > { %v4409_v26 = vadd.f32 %v2215_v10, %v354_v55 }
 0x210   : > { %v4345_v28 = vpop.f32.mrb[16].mxu0 }
 0x211   : > { %v5987_v3 = vadd.f32 %v4395_v1, %v4345_v28  ;;  %v3102_v7 = vpop.f32.mrb[17].mxu0 }
 0x212   : > { %v5989_v45 = vadd.f32 %v4397_v41, %v3102_v7  ;;  %v4346_v2 = vpop.f32.mrb[18].mxu0  ;;  %v363_v41 = vld [vmem:[#allocation2 + $0xf0] sm:$0xff] }
 0x213   : > { %v4209_v56 = vpop.f32.mrb[24].mxu1  ;;  %3216 = vst.msk [vmem:[#allocation2 + $0x90] sm:$0xff] %vm3197_vm8, %v5987_v3  ;;  %v5993_v16 = vadd.f32 %v4399_v11, %v4346_v2  ;;  %v3105_v40 = vpop.f32.mrb[19].mxu0  ;;  %v364_v2 = vld [vmem:[#allocation2 + $0xf8] sm:$0xff] }
 0x214   : > { %v2228_v44 = vpop.f32.mrb[25].mxu1  ;;  %3214 = vst.msk [vmem:[#allocation2 + $0x80] sm:$0xff] %vm3197_vm8, %v5989_v45  ;;  %v5997_v42 = vadd.f32 %v4401_v30, %v3105_v40  ;;  %v4411_v51 = vadd.f32 %v4209_v56, %v359_v38  ;;  %v361_v30 = vld [vmem:[#allocation2 + $0xe0] sm:$0xff]  ;;  %v362_v56 = vld [vmem:[#allocation2 + $0xe8] sm:$0xff] }
 0x215   : > { %v4210_v39 = vpop.f32.mrb[26].mxu1  ;;  %3217 = vst.msk [vmem:[#allocation2 + $0x98] sm:$0xff] %vm3197_vm8, %v5993_v16  ;;  %v4413_v4 = vadd.f32 %v2228_v44, %v357_v15 }
 0x216   : > { %v2231_v32 = vpop.f32.mrb[27].mxu1  ;;  %3215 = vst.msk [vmem:[#allocation2 + $0x88] sm:$0xff] %vm3197_vm8, %v5997_v42  ;;  %v4415_v48 = vadd.f32 %v4210_v39, %v360_v24 }
 0x217   : > { %v4417_v8 = vadd.f32 %v2231_v32, %v358_v34 }
 0x218   : > { %v4349_v33 = vpop.f32.mrb[20].mxu0 }
 0x219   : > { %v6003_v43 = vadd.f32 %v4403_v36, %v4349_v33  ;;  %v3118_v31 = vpop.f32.mrb[21].mxu0 }
 0x21a   : > { %v6005_v62 = vadd.f32 %v4405_v50, %v3118_v31  ;;  %v4350_v52 = vpop.f32.mrb[22].mxu0 }
 0x21b   : > { %v4213_v13 = vpop.f32.mrb[28].mxu1  ;;  %3220 = vst.msk [vmem:[#allocation2 + $0xb0] sm:$0xff] %vm3197_vm8, %v6003_v43  ;;  %v6009_v61 = vadd.f32 %v4407_v57, %v4350_v52  ;;  %v3121_v14 = vpop.f32.mrb[23].mxu0 }
 0x21c   : > { %v2244_v29 = vpop.f32.mrb[29].mxu1  ;;  %3218 = vst.msk [vmem:[#allocation2 + $0xa0] sm:$0xff] %vm3197_vm8, %v6005_v62  ;;  %v6013_v60 = vadd.f32 %v4409_v26, %v3121_v14  ;;  %v4419_v58 = vadd.f32 %v4213_v13, %v363_v41  ;;  %v6055_v26 = vld [vmem:[%s6208_s2] ss:$0 sm:$0xff] (!%p3804_p10) }
 0x21d   : > { %v4214_v20 = vpop.f32.mrb[30].mxu1  ;;  %3221 = vst.msk [vmem:[#allocation2 + $0xb8] sm:$0xff] %vm3197_vm8, %v6009_v61  ;;  %v4421_v40 = vadd.f32 %v2244_v29, %v361_v30  ;;  %v3241_v31 = vadd.f32 (!%p3804_p10), %v5921_v46, %v6055_v26  ;;  %v3242_v52 = vadd.f32 (!%p3804_p10), %v5929_v17, %v6055_v26  ;;  %v3243_v38 = vadd.f32 (!%p3804_p10), %v5919_v19, %v6055_v26 }
 0x21e   : > { %v2247_v5 = vpop.f32.mrb[31].mxu1  ;;  %3219 = vst.msk [vmem:[#allocation2 + $0xa8] sm:$0xff] %vm3197_vm8, %v6013_v60  ;;  %v4423_v63 = vadd.f32 %v4214_v20, %v364_v2  ;;  %v3244_v13 = vadd.f32 (!%p3804_p10), %v5925_v47, %v6055_v26  ;;  %v3245_v14 = vadd.f32 (!%p3804_p10), %v5937_v23, %v6055_v26  ;;  %v3246_v15 = vadd.f32 (!%p3804_p10), %v5945_v18, %v6055_v26 }
 0x21f   : > { %v4425_v35 = vadd.f32 %v2247_v5, %v362_v56  ;;  %v3247_v46 = vadd.f32 (!%p3804_p10), %v5935_v49, %v6055_v26  ;;  %v3248_v17 = vadd.f32 (!%p3804_p10), %v5941_v54, %v6055_v26  ;;  %v3841_v29 = vpack.c.bf16 (!%p3804_p10), %v3241_v31, %v3241_v31 }
 0x220   : > { %v4353_v6 = vpop.f32.mrb[24].mxu0  ;;  %v3842_v19 = vpack.c.bf16 (!%p3804_p10), %v3242_v52, %v3242_v52  ;;  %v3843_v24 = vpack.c.bf16 (!%p3804_p10), %v3243_v38, %v3243_v38  ;;  %v3844_v47 = vpack.c.bf16 (!%p3804_p10), %v3244_v13, %v3244_v13  ;;  %v3845_v20 = vpack.c.bf16 (!%p3804_p10), %v3245_v14, %v3245_v14 }
 0x221   : > { %v6019_v9 = vadd.f32 %v4411_v51, %v4353_v6  ;;  %v3134_v1 = vpop.f32.mrb[25].mxu0  ;;  %v3846_v51 = vpack.c.bf16 (!%p3804_p10), %v3246_v15, %v3246_v15  ;;  %v3847_v23 = vpack.c.bf16 (!%p3804_p10), %v3247_v46, %v3247_v46  ;;  %v3848_v34 = vpack.c.bf16 (!%p3804_p10), %v3248_v17, %v3248_v17  ;;  %3402 = vst.msk [vmem:[%s4885_s13] sm:$0xf] (!%p3804_p10), %vm3401_vm9, %v3841_v29 }
 0x222   : > { %v6021_v53 = vadd.f32 %v4413_v4, %v3134_v1  ;;  %v4354_v10 = vpop.f32.mrb[26].mxu0  ;;  %3403 = vst.msk [vmem:[%s4885_s13 + $0x4] sm:$0xf] (!%p3804_p10), %vm3401_vm9, %v3842_v19  ;;  %3404 = vst.msk [vmem:[%s4885_s13 + $0x8] sm:$0xf] (!%p3804_p10), %vm3401_vm9, %v3843_v24  ;;  %v3249_v49 = vadd.f32 (!%p3804_p10), %v5953_v37, %v6055_v26  ;;  %v3250_v54 = vadd.f32 (!%p3804_p10), %v5961_v12, %v6055_v26 }
 0x223   : > { %3224 = vst.msk [vmem:[#allocation2 + $0xd0] sm:$0xff] %vm3197_vm8, %v6019_v9  ;;  %v6025_v11 = vadd.f32 %v4415_v48, %v4354_v10  ;;  %v3137_v28 = vpop.f32.mrb[27].mxu0  ;;  %v3251_v18 = vadd.f32 (!%p3804_p10), %v5951_v0, %v6055_v26  ;;  %v3252_v5 = vadd.f32 (!%p3804_p10), %v5957_v59, %v6055_v26  ;;  %v3253_v37 = vadd.f32 (!%p3804_p10), %v5973_v22, %v6055_v26 }
 0x224   : > { %3222 = vst.msk [vmem:[#allocation2 + $0xc0] sm:$0xff] %vm3197_vm8, %v6021_v53  ;;  %v6029_v7 = vadd.f32 %v4417_v8, %v3137_v28  ;;  %v3254_v0 = vadd.f32 (!%p3804_p10), %v5981_v21, %v6055_v26  ;;  %v3255_v59 = vadd.f32 (!%p3804_p10), %v5970_v25, %v6055_v26  ;;  %v3256_v12 = vadd.f32 (!%p3804_p10), %v5977_v27, %v6055_v26 }
 0x225   : > { %3225 = vst.msk [vmem:[#allocation2 + $0xd8] sm:$0xff] %vm3197_vm8, %v6025_v11  ;;  %v3849_v4 = vpack.c.bf16 (!%p3804_p10), %v3249_v49, %v3249_v49  ;;  %v3850_v48 = vpack.c.bf16 (!%p3804_p10), %v3250_v54, %v3250_v54  ;;  %v3851_v6 = vpack.c.bf16 (!%p3804_p10), %v3251_v18, %v3251_v18  ;;  %v3852_v8 = vpack.c.bf16 (!%p3804_p10), %v3252_v5, %v3252_v5 }
 0x226   : > { %3223 = vst.msk [vmem:[#allocation2 + $0xc8] sm:$0xff] %vm3197_vm8, %v6029_v7  ;;  %v3853_v1 = vpack.c.bf16 (!%p3804_p10), %v3253_v37, %v3253_v37  ;;  %v3854_v10 = vpack.c.bf16 (!%p3804_p10), %v3254_v0, %v3254_v0  ;;  %v3855_v22 = vpack.c.bf16 (!%p3804_p10), %v3255_v59, %v3255_v59  ;;  %v3856_v41 = vpack.c.bf16 (!%p3804_p10), %v3256_v12, %v3256_v12 }
 0x227   : > { %3405 = vst.msk [vmem:[%s4885_s13 + $0xc] sm:$0xf] (!%p3804_p10), %vm3401_vm9, %v3844_v47  ;;  %3406 = vst.msk [vmem:[%s4885_s13 + $0x10] sm:$0xf] (!%p3804_p10), %vm3401_vm9, %v3845_v20  ;;  %v3257_v25 = vadd.f32 (!%p3804_p10), %v5989_v45, %v6055_v26  ;;  %v3258_v27 = vadd.f32 (!%p3804_p10), %v5997_v42, %v6055_v26  ;;  %v3259_v21 = vadd.f32 (!%p3804_p10), %v5987_v3, %v6055_v26 }
 0x228   : > { %v4357_v44 = vpop.f32.mrb[28].mxu0  ;;  %3233 = sbr.rel (%p3804_p10) target bundleno = 570 (0x23a), region = 40  ;;  %3407 = vst.msk [vmem:[%s4885_s13 + $0x14] sm:$0xf] (!%p3804_p10), %vm3401_vm9, %v3846_v51  ;;  %3408 = vst.msk [vmem:[%s4885_s13 + $0x18] sm:$0xf] (!%p3804_p10), %vm3401_vm9, %v3847_v23  ;;  %v3260_v28 = vadd.f32 (!%p3804_p10), %v5993_v16, %v6055_v26  ;;  %v3261_v45 = vadd.f32 (!%p3804_p10), %v6005_v62, %v6055_v26  ;;  %v3262_v3 = vadd.f32 (!%p3804_p10), %v6013_v60, %v6055_v26 }
 0x229   : > { %v6035_v39 = vadd.f32 %v4419_v58, %v4357_v44  ;;  %v3150_v36 = vpop.f32.mrb[29].mxu0  ;;  %3409 = vst.msk [vmem:[%s4885_s13 + $0x1c] sm:$0xf] (!%p3804_p10), %vm3401_vm9, %v3848_v34  ;;  %3410 = vst.msk [vmem:[%s4885_s13 + $0x20] sm:$0xf] (!%p3804_p10), %vm3401_vm9, %v3849_v4  ;;  %v3263_v16 = vadd.f32 (!%p3804_p10), %v6003_v43, %v6055_v26  ;;  %v3264_v42 = vadd.f32 (!%p3804_p10), %v6009_v61, %v6055_v26 }
 0x22a   : > { %v6037_v55 = vadd.f32 %v4421_v40, %v3150_v36  ;;  %v4358_v32 = vpop.f32.mrb[30].mxu0  ;;  %3411 = vst.msk [vmem:[%s4885_s13 + $0x24] sm:$0xf] (!%p3804_p10), %vm3401_vm9, %v3850_v48  ;;  %3412 = vst.msk [vmem:[%s4885_s13 + $0x28] sm:$0xf] (!%p3804_p10), %vm3401_vm9, %v3851_v6  ;;  %v3857_v30 = vpack.c.bf16 (!%p3804_p10), %v3257_v25, %v3257_v25  ;;  %v3858_v2 = vpack.c.bf16 (!%p3804_p10), %v3258_v27, %v3258_v27 }
 0x22b   : > { %3228 = vst.msk [vmem:[#allocation2 + $0xf0] sm:$0xff] %vm3197_vm8, %v6035_v39  ;;  %v6041_v50 = vadd.f32 %v4423_v63, %v4358_v32  ;;  %v3153_v57 = vpop.f32.mrb[31].mxu0  ;;  %v3859_v58 = vpack.c.bf16 (!%p3804_p10), %v3259_v21, %v3259_v21  ;;  %v3860_v56 = vpack.c.bf16 (!%p3804_p10), %v3260_v28, %v3260_v28  ;;  %v3861_v40 = vpack.c.bf16 (!%p3804_p10), %v3261_v45, %v3261_v45 }
 0x22c   : > { %3226 = vst.msk [vmem:[#allocation2 + $0xe0] sm:$0xff] %vm3197_vm8, %v6037_v55  ;;  %v6045_v33 = vadd.f32 %v4425_v35, %v3153_v57  ;;  %v3862_v63 = vpack.c.bf16 (!%p3804_p10), %v3262_v3, %v3262_v3  ;;  %v3863_v62 = vpack.c.bf16 (!%p3804_p10), %v3263_v16, %v3263_v16  ;;  %v3864_v44 = vpack.c.bf16 (!%p3804_p10), %v3264_v42, %v3264_v42 }
 0x22d   : > { %3229 = vst.msk [vmem:[#allocation2 + $0xf8] sm:$0xff] %vm3197_vm8, %v6041_v50  ;;  %v3265_v43 = vadd.f32 (!%p3804_p10), %v6021_v53, %v6055_v26  ;;  %v3266_v61 = vadd.f32 (!%p3804_p10), %v6029_v7, %v6055_v26  ;;  %v3267_v60 = vadd.f32 (!%p3804_p10), %v6019_v9, %v6055_v26  ;;  %v3268_v35 = vadd.f32 (!%p3804_p10), %v6025_v11, %v6055_v26 }
 0x22e   : > { %3227 = vst.msk [vmem:[#allocation2 + $0xe8] sm:$0xff] %vm3197_vm8, %v6045_v33  ;;  %v3269_v53 = vadd.f32 (!%p3804_p10), %v6037_v55, %v6055_v26  ;;  %v3270_v9 = vadd.f32 (!%p3804_p10), %v6045_v33, %v6055_v26  ;;  %v3271_v11 = vadd.f32 (!%p3804_p10), %v6035_v39, %v6055_v26  ;;  %v3272_v7 = vadd.f32 (!%p3804_p10), %v6041_v50, %v6055_v26 }
 0x22f   : > { %3413 = vst.msk [vmem:[%s4885_s13 + $0x2c] sm:$0xf] %vm3401_vm9, %v3852_v8  ;;  %3414 = vst.msk [vmem:[%s4885_s13 + $0x30] sm:$0xf] %vm3401_vm9, %v3853_v1  ;;  %v3865_v36 = vpack.c.bf16 %v3265_v43, %v3265_v43  ;;  %v3866_v32 = vpack.c.bf16 %v3266_v61, %v3266_v61  ;;  %v3867_v57 = vpack.c.bf16 %v3267_v60, %v3267_v60 }
 0x230   : > { %3415 = vst.msk [vmem:[%s4885_s13 + $0x34] sm:$0xf] %vm3401_vm9, %v3854_v10  ;;  %3416 = vst.msk [vmem:[%s4885_s13 + $0x38] sm:$0xf] %vm3401_vm9, %v3855_v22  ;;  %v3868_v31 = vpack.c.bf16 %v3268_v35, %v3268_v35  ;;  %v3869_v52 = vpack.c.bf16 %v3269_v53, %v3269_v53  ;;  %v3870_v38 = vpack.c.bf16 %v3270_v9, %v3270_v9 }
 0x231   : > { %3417 = vst.msk [vmem:[%s4885_s13 + $0x3c] sm:$0xf] %vm3401_vm9, %v3856_v41  ;;  %3418 = vst.msk [vmem:[%s4885_s13 + $0x40] sm:$0xf] %vm3401_vm9, %v3857_v30  ;;  %v3871_v55 = vpack.c.bf16 %v3271_v11, %v3271_v11  ;;  %v3872_v13 = vpack.c.bf16 %v3272_v7, %v3272_v7 }
 0x232   : > { %3419 = vst.msk [vmem:[%s4885_s13 + $0x44] sm:$0xf] %vm3401_vm9, %v3858_v2  ;;  %3420 = vst.msk [vmem:[%s4885_s13 + $0x48] sm:$0xf] %vm3401_vm9, %v3859_v58 }
 0x233   : > { %3421 = vst.msk [vmem:[%s4885_s13 + $0x4c] sm:$0xf] %vm3401_vm9, %v3860_v56  ;;  %3422 = vst.msk [vmem:[%s4885_s13 + $0x50] sm:$0xf] %vm3401_vm9, %v3861_v40 }
 0x234   : > { %3423 = vst.msk [vmem:[%s4885_s13 + $0x54] sm:$0xf] %vm3401_vm9, %v3862_v63  ;;  %3424 = vst.msk [vmem:[%s4885_s13 + $0x58] sm:$0xf] %vm3401_vm9, %v3863_v62 }
 0x235   : > { %3425 = vst.msk [vmem:[%s4885_s13 + $0x5c] sm:$0xf] %vm3401_vm9, %v3864_v44  ;;  %3426 = vst.msk [vmem:[%s4885_s13 + $0x60] sm:$0xf] %vm3401_vm9, %v3865_v36 }
 0x236   : > { %3427 = vst.msk [vmem:[%s4885_s13 + $0x64] sm:$0xf] %vm3401_vm9, %v3866_v32  ;;  %3428 = vst.msk [vmem:[%s4885_s13 + $0x68] sm:$0xf] %vm3401_vm9, %v3867_v57 }
 0x237   : > { %3429 = vst.msk [vmem:[%s4885_s13 + $0x6c] sm:$0xf] %vm3401_vm9, %v3868_v31  ;;  %3430 = vst.msk [vmem:[%s4885_s13 + $0x70] sm:$0xf] %vm3401_vm9, %v3869_v52 }
 0x238   : > { %3431 = vst.msk [vmem:[%s4885_s13 + $0x74] sm:$0xf] %vm3401_vm9, %v3870_v38  ;;  %3432 = vst.msk [vmem:[%s4885_s13 + $0x78] sm:$0xf] %vm3401_vm9, %v3871_v55 }
 0x239   : > { %3433 = vst.msk [vmem:[%s4885_s13 + $0x7c] sm:$0xf] %vm3401_vm9, %v3872_v13 }
 0x23a PF: > { %s13_s18 = sadd.s32 1, %s4802_s18   ;;  %s6349_s12 = smov %s4790_s15 }
 0x23b   : > { %p10_p11 = scmp.ge.s32.totalorder %s13_s18, 26   ;;  %s6350_s13 = smov %s4794_s16 }
 0x23c   : > { %s6351_s14 = smov %s4798_s17  ;;  %s6352_s15 = smov %s6356_s19 }
 0x23d   : > { %s6353_s16 = smov %s6360_s20  ;;  %s6354_s17 = smov %s6364_s21 }
 0x23e   :  { %12 = sbr.rel (!%p10_p11) target bundleno = 4 (0x4), region = 81 }

</bundles_post_ra>
